<compile_context>
chip_gen: v5e
topology: v5e:2x2
jax: 0.10.0
libtpu: 0.0.40
codegen_flags: <defaults>
</compile_context>

<pallas_src>
import functools

import jax
import jax.numpy as jnp
import numpy as np
from jax.experimental import pallas as pl
from jax.experimental.pallas import tpu as pltpu


# ----------------------------------------------------------------------------
# Fused Pallas kernel: conv1 -> pool1 -> conv2 -> pool2 -> fc1 -> fc2
# ----------------------------------------------------------------------------
def _lenet5_kernel(xp_ref, w1_ref, b1_ref, w2_ref, b2_ref, fw1_ref, fb1_ref,
                   fw2_ref, fb2_ref, out_ref,
                   hp1_ref, pool1_ref, hp2_ref, pool2_ref, *, batch):
    B = batch

    # ---- conv1: single MXU matmul over im2col patches (K padded 25 -> 32) ----
    # xp_ref: (B*24*24, 32) bf16, rows ordered (b, i, j); w1_ref: (32, 10) bf16
    o1 = jnp.dot(xp_ref[...], w1_ref[...],
                 preferred_element_type=jnp.float32)          # (B*576, 10) f32
    o1 = o1 + b1_ref[...]                                     # bias (1, 10)

    # ---- pool1 (2x2 max) + ReLU ----
    # H direction: split leading rows (b, io, di, j) -> max over di.
    o1r = o1.reshape(B, 12, 2, 24, 10)
    hp1_ref[...] = jnp.maximum(o1r[:, :, 0], o1r[:, :, 1])    # (B, 12, 24, 10)
    # W direction: unrolled static column reads, write columns into scratch.
    for jo in range(12):
        col = jnp.maximum(hp1_ref[:, :, 2 * jo, :],
                          hp1_ref[:, :, 2 * jo + 1, :])       # (B, 12, 10)
        pool1_ref[:, :, jo, :] = jnp.maximum(col, 0.0)

    # ---- conv2: 25 taps, each a (B*64, 10) @ (10, 20) MXU matmul ----
    acc2 = jnp.zeros((B * 64, 20), jnp.float32)
    for kh in range(5):
        for kw in range(5):
            win = pool1_ref[:, kh:kh + 8, kw:kw + 8, :]       # (B, 8, 8, 10) f32
            win2 = win.reshape(B * 64, 10).astype(jnp.bfloat16)
            acc2 = acc2 + jnp.dot(win2, w2_ref[kh, kw],
                                  preferred_element_type=jnp.float32)
    acc2 = acc2 + b2_ref[...]                                 # (B*64, 20)

    # ---- pool2 (2x2 max) + ReLU ----
    o2r = acc2.reshape(B, 4, 2, 8, 20)
    hp2_ref[...] = jnp.maximum(o2r[:, :, 0], o2r[:, :, 1])    # (B, 4, 8, 20)
    for jo in range(4):
        col = jnp.maximum(hp2_ref[:, :, 2 * jo, :],
                          hp2_ref[:, :, 2 * jo + 1, :])       # (B, 4, 20)
        pool2_ref[:, :, jo, :] = jnp.maximum(col, 0.0)

    # ---- fc1 (+ReLU): contraction over the 16 spatial positions ----
    acc_fc1 = jnp.zeros((B, 50), jnp.float32)
    for h in range(4):
        for w in range(4):
            xin = pool2_ref[:, h, w, :].astype(jnp.bfloat16)  # (B, 20)
            acc_fc1 = acc_fc1 + jnp.dot(xin, fw1_ref[h, w],
                                        preferred_element_type=jnp.float32)
    h1 = jnp.maximum(acc_fc1 + fb1_ref[...], 0.0)             # (B, 50)

    # ---- fc2 ----
    out = jnp.dot(h1.astype(jnp.bfloat16), fw2_ref[...],
                  preferred_element_type=jnp.float32) + fb2_ref[...]
    out_ref[...] = out                                        # (B, 10) f32


def lenet5_fused(xp2d, w1p, b1, w2r, b2, fw1r, fb1, fw2r, fb2, *, batch):
    vmem = lambda: pl.BlockSpec(memory_space=pltpu.MemorySpace.VMEM)
    return pl.pallas_call(
        functools.partial(_lenet5_kernel, batch=batch),
        out_shape=jax.ShapeDtypeStruct((batch, 10), jnp.float32),
        in_specs=[vmem() for _ in range(9)],
        out_specs=vmem(),
        scratch_shapes=[
            pltpu.VMEM((batch, 12, 24, 10), jnp.float32),   # conv1 after H-pool
            pltpu.VMEM((batch, 12, 12, 10), jnp.float32),   # pool1 + relu
            pltpu.VMEM((batch, 4, 8, 20), jnp.float32),     # conv2 after H-pool
            pltpu.VMEM((batch, 4, 4, 20), jnp.float32),     # pool2 + relu
        ],
    )(xp2d, w1p, b1, w2r, b2, fw1r, fb1, fw2r, fb2)


# ----------------------------------------------------------------------------
# One-time weight preparation (outside the hot path, per perf review opt #6)
# ----------------------------------------------------------------------------
def prepare_params(params):
    w1, b1, w2, b2, fw1, fb1, fw2, fb2 = params
    # conv1: (10,1,5,5) -> (25,10), pad K 25->32, taps in (kh,kw) row-major.
    w1m = jnp.pad(w1.reshape(10, 25).T, ((0, 7), (0, 0)))
    w1p = w1m.astype(jnp.bfloat16)                                  # (32, 10)
    b1p = b1.reshape(1, 10).astype(jnp.float32)
    # conv2: (20,10,5,5) -> (kh,kw,c,oc) = (5,5,10,20)
    w2r = jnp.transpose(w2, (2, 3, 1, 0)).astype(jnp.bfloat16)
    b2p = b2.reshape(1, 20).astype(jnp.float32)
    # fc1: torch flatten order is c*16 + h*4 + w -> store as (h,w,c,n).
    fw1r = jnp.transpose(fw1.reshape(50, 20, 4, 4),
                         (2, 3, 1, 0)).astype(jnp.bfloat16)         # (4,4,20,50)
    fb1p = fb1.reshape(1, 50).astype(jnp.float32)
    fw2r = fw2.T.astype(jnp.bfloat16)                               # (50, 10)
    fb2p = fb2.reshape(1, 10).astype(jnp.float32)
    return (w1p, b1p, w2r, b2p, fw1r, fb1p, fw2r, fb2p)


# ----------------------------------------------------------------------------
# Forward: one XLA patches op + one fused Pallas kernel
# ----------------------------------------------------------------------------
@jax.jit
def lenet5_forward(x, prepared):
    w1p, b1p, w2r, b2p, fw1r, fb1p, fw2r, fb2p = prepared
    B = x.shape[0]
    # conv1 im2col patches in a single XLA op (C=1 -> 25 taps, (kh,kw) order).
    xp = jax.lax.conv_general_dilated_patches(
        x, filter_shape=(5, 5), window_strides=(1, 1), padding="VALID",
        dimension_numbers=("NCHW", "OIHW", "NHWC"))                 # (B,24,24,25)
    xp = jnp.pad(xp, ((0, 0), (0, 0), (0, 0), (0, 7)))              # K 25 -> 32
    xp2d = xp.reshape(B * 24 * 24, 32).astype(jnp.bfloat16)
    return lenet5_fused(xp2d, w1p, b1p, w2r, b2p, fw1r, fb1p, fw2r, fb2p,
                        batch=B)


# ----------------------------------------------------------------------------
# Pure-JAX reference for verification
# ----------------------------------------------------------------------------
def lenet5_reference(x, params):
    w1, b1, w2, b2, fw1, fb1, fw2, fb2 = params

    def conv(y, w, b):
        dn = jax.lax.conv_dimension_numbers(y.shape, w.shape,
                                            ("NCHW", "OIHW", "NCHW"))
        out = jax.lax.conv_general_dilated(y, w, (1, 1), "VALID",
                                           dimension_numbers=dn)
        return out + b[None, :, None, None]

    def pool_relu(y):
        y = jax.lax.reduce_window(y, -jnp.inf, jax.lax.max,
                                  (1, 1, 2, 2), (1, 1, 2, 2), "VALID")
        return jnp.maximum(y, 0.0)

    y = pool_relu(conv(x, w1, b1))
    y = pool_relu(conv(y, w2, b2))
    y = y.reshape(y.shape[0], -1)
    y = jnp.maximum(y @ fw1.T + fb1, 0.0)
    return y @ fw2.T + fb2


def init_params(key):
    ks = jax.random.split(key, 8)

    def uni(k, shape, fan_in):
        bound = 1.0 / np.sqrt(fan_in)
        return jax.random.uniform(k, shape, jnp.float32, -bound, bound)

    w1 = uni(ks[0], (10, 1, 5, 5), 1 * 5 * 5)
    b1 = uni(ks[1], (10,), 1 * 5 * 5)
    w2 = uni(ks[2], (20, 10, 5, 5), 10 * 5 * 5)
    b2 = uni(ks[3], (20,), 10 * 5 * 5)
    fw1 = uni(ks[4], (50, 320), 320)
    fb1 = uni(ks[5], (50,), 320)
    fw2 = uni(ks[6], (10, 50), 50)
    fb2 = uni(ks[7], (10,), 50)
    return (w1, b1, w2, b2, fw1, fb1, fw2, fb2)


if __name__ == "__main__":
    key = jax.random.PRNGKey(0)
    k_params, k_x = jax.random.split(key)
    params = init_params(k_params)
    prepared = prepare_params(params)

    # MNIST-sized input is forced by fc1 (320 = 20*4*4 requires 28x28 images).
    x = jax.random.normal(k_x, (2, 1, 28, 28), dtype=jnp.float32)

    out = jax.block_until_ready(lenet5_forward(x, prepared))
    ref = jax.block_until_ready(lenet5_reference(x, params))

    np.testing.assert_allclose(np.asarray(out), np.asarray(ref),
                               rtol=2e-2, atol=2e-2)
    assert out.shape == (2, 10) and out.dtype == jnp.float32
    print("KERNEL_OK")
</pallas_src>

<mosaic_0001>
module attributes {stable_mosaic.version = 11 : i64} {
  func.func @_lenet5_kernel(%arg0: memref<1152x32xbf16, #tpu.memory_space<vmem>>, %arg1: memref<32x10xbf16, #tpu.memory_space<vmem>>, %arg2: memref<1x10xf32, #tpu.memory_space<vmem>>, %arg3: memref<5x5x10x20xbf16, #tpu.memory_space<vmem>>, %arg4: memref<1x20xf32, #tpu.memory_space<vmem>>, %arg5: memref<4x4x20x50xbf16, #tpu.memory_space<vmem>>, %arg6: memref<1x50xf32, #tpu.memory_space<vmem>>, %arg7: memref<50x10xbf16, #tpu.memory_space<vmem>>, %arg8: memref<1x10xf32, #tpu.memory_space<vmem>>, %arg9: memref<2x10xf32, #tpu.memory_space<vmem>>, %arg10: memref<2x12x24x10xf32, #tpu.memory_space<vmem>>, %arg11: memref<2x12x12x10xf32, #tpu.memory_space<vmem>>, %arg12: memref<2x4x8x20xf32, #tpu.memory_space<vmem>>, %arg13: memref<2x4x4x20xf32, #tpu.memory_space<vmem>>) attributes {dimension_semantics = [], scalar_prefetch = 0 : i64, scratch_operands = 4 : i64, tpu.core_type = #tpu.core_type<tc>} {
    %c0 = arith.constant 0 : index
    %c0_0 = arith.constant 0 : index
    %0 = vector.load %arg0[%c0, %c0_0] : memref<1152x32xbf16, #tpu.memory_space<vmem>>, vector<1152x32xbf16>
    %c0_1 = arith.constant 0 : index
    %c0_2 = arith.constant 0 : index
    %1 = vector.load %arg1[%c0_1, %c0_2] : memref<32x10xbf16, #tpu.memory_space<vmem>>, vector<32x10xbf16>
    %cst = arith.constant dense<0.000000e+00> : vector<1152x10xf32>
    %2 = tpu.matmul %0, %1, %cst {dimension_numbers = #tpu.dot_dimension_numbers<[1], [0], [0], [1], [0, 0, 1, 1], [], []>} : vector<1152x32xbf16>, vector<32x10xbf16>, vector<1152x10xf32> -> vector<1152x10xf32>
    %c0_3 = arith.constant 0 : index
    %c0_4 = arith.constant 0 : index
    %3 = vector.load %arg2[%c0_3, %c0_4] : memref<1x10xf32, #tpu.memory_space<vmem>>, vector<1x10xf32>
    %4 = vector.broadcast %3 : vector<1x10xf32> to vector<1152x10xf32>
    %5 = arith.addf %2, %4 : vector<1152x10xf32>
    %6 = vector.shape_cast %5 : vector<1152x10xf32> to vector<2x12x2x24x10xf32>
    %7 = vector.extract_strided_slice %6 {offsets = [0, 0, 0, 0, 0], sizes = [2, 12, 1, 24, 10], strides = [1, 1, 1, 1, 1]} : vector<2x12x2x24x10xf32> to vector<2x12x1x24x10xf32>
    %8 = vector.shape_cast %7 : vector<2x12x1x24x10xf32> to vector<2x12x24x10xf32>
    %9 = vector.extract_strided_slice %6 {offsets = [0, 0, 1, 0, 0], sizes = [2, 12, 1, 24, 10], strides = [1, 1, 1, 1, 1]} : vector<2x12x2x24x10xf32> to vector<2x12x1x24x10xf32>
    %10 = vector.shape_cast %9 : vector<2x12x1x24x10xf32> to vector<2x12x24x10xf32>
    %11 = arith.maximumf %8, %10 : vector<2x12x24x10xf32>
    %c0_5 = arith.constant 0 : index
    %c0_6 = arith.constant 0 : index
    %c0_7 = arith.constant 0 : index
    %c0_8 = arith.constant 0 : index
    %12 = vector.load %arg10[%c0_5, %c0_6, %c0_7, %c0_8] : memref<2x12x24x10xf32, #tpu.memory_space<vmem>>, vector<2x12x24x10xf32>
    tpu.vector_store %arg10[%c0_5, %c0_6, %c0_7, %c0_8], %11 {strides = array<i32>} : memref<2x12x24x10xf32, #tpu.memory_space<vmem>>, vector<2x12x24x10xf32>,
    %c0_9 = arith.constant 0 : index
    %c0_10 = arith.constant 0 : index
    %c0_11 = arith.constant 0 : index
    %c0_12 = arith.constant 0 : index
    %13 = vector.load %arg10[%c0_9, %c0_10, %c0_11, %c0_12] : memref<2x12x24x10xf32, #tpu.memory_space<vmem>>, vector<2x12x1x10xf32>
    %14 = vector.shape_cast %13 : vector<2x12x1x10xf32> to vector<2x12x10xf32>
    %c0_13 = arith.constant 0 : index
    %c0_14 = arith.constant 0 : index
    %c1 = arith.constant 1 : index
    %c0_15 = arith.constant 0 : index
    %15 = vector.load %arg10[%c0_13, %c0_14, %c1, %c0_15] : memref<2x12x24x10xf32, #tpu.memory_space<vmem>>, vector<2x12x1x10xf32>
    %16 = vector.shape_cast %15 : vector<2x12x1x10xf32> to vector<2x12x10xf32>
    %17 = arith.maximumf %14, %16 : vector<2x12x10xf32>
    %cst_16 = arith.constant 0.000000e+00 : f32
    %18 = vector.broadcast %cst_16 : f32 to vector<2x12x10xf32>
    %19 = arith.maximumf %17, %18 : vector<2x12x10xf32>
    %c0_17 = arith.constant 0 : index
    %c0_18 = arith.constant 0 : index
    %c0_19 = arith.constant 0 : index
    %c0_20 = arith.constant 0 : index
    %20 = vector.load %arg11[%c0_17, %c0_18, %c0_19, %c0_20] : memref<2x12x12x10xf32, #tpu.memory_space<vmem>>, vector<2x12x1x10xf32>
    %21 = vector.shape_cast %20 : vector<2x12x1x10xf32> to vector<2x12x10xf32>
    %22 = vector.shape_cast %19 : vector<2x12x10xf32> to vector<2x12x1x10xf32>
    tpu.vector_store %arg11[%c0_17, %c0_18, %c0_19, %c0_20], %22 {strides = array<i32>} : memref<2x12x12x10xf32, #tpu.memory_space<vmem>>, vector<2x12x1x10xf32>,
    %c0_21 = arith.constant 0 : index
    %c0_22 = arith.constant 0 : index
    %c2 = arith.constant 2 : index
    %c0_23 = arith.constant 0 : index
    %23 = vector.load %arg10[%c0_21, %c0_22, %c2, %c0_23] : memref<2x12x24x10xf32, #tpu.memory_space<vmem>>, vector<2x12x1x10xf32>
    %24 = vector.shape_cast %23 : vector<2x12x1x10xf32> to vector<2x12x10xf32>
    %c0_24 = arith.constant 0 : index
    %c0_25 = arith.constant 0 : index
    %c3 = arith.constant 3 : index
    %c0_26 = arith.constant 0 : index
    %25 = vector.load %arg10[%c0_24, %c0_25, %c3, %c0_26] : memref<2x12x24x10xf32, #tpu.memory_space<vmem>>, vector<2x12x1x10xf32>
    %26 = vector.shape_cast %25 : vector<2x12x1x10xf32> to vector<2x12x10xf32>
    %27 = arith.maximumf %24, %26 : vector<2x12x10xf32>
    %cst_27 = arith.constant 0.000000e+00 : f32
    %28 = vector.broadcast %cst_27 : f32 to vector<2x12x10xf32>
    %29 = arith.maximumf %27, %28 : vector<2x12x10xf32>
    %c0_28 = arith.constant 0 : index
    %c0_29 = arith.constant 0 : index
    %c1_30 = arith.constant 1 : index
    %c0_31 = arith.constant 0 : index
    %30 = vector.load %arg11[%c0_28, %c0_29, %c1_30, %c0_31] : memref<2x12x12x10xf32, #tpu.memory_space<vmem>>, vector<2x12x1x10xf32>
    %31 = vector.shape_cast %30 : vector<2x12x1x10xf32> to vector<2x12x10xf32>
    %32 = vector.shape_cast %29 : vector<2x12x10xf32> to vector<2x12x1x10xf32>
    tpu.vector_store %arg11[%c0_28, %c0_29, %c1_30, %c0_31], %32 {strides = array<i32>} : memref<2x12x12x10xf32, #tpu.memory_space<vmem>>, vector<2x12x1x10xf32>,
    %c0_32 = arith.constant 0 : index
    %c0_33 = arith.constant 0 : index
    %c4 = arith.constant 4 : index
    %c0_34 = arith.constant 0 : index
    %33 = vector.load %arg10[%c0_32, %c0_33, %c4, %c0_34] : memref<2x12x24x10xf32, #tpu.memory_space<vmem>>, vector<2x12x1x10xf32>
    %34 = vector.shape_cast %33 : vector<2x12x1x10xf32> to vector<2x12x10xf32>
    %c0_35 = arith.constant 0 : index
    %c0_36 = arith.constant 0 : index
    %c5 = arith.constant 5 : index
    %c0_37 = arith.constant 0 : index
    %35 = vector.load %arg10[%c0_35, %c0_36, %c5, %c0_37] : memref<2x12x24x10xf32, #tpu.memory_space<vmem>>, vector<2x12x1x10xf32>
    %36 = vector.shape_cast %35 : vector<2x12x1x10xf32> to vector<2x12x10xf32>
    %37 = arith.maximumf %34, %36 : vector<2x12x10xf32>
    %cst_38 = arith.constant 0.000000e+00 : f32
    %38 = vector.broadcast %cst_38 : f32 to vector<2x12x10xf32>
    %39 = arith.maximumf %37, %38 : vector<2x12x10xf32>
    %c0_39 = arith.constant 0 : index
    %c0_40 = arith.constant 0 : index
    %c2_41 = arith.constant 2 : index
    %c0_42 = arith.constant 0 : index
    %40 = vector.load %arg11[%c0_39, %c0_40, %c2_41, %c0_42] : memref<2x12x12x10xf32, #tpu.memory_space<vmem>>, vector<2x12x1x10xf32>
    %41 = vector.shape_cast %40 : vector<2x12x1x10xf32> to vector<2x12x10xf32>
    %42 = vector.shape_cast %39 : vector<2x12x10xf32> to vector<2x12x1x10xf32>
    tpu.vector_store %arg11[%c0_39, %c0_40, %c2_41, %c0_42], %42 {strides = array<i32>} : memref<2x12x12x10xf32, #tpu.memory_space<vmem>>, vector<2x12x1x10xf32>,
    %c0_43 = arith.constant 0 : index
    %c0_44 = arith.constant 0 : index
    %c6 = arith.constant 6 : index
    %c0_45 = arith.constant 0 : index
    %43 = vector.load %arg10[%c0_43, %c0_44, %c6, %c0_45] : memref<2x12x24x10xf32, #tpu.memory_space<vmem>>, vector<2x12x1x10xf32>
    %44 = vector.shape_cast %43 : vector<2x12x1x10xf32> to vector<2x12x10xf32>
    %c0_46 = arith.constant 0 : index
    %c0_47 = arith.constant 0 : index
    %c7 = arith.constant 7 : index
    %c0_48 = arith.constant 0 : index
    %45 = vector.load %arg10[%c0_46, %c0_47, %c7, %c0_48] : memref<2x12x24x10xf32, #tpu.memory_space<vmem>>, vector<2x12x1x10xf32>
    %46 = vector.shape_cast %45 : vector<2x12x1x10xf32> to vector<2x12x10xf32>
    %47 = arith.maximumf %44, %46 : vector<2x12x10xf32>
    %cst_49 = arith.constant 0.000000e+00 : f32
    %48 = vector.broadcast %cst_49 : f32 to vector<2x12x10xf32>
    %49 = arith.maximumf %47, %48 : vector<2x12x10xf32>
    %c0_50 = arith.constant 0 : index
    %c0_51 = arith.constant 0 : index
    %c3_52 = arith.constant 3 : index
    %c0_53 = arith.constant 0 : index
    %50 = vector.load %arg11[%c0_50, %c0_51, %c3_52, %c0_53] : memref<2x12x12x10xf32, #tpu.memory_space<vmem>>, vector<2x12x1x10xf32>
    %51 = vector.shape_cast %50 : vector<2x12x1x10xf32> to vector<2x12x10xf32>
    %52 = vector.shape_cast %49 : vector<2x12x10xf32> to vector<2x12x1x10xf32>
    tpu.vector_store %arg11[%c0_50, %c0_51, %c3_52, %c0_53], %52 {strides = array<i32>} : memref<2x12x12x10xf32, #tpu.memory_space<vmem>>, vector<2x12x1x10xf32>,
    %c0_54 = arith.constant 0 : index
    %c0_55 = arith.constant 0 : index
    %c8 = arith.constant 8 : index
    %c0_56 = arith.constant 0 : index
    %53 = vector.load %arg10[%c0_54, %c0_55, %c8, %c0_56] : memref<2x12x24x10xf32, #tpu.memory_space<vmem>>, vector<2x12x1x10xf32>
    %54 = vector.shape_cast %53 : vector<2x12x1x10xf32> to vector<2x12x10xf32>
    %c0_57 = arith.constant 0 : index
    %c0_58 = arith.constant 0 : index
    %c9 = arith.constant 9 : index
    %c0_59 = arith.constant 0 : index
    %55 = vector.load %arg10[%c0_57, %c0_58, %c9, %c0_59] : memref<2x12x24x10xf32, #tpu.memory_space<vmem>>, vector<2x12x1x10xf32>
    %56 = vector.shape_cast %55 : vector<2x12x1x10xf32> to vector<2x12x10xf32>
    %57 = arith.maximumf %54, %56 : vector<2x12x10xf32>
    %cst_60 = arith.constant 0.000000e+00 : f32
    %58 = vector.broadcast %cst_60 : f32 to vector<2x12x10xf32>
    %59 = arith.maximumf %57, %58 : vector<2x12x10xf32>
    %c0_61 = arith.constant 0 : index
    %c0_62 = arith.constant 0 : index
    %c4_63 = arith.constant 4 : index
    %c0_64 = arith.constant 0 : index
    %60 = vector.load %arg11[%c0_61, %c0_62, %c4_63, %c0_64] : memref<2x12x12x10xf32, #tpu.memory_space<vmem>>, vector<2x12x1x10xf32>
    %61 = vector.shape_cast %60 : vector<2x12x1x10xf32> to vector<2x12x10xf32>
    %62 = vector.shape_cast %59 : vector<2x12x10xf32> to vector<2x12x1x10xf32>
    tpu.vector_store %arg11[%c0_61, %c0_62, %c4_63, %c0_64], %62 {strides = array<i32>} : memref<2x12x12x10xf32, #tpu.memory_space<vmem>>, vector<2x12x1x10xf32>,
    %c0_65 = arith.constant 0 : index
    %c0_66 = arith.constant 0 : index
    %c10 = arith.constant 10 : index
    %c0_67 = arith.constant 0 : index
    %63 = vector.load %arg10[%c0_65, %c0_66, %c10, %c0_67] : memref<2x12x24x10xf32, #tpu.memory_space<vmem>>, vector<2x12x1x10xf32>
    %64 = vector.shape_cast %63 : vector<2x12x1x10xf32> to vector<2x12x10xf32>
    %c0_68 = arith.constant 0 : index
    %c0_69 = arith.constant 0 : index
    %c11 = arith.constant 11 : index
    %c0_70 = arith.constant 0 : index
    %65 = vector.load %arg10[%c0_68, %c0_69, %c11, %c0_70] : memref<2x12x24x10xf32, #tpu.memory_space<vmem>>, vector<2x12x1x10xf32>
    %66 = vector.shape_cast %65 : vector<2x12x1x10xf32> to vector<2x12x10xf32>
    %67 = arith.maximumf %64, %66 : vector<2x12x10xf32>
    %cst_71 = arith.constant 0.000000e+00 : f32
    %68 = vector.broadcast %cst_71 : f32 to vector<2x12x10xf32>
    %69 = arith.maximumf %67, %68 : vector<2x12x10xf32>
    %c0_72 = arith.constant 0 : index
    %c0_73 = arith.constant 0 : index
    %c5_74 = arith.constant 5 : index
    %c0_75 = arith.constant 0 : index
    %70 = vector.load %arg11[%c0_72, %c0_73, %c5_74, %c0_75] : memref<2x12x12x10xf32, #tpu.memory_space<vmem>>, vector<2x12x1x10xf32>
    %71 = vector.shape_cast %70 : vector<2x12x1x10xf32> to vector<2x12x10xf32>
    %72 = vector.shape_cast %69 : vector<2x12x10xf32> to vector<2x12x1x10xf32>
    tpu.vector_store %arg11[%c0_72, %c0_73, %c5_74, %c0_75], %72 {strides = array<i32>} : memref<2x12x12x10xf32, #tpu.memory_space<vmem>>, vector<2x12x1x10xf32>,
    %c0_76 = arith.constant 0 : index
    %c0_77 = arith.constant 0 : index
    %c12 = arith.constant 12 : index
    %c0_78 = arith.constant 0 : index
    %73 = vector.load %arg10[%c0_76, %c0_77, %c12, %c0_78] : memref<2x12x24x10xf32, #tpu.memory_space<vmem>>, vector<2x12x1x10xf32>
    %74 = vector.shape_cast %73 : vector<2x12x1x10xf32> to vector<2x12x10xf32>
    %c0_79 = arith.constant 0 : index
    %c0_80 = arith.constant 0 : index
    %c13 = arith.constant 13 : index
    %c0_81 = arith.constant 0 : index
    %75 = vector.load %arg10[%c0_79, %c0_80, %c13, %c0_81] : memref<2x12x24x10xf32, #tpu.memory_space<vmem>>, vector<2x12x1x10xf32>
    %76 = vector.shape_cast %75 : vector<2x12x1x10xf32> to vector<2x12x10xf32>
    %77 = arith.maximumf %74, %76 : vector<2x12x10xf32>
    %cst_82 = arith.constant 0.000000e+00 : f32
    %78 = vector.broadcast %cst_82 : f32 to vector<2x12x10xf32>
    %79 = arith.maximumf %77, %78 : vector<2x12x10xf32>
    %c0_83 = arith.constant 0 : index
    %c0_84 = arith.constant 0 : index
    %c6_85 = arith.constant 6 : index
    %c0_86 = arith.constant 0 : index
    %80 = vector.load %arg11[%c0_83, %c0_84, %c6_85, %c0_86] : memref<2x12x12x10xf32, #tpu.memory_space<vmem>>, vector<2x12x1x10xf32>
    %81 = vector.shape_cast %80 : vector<2x12x1x10xf32> to vector<2x12x10xf32>
    %82 = vector.shape_cast %79 : vector<2x12x10xf32> to vector<2x12x1x10xf32>
    tpu.vector_store %arg11[%c0_83, %c0_84, %c6_85, %c0_86], %82 {strides = array<i32>} : memref<2x12x12x10xf32, #tpu.memory_space<vmem>>, vector<2x12x1x10xf32>,
    %c0_87 = arith.constant 0 : index
    %c0_88 = arith.constant 0 : index
    %c14 = arith.constant 14 : index
    %c0_89 = arith.constant 0 : index
    %83 = vector.load %arg10[%c0_87, %c0_88, %c14, %c0_89] : memref<2x12x24x10xf32, #tpu.memory_space<vmem>>, vector<2x12x1x10xf32>
    %84 = vector.shape_cast %83 : vector<2x12x1x10xf32> to vector<2x12x10xf32>
    %c0_90 = arith.constant 0 : index
    %c0_91 = arith.constant 0 : index
    %c15 = arith.constant 15 : index
    %c0_92 = arith.constant 0 : index
    %85 = vector.load %arg10[%c0_90, %c0_91, %c15, %c0_92] : memref<2x12x24x10xf32, #tpu.memory_space<vmem>>, vector<2x12x1x10xf32>
    %86 = vector.shape_cast %85 : vector<2x12x1x10xf32> to vector<2x12x10xf32>
    %87 = arith.maximumf %84, %86 : vector<2x12x10xf32>
    %cst_93 = arith.constant 0.000000e+00 : f32
    %88 = vector.broadcast %cst_93 : f32 to vector<2x12x10xf32>
    %89 = arith.maximumf %87, %88 : vector<2x12x10xf32>
    %c0_94 = arith.constant 0 : index
    %c0_95 = arith.constant 0 : index
    %c7_96 = arith.constant 7 : index
    %c0_97 = arith.constant 0 : index
    %90 = vector.load %arg11[%c0_94, %c0_95, %c7_96, %c0_97] : memref<2x12x12x10xf32, #tpu.memory_space<vmem>>, vector<2x12x1x10xf32>
    %91 = vector.shape_cast %90 : vector<2x12x1x10xf32> to vector<2x12x10xf32>
    %92 = vector.shape_cast %89 : vector<2x12x10xf32> to vector<2x12x1x10xf32>
    tpu.vector_store %arg11[%c0_94, %c0_95, %c7_96, %c0_97], %92 {strides = array<i32>} : memref<2x12x12x10xf32, #tpu.memory_space<vmem>>, vector<2x12x1x10xf32>,
    %c0_98 = arith.constant 0 : index
    %c0_99 = arith.constant 0 : index
    %c16 = arith.constant 16 : index
    %c0_100 = arith.constant 0 : index
    %93 = vector.load %arg10[%c0_98, %c0_99, %c16, %c0_100] : memref<2x12x24x10xf32, #tpu.memory_space<vmem>>, vector<2x12x1x10xf32>
    %94 = vector.shape_cast %93 : vector<2x12x1x10xf32> to vector<2x12x10xf32>
    %c0_101 = arith.constant 0 : index
    %c0_102 = arith.constant 0 : index
    %c17 = arith.constant 17 : index
    %c0_103 = arith.constant 0 : index
    %95 = vector.load %arg10[%c0_101, %c0_102, %c17, %c0_103] : memref<2x12x24x10xf32, #tpu.memory_space<vmem>>, vector<2x12x1x10xf32>
    %96 = vector.shape_cast %95 : vector<2x12x1x10xf32> to vector<2x12x10xf32>
    %97 = arith.maximumf %94, %96 : vector<2x12x10xf32>
    %cst_104 = arith.constant 0.000000e+00 : f32
    %98 = vector.broadcast %cst_104 : f32 to vector<2x12x10xf32>
    %99 = arith.maximumf %97, %98 : vector<2x12x10xf32>
    %c0_105 = arith.constant 0 : index
    %c0_106 = arith.constant 0 : index
    %c8_107 = arith.constant 8 : index
    %c0_108 = arith.constant 0 : index
    %100 = vector.load %arg11[%c0_105, %c0_106, %c8_107, %c0_108] : memref<2x12x12x10xf32, #tpu.memory_space<vmem>>, vector<2x12x1x10xf32>
    %101 = vector.shape_cast %100 : vector<2x12x1x10xf32> to vector<2x12x10xf32>
    %102 = vector.shape_cast %99 : vector<2x12x10xf32> to vector<2x12x1x10xf32>
    tpu.vector_store %arg11[%c0_105, %c0_106, %c8_107, %c0_108], %102 {strides = array<i32>} : memref<2x12x12x10xf32, #tpu.memory_space<vmem>>, vector<2x12x1x10xf32>,
    %c0_109 = arith.constant 0 : index
    %c0_110 = arith.constant 0 : index
    %c18 = arith.constant 18 : index
    %c0_111 = arith.constant 0 : index
    %103 = vector.load %arg10[%c0_109, %c0_110, %c18, %c0_111] : memref<2x12x24x10xf32, #tpu.memory_space<vmem>>, vector<2x12x1x10xf32>
    %104 = vector.shape_cast %103 : vector<2x12x1x10xf32> to vector<2x12x10xf32>
    %c0_112 = arith.constant 0 : index
    %c0_113 = arith.constant 0 : index
    %c19 = arith.constant 19 : index
    %c0_114 = arith.constant 0 : index
    %105 = vector.load %arg10[%c0_112, %c0_113, %c19, %c0_114] : memref<2x12x24x10xf32, #tpu.memory_space<vmem>>, vector<2x12x1x10xf32>
    %106 = vector.shape_cast %105 : vector<2x12x1x10xf32> to vector<2x12x10xf32>
    %107 = arith.maximumf %104, %106 : vector<2x12x10xf32>
    %cst_115 = arith.constant 0.000000e+00 : f32
    %108 = vector.broadcast %cst_115 : f32 to vector<2x12x10xf32>
    %109 = arith.maximumf %107, %108 : vector<2x12x10xf32>
    %c0_116 = arith.constant 0 : index
    %c0_117 = arith.constant 0 : index
    %c9_118 = arith.constant 9 : index
    %c0_119 = arith.constant 0 : index
    %110 = vector.load %arg11[%c0_116, %c0_117, %c9_118, %c0_119] : memref<2x12x12x10xf32, #tpu.memory_space<vmem>>, vector<2x12x1x10xf32>
    %111 = vector.shape_cast %110 : vector<2x12x1x10xf32> to vector<2x12x10xf32>
    %112 = vector.shape_cast %109 : vector<2x12x10xf32> to vector<2x12x1x10xf32>
    tpu.vector_store %arg11[%c0_116, %c0_117, %c9_118, %c0_119], %112 {strides = array<i32>} : memref<2x12x12x10xf32, #tpu.memory_space<vmem>>, vector<2x12x1x10xf32>,
    %c0_120 = arith.constant 0 : index
    %c0_121 = arith.constant 0 : index
    %c20 = arith.constant 20 : index
    %c0_122 = arith.constant 0 : index
    %113 = vector.load %arg10[%c0_120, %c0_121, %c20, %c0_122] : memref<2x12x24x10xf32, #tpu.memory_space<vmem>>, vector<2x12x1x10xf32>
    %114 = vector.shape_cast %113 : vector<2x12x1x10xf32> to vector<2x12x10xf32>
    %c0_123 = arith.constant 0 : index
    %c0_124 = arith.constant 0 : index
    %c21 = arith.constant 21 : index
    %c0_125 = arith.constant 0 : index
    %115 = vector.load %arg10[%c0_123, %c0_124, %c21, %c0_125] : memref<2x12x24x10xf32, #tpu.memory_space<vmem>>, vector<2x12x1x10xf32>
    %116 = vector.shape_cast %115 : vector<2x12x1x10xf32> to vector<2x12x10xf32>
    %117 = arith.maximumf %114, %116 : vector<2x12x10xf32>
    %cst_126 = arith.constant 0.000000e+00 : f32
    %118 = vector.broadcast %cst_126 : f32 to vector<2x12x10xf32>
    %119 = arith.maximumf %117, %118 : vector<2x12x10xf32>
    %c0_127 = arith.constant 0 : index
    %c0_128 = arith.constant 0 : index
    %c10_129 = arith.constant 10 : index
    %c0_130 = arith.constant 0 : index
    %120 = vector.load %arg11[%c0_127, %c0_128, %c10_129, %c0_130] : memref<2x12x12x10xf32, #tpu.memory_space<vmem>>, vector<2x12x1x10xf32>
    %121 = vector.shape_cast %120 : vector<2x12x1x10xf32> to vector<2x12x10xf32>
    %122 = vector.shape_cast %119 : vector<2x12x10xf32> to vector<2x12x1x10xf32>
    tpu.vector_store %arg11[%c0_127, %c0_128, %c10_129, %c0_130], %122 {strides = array<i32>} : memref<2x12x12x10xf32, #tpu.memory_space<vmem>>, vector<2x12x1x10xf32>,
    %c0_131 = arith.constant 0 : index
    %c0_132 = arith.constant 0 : index
    %c22 = arith.constant 22 : index
    %c0_133 = arith.constant 0 : index
    %123 = vector.load %arg10[%c0_131, %c0_132, %c22, %c0_133] : memref<2x12x24x10xf32, #tpu.memory_space<vmem>>, vector<2x12x1x10xf32>
    %124 = vector.shape_cast %123 : vector<2x12x1x10xf32> to vector<2x12x10xf32>
    %c0_134 = arith.constant 0 : index
    %c0_135 = arith.constant 0 : index
    %c23 = arith.constant 23 : index
    %c0_136 = arith.constant 0 : index
    %125 = vector.load %arg10[%c0_134, %c0_135, %c23, %c0_136] : memref<2x12x24x10xf32, #tpu.memory_space<vmem>>, vector<2x12x1x10xf32>
    %126 = vector.shape_cast %125 : vector<2x12x1x10xf32> to vector<2x12x10xf32>
    %127 = arith.maximumf %124, %126 : vector<2x12x10xf32>
    %cst_137 = arith.constant 0.000000e+00 : f32
    %128 = vector.broadcast %cst_137 : f32 to vector<2x12x10xf32>
    %129 = arith.maximumf %127, %128 : vector<2x12x10xf32>
    %c0_138 = arith.constant 0 : index
    %c0_139 = arith.constant 0 : index
    %c11_140 = arith.constant 11 : index
    %c0_141 = arith.constant 0 : index
    %130 = vector.load %arg11[%c0_138, %c0_139, %c11_140, %c0_141] : memref<2x12x12x10xf32, #tpu.memory_space<vmem>>, vector<2x12x1x10xf32>
    %131 = vector.shape_cast %130 : vector<2x12x1x10xf32> to vector<2x12x10xf32>
    %132 = vector.shape_cast %129 : vector<2x12x10xf32> to vector<2x12x1x10xf32>
    tpu.vector_store %arg11[%c0_138, %c0_139, %c11_140, %c0_141], %132 {strides = array<i32>} : memref<2x12x12x10xf32, #tpu.memory_space<vmem>>, vector<2x12x1x10xf32>,
    %cst_142 = arith.constant 0.000000e+00 : f32
    %133 = vector.broadcast %cst_142 : f32 to vector<128x20xf32>
    %c0_143 = arith.constant 0 : index
    %c0_144 = arith.constant 0 : index
    %c0_145 = arith.constant 0 : index
    %c0_146 = arith.constant 0 : index
    %134 = vector.load %arg11[%c0_143, %c0_144, %c0_145, %c0_146] : memref<2x12x12x10xf32, #tpu.memory_space<vmem>>, vector<2x8x8x10xf32>
    %135 = vector.shape_cast %134 : vector<2x8x8x10xf32> to vector<128x10xf32>
    %136 = arith.truncf %135 : vector<128x10xf32> to vector<128x10xbf16>
    %c0_147 = arith.constant 0 : index
    %c0_148 = arith.constant 0 : index
    %c0_149 = arith.constant 0 : index
    %c0_150 = arith.constant 0 : index
    %137 = vector.load %arg3[%c0_147, %c0_148, %c0_149, %c0_150] : memref<5x5x10x20xbf16, #tpu.memory_space<vmem>>, vector<1x1x10x20xbf16>
    %138 = vector.shape_cast %137 : vector<1x1x10x20xbf16> to vector<10x20xbf16>
    %cst_151 = arith.constant dense<0.000000e+00> : vector<128x20xf32>
    %139 = tpu.matmul %136, %138, %cst_151 {dimension_numbers = #tpu.dot_dimension_numbers<[1], [0], [0], [1], [0, 0, 1, 1], [], []>} : vector<128x10xbf16>, vector<10x20xbf16>, vector<128x20xf32> -> vector<128x20xf32>
    %140 = arith.addf %133, %139 : vector<128x20xf32>
    %c0_152 = arith.constant 0 : index
    %c0_153 = arith.constant 0 : index
    %c1_154 = arith.constant 1 : index
    %c0_155 = arith.constant 0 : index
    %141 = vector.load %arg11[%c0_152, %c0_153, %c1_154, %c0_155] : memref<2x12x12x10xf32, #tpu.memory_space<vmem>>, vector<2x8x8x10xf32>
    %142 = vector.shape_cast %141 : vector<2x8x8x10xf32> to vector<128x10xf32>
    %143 = arith.truncf %142 : vector<128x10xf32> to vector<128x10xbf16>
    %c0_156 = arith.constant 0 : index
    %c1_157 = arith.constant 1 : index
    %c0_158 = arith.constant 0 : index
    %c0_159 = arith.constant 0 : index
    %144 = vector.load %arg3[%c0_156, %c1_157, %c0_158, %c0_159] : memref<5x5x10x20xbf16, #tpu.memory_space<vmem>>, vector<1x1x10x20xbf16>
    %145 = vector.shape_cast %144 : vector<1x1x10x20xbf16> to vector<10x20xbf16>
    %cst_160 = arith.constant dense<0.000000e+00> : vector<128x20xf32>
    %146 = tpu.matmul %143, %145, %cst_160 {dimension_numbers = #tpu.dot_dimension_numbers<[1], [0], [0], [1], [0, 0, 1, 1], [], []>} : vector<128x10xbf16>, vector<10x20xbf16>, vector<128x20xf32> -> vector<128x20xf32>
    %147 = arith.addf %140, %146 : vector<128x20xf32>
    %c0_161 = arith.constant 0 : index
    %c0_162 = arith.constant 0 : index
    %c2_163 = arith.constant 2 : index
    %c0_164 = arith.constant 0 : index
    %148 = vector.load %arg11[%c0_161, %c0_162, %c2_163, %c0_164] : memref<2x12x12x10xf32, #tpu.memory_space<vmem>>, vector<2x8x8x10xf32>
    %149 = vector.shape_cast %148 : vector<2x8x8x10xf32> to vector<128x10xf32>
    %150 = arith.truncf %149 : vector<128x10xf32> to vector<128x10xbf16>
    %c0_165 = arith.constant 0 : index
    %c2_166 = arith.constant 2 : index
    %c0_167 = arith.constant 0 : index
    %c0_168 = arith.constant 0 : index
    %151 = vector.load %arg3[%c0_165, %c2_166, %c0_167, %c0_168] : memref<5x5x10x20xbf16, #tpu.memory_space<vmem>>, vector<1x1x10x20xbf16>
    %152 = vector.shape_cast %151 : vector<1x1x10x20xbf16> to vector<10x20xbf16>
    %cst_169 = arith.constant dense<0.000000e+00> : vector<128x20xf32>
    %153 = tpu.matmul %150, %152, %cst_169 {dimension_numbers = #tpu.dot_dimension_numbers<[1], [0], [0], [1], [0, 0, 1, 1], [], []>} : vector<128x10xbf16>, vector<10x20xbf16>, vector<128x20xf32> -> vector<128x20xf32>
    %154 = arith.addf %147, %153 : vector<128x20xf32>
    %c0_170 = arith.constant 0 : index
    %c0_171 = arith.constant 0 : index
    %c3_172 = arith.constant 3 : index
    %c0_173 = arith.constant 0 : index
    %155 = vector.load %arg11[%c0_170, %c0_171, %c3_172, %c0_173] : memref<2x12x12x10xf32, #tpu.memory_space<vmem>>, vector<2x8x8x10xf32>
    %156 = vector.shape_cast %155 : vector<2x8x8x10xf32> to vector<128x10xf32>
    %157 = arith.truncf %156 : vector<128x10xf32> to vector<128x10xbf16>
    %c0_174 = arith.constant 0 : index
    %c3_175 = arith.constant 3 : index
    %c0_176 = arith.constant 0 : index
    %c0_177 = arith.constant 0 : index
    %158 = vector.load %arg3[%c0_174, %c3_175, %c0_176, %c0_177] : memref<5x5x10x20xbf16, #tpu.memory_space<vmem>>, vector<1x1x10x20xbf16>
    %159 = vector.shape_cast %158 : vector<1x1x10x20xbf16> to vector<10x20xbf16>
    %cst_178 = arith.constant dense<0.000000e+00> : vector<128x20xf32>
    %160 = tpu.matmul %157, %159, %cst_178 {dimension_numbers = #tpu.dot_dimension_numbers<[1], [0], [0], [1], [0, 0, 1, 1], [], []>} : vector<128x10xbf16>, vector<10x20xbf16>, vector<128x20xf32> -> vector<128x20xf32>
    %161 = arith.addf %154, %160 : vector<128x20xf32>
    %c0_179 = arith.constant 0 : index
    %c0_180 = arith.constant 0 : index
    %c4_181 = arith.constant 4 : index
    %c0_182 = arith.constant 0 : index
    %162 = vector.load %arg11[%c0_179, %c0_180, %c4_181, %c0_182] : memref<2x12x12x10xf32, #tpu.memory_space<vmem>>, vector<2x8x8x10xf32>
    %163 = vector.shape_cast %162 : vector<2x8x8x10xf32> to vector<128x10xf32>
    %164 = arith.truncf %163 : vector<128x10xf32> to vector<128x10xbf16>
    %c0_183 = arith.constant 0 : index
    %c4_184 = arith.constant 4 : index
    %c0_185 = arith.constant 0 : index
    %c0_186 = arith.constant 0 : index
    %165 = vector.load %arg3[%c0_183, %c4_184, %c0_185, %c0_186] : memref<5x5x10x20xbf16, #tpu.memory_space<vmem>>, vector<1x1x10x20xbf16>
    %166 = vector.shape_cast %165 : vector<1x1x10x20xbf16> to vector<10x20xbf16>
    %cst_187 = arith.constant dense<0.000000e+00> : vector<128x20xf32>
    %167 = tpu.matmul %164, %166, %cst_187 {dimension_numbers = #tpu.dot_dimension_numbers<[1], [0], [0], [1], [0, 0, 1, 1], [], []>} : vector<128x10xbf16>, vector<10x20xbf16>, vector<128x20xf32> -> vector<128x20xf32>
    %168 = arith.addf %161, %167 : vector<128x20xf32>
    %c0_188 = arith.constant 0 : index
    %c1_189 = arith.constant 1 : index
    %c0_190 = arith.constant 0 : index
    %c0_191 = arith.constant 0 : index
    %169 = vector.load %arg11[%c0_188, %c1_189, %c0_190, %c0_191] : memref<2x12x12x10xf32, #tpu.memory_space<vmem>>, vector<2x8x8x10xf32>
    %170 = vector.shape_cast %169 : vector<2x8x8x10xf32> to vector<128x10xf32>
    %171 = arith.truncf %170 : vector<128x10xf32> to vector<128x10xbf16>
    %c1_192 = arith.constant 1 : index
    %c0_193 = arith.constant 0 : index
    %c0_194 = arith.constant 0 : index
    %c0_195 = arith.constant 0 : index
    %172 = vector.load %arg3[%c1_192, %c0_193, %c0_194, %c0_195] : memref<5x5x10x20xbf16, #tpu.memory_space<vmem>>, vector<1x1x10x20xbf16>
    %173 = vector.shape_cast %172 : vector<1x1x10x20xbf16> to vector<10x20xbf16>
    %cst_196 = arith.constant dense<0.000000e+00> : vector<128x20xf32>
    %174 = tpu.matmul %171, %173, %cst_196 {dimension_numbers = #tpu.dot_dimension_numbers<[1], [0], [0], [1], [0, 0, 1, 1], [], []>} : vector<128x10xbf16>, vector<10x20xbf16>, vector<128x20xf32> -> vector<128x20xf32>
    %175 = arith.addf %168, %174 : vector<128x20xf32>
    %c0_197 = arith.constant 0 : index
    %c1_198 = arith.constant 1 : index
    %c1_199 = arith.constant 1 : index
    %c0_200 = arith.constant 0 : index
    %176 = vector.load %arg11[%c0_197, %c1_198, %c1_199, %c0_200] : memref<2x12x12x10xf32, #tpu.memory_space<vmem>>, vector<2x8x8x10xf32>
    %177 = vector.shape_cast %176 : vector<2x8x8x10xf32> to vector<128x10xf32>
    %178 = arith.truncf %177 : vector<128x10xf32> to vector<128x10xbf16>
    %c1_201 = arith.constant 1 : index
    %c1_202 = arith.constant 1 : index
    %c0_203 = arith.constant 0 : index
    %c0_204 = arith.constant 0 : index
    %179 = vector.load %arg3[%c1_201, %c1_202, %c0_203, %c0_204] : memref<5x5x10x20xbf16, #tpu.memory_space<vmem>>, vector<1x1x10x20xbf16>
    %180 = vector.shape_cast %179 : vector<1x1x10x20xbf16> to vector<10x20xbf16>
    %cst_205 = arith.constant dense<0.000000e+00> : vector<128x20xf32>
    %181 = tpu.matmul %178, %180, %cst_205 {dimension_numbers = #tpu.dot_dimension_numbers<[1], [0], [0], [1], [0, 0, 1, 1], [], []>} : vector<128x10xbf16>, vector<10x20xbf16>, vector<128x20xf32> -> vector<128x20xf32>
    %182 = arith.addf %175, %181 : vector<128x20xf32>
    %c0_206 = arith.constant 0 : index
    %c1_207 = arith.constant 1 : index
    %c2_208 = arith.constant 2 : index
    %c0_209 = arith.constant 0 : index
    %183 = vector.load %arg11[%c0_206, %c1_207, %c2_208, %c0_209] : memref<2x12x12x10xf32, #tpu.memory_space<vmem>>, vector<2x8x8x10xf32>
    %184 = vector.shape_cast %183 : vector<2x8x8x10xf32> to vector<128x10xf32>
    %185 = arith.truncf %184 : vector<128x10xf32> to vector<128x10xbf16>
    %c1_210 = arith.constant 1 : index
    %c2_211 = arith.constant 2 : index
    %c0_212 = arith.constant 0 : index
    %c0_213 = arith.constant 0 : index
    %186 = vector.load %arg3[%c1_210, %c2_211, %c0_212, %c0_213] : memref<5x5x10x20xbf16, #tpu.memory_space<vmem>>, vector<1x1x10x20xbf16>
    %187 = vector.shape_cast %186 : vector<1x1x10x20xbf16> to vector<10x20xbf16>
    %cst_214 = arith.constant dense<0.000000e+00> : vector<128x20xf32>
    %188 = tpu.matmul %185, %187, %cst_214 {dimension_numbers = #tpu.dot_dimension_numbers<[1], [0], [0], [1], [0, 0, 1, 1], [], []>} : vector<128x10xbf16>, vector<10x20xbf16>, vector<128x20xf32> -> vector<128x20xf32>
    %189 = arith.addf %182, %188 : vector<128x20xf32>
    %c0_215 = arith.constant 0 : index
    %c1_216 = arith.constant 1 : index
    %c3_217 = arith.constant 3 : index
    %c0_218 = arith.constant 0 : index
    %190 = vector.load %arg11[%c0_215, %c1_216, %c3_217, %c0_218] : memref<2x12x12x10xf32, #tpu.memory_space<vmem>>, vector<2x8x8x10xf32>
    %191 = vector.shape_cast %190 : vector<2x8x8x10xf32> to vector<128x10xf32>
    %192 = arith.truncf %191 : vector<128x10xf32> to vector<128x10xbf16>
    %c1_219 = arith.constant 1 : index
    %c3_220 = arith.constant 3 : index
    %c0_221 = arith.constant 0 : index
    %c0_222 = arith.constant 0 : index
    %193 = vector.load %arg3[%c1_219, %c3_220, %c0_221, %c0_222] : memref<5x5x10x20xbf16, #tpu.memory_space<vmem>>, vector<1x1x10x20xbf16>
    %194 = vector.shape_cast %193 : vector<1x1x10x20xbf16> to vector<10x20xbf16>
    %cst_223 = arith.constant dense<0.000000e+00> : vector<128x20xf32>
    %195 = tpu.matmul %192, %194, %cst_223 {dimension_numbers = #tpu.dot_dimension_numbers<[1], [0], [0], [1], [0, 0, 1, 1], [], []>} : vector<128x10xbf16>, vector<10x20xbf16>, vector<128x20xf32> -> vector<128x20xf32>
    %196 = arith.addf %189, %195 : vector<128x20xf32>
    %c0_224 = arith.constant 0 : index
    %c1_225 = arith.constant 1 : index
    %c4_226 = arith.constant 4 : index
    %c0_227 = arith.constant 0 : index
    %197 = vector.load %arg11[%c0_224, %c1_225, %c4_226, %c0_227] : memref<2x12x12x10xf32, #tpu.memory_space<vmem>>, vector<2x8x8x10xf32>
    %198 = vector.shape_cast %197 : vector<2x8x8x10xf32> to vector<128x10xf32>
    %199 = arith.truncf %198 : vector<128x10xf32> to vector<128x10xbf16>
    %c1_228 = arith.constant 1 : index
    %c4_229 = arith.constant 4 : index
    %c0_230 = arith.constant 0 : index
    %c0_231 = arith.constant 0 : index
    %200 = vector.load %arg3[%c1_228, %c4_229, %c0_230, %c0_231] : memref<5x5x10x20xbf16, #tpu.memory_space<vmem>>, vector<1x1x10x20xbf16>
    %201 = vector.shape_cast %200 : vector<1x1x10x20xbf16> to vector<10x20xbf16>
    %cst_232 = arith.constant dense<0.000000e+00> : vector<128x20xf32>
    %202 = tpu.matmul %199, %201, %cst_232 {dimension_numbers = #tpu.dot_dimension_numbers<[1], [0], [0], [1], [0, 0, 1, 1], [], []>} : vector<128x10xbf16>, vector<10x20xbf16>, vector<128x20xf32> -> vector<128x20xf32>
    %203 = arith.addf %196, %202 : vector<128x20xf32>
    %c0_233 = arith.constant 0 : index
    %c2_234 = arith.constant 2 : index
    %c0_235 = arith.constant 0 : index
    %c0_236 = arith.constant 0 : index
    %204 = vector.load %arg11[%c0_233, %c2_234, %c0_235, %c0_236] : memref<2x12x12x10xf32, #tpu.memory_space<vmem>>, vector<2x8x8x10xf32>
    %205 = vector.shape_cast %204 : vector<2x8x8x10xf32> to vector<128x10xf32>
    %206 = arith.truncf %205 : vector<128x10xf32> to vector<128x10xbf16>
    %c2_237 = arith.constant 2 : index
    %c0_238 = arith.constant 0 : index
    %c0_239 = arith.constant 0 : index
    %c0_240 = arith.constant 0 : index
    %207 = vector.load %arg3[%c2_237, %c0_238, %c0_239, %c0_240] : memref<5x5x10x20xbf16, #tpu.memory_space<vmem>>, vector<1x1x10x20xbf16>
    %208 = vector.shape_cast %207 : vector<1x1x10x20xbf16> to vector<10x20xbf16>
    %cst_241 = arith.constant dense<0.000000e+00> : vector<128x20xf32>
    %209 = tpu.matmul %206, %208, %cst_241 {dimension_numbers = #tpu.dot_dimension_numbers<[1], [0], [0], [1], [0, 0, 1, 1], [], []>} : vector<128x10xbf16>, vector<10x20xbf16>, vector<128x20xf32> -> vector<128x20xf32>
    %210 = arith.addf %203, %209 : vector<128x20xf32>
    %c0_242 = arith.constant 0 : index
    %c2_243 = arith.constant 2 : index
    %c1_244 = arith.constant 1 : index
    %c0_245 = arith.constant 0 : index
    %211 = vector.load %arg11[%c0_242, %c2_243, %c1_244, %c0_245] : memref<2x12x12x10xf32, #tpu.memory_space<vmem>>, vector<2x8x8x10xf32>
    %212 = vector.shape_cast %211 : vector<2x8x8x10xf32> to vector<128x10xf32>
    %213 = arith.truncf %212 : vector<128x10xf32> to vector<128x10xbf16>
    %c2_246 = arith.constant 2 : index
    %c1_247 = arith.constant 1 : index
    %c0_248 = arith.constant 0 : index
    %c0_249 = arith.constant 0 : index
    %214 = vector.load %arg3[%c2_246, %c1_247, %c0_248, %c0_249] : memref<5x5x10x20xbf16, #tpu.memory_space<vmem>>, vector<1x1x10x20xbf16>
    %215 = vector.shape_cast %214 : vector<1x1x10x20xbf16> to vector<10x20xbf16>
    %cst_250 = arith.constant dense<0.000000e+00> : vector<128x20xf32>
    %216 = tpu.matmul %213, %215, %cst_250 {dimension_numbers = #tpu.dot_dimension_numbers<[1], [0], [0], [1], [0, 0, 1, 1], [], []>} : vector<128x10xbf16>, vector<10x20xbf16>, vector<128x20xf32> -> vector<128x20xf32>
    %217 = arith.addf %210, %216 : vector<128x20xf32>
    %c0_251 = arith.constant 0 : index
    %c2_252 = arith.constant 2 : index
    %c2_253 = arith.constant 2 : index
    %c0_254 = arith.constant 0 : index
    %218 = vector.load %arg11[%c0_251, %c2_252, %c2_253, %c0_254] : memref<2x12x12x10xf32, #tpu.memory_space<vmem>>, vector<2x8x8x10xf32>
    %219 = vector.shape_cast %218 : vector<2x8x8x10xf32> to vector<128x10xf32>
    %220 = arith.truncf %219 : vector<128x10xf32> to vector<128x10xbf16>
    %c2_255 = arith.constant 2 : index
    %c2_256 = arith.constant 2 : index
    %c0_257 = arith.constant 0 : index
    %c0_258 = arith.constant 0 : index
    %221 = vector.load %arg3[%c2_255, %c2_256, %c0_257, %c0_258] : memref<5x5x10x20xbf16, #tpu.memory_space<vmem>>, vector<1x1x10x20xbf16>
    %222 = vector.shape_cast %221 : vector<1x1x10x20xbf16> to vector<10x20xbf16>
    %cst_259 = arith.constant dense<0.000000e+00> : vector<128x20xf32>
    %223 = tpu.matmul %220, %222, %cst_259 {dimension_numbers = #tpu.dot_dimension_numbers<[1], [0], [0], [1], [0, 0, 1, 1], [], []>} : vector<128x10xbf16>, vector<10x20xbf16>, vector<128x20xf32> -> vector<128x20xf32>
    %224 = arith.addf %217, %223 : vector<128x20xf32>
    %c0_260 = arith.constant 0 : index
    %c2_261 = arith.constant 2 : index
    %c3_262 = arith.constant 3 : index
    %c0_263 = arith.constant 0 : index
    %225 = vector.load %arg11[%c0_260, %c2_261, %c3_262, %c0_263] : memref<2x12x12x10xf32, #tpu.memory_space<vmem>>, vector<2x8x8x10xf32>
    %226 = vector.shape_cast %225 : vector<2x8x8x10xf32> to vector<128x10xf32>
    %227 = arith.truncf %226 : vector<128x10xf32> to vector<128x10xbf16>
    %c2_264 = arith.constant 2 : index
    %c3_265 = arith.constant 3 : index
    %c0_266 = arith.constant 0 : index
    %c0_267 = arith.constant 0 : index
    %228 = vector.load %arg3[%c2_264, %c3_265, %c0_266, %c0_267] : memref<5x5x10x20xbf16, #tpu.memory_space<vmem>>, vector<1x1x10x20xbf16>
    %229 = vector.shape_cast %228 : vector<1x1x10x20xbf16> to vector<10x20xbf16>
    %cst_268 = arith.constant dense<0.000000e+00> : vector<128x20xf32>
    %230 = tpu.matmul %227, %229, %cst_268 {dimension_numbers = #tpu.dot_dimension_numbers<[1], [0], [0], [1], [0, 0, 1, 1], [], []>} : vector<128x10xbf16>, vector<10x20xbf16>, vector<128x20xf32> -> vector<128x20xf32>
    %231 = arith.addf %224, %230 : vector<128x20xf32>
    %c0_269 = arith.constant 0 : index
    %c2_270 = arith.constant 2 : index
    %c4_271 = arith.constant 4 : index
    %c0_272 = arith.constant 0 : index
    %232 = vector.load %arg11[%c0_269, %c2_270, %c4_271, %c0_272] : memref<2x12x12x10xf32, #tpu.memory_space<vmem>>, vector<2x8x8x10xf32>
    %233 = vector.shape_cast %232 : vector<2x8x8x10xf32> to vector<128x10xf32>
    %234 = arith.truncf %233 : vector<128x10xf32> to vector<128x10xbf16>
    %c2_273 = arith.constant 2 : index
    %c4_274 = arith.constant 4 : index
    %c0_275 = arith.constant 0 : index
    %c0_276 = arith.constant 0 : index
    %235 = vector.load %arg3[%c2_273, %c4_274, %c0_275, %c0_276] : memref<5x5x10x20xbf16, #tpu.memory_space<vmem>>, vector<1x1x10x20xbf16>
    %236 = vector.shape_cast %235 : vector<1x1x10x20xbf16> to vector<10x20xbf16>
    %cst_277 = arith.constant dense<0.000000e+00> : vector<128x20xf32>
    %237 = tpu.matmul %234, %236, %cst_277 {dimension_numbers = #tpu.dot_dimension_numbers<[1], [0], [0], [1], [0, 0, 1, 1], [], []>} : vector<128x10xbf16>, vector<10x20xbf16>, vector<128x20xf32> -> vector<128x20xf32>
    %238 = arith.addf %231, %237 : vector<128x20xf32>
    %c0_278 = arith.constant 0 : index
    %c3_279 = arith.constant 3 : index
    %c0_280 = arith.constant 0 : index
    %c0_281 = arith.constant 0 : index
    %239 = vector.load %arg11[%c0_278, %c3_279, %c0_280, %c0_281] : memref<2x12x12x10xf32, #tpu.memory_space<vmem>>, vector<2x8x8x10xf32>
    %240 = vector.shape_cast %239 : vector<2x8x8x10xf32> to vector<128x10xf32>
    %241 = arith.truncf %240 : vector<128x10xf32> to vector<128x10xbf16>
    %c3_282 = arith.constant 3 : index
    %c0_283 = arith.constant 0 : index
    %c0_284 = arith.constant 0 : index
    %c0_285 = arith.constant 0 : index
    %242 = vector.load %arg3[%c3_282, %c0_283, %c0_284, %c0_285] : memref<5x5x10x20xbf16, #tpu.memory_space<vmem>>, vector<1x1x10x20xbf16>
    %243 = vector.shape_cast %242 : vector<1x1x10x20xbf16> to vector<10x20xbf16>
    %cst_286 = arith.constant dense<0.000000e+00> : vector<128x20xf32>
    %244 = tpu.matmul %241, %243, %cst_286 {dimension_numbers = #tpu.dot_dimension_numbers<[1], [0], [0], [1], [0, 0, 1, 1], [], []>} : vector<128x10xbf16>, vector<10x20xbf16>, vector<128x20xf32> -> vector<128x20xf32>
    %245 = arith.addf %238, %244 : vector<128x20xf32>
    %c0_287 = arith.constant 0 : index
    %c3_288 = arith.constant 3 : index
    %c1_289 = arith.constant 1 : index
    %c0_290 = arith.constant 0 : index
    %246 = vector.load %arg11[%c0_287, %c3_288, %c1_289, %c0_290] : memref<2x12x12x10xf32, #tpu.memory_space<vmem>>, vector<2x8x8x10xf32>
    %247 = vector.shape_cast %246 : vector<2x8x8x10xf32> to vector<128x10xf32>
    %248 = arith.truncf %247 : vector<128x10xf32> to vector<128x10xbf16>
    %c3_291 = arith.constant 3 : index
    %c1_292 = arith.constant 1 : index
    %c0_293 = arith.constant 0 : index
    %c0_294 = arith.constant 0 : index
    %249 = vector.load %arg3[%c3_291, %c1_292, %c0_293, %c0_294] : memref<5x5x10x20xbf16, #tpu.memory_space<vmem>>, vector<1x1x10x20xbf16>
    %250 = vector.shape_cast %249 : vector<1x1x10x20xbf16> to vector<10x20xbf16>
    %cst_295 = arith.constant dense<0.000000e+00> : vector<128x20xf32>
    %251 = tpu.matmul %248, %250, %cst_295 {dimension_numbers = #tpu.dot_dimension_numbers<[1], [0], [0], [1], [0, 0, 1, 1], [], []>} : vector<128x10xbf16>, vector<10x20xbf16>, vector<128x20xf32> -> vector<128x20xf32>
    %252 = arith.addf %245, %251 : vector<128x20xf32>
    %c0_296 = arith.constant 0 : index
    %c3_297 = arith.constant 3 : index
    %c2_298 = arith.constant 2 : index
    %c0_299 = arith.constant 0 : index
    %253 = vector.load %arg11[%c0_296, %c3_297, %c2_298, %c0_299] : memref<2x12x12x10xf32, #tpu.memory_space<vmem>>, vector<2x8x8x10xf32>
    %254 = vector.shape_cast %253 : vector<2x8x8x10xf32> to vector<128x10xf32>
    %255 = arith.truncf %254 : vector<128x10xf32> to vector<128x10xbf16>
    %c3_300 = arith.constant 3 : index
    %c2_301 = arith.constant 2 : index
    %c0_302 = arith.constant 0 : index
    %c0_303 = arith.constant 0 : index
    %256 = vector.load %arg3[%c3_300, %c2_301, %c0_302, %c0_303] : memref<5x5x10x20xbf16, #tpu.memory_space<vmem>>, vector<1x1x10x20xbf16>
    %257 = vector.shape_cast %256 : vector<1x1x10x20xbf16> to vector<10x20xbf16>
    %cst_304 = arith.constant dense<0.000000e+00> : vector<128x20xf32>
    %258 = tpu.matmul %255, %257, %cst_304 {dimension_numbers = #tpu.dot_dimension_numbers<[1], [0], [0], [1], [0, 0, 1, 1], [], []>} : vector<128x10xbf16>, vector<10x20xbf16>, vector<128x20xf32> -> vector<128x20xf32>
    %259 = arith.addf %252, %258 : vector<128x20xf32>
    %c0_305 = arith.constant 0 : index
    %c3_306 = arith.constant 3 : index
    %c3_307 = arith.constant 3 : index
    %c0_308 = arith.constant 0 : index
    %260 = vector.load %arg11[%c0_305, %c3_306, %c3_307, %c0_308] : memref<2x12x12x10xf32, #tpu.memory_space<vmem>>, vector<2x8x8x10xf32>
    %261 = vector.shape_cast %260 : vector<2x8x8x10xf32> to vector<128x10xf32>
    %262 = arith.truncf %261 : vector<128x10xf32> to vector<128x10xbf16>
    %c3_309 = arith.constant 3 : index
    %c3_310 = arith.constant 3 : index
    %c0_311 = arith.constant 0 : index
    %c0_312 = arith.constant 0 : index
    %263 = vector.load %arg3[%c3_309, %c3_310, %c0_311, %c0_312] : memref<5x5x10x20xbf16, #tpu.memory_space<vmem>>, vector<1x1x10x20xbf16>
    %264 = vector.shape_cast %263 : vector<1x1x10x20xbf16> to vector<10x20xbf16>
    %cst_313 = arith.constant dense<0.000000e+00> : vector<128x20xf32>
    %265 = tpu.matmul %262, %264, %cst_313 {dimension_numbers = #tpu.dot_dimension_numbers<[1], [0], [0], [1], [0, 0, 1, 1], [], []>} : vector<128x10xbf16>, vector<10x20xbf16>, vector<128x20xf32> -> vector<128x20xf32>
    %266 = arith.addf %259, %265 : vector<128x20xf32>
    %c0_314 = arith.constant 0 : index
    %c3_315 = arith.constant 3 : index
    %c4_316 = arith.constant 4 : index
    %c0_317 = arith.constant 0 : index
    %267 = vector.load %arg11[%c0_314, %c3_315, %c4_316, %c0_317] : memref<2x12x12x10xf32, #tpu.memory_space<vmem>>, vector<2x8x8x10xf32>
    %268 = vector.shape_cast %267 : vector<2x8x8x10xf32> to vector<128x10xf32>
    %269 = arith.truncf %268 : vector<128x10xf32> to vector<128x10xbf16>
    %c3_318 = arith.constant 3 : index
    %c4_319 = arith.constant 4 : index
    %c0_320 = arith.constant 0 : index
    %c0_321 = arith.constant 0 : index
    %270 = vector.load %arg3[%c3_318, %c4_319, %c0_320, %c0_321] : memref<5x5x10x20xbf16, #tpu.memory_space<vmem>>, vector<1x1x10x20xbf16>
    %271 = vector.shape_cast %270 : vector<1x1x10x20xbf16> to vector<10x20xbf16>
    %cst_322 = arith.constant dense<0.000000e+00> : vector<128x20xf32>
    %272 = tpu.matmul %269, %271, %cst_322 {dimension_numbers = #tpu.dot_dimension_numbers<[1], [0], [0], [1], [0, 0, 1, 1], [], []>} : vector<128x10xbf16>, vector<10x20xbf16>, vector<128x20xf32> -> vector<128x20xf32>
    %273 = arith.addf %266, %272 : vector<128x20xf32>
    %c0_323 = arith.constant 0 : index
    %c4_324 = arith.constant 4 : index
    %c0_325 = arith.constant 0 : index
    %c0_326 = arith.constant 0 : index
    %274 = vector.load %arg11[%c0_323, %c4_324, %c0_325, %c0_326] : memref<2x12x12x10xf32, #tpu.memory_space<vmem>>, vector<2x8x8x10xf32>
    %275 = vector.shape_cast %274 : vector<2x8x8x10xf32> to vector<128x10xf32>
    %276 = arith.truncf %275 : vector<128x10xf32> to vector<128x10xbf16>
    %c4_327 = arith.constant 4 : index
    %c0_328 = arith.constant 0 : index
    %c0_329 = arith.constant 0 : index
    %c0_330 = arith.constant 0 : index
    %277 = vector.load %arg3[%c4_327, %c0_328, %c0_329, %c0_330] : memref<5x5x10x20xbf16, #tpu.memory_space<vmem>>, vector<1x1x10x20xbf16>
    %278 = vector.shape_cast %277 : vector<1x1x10x20xbf16> to vector<10x20xbf16>
    %cst_331 = arith.constant dense<0.000000e+00> : vector<128x20xf32>
    %279 = tpu.matmul %276, %278, %cst_331 {dimension_numbers = #tpu.dot_dimension_numbers<[1], [0], [0], [1], [0, 0, 1, 1], [], []>} : vector<128x10xbf16>, vector<10x20xbf16>, vector<128x20xf32> -> vector<128x20xf32>
    %280 = arith.addf %273, %279 : vector<128x20xf32>
    %c0_332 = arith.constant 0 : index
    %c4_333 = arith.constant 4 : index
    %c1_334 = arith.constant 1 : index
    %c0_335 = arith.constant 0 : index
    %281 = vector.load %arg11[%c0_332, %c4_333, %c1_334, %c0_335] : memref<2x12x12x10xf32, #tpu.memory_space<vmem>>, vector<2x8x8x10xf32>
    %282 = vector.shape_cast %281 : vector<2x8x8x10xf32> to vector<128x10xf32>
    %283 = arith.truncf %282 : vector<128x10xf32> to vector<128x10xbf16>
    %c4_336 = arith.constant 4 : index
    %c1_337 = arith.constant 1 : index
    %c0_338 = arith.constant 0 : index
    %c0_339 = arith.constant 0 : index
    %284 = vector.load %arg3[%c4_336, %c1_337, %c0_338, %c0_339] : memref<5x5x10x20xbf16, #tpu.memory_space<vmem>>, vector<1x1x10x20xbf16>
    %285 = vector.shape_cast %284 : vector<1x1x10x20xbf16> to vector<10x20xbf16>
    %cst_340 = arith.constant dense<0.000000e+00> : vector<128x20xf32>
    %286 = tpu.matmul %283, %285, %cst_340 {dimension_numbers = #tpu.dot_dimension_numbers<[1], [0], [0], [1], [0, 0, 1, 1], [], []>} : vector<128x10xbf16>, vector<10x20xbf16>, vector<128x20xf32> -> vector<128x20xf32>
    %287 = arith.addf %280, %286 : vector<128x20xf32>
    %c0_341 = arith.constant 0 : index
    %c4_342 = arith.constant 4 : index
    %c2_343 = arith.constant 2 : index
    %c0_344 = arith.constant 0 : index
    %288 = vector.load %arg11[%c0_341, %c4_342, %c2_343, %c0_344] : memref<2x12x12x10xf32, #tpu.memory_space<vmem>>, vector<2x8x8x10xf32>
    %289 = vector.shape_cast %288 : vector<2x8x8x10xf32> to vector<128x10xf32>
    %290 = arith.truncf %289 : vector<128x10xf32> to vector<128x10xbf16>
    %c4_345 = arith.constant 4 : index
    %c2_346 = arith.constant 2 : index
    %c0_347 = arith.constant 0 : index
    %c0_348 = arith.constant 0 : index
    %291 = vector.load %arg3[%c4_345, %c2_346, %c0_347, %c0_348] : memref<5x5x10x20xbf16, #tpu.memory_space<vmem>>, vector<1x1x10x20xbf16>
    %292 = vector.shape_cast %291 : vector<1x1x10x20xbf16> to vector<10x20xbf16>
    %cst_349 = arith.constant dense<0.000000e+00> : vector<128x20xf32>
    %293 = tpu.matmul %290, %292, %cst_349 {dimension_numbers = #tpu.dot_dimension_numbers<[1], [0], [0], [1], [0, 0, 1, 1], [], []>} : vector<128x10xbf16>, vector<10x20xbf16>, vector<128x20xf32> -> vector<128x20xf32>
    %294 = arith.addf %287, %293 : vector<128x20xf32>
    %c0_350 = arith.constant 0 : index
    %c4_351 = arith.constant 4 : index
    %c3_352 = arith.constant 3 : index
    %c0_353 = arith.constant 0 : index
    %295 = vector.load %arg11[%c0_350, %c4_351, %c3_352, %c0_353] : memref<2x12x12x10xf32, #tpu.memory_space<vmem>>, vector<2x8x8x10xf32>
    %296 = vector.shape_cast %295 : vector<2x8x8x10xf32> to vector<128x10xf32>
    %297 = arith.truncf %296 : vector<128x10xf32> to vector<128x10xbf16>
    %c4_354 = arith.constant 4 : index
    %c3_355 = arith.constant 3 : index
    %c0_356 = arith.constant 0 : index
    %c0_357 = arith.constant 0 : index
    %298 = vector.load %arg3[%c4_354, %c3_355, %c0_356, %c0_357] : memref<5x5x10x20xbf16, #tpu.memory_space<vmem>>, vector<1x1x10x20xbf16>
    %299 = vector.shape_cast %298 : vector<1x1x10x20xbf16> to vector<10x20xbf16>
    %cst_358 = arith.constant dense<0.000000e+00> : vector<128x20xf32>
    %300 = tpu.matmul %297, %299, %cst_358 {dimension_numbers = #tpu.dot_dimension_numbers<[1], [0], [0], [1], [0, 0, 1, 1], [], []>} : vector<128x10xbf16>, vector<10x20xbf16>, vector<128x20xf32> -> vector<128x20xf32>
    %301 = arith.addf %294, %300 : vector<128x20xf32>
    %c0_359 = arith.constant 0 : index
    %c4_360 = arith.constant 4 : index
    %c4_361 = arith.constant 4 : index
    %c0_362 = arith.constant 0 : index
    %302 = vector.load %arg11[%c0_359, %c4_360, %c4_361, %c0_362] : memref<2x12x12x10xf32, #tpu.memory_space<vmem>>, vector<2x8x8x10xf32>
    %303 = vector.shape_cast %302 : vector<2x8x8x10xf32> to vector<128x10xf32>
    %304 = arith.truncf %303 : vector<128x10xf32> to vector<128x10xbf16>
    %c4_363 = arith.constant 4 : index
    %c4_364 = arith.constant 4 : index
    %c0_365 = arith.constant 0 : index
    %c0_366 = arith.constant 0 : index
    %305 = vector.load %arg3[%c4_363, %c4_364, %c0_365, %c0_366] : memref<5x5x10x20xbf16, #tpu.memory_space<vmem>>, vector<1x1x10x20xbf16>
    %306 = vector.shape_cast %305 : vector<1x1x10x20xbf16> to vector<10x20xbf16>
    %cst_367 = arith.constant dense<0.000000e+00> : vector<128x20xf32>
    %307 = tpu.matmul %304, %306, %cst_367 {dimension_numbers = #tpu.dot_dimension_numbers<[1], [0], [0], [1], [0, 0, 1, 1], [], []>} : vector<128x10xbf16>, vector<10x20xbf16>, vector<128x20xf32> -> vector<128x20xf32>
    %308 = arith.addf %301, %307 : vector<128x20xf32>
    %c0_368 = arith.constant 0 : index
    %c0_369 = arith.constant 0 : index
    %309 = vector.load %arg4[%c0_368, %c0_369] : memref<1x20xf32, #tpu.memory_space<vmem>>, vector<1x20xf32>
    %310 = vector.broadcast %309 : vector<1x20xf32> to vector<128x20xf32>
    %311 = arith.addf %308, %310 : vector<128x20xf32>
    %312 = vector.shape_cast %311 : vector<128x20xf32> to vector<2x4x2x8x20xf32>
    %313 = vector.extract_strided_slice %312 {offsets = [0, 0, 0, 0, 0], sizes = [2, 4, 1, 8, 20], strides = [1, 1, 1, 1, 1]} : vector<2x4x2x8x20xf32> to vector<2x4x1x8x20xf32>
    %314 = vector.shape_cast %313 : vector<2x4x1x8x20xf32> to vector<2x4x8x20xf32>
    %315 = vector.extract_strided_slice %312 {offsets = [0, 0, 1, 0, 0], sizes = [2, 4, 1, 8, 20], strides = [1, 1, 1, 1, 1]} : vector<2x4x2x8x20xf32> to vector<2x4x1x8x20xf32>
    %316 = vector.shape_cast %315 : vector<2x4x1x8x20xf32> to vector<2x4x8x20xf32>
    %317 = arith.maximumf %314, %316 : vector<2x4x8x20xf32>
    %c0_370 = arith.constant 0 : index
    %c0_371 = arith.constant 0 : index
    %c0_372 = arith.constant 0 : index
    %c0_373 = arith.constant 0 : index
    %318 = vector.load %arg12[%c0_370, %c0_371, %c0_372, %c0_373] : memref<2x4x8x20xf32, #tpu.memory_space<vmem>>, vector<2x4x8x20xf32>
    tpu.vector_store %arg12[%c0_370, %c0_371, %c0_372, %c0_373], %317 {strides = array<i32>} : memref<2x4x8x20xf32, #tpu.memory_space<vmem>>, vector<2x4x8x20xf32>,
    %c0_374 = arith.constant 0 : index
    %c0_375 = arith.constant 0 : index
    %c0_376 = arith.constant 0 : index
    %c0_377 = arith.constant 0 : index
    %319 = vector.load %arg12[%c0_374, %c0_375, %c0_376, %c0_377] : memref<2x4x8x20xf32, #tpu.memory_space<vmem>>, vector<2x4x1x20xf32>
    %320 = vector.shape_cast %319 : vector<2x4x1x20xf32> to vector<2x4x20xf32>
    %c0_378 = arith.constant 0 : index
    %c0_379 = arith.constant 0 : index
    %c1_380 = arith.constant 1 : index
    %c0_381 = arith.constant 0 : index
    %321 = vector.load %arg12[%c0_378, %c0_379, %c1_380, %c0_381] : memref<2x4x8x20xf32, #tpu.memory_space<vmem>>, vector<2x4x1x20xf32>
    %322 = vector.shape_cast %321 : vector<2x4x1x20xf32> to vector<2x4x20xf32>
    %323 = arith.maximumf %320, %322 : vector<2x4x20xf32>
    %cst_382 = arith.constant 0.000000e+00 : f32
    %324 = vector.broadcast %cst_382 : f32 to vector<2x4x20xf32>
    %325 = arith.maximumf %323, %324 : vector<2x4x20xf32>
    %c0_383 = arith.constant 0 : index
    %c0_384 = arith.constant 0 : index
    %c0_385 = arith.constant 0 : index
    %c0_386 = arith.constant 0 : index
    %326 = vector.load %arg13[%c0_383, %c0_384, %c0_385, %c0_386] : memref<2x4x4x20xf32, #tpu.memory_space<vmem>>, vector<2x4x1x20xf32>
    %327 = vector.shape_cast %326 : vector<2x4x1x20xf32> to vector<2x4x20xf32>
    %328 = vector.shape_cast %325 : vector<2x4x20xf32> to vector<2x4x1x20xf32>
    tpu.vector_store %arg13[%c0_383, %c0_384, %c0_385, %c0_386], %328 {strides = array<i32>} : memref<2x4x4x20xf32, #tpu.memory_space<vmem>>, vector<2x4x1x20xf32>,
    %c0_387 = arith.constant 0 : index
    %c0_388 = arith.constant 0 : index
    %c2_389 = arith.constant 2 : index
    %c0_390 = arith.constant 0 : index
    %329 = vector.load %arg12[%c0_387, %c0_388, %c2_389, %c0_390] : memref<2x4x8x20xf32, #tpu.memory_space<vmem>>, vector<2x4x1x20xf32>
    %330 = vector.shape_cast %329 : vector<2x4x1x20xf32> to vector<2x4x20xf32>
    %c0_391 = arith.constant 0 : index
    %c0_392 = arith.constant 0 : index
    %c3_393 = arith.constant 3 : index
    %c0_394 = arith.constant 0 : index
    %331 = vector.load %arg12[%c0_391, %c0_392, %c3_393, %c0_394] : memref<2x4x8x20xf32, #tpu.memory_space<vmem>>, vector<2x4x1x20xf32>
    %332 = vector.shape_cast %331 : vector<2x4x1x20xf32> to vector<2x4x20xf32>
    %333 = arith.maximumf %330, %332 : vector<2x4x20xf32>
    %cst_395 = arith.constant 0.000000e+00 : f32
    %334 = vector.broadcast %cst_395 : f32 to vector<2x4x20xf32>
    %335 = arith.maximumf %333, %334 : vector<2x4x20xf32>
    %c0_396 = arith.constant 0 : index
    %c0_397 = arith.constant 0 : index
    %c1_398 = arith.constant 1 : index
    %c0_399 = arith.constant 0 : index
    %336 = vector.load %arg13[%c0_396, %c0_397, %c1_398, %c0_399] : memref<2x4x4x20xf32, #tpu.memory_space<vmem>>, vector<2x4x1x20xf32>
    %337 = vector.shape_cast %336 : vector<2x4x1x20xf32> to vector<2x4x20xf32>
    %338 = vector.shape_cast %335 : vector<2x4x20xf32> to vector<2x4x1x20xf32>
    tpu.vector_store %arg13[%c0_396, %c0_397, %c1_398, %c0_399], %338 {strides = array<i32>} : memref<2x4x4x20xf32, #tpu.memory_space<vmem>>, vector<2x4x1x20xf32>,
    %c0_400 = arith.constant 0 : index
    %c0_401 = arith.constant 0 : index
    %c4_402 = arith.constant 4 : index
    %c0_403 = arith.constant 0 : index
    %339 = vector.load %arg12[%c0_400, %c0_401, %c4_402, %c0_403] : memref<2x4x8x20xf32, #tpu.memory_space<vmem>>, vector<2x4x1x20xf32>
    %340 = vector.shape_cast %339 : vector<2x4x1x20xf32> to vector<2x4x20xf32>
    %c0_404 = arith.constant 0 : index
    %c0_405 = arith.constant 0 : index
    %c5_406 = arith.constant 5 : index
    %c0_407 = arith.constant 0 : index
    %341 = vector.load %arg12[%c0_404, %c0_405, %c5_406, %c0_407] : memref<2x4x8x20xf32, #tpu.memory_space<vmem>>, vector<2x4x1x20xf32>
    %342 = vector.shape_cast %341 : vector<2x4x1x20xf32> to vector<2x4x20xf32>
    %343 = arith.maximumf %340, %342 : vector<2x4x20xf32>
    %cst_408 = arith.constant 0.000000e+00 : f32
    %344 = vector.broadcast %cst_408 : f32 to vector<2x4x20xf32>
    %345 = arith.maximumf %343, %344 : vector<2x4x20xf32>
    %c0_409 = arith.constant 0 : index
    %c0_410 = arith.constant 0 : index
    %c2_411 = arith.constant 2 : index
    %c0_412 = arith.constant 0 : index
    %346 = vector.load %arg13[%c0_409, %c0_410, %c2_411, %c0_412] : memref<2x4x4x20xf32, #tpu.memory_space<vmem>>, vector<2x4x1x20xf32>
    %347 = vector.shape_cast %346 : vector<2x4x1x20xf32> to vector<2x4x20xf32>
    %348 = vector.shape_cast %345 : vector<2x4x20xf32> to vector<2x4x1x20xf32>
    tpu.vector_store %arg13[%c0_409, %c0_410, %c2_411, %c0_412], %348 {strides = array<i32>} : memref<2x4x4x20xf32, #tpu.memory_space<vmem>>, vector<2x4x1x20xf32>,
    %c0_413 = arith.constant 0 : index
    %c0_414 = arith.constant 0 : index
    %c6_415 = arith.constant 6 : index
    %c0_416 = arith.constant 0 : index
    %349 = vector.load %arg12[%c0_413, %c0_414, %c6_415, %c0_416] : memref<2x4x8x20xf32, #tpu.memory_space<vmem>>, vector<2x4x1x20xf32>
    %350 = vector.shape_cast %349 : vector<2x4x1x20xf32> to vector<2x4x20xf32>
    %c0_417 = arith.constant 0 : index
    %c0_418 = arith.constant 0 : index
    %c7_419 = arith.constant 7 : index
    %c0_420 = arith.constant 0 : index
    %351 = vector.load %arg12[%c0_417, %c0_418, %c7_419, %c0_420] : memref<2x4x8x20xf32, #tpu.memory_space<vmem>>, vector<2x4x1x20xf32>
    %352 = vector.shape_cast %351 : vector<2x4x1x20xf32> to vector<2x4x20xf32>
    %353 = arith.maximumf %350, %352 : vector<2x4x20xf32>
    %cst_421 = arith.constant 0.000000e+00 : f32
    %354 = vector.broadcast %cst_421 : f32 to vector<2x4x20xf32>
    %355 = arith.maximumf %353, %354 : vector<2x4x20xf32>
    %c0_422 = arith.constant 0 : index
    %c0_423 = arith.constant 0 : index
    %c3_424 = arith.constant 3 : index
    %c0_425 = arith.constant 0 : index
    %356 = vector.load %arg13[%c0_422, %c0_423, %c3_424, %c0_425] : memref<2x4x4x20xf32, #tpu.memory_space<vmem>>, vector<2x4x1x20xf32>
    %357 = vector.shape_cast %356 : vector<2x4x1x20xf32> to vector<2x4x20xf32>
    %358 = vector.shape_cast %355 : vector<2x4x20xf32> to vector<2x4x1x20xf32>
    tpu.vector_store %arg13[%c0_422, %c0_423, %c3_424, %c0_425], %358 {strides = array<i32>} : memref<2x4x4x20xf32, #tpu.memory_space<vmem>>, vector<2x4x1x20xf32>,
    %cst_426 = arith.constant 0.000000e+00 : f32
    %359 = vector.broadcast %cst_426 : f32 to vector<2x50xf32>
    %c0_427 = arith.constant 0 : index
    %c0_428 = arith.constant 0 : index
    %c0_429 = arith.constant 0 : index
    %c0_430 = arith.constant 0 : index
    %360 = vector.load %arg13[%c0_427, %c0_428, %c0_429, %c0_430] : memref<2x4x4x20xf32, #tpu.memory_space<vmem>>, vector<2x1x1x20xf32>
    %361 = vector.shape_cast %360 : vector<2x1x1x20xf32> to vector<2x20xf32>
    %362 = arith.truncf %361 : vector<2x20xf32> to vector<2x20xbf16>
    %c0_431 = arith.constant 0 : index
    %c0_432 = arith.constant 0 : index
    %c0_433 = arith.constant 0 : index
    %c0_434 = arith.constant 0 : index
    %363 = vector.load %arg5[%c0_431, %c0_432, %c0_433, %c0_434] : memref<4x4x20x50xbf16, #tpu.memory_space<vmem>>, vector<1x1x20x50xbf16>
    %364 = vector.shape_cast %363 : vector<1x1x20x50xbf16> to vector<20x50xbf16>
    %cst_435 = arith.constant dense<0.000000e+00> : vector<2x50xf32>
    %365 = tpu.matmul %362, %364, %cst_435 {dimension_numbers = #tpu.dot_dimension_numbers<[1], [0], [0], [1], [0, 0, 1, 1], [], []>} : vector<2x20xbf16>, vector<20x50xbf16>, vector<2x50xf32> -> vector<2x50xf32>
    %366 = arith.addf %359, %365 : vector<2x50xf32>
    %c0_436 = arith.constant 0 : index
    %c0_437 = arith.constant 0 : index
    %c1_438 = arith.constant 1 : index
    %c0_439 = arith.constant 0 : index
    %367 = vector.load %arg13[%c0_436, %c0_437, %c1_438, %c0_439] : memref<2x4x4x20xf32, #tpu.memory_space<vmem>>, vector<2x1x1x20xf32>
    %368 = vector.shape_cast %367 : vector<2x1x1x20xf32> to vector<2x20xf32>
    %369 = arith.truncf %368 : vector<2x20xf32> to vector<2x20xbf16>
    %c0_440 = arith.constant 0 : index
    %c1_441 = arith.constant 1 : index
    %c0_442 = arith.constant 0 : index
    %c0_443 = arith.constant 0 : index
    %370 = vector.load %arg5[%c0_440, %c1_441, %c0_442, %c0_443] : memref<4x4x20x50xbf16, #tpu.memory_space<vmem>>, vector<1x1x20x50xbf16>
    %371 = vector.shape_cast %370 : vector<1x1x20x50xbf16> to vector<20x50xbf16>
    %cst_444 = arith.constant dense<0.000000e+00> : vector<2x50xf32>
    %372 = tpu.matmul %369, %371, %cst_444 {dimension_numbers = #tpu.dot_dimension_numbers<[1], [0], [0], [1], [0, 0, 1, 1], [], []>} : vector<2x20xbf16>, vector<20x50xbf16>, vector<2x50xf32> -> vector<2x50xf32>
    %373 = arith.addf %366, %372 : vector<2x50xf32>
    %c0_445 = arith.constant 0 : index
    %c0_446 = arith.constant 0 : index
    %c2_447 = arith.constant 2 : index
    %c0_448 = arith.constant 0 : index
    %374 = vector.load %arg13[%c0_445, %c0_446, %c2_447, %c0_448] : memref<2x4x4x20xf32, #tpu.memory_space<vmem>>, vector<2x1x1x20xf32>
    %375 = vector.shape_cast %374 : vector<2x1x1x20xf32> to vector<2x20xf32>
    %376 = arith.truncf %375 : vector<2x20xf32> to vector<2x20xbf16>
    %c0_449 = arith.constant 0 : index
    %c2_450 = arith.constant 2 : index
    %c0_451 = arith.constant 0 : index
    %c0_452 = arith.constant 0 : index
    %377 = vector.load %arg5[%c0_449, %c2_450, %c0_451, %c0_452] : memref<4x4x20x50xbf16, #tpu.memory_space<vmem>>, vector<1x1x20x50xbf16>
    %378 = vector.shape_cast %377 : vector<1x1x20x50xbf16> to vector<20x50xbf16>
    %cst_453 = arith.constant dense<0.000000e+00> : vector<2x50xf32>
    %379 = tpu.matmul %376, %378, %cst_453 {dimension_numbers = #tpu.dot_dimension_numbers<[1], [0], [0], [1], [0, 0, 1, 1], [], []>} : vector<2x20xbf16>, vector<20x50xbf16>, vector<2x50xf32> -> vector<2x50xf32>
    %380 = arith.addf %373, %379 : vector<2x50xf32>
    %c0_454 = arith.constant 0 : index
    %c0_455 = arith.constant 0 : index
    %c3_456 = arith.constant 3 : index
    %c0_457 = arith.constant 0 : index
    %381 = vector.load %arg13[%c0_454, %c0_455, %c3_456, %c0_457] : memref<2x4x4x20xf32, #tpu.memory_space<vmem>>, vector<2x1x1x20xf32>
    %382 = vector.shape_cast %381 : vector<2x1x1x20xf32> to vector<2x20xf32>
    %383 = arith.truncf %382 : vector<2x20xf32> to vector<2x20xbf16>
    %c0_458 = arith.constant 0 : index
    %c3_459 = arith.constant 3 : index
    %c0_460 = arith.constant 0 : index
    %c0_461 = arith.constant 0 : index
    %384 = vector.load %arg5[%c0_458, %c3_459, %c0_460, %c0_461] : memref<4x4x20x50xbf16, #tpu.memory_space<vmem>>, vector<1x1x20x50xbf16>
    %385 = vector.shape_cast %384 : vector<1x1x20x50xbf16> to vector<20x50xbf16>
    %cst_462 = arith.constant dense<0.000000e+00> : vector<2x50xf32>
    %386 = tpu.matmul %383, %385, %cst_462 {dimension_numbers = #tpu.dot_dimension_numbers<[1], [0], [0], [1], [0, 0, 1, 1], [], []>} : vector<2x20xbf16>, vector<20x50xbf16>, vector<2x50xf32> -> vector<2x50xf32>
    %387 = arith.addf %380, %386 : vector<2x50xf32>
    %c0_463 = arith.constant 0 : index
    %c1_464 = arith.constant 1 : index
    %c0_465 = arith.constant 0 : index
    %c0_466 = arith.constant 0 : index
    %388 = vector.load %arg13[%c0_463, %c1_464, %c0_465, %c0_466] : memref<2x4x4x20xf32, #tpu.memory_space<vmem>>, vector<2x1x1x20xf32>
    %389 = vector.shape_cast %388 : vector<2x1x1x20xf32> to vector<2x20xf32>
    %390 = arith.truncf %389 : vector<2x20xf32> to vector<2x20xbf16>
    %c1_467 = arith.constant 1 : index
    %c0_468 = arith.constant 0 : index
    %c0_469 = arith.constant 0 : index
    %c0_470 = arith.constant 0 : index
    %391 = vector.load %arg5[%c1_467, %c0_468, %c0_469, %c0_470] : memref<4x4x20x50xbf16, #tpu.memory_space<vmem>>, vector<1x1x20x50xbf16>
    %392 = vector.shape_cast %391 : vector<1x1x20x50xbf16> to vector<20x50xbf16>
    %cst_471 = arith.constant dense<0.000000e+00> : vector<2x50xf32>
    %393 = tpu.matmul %390, %392, %cst_471 {dimension_numbers = #tpu.dot_dimension_numbers<[1], [0], [0], [1], [0, 0, 1, 1], [], []>} : vector<2x20xbf16>, vector<20x50xbf16>, vector<2x50xf32> -> vector<2x50xf32>
    %394 = arith.addf %387, %393 : vector<2x50xf32>
    %c0_472 = arith.constant 0 : index
    %c1_473 = arith.constant 1 : index
    %c1_474 = arith.constant 1 : index
    %c0_475 = arith.constant 0 : index
    %395 = vector.load %arg13[%c0_472, %c1_473, %c1_474, %c0_475] : memref<2x4x4x20xf32, #tpu.memory_space<vmem>>, vector<2x1x1x20xf32>
    %396 = vector.shape_cast %395 : vector<2x1x1x20xf32> to vector<2x20xf32>
    %397 = arith.truncf %396 : vector<2x20xf32> to vector<2x20xbf16>
    %c1_476 = arith.constant 1 : index
    %c1_477 = arith.constant 1 : index
    %c0_478 = arith.constant 0 : index
    %c0_479 = arith.constant 0 : index
    %398 = vector.load %arg5[%c1_476, %c1_477, %c0_478, %c0_479] : memref<4x4x20x50xbf16, #tpu.memory_space<vmem>>, vector<1x1x20x50xbf16>
    %399 = vector.shape_cast %398 : vector<1x1x20x50xbf16> to vector<20x50xbf16>
    %cst_480 = arith.constant dense<0.000000e+00> : vector<2x50xf32>
    %400 = tpu.matmul %397, %399, %cst_480 {dimension_numbers = #tpu.dot_dimension_numbers<[1], [0], [0], [1], [0, 0, 1, 1], [], []>} : vector<2x20xbf16>, vector<20x50xbf16>, vector<2x50xf32> -> vector<2x50xf32>
    %401 = arith.addf %394, %400 : vector<2x50xf32>
    %c0_481 = arith.constant 0 : index
    %c1_482 = arith.constant 1 : index
    %c2_483 = arith.constant 2 : index
    %c0_484 = arith.constant 0 : index
    %402 = vector.load %arg13[%c0_481, %c1_482, %c2_483, %c0_484] : memref<2x4x4x20xf32, #tpu.memory_space<vmem>>, vector<2x1x1x20xf32>
    %403 = vector.shape_cast %402 : vector<2x1x1x20xf32> to vector<2x20xf32>
    %404 = arith.truncf %403 : vector<2x20xf32> to vector<2x20xbf16>
    %c1_485 = arith.constant 1 : index
    %c2_486 = arith.constant 2 : index
    %c0_487 = arith.constant 0 : index
    %c0_488 = arith.constant 0 : index
    %405 = vector.load %arg5[%c1_485, %c2_486, %c0_487, %c0_488] : memref<4x4x20x50xbf16, #tpu.memory_space<vmem>>, vector<1x1x20x50xbf16>
    %406 = vector.shape_cast %405 : vector<1x1x20x50xbf16> to vector<20x50xbf16>
    %cst_489 = arith.constant dense<0.000000e+00> : vector<2x50xf32>
    %407 = tpu.matmul %404, %406, %cst_489 {dimension_numbers = #tpu.dot_dimension_numbers<[1], [0], [0], [1], [0, 0, 1, 1], [], []>} : vector<2x20xbf16>, vector<20x50xbf16>, vector<2x50xf32> -> vector<2x50xf32>
    %408 = arith.addf %401, %407 : vector<2x50xf32>
    %c0_490 = arith.constant 0 : index
    %c1_491 = arith.constant 1 : index
    %c3_492 = arith.constant 3 : index
    %c0_493 = arith.constant 0 : index
    %409 = vector.load %arg13[%c0_490, %c1_491, %c3_492, %c0_493] : memref<2x4x4x20xf32, #tpu.memory_space<vmem>>, vector<2x1x1x20xf32>
    %410 = vector.shape_cast %409 : vector<2x1x1x20xf32> to vector<2x20xf32>
    %411 = arith.truncf %410 : vector<2x20xf32> to vector<2x20xbf16>
    %c1_494 = arith.constant 1 : index
    %c3_495 = arith.constant 3 : index
    %c0_496 = arith.constant 0 : index
    %c0_497 = arith.constant 0 : index
    %412 = vector.load %arg5[%c1_494, %c3_495, %c0_496, %c0_497] : memref<4x4x20x50xbf16, #tpu.memory_space<vmem>>, vector<1x1x20x50xbf16>
    %413 = vector.shape_cast %412 : vector<1x1x20x50xbf16> to vector<20x50xbf16>
    %cst_498 = arith.constant dense<0.000000e+00> : vector<2x50xf32>
    %414 = tpu.matmul %411, %413, %cst_498 {dimension_numbers = #tpu.dot_dimension_numbers<[1], [0], [0], [1], [0, 0, 1, 1], [], []>} : vector<2x20xbf16>, vector<20x50xbf16>, vector<2x50xf32> -> vector<2x50xf32>
    %415 = arith.addf %408, %414 : vector<2x50xf32>
    %c0_499 = arith.constant 0 : index
    %c2_500 = arith.constant 2 : index
    %c0_501 = arith.constant 0 : index
    %c0_502 = arith.constant 0 : index
    %416 = vector.load %arg13[%c0_499, %c2_500, %c0_501, %c0_502] : memref<2x4x4x20xf32, #tpu.memory_space<vmem>>, vector<2x1x1x20xf32>
    %417 = vector.shape_cast %416 : vector<2x1x1x20xf32> to vector<2x20xf32>
    %418 = arith.truncf %417 : vector<2x20xf32> to vector<2x20xbf16>
    %c2_503 = arith.constant 2 : index
    %c0_504 = arith.constant 0 : index
    %c0_505 = arith.constant 0 : index
    %c0_506 = arith.constant 0 : index
    %419 = vector.load %arg5[%c2_503, %c0_504, %c0_505, %c0_506] : memref<4x4x20x50xbf16, #tpu.memory_space<vmem>>, vector<1x1x20x50xbf16>
    %420 = vector.shape_cast %419 : vector<1x1x20x50xbf16> to vector<20x50xbf16>
    %cst_507 = arith.constant dense<0.000000e+00> : vector<2x50xf32>
    %421 = tpu.matmul %418, %420, %cst_507 {dimension_numbers = #tpu.dot_dimension_numbers<[1], [0], [0], [1], [0, 0, 1, 1], [], []>} : vector<2x20xbf16>, vector<20x50xbf16>, vector<2x50xf32> -> vector<2x50xf32>
    %422 = arith.addf %415, %421 : vector<2x50xf32>
    %c0_508 = arith.constant 0 : index
    %c2_509 = arith.constant 2 : index
    %c1_510 = arith.constant 1 : index
    %c0_511 = arith.constant 0 : index
    %423 = vector.load %arg13[%c0_508, %c2_509, %c1_510, %c0_511] : memref<2x4x4x20xf32, #tpu.memory_space<vmem>>, vector<2x1x1x20xf32>
    %424 = vector.shape_cast %423 : vector<2x1x1x20xf32> to vector<2x20xf32>
    %425 = arith.truncf %424 : vector<2x20xf32> to vector<2x20xbf16>
    %c2_512 = arith.constant 2 : index
    %c1_513 = arith.constant 1 : index
    %c0_514 = arith.constant 0 : index
    %c0_515 = arith.constant 0 : index
    %426 = vector.load %arg5[%c2_512, %c1_513, %c0_514, %c0_515] : memref<4x4x20x50xbf16, #tpu.memory_space<vmem>>, vector<1x1x20x50xbf16>
    %427 = vector.shape_cast %426 : vector<1x1x20x50xbf16> to vector<20x50xbf16>
    %cst_516 = arith.constant dense<0.000000e+00> : vector<2x50xf32>
    %428 = tpu.matmul %425, %427, %cst_516 {dimension_numbers = #tpu.dot_dimension_numbers<[1], [0], [0], [1], [0, 0, 1, 1], [], []>} : vector<2x20xbf16>, vector<20x50xbf16>, vector<2x50xf32> -> vector<2x50xf32>
    %429 = arith.addf %422, %428 : vector<2x50xf32>
    %c0_517 = arith.constant 0 : index
    %c2_518 = arith.constant 2 : index
    %c2_519 = arith.constant 2 : index
    %c0_520 = arith.constant 0 : index
    %430 = vector.load %arg13[%c0_517, %c2_518, %c2_519, %c0_520] : memref<2x4x4x20xf32, #tpu.memory_space<vmem>>, vector<2x1x1x20xf32>
    %431 = vector.shape_cast %430 : vector<2x1x1x20xf32> to vector<2x20xf32>
    %432 = arith.truncf %431 : vector<2x20xf32> to vector<2x20xbf16>
    %c2_521 = arith.constant 2 : index
    %c2_522 = arith.constant 2 : index
    %c0_523 = arith.constant 0 : index
    %c0_524 = arith.constant 0 : index
    %433 = vector.load %arg5[%c2_521, %c2_522, %c0_523, %c0_524] : memref<4x4x20x50xbf16, #tpu.memory_space<vmem>>, vector<1x1x20x50xbf16>
    %434 = vector.shape_cast %433 : vector<1x1x20x50xbf16> to vector<20x50xbf16>
    %cst_525 = arith.constant dense<0.000000e+00> : vector<2x50xf32>
    %435 = tpu.matmul %432, %434, %cst_525 {dimension_numbers = #tpu.dot_dimension_numbers<[1], [0], [0], [1], [0, 0, 1, 1], [], []>} : vector<2x20xbf16>, vector<20x50xbf16>, vector<2x50xf32> -> vector<2x50xf32>
    %436 = arith.addf %429, %435 : vector<2x50xf32>
    %c0_526 = arith.constant 0 : index
    %c2_527 = arith.constant 2 : index
    %c3_528 = arith.constant 3 : index
    %c0_529 = arith.constant 0 : index
    %437 = vector.load %arg13[%c0_526, %c2_527, %c3_528, %c0_529] : memref<2x4x4x20xf32, #tpu.memory_space<vmem>>, vector<2x1x1x20xf32>
    %438 = vector.shape_cast %437 : vector<2x1x1x20xf32> to vector<2x20xf32>
    %439 = arith.truncf %438 : vector<2x20xf32> to vector<2x20xbf16>
    %c2_530 = arith.constant 2 : index
    %c3_531 = arith.constant 3 : index
    %c0_532 = arith.constant 0 : index
    %c0_533 = arith.constant 0 : index
    %440 = vector.load %arg5[%c2_530, %c3_531, %c0_532, %c0_533] : memref<4x4x20x50xbf16, #tpu.memory_space<vmem>>, vector<1x1x20x50xbf16>
    %441 = vector.shape_cast %440 : vector<1x1x20x50xbf16> to vector<20x50xbf16>
    %cst_534 = arith.constant dense<0.000000e+00> : vector<2x50xf32>
    %442 = tpu.matmul %439, %441, %cst_534 {dimension_numbers = #tpu.dot_dimension_numbers<[1], [0], [0], [1], [0, 0, 1, 1], [], []>} : vector<2x20xbf16>, vector<20x50xbf16>, vector<2x50xf32> -> vector<2x50xf32>
    %443 = arith.addf %436, %442 : vector<2x50xf32>
    %c0_535 = arith.constant 0 : index
    %c3_536 = arith.constant 3 : index
    %c0_537 = arith.constant 0 : index
    %c0_538 = arith.constant 0 : index
    %444 = vector.load %arg13[%c0_535, %c3_536, %c0_537, %c0_538] : memref<2x4x4x20xf32, #tpu.memory_space<vmem>>, vector<2x1x1x20xf32>
    %445 = vector.shape_cast %444 : vector<2x1x1x20xf32> to vector<2x20xf32>
    %446 = arith.truncf %445 : vector<2x20xf32> to vector<2x20xbf16>
    %c3_539 = arith.constant 3 : index
    %c0_540 = arith.constant 0 : index
    %c0_541 = arith.constant 0 : index
    %c0_542 = arith.constant 0 : index
    %447 = vector.load %arg5[%c3_539, %c0_540, %c0_541, %c0_542] : memref<4x4x20x50xbf16, #tpu.memory_space<vmem>>, vector<1x1x20x50xbf16>
    %448 = vector.shape_cast %447 : vector<1x1x20x50xbf16> to vector<20x50xbf16>
    %cst_543 = arith.constant dense<0.000000e+00> : vector<2x50xf32>
    %449 = tpu.matmul %446, %448, %cst_543 {dimension_numbers = #tpu.dot_dimension_numbers<[1], [0], [0], [1], [0, 0, 1, 1], [], []>} : vector<2x20xbf16>, vector<20x50xbf16>, vector<2x50xf32> -> vector<2x50xf32>
    %450 = arith.addf %443, %449 : vector<2x50xf32>
    %c0_544 = arith.constant 0 : index
    %c3_545 = arith.constant 3 : index
    %c1_546 = arith.constant 1 : index
    %c0_547 = arith.constant 0 : index
    %451 = vector.load %arg13[%c0_544, %c3_545, %c1_546, %c0_547] : memref<2x4x4x20xf32, #tpu.memory_space<vmem>>, vector<2x1x1x20xf32>
    %452 = vector.shape_cast %451 : vector<2x1x1x20xf32> to vector<2x20xf32>
    %453 = arith.truncf %452 : vector<2x20xf32> to vector<2x20xbf16>
    %c3_548 = arith.constant 3 : index
    %c1_549 = arith.constant 1 : index
    %c0_550 = arith.constant 0 : index
    %c0_551 = arith.constant 0 : index
    %454 = vector.load %arg5[%c3_548, %c1_549, %c0_550, %c0_551] : memref<4x4x20x50xbf16, #tpu.memory_space<vmem>>, vector<1x1x20x50xbf16>
    %455 = vector.shape_cast %454 : vector<1x1x20x50xbf16> to vector<20x50xbf16>
    %cst_552 = arith.constant dense<0.000000e+00> : vector<2x50xf32>
    %456 = tpu.matmul %453, %455, %cst_552 {dimension_numbers = #tpu.dot_dimension_numbers<[1], [0], [0], [1], [0, 0, 1, 1], [], []>} : vector<2x20xbf16>, vector<20x50xbf16>, vector<2x50xf32> -> vector<2x50xf32>
    %457 = arith.addf %450, %456 : vector<2x50xf32>
    %c0_553 = arith.constant 0 : index
    %c3_554 = arith.constant 3 : index
    %c2_555 = arith.constant 2 : index
    %c0_556 = arith.constant 0 : index
    %458 = vector.load %arg13[%c0_553, %c3_554, %c2_555, %c0_556] : memref<2x4x4x20xf32, #tpu.memory_space<vmem>>, vector<2x1x1x20xf32>
    %459 = vector.shape_cast %458 : vector<2x1x1x20xf32> to vector<2x20xf32>
    %460 = arith.truncf %459 : vector<2x20xf32> to vector<2x20xbf16>
    %c3_557 = arith.constant 3 : index
    %c2_558 = arith.constant 2 : index
    %c0_559 = arith.constant 0 : index
    %c0_560 = arith.constant 0 : index
    %461 = vector.load %arg5[%c3_557, %c2_558, %c0_559, %c0_560] : memref<4x4x20x50xbf16, #tpu.memory_space<vmem>>, vector<1x1x20x50xbf16>
    %462 = vector.shape_cast %461 : vector<1x1x20x50xbf16> to vector<20x50xbf16>
    %cst_561 = arith.constant dense<0.000000e+00> : vector<2x50xf32>
    %463 = tpu.matmul %460, %462, %cst_561 {dimension_numbers = #tpu.dot_dimension_numbers<[1], [0], [0], [1], [0, 0, 1, 1], [], []>} : vector<2x20xbf16>, vector<20x50xbf16>, vector<2x50xf32> -> vector<2x50xf32>
    %464 = arith.addf %457, %463 : vector<2x50xf32>
    %c0_562 = arith.constant 0 : index
    %c3_563 = arith.constant 3 : index
    %c3_564 = arith.constant 3 : index
    %c0_565 = arith.constant 0 : index
    %465 = vector.load %arg13[%c0_562, %c3_563, %c3_564, %c0_565] : memref<2x4x4x20xf32, #tpu.memory_space<vmem>>, vector<2x1x1x20xf32>
    %466 = vector.shape_cast %465 : vector<2x1x1x20xf32> to vector<2x20xf32>
    %467 = arith.truncf %466 : vector<2x20xf32> to vector<2x20xbf16>
    %c3_566 = arith.constant 3 : index
    %c3_567 = arith.constant 3 : index
    %c0_568 = arith.constant 0 : index
    %c0_569 = arith.constant 0 : index
    %468 = vector.load %arg5[%c3_566, %c3_567, %c0_568, %c0_569] : memref<4x4x20x50xbf16, #tpu.memory_space<vmem>>, vector<1x1x20x50xbf16>
    %469 = vector.shape_cast %468 : vector<1x1x20x50xbf16> to vector<20x50xbf16>
    %cst_570 = arith.constant dense<0.000000e+00> : vector<2x50xf32>
    %470 = tpu.matmul %467, %469, %cst_570 {dimension_numbers = #tpu.dot_dimension_numbers<[1], [0], [0], [1], [0, 0, 1, 1], [], []>} : vector<2x20xbf16>, vector<20x50xbf16>, vector<2x50xf32> -> vector<2x50xf32>
    %471 = arith.addf %464, %470 : vector<2x50xf32>
    %c0_571 = arith.constant 0 : index
    %c0_572 = arith.constant 0 : index
    %472 = vector.load %arg6[%c0_571, %c0_572] : memref<1x50xf32, #tpu.memory_space<vmem>>, vector<1x50xf32>
    %473 = vector.broadcast %472 : vector<1x50xf32> to vector<2x50xf32>
    %474 = arith.addf %471, %473 : vector<2x50xf32>
    %cst_573 = arith.constant 0.000000e+00 : f32
    %475 = vector.broadcast %cst_573 : f32 to vector<2x50xf32>
    %476 = arith.maximumf %474, %475 : vector<2x50xf32>
    %477 = arith.truncf %476 : vector<2x50xf32> to vector<2x50xbf16>
    %c0_574 = arith.constant 0 : index
    %c0_575 = arith.constant 0 : index
    %478 = vector.load %arg7[%c0_574, %c0_575] : memref<50x10xbf16, #tpu.memory_space<vmem>>, vector<50x10xbf16>
    %cst_576 = arith.constant dense<0.000000e+00> : vector<2x10xf32>
    %479 = tpu.matmul %477, %478, %cst_576 {dimension_numbers = #tpu.dot_dimension_numbers<[1], [0], [0], [1], [0, 0, 1, 1], [], []>} : vector<2x50xbf16>, vector<50x10xbf16>, vector<2x10xf32> -> vector<2x10xf32>
    %c0_577 = arith.constant 0 : index
    %c0_578 = arith.constant 0 : index
    %480 = vector.load %arg8[%c0_577, %c0_578] : memref<1x10xf32, #tpu.memory_space<vmem>>, vector<1x10xf32>
    %481 = vector.broadcast %480 : vector<1x10xf32> to vector<2x10xf32>
    %482 = arith.addf %479, %481 : vector<2x10xf32>
    %c0_579 = arith.constant 0 : index
    %c0_580 = arith.constant 0 : index
    %483 = vector.load %arg9[%c0_579, %c0_580] : memref<2x10xf32, #tpu.memory_space<vmem>>, vector<2x10xf32>
    tpu.vector_store %arg9[%c0_579, %c0_580], %482 {strides = array<i32>} : memref<2x10xf32, #tpu.memory_space<vmem>>, vector<2x10xf32>,
    return
  }
}

</mosaic_0001>

<bundles_post_ra>
// kernel: lenet5_forward.1
= control target key start
LH: loop header
LB: loop body
LE: loop exit
PB: predicated region body
PF: predicated region fallthrough
CT: control target
= control target key end

     0   :  { %s10377_s0 = inlined_call_operand.vmem [shape: bf16[1152,32], index: 0, kind: input, shape index: {}]   ;;  %s10378_s1 = inlined_call_operand.vmem [shape: bf16[32,10], index: 1, kind: input, shape index: {}]   ;;  %s10379_s2 = inlined_call_operand.vmem [shape: f32[1,10], index: 2, kind: input, shape index: {}]   ;;  %s10380_s3 = inlined_call_operand.vmem [shape: bf16[5,5,10,20], index: 3, kind: input, shape index: {}]   ;;  %s10381_s4 = inlined_call_operand.vmem [shape: f32[1,20], index: 4, kind: input, shape index: {}]   ;;  %s10382_s5 = inlined_call_operand.vmem [shape: bf16[4,4,20,50], index: 5, kind: input, shape index: {}]   ;;  %s10383_s6 = inlined_call_operand.vmem [shape: f32[1,50], index: 6, kind: input, shape index: {}]   ;;  %s10384_s7 = inlined_call_operand.vmem [shape: bf16[50,10], index: 7, kind: input, shape index: {}]   ;;  %s10385_s8 = inlined_call_operand.vmem [shape: f32[1,10], index: 8, kind: input, shape index: {}]   ;;  %s10386_s9 = inlined_call_operand.hbm [shape: f32[2,10], index: 9, kind: output, shape index: {}]  }
   0x1   :  { %v7711_v0 = vld [vmem:[%s10378_s1 + $0x8] sm:$0xff]  ;;  %v7710_v1 = vld [vmem:[%s10378_s1] sm:$0xff] }
   0x2   :  { %781 = vmatpush.bf16.msra.mxu0 %v7711_v0 }
   0x3   :  { %14 = vsyncpa [#allocation7], 0  ;;  %v7638_v2 = vld [vmem:[%s10377_s0] sm:$0xff]  ;;  %vm558_vm0 = vcmask 261120   ;;  %v7639_v3 = vld [vmem:[%s10377_s0 + $0x8] sm:$0xff]  ;;  %vm1216_vm1 = vcmask 80896  }
   0x4   :  { %v7640_v4 = vld [vmem:[%s10377_s0 + $0x10] sm:$0xff]  ;;  %v7641_v5 = vld [vmem:[%s10377_s0 + $0x18] sm:$0xff]  ;;  %v7642_v6 = vld [vmem:[%s10377_s0 + $0x20] sm:$0xff]  ;;  %vm1385_vm2 = vcmask 73728   ;;  %vm2812_vm3 = vcmask 1044480   ;;  %vm6035_vm4 = vcmask 1041408  }
   0x5   :  { %v7643_v7 = vld [vmem:[%s10377_s0 + $0x28] sm:$0xff]  ;;  %v7644_v8 = vld [vmem:[%s10377_s0 + $0x30] sm:$0xff]  ;;  %v7645_v9 = vld [vmem:[%s10377_s0 + $0x38] sm:$0xff]  ;;  %vm5830_vm5 = vcmask 162816   ;;  %vm5871_vm6 = vcmask 155648   ;;  %vm6020_vm7 = vcmask 1041409  }
   0x6   :  { %782 = vmatpush.bf16.msra.mxu0 %v7710_v1  ;;  %v7646_v10 = vld [vmem:[%s10377_s0 + $0x40] sm:$0xff]  ;;  %v7647_v13 = vld [vmem:[%s10377_s0 + $0x48] sm:$0xff]  ;;  %v7648_v20 = vld [vmem:[%s10377_s0 + $0x50] sm:$0xff]  ;;  %vm6749_vm8 = vcmask 1040384   ;;  %vm6745_vm9 = vcmask 408576   ;;  %s7858_s21 = smov [#allocation6]  }
   0x7   :  { %v7958_v15 = vld [vmem:[%s10379_s2] ss:$0 sm:$0xff]  ;;  %v7649_v56 = vld [vmem:[%s10377_s0 + $0x58] sm:$0xff]  ;;  %s6773_s22 = sshll.u32 %s7858_s21, 4  ;;  %s6775_s23 = sshll.u32 %s10386_s9, 4  ;;  %vm6766_vm10 = vcmask 74752   ;;  %s6774_s22 = int_to_ptr.vmem [resolvable:$true] %s6773_s22  ;;  %s6776_s23 = int_to_ptr.hbm [resolvable:$true] %s6775_s23 }
   0x9   :  { %7080 = vmatmul.msk.bf16.vlgmr.msra.gmra.mxu0 %vm558_vm0, %v7638_v2 }
  0x19   :  { %7081 = vmatmul.msk.bf16.gmra.mxu0 %vm558_vm0, %v7639_v3 }
  0x29   :  { %7082 = vmatmul.msk.bf16.gmra.mxu0 %vm558_vm0, %v7640_v4 }
  0x39   :  { %7083 = vmatmul.msk.bf16.gmra.mxu0 %vm558_vm0, %v7641_v5 }
  0x49   :  { %7084 = vmatmul.msk.bf16.gmra.mxu0 %vm558_vm0, %v7642_v6 }
  0x59   :  { %7085 = vmatmul.msk.bf16.gmra.mxu0 %vm558_vm0, %v7643_v7 }
  0x69   :  { %7086 = vmatmul.msk.bf16.gmra.mxu0 %vm558_vm0, %v7644_v8 }
  0x79   :  { %7087 = vmatmul.msk.bf16.gmra.mxu0 %vm558_vm0, %v7645_v9 }
  0x86   :  { %v784_v11 = vpop.f32.mrf.mxu0 }
  0x87   :  { %v785_v17 = vadd.f32 %v7958_v15, %v784_v11 }
  0x89   :  { %7088 = vmatmul.msk.bf16.gmra.mxu0 %vm558_vm0, %v7646_v10 }
  0x8e   :  { %v786_v12 = vpop.f32.mrf.mxu0 }
  0x8f   :  { %v787_v22 = vadd.f32 %v7958_v15, %v786_v12 }
  0x96   :  { %v789_v14 = vpop.f32.mrf.mxu0 }
  0x97   :  { %v790_v41 = vadd.f32 %v7958_v15, %v789_v14 }
  0x99   :  { %7089 = vmatmul.msk.bf16.gmra.mxu0 %vm558_vm0, %v7647_v13 }
  0x9e   :  { %v791_v16 = vpop.f32.mrf.mxu0 }
  0x9f   :  { %v792_v18 = vadd.f32 %v7958_v15, %v791_v16 }
  0xa1   :  { %v1144_v19 = vmax.f32 %v785_v17, %v792_v18  ;;  %v7650_v17 = vld [vmem:[%s10377_s0 + $0x60] sm:$0xff] }
  0xa3   :  { %1217 = vst.msk [vmem:[#allocation2] sm:$0xff] %vm1216_vm1, %v1144_v19 }
  0xa6   :  { %v794_v21 = vpop.f32.mrf.mxu0 }
  0xa7   :  { %v795_v23 = vadd.f32 %v7958_v15, %v794_v21  ;;  %v7712_v21 = vld [vmem:[%s10380_s3] sm:$0x10] }
  0xa9   :  { %v1145_v24 = vmax.f32 %v787_v22, %v795_v23  ;;  %7090 = vmatmul.msk.bf16.gmra.mxu0 %vm558_vm0, %v7648_v20  ;;  %v7168_v20 = vld [vmem:[%s10380_s3] sm:$0xf] }
  0xaa   :  { %v1289_v25 = vld [vmem:[#allocation2] sm:$0x1]  ;;  %v1313_v26 = vld [vmem:[#allocation2 + $0x1] sm:$0x1]  ;;  %v1410_v27 = vld [vmem:[#allocation2 + $0x2] sm:$0x1] }
  0xab   :  { %v1337_v28 = vmax.f32 %v1289_v25, %v1313_v26  ;;  %v1434_v29 = vld [vmem:[#allocation2 + $0x3] sm:$0x1]  ;;  %v1530_v30 = vld [vmem:[#allocation2 + $0x4] sm:$0x1]  ;;  %v1554_v31 = vld [vmem:[#allocation2 + $0x5] sm:$0x1] }
  0xac   :  { %v1458_v32 = vmax.f32 %v1410_v27, %v1434_v29  ;;  %v1578_v33 = vmax.f32 %v1530_v30, %v1554_v31  ;;  %v1650_v34 = vld [vmem:[#allocation2 + $0x6] sm:$0x1]  ;;  %v1674_v35 = vld [vmem:[#allocation2 + $0x7] sm:$0x1]  ;;  %1218 = vst.msk [vmem:[#allocation2 + $0x8] sm:$0xff] %vm1216_vm1, %v1145_v24  ;;  %v7169_v24 = vor.u32 %v7712_v21, %v7168_v20  ;;  %v7651_v27 = vld [vmem:[%s10377_s0 + $0x68] sm:$0xff] }
  0xad   :  { %v1698_v36 = vmax.f32 %v1650_v34, %v1674_v35  ;;  %v1361_v37 = vmax.f32 %v1337_v28, 0.0  ;;  %v7156_v29 = vld [vmem:[%s10380_s3 + $0x8] sm:$0xf]  ;;  %v7713_v30 = vld [vmem:[%s10380_s3 + $0x8] sm:$0x10] }
  0xae   :  { %v796_v38 = vpop.f32.mrf.mxu0  ;;  %v1482_v39 = vmax.f32 %v1458_v32, 0.0  ;;  %v1602_v40 = vmax.f32 %v1578_v33, 0.0  ;;  %v2895_v26 = vsel %vm2812_vm3, %v7169_v24, 0  ;;  %v7182_v31 = vld [vmem:[%s10380_s3 + $0x10] sm:$0xf]  ;;  %v7157_v34 = vor.u32 %v7713_v30, %v7156_v29 }
  0xaf   :  { %v797_v42 = vadd.f32 %v7958_v15, %v796_v38  ;;  %1386 = vst.msk [vmem:[#allocation3] sm:$0x1] %vm1385_vm2, %v1361_v37  ;;  %v1722_v43 = vmax.f32 %v1698_v36, 0.0  ;;  %2904 = vmatpush.bf16.msra.mxu2 %v2895_v26  ;;  %v7714_v35 = vld [vmem:[%s10380_s3 + $0x10] sm:$0x10] }
  0xb0   :  { %1506 = vst.msk [vmem:[#allocation3 + $0x1] sm:$0x1] %vm1385_vm2, %v1482_v39  ;;  %v7183_v36 = vor.u32 %v7714_v35, %v7182_v31  ;;  %v2814_v38 = vsel %vm2812_vm3, %v7157_v34, 0  ;;  %v7653_v35 = vld [vmem:[%s10377_s0 + $0x78] sm:$0xff] }
  0xb1   :  { %v1146_v44 = vmax.f32 %v790_v41, %v797_v42  ;;  %1626 = vst.msk [vmem:[#allocation3 + $0x2] sm:$0x1] %vm1385_vm2, %v1602_v40  ;;  %2823 = vmatpush.bf16.msra.mxu1 %v2814_v38 }
  0xb2   :  { %1746 = vst.msk [vmem:[#allocation3 + $0x3] sm:$0x1] %vm1385_vm2, %v1722_v43 }
  0xb3   :  { %v1770_v45 = vld [vmem:[#allocation2 + $0x8] sm:$0x1]  ;;  %v1794_v46 = vld [vmem:[#allocation2 + $0x9] sm:$0x1]  ;;  %v1890_v47 = vld [vmem:[#allocation2 + $0xa] sm:$0x1] }
  0xb4   :  { %v1818_v48 = vmax.f32 %v1770_v45, %v1794_v46  ;;  %v1914_v49 = vld [vmem:[#allocation2 + $0xb] sm:$0x1]  ;;  %v2010_v50 = vld [vmem:[#allocation2 + $0xc] sm:$0x1]  ;;  %v2034_v51 = vld [vmem:[#allocation2 + $0xd] sm:$0x1] }
  0xb5   :  { %v1938_v52 = vmax.f32 %v1890_v47, %v1914_v49  ;;  %v2058_v53 = vmax.f32 %v2010_v50, %v2034_v51  ;;  %v2130_v54 = vld [vmem:[#allocation2 + $0xe] sm:$0x1]  ;;  %v2154_v55 = vld [vmem:[#allocation2 + $0xf] sm:$0x1]  ;;  %1219 = vst.msk [vmem:[#allocation2 + $0x10] sm:$0xff] %vm1216_vm1, %v1146_v44  ;;  %v3003_v50 = vsel %vm2812_vm3, %v7183_v36, 0 }
  0xb6   :  { %v1842_v57 = vmax.f32 %v1818_v48, 0.0  ;;  %v2178_v58 = vmax.f32 %v2130_v54, %v2154_v55  ;;  %v799_v59 = vpop.f32.mrf.mxu0  ;;  %3012 = vmatpush.bf16.msra.mxu3 %v3003_v50 }
  0xb7   :  { %v1962_v60 = vmax.f32 %v1938_v52, 0.0  ;;  %v2082_v61 = vmax.f32 %v2058_v53, 0.0  ;;  %v800_v22 = vadd.f32 %v7958_v15, %v799_v59 }
  0xb8   :  { %v2202_v62 = vmax.f32 %v2178_v58, 0.0  ;;  %1866 = vst.msk [vmem:[#allocation3 + $0x4] sm:$0x1] %vm1385_vm2, %v1842_v57 }
  0xb9   :  { %7091 = vmatmul.msk.bf16.gmra.mxu0 %vm558_vm0, %v7649_v56  ;;  %1986 = vst.msk [vmem:[#allocation3 + $0x5] sm:$0x1] %vm1385_vm2, %v1962_v60 }
  0xba   :  { %2106 = vst.msk [vmem:[#allocation3 + $0x6] sm:$0x1] %vm1385_vm2, %v2082_v61 }
  0xbb   :  { %2226 = vst.msk [vmem:[#allocation3 + $0x7] sm:$0x1] %vm1385_vm2, %v2202_v62 }
  0xbc   :  { %v2250_v63 = vld [vmem:[#allocation2 + $0x10] sm:$0x1]  ;;  %v2274_v0 = vld [vmem:[#allocation2 + $0x11] sm:$0x1]  ;;  %v2370_v1 = vld [vmem:[#allocation2 + $0x12] sm:$0x1] }
  0xbd   :  { %v2298_v2 = vmax.f32 %v2250_v63, %v2274_v0  ;;  %v2394_v3 = vld [vmem:[#allocation2 + $0x13] sm:$0x1]  ;;  %v2490_v4 = vld [vmem:[#allocation2 + $0x14] sm:$0x1]  ;;  %v2514_v5 = vld [vmem:[#allocation2 + $0x15] sm:$0x1] }
  0xbe   :  { %v2418_v6 = vmax.f32 %v2370_v1, %v2394_v3  ;;  %v2538_v7 = vmax.f32 %v2490_v4, %v2514_v5  ;;  %v2610_v8 = vld [vmem:[#allocation2 + $0x16] sm:$0x1]  ;;  %v2634_v9 = vld [vmem:[#allocation2 + $0x17] sm:$0x1]  ;;  %v801_v10 = vpop.f32.mrf.mxu0 }
  0xbf   :  { %v2658_v11 = vmax.f32 %v2610_v8, %v2634_v9  ;;  %v2322_v12 = vmax.f32 %v2298_v2, 0.0  ;;  %v802_v32 = vadd.f32 %v7958_v15, %v801_v10 }
  0xc0   :  { %v2562_v13 = vmax.f32 %v2538_v7, 0.0  ;;  %v2442_v14 = vmax.f32 %v2418_v6, 0.0  ;;  %v7652_v7 = vld [vmem:[%s10377_s0 + $0x70] sm:$0xff] }
  0xc1   :  { %v2682_v16 = vmax.f32 %v2658_v11, 0.0  ;;  %2346 = vst.msk [vmem:[#allocation3 + $0x8] sm:$0x1] %vm1385_vm2, %v2322_v12 }
  0xc2   :  { %2586 = vst.msk [vmem:[#allocation3 + $0xa] sm:$0x1] %vm1385_vm2, %v2562_v13 }
  0xc3   :  { %2706 = vst.msk [vmem:[#allocation3 + $0xb] sm:$0x1] %vm1385_vm2, %v2682_v16 }
  0xc4   :  { %2466 = vst.msk [vmem:[#allocation3 + $0x9] sm:$0x1] %vm1385_vm2, %v2442_v14 }
  0xc6   :  { %v804_v18 = vpop.f32.mrf.mxu0 }
  0xc7   :  { %v805_v56 = vadd.f32 %v7958_v15, %v804_v18 }
  0xc9   :  { %7092 = vmatmul.msk.bf16.gmra.mxu0 %vm558_vm0, %v7650_v17 }
  0xce   :  { %v806_v19 = vpop.f32.mrf.mxu0 }
  0xcf   :  { %v807_v23 = vadd.f32 %v7958_v15, %v806_v19 }
  0xd1   :  { %v1147_v25 = vmax.f32 %v800_v22, %v807_v23 }
  0xd3   :  { %1220 = vst.msk [vmem:[#allocation2 + $0x18] sm:$0xff] %vm1216_vm1, %v1147_v25 }
  0xd6   :  { %v809_v28 = vpop.f32.mrf.mxu0 }
  0xd7   :  { %v810_v33 = vadd.f32 %v7958_v15, %v809_v28 }
  0xd9   :  { %v1148_v37 = vmax.f32 %v802_v32, %v810_v33  ;;  %7093 = vmatmul.msk.bf16.gmra.mxu0 %vm558_vm0, %v7651_v27  ;;  %v2730_v32 = vld [vmem:[#allocation3] sm:$0xff] }
  0xda   :  { %v1290_v39 = vld [vmem:[#allocation2 + $0x18] sm:$0x1]  ;;  %v1314_v40 = vld [vmem:[#allocation2 + $0x19] sm:$0x1]  ;;  %v1411_v41 = vld [vmem:[#allocation2 + $0x1a] sm:$0x1] }
  0xdb   :  { %v1338_v42 = vmax.f32 %v1290_v39, %v1314_v40  ;;  %v1435_v43 = vld [vmem:[#allocation2 + $0x1b] sm:$0x1]  ;;  %v1531_v44 = vld [vmem:[#allocation2 + $0x1c] sm:$0x1]  ;;  %v1555_v45 = vld [vmem:[#allocation2 + $0x1d] sm:$0x1] }
  0xdc   :  { %v1459_v46 = vmax.f32 %v1411_v41, %v1435_v43  ;;  %v1579_v47 = vmax.f32 %v1531_v44, %v1555_v45  ;;  %v1651_v48 = vld [vmem:[#allocation2 + $0x1e] sm:$0x1]  ;;  %v1675_v49 = vld [vmem:[#allocation2 + $0x1f] sm:$0x1]  ;;  %1221 = vst.msk [vmem:[#allocation2 + $0x20] sm:$0xff] %vm1216_vm1, %v1148_v37  ;;  %v2756_v37 = vld [vmem:[#allocation3 + $0x1] sm:$0xff] }
  0xdd   :  { %v1699_v51 = vmax.f32 %v1651_v48, %v1675_v49  ;;  %v1362_v52 = vmax.f32 %v1338_v42, 0.0  ;;  %v2946_v40 = vld [vmem:[#allocation3 + $0x2] sm:$0xff] }
  0xde   :  { %v811_v53 = vpop.f32.mrf.mxu0  ;;  %v1483_v54 = vmax.f32 %v1459_v46, 0.0  ;;  %v1603_v55 = vmax.f32 %v1579_v47, 0.0  ;;  %v7654_v47 = vld [vmem:[%s10377_s0 + $0x80] sm:$0xff] }
  0xdf   :  { %v812_v57 = vadd.f32 %v7958_v15, %v811_v53  ;;  %1387 = vst.msk [vmem:[#allocation3 + $0x10] sm:$0x1] %vm1385_vm2, %v1362_v52  ;;  %v1723_v58 = vmax.f32 %v1699_v51, 0.0 }
  0xe0   :  { %1507 = vst.msk [vmem:[#allocation3 + $0x11] sm:$0x1] %vm1385_vm2, %v1483_v54 }
  0xe1   :  { %v1149_v59 = vmax.f32 %v805_v56, %v812_v57  ;;  %1627 = vst.msk [vmem:[#allocation3 + $0x12] sm:$0x1] %vm1385_vm2, %v1603_v55 }
  0xe2   :  { %1747 = vst.msk [vmem:[#allocation3 + $0x13] sm:$0x1] %vm1385_vm2, %v1723_v58 }
  0xe3   :  { %v1771_v60 = vld [vmem:[#allocation2 + $0x20] sm:$0x1]  ;;  %v1795_v61 = vld [vmem:[#allocation2 + $0x21] sm:$0x1]  ;;  %v1891_v62 = vld [vmem:[#allocation2 + $0x22] sm:$0x1] }
  0xe4   :  { %v1819_v63 = vmax.f32 %v1771_v60, %v1795_v61  ;;  %v1915_v0 = vld [vmem:[#allocation2 + $0x23] sm:$0x1]  ;;  %v2011_v1 = vld [vmem:[#allocation2 + $0x24] sm:$0x1]  ;;  %v2035_v2 = vld [vmem:[#allocation2 + $0x25] sm:$0x1] }
  0xe5   :  { %v1939_v3 = vmax.f32 %v1891_v62, %v1915_v0  ;;  %v2059_v4 = vmax.f32 %v2011_v1, %v2035_v2  ;;  %v2131_v5 = vld [vmem:[#allocation2 + $0x26] sm:$0x1]  ;;  %v2155_v6 = vld [vmem:[#allocation2 + $0x27] sm:$0x1]  ;;  %1222 = vst.msk [vmem:[#allocation2 + $0x28] sm:$0xff] %vm1216_vm1, %v1149_v59 }
  0xe6   :  { %v1843_v8 = vmax.f32 %v1819_v63, 0.0  ;;  %v2179_v9 = vmax.f32 %v2131_v5, %v2155_v6  ;;  %v814_v10 = vpop.f32.mrf.mxu0 }
  0xe7   :  { %v1963_v11 = vmax.f32 %v1939_v3, 0.0  ;;  %v2083_v12 = vmax.f32 %v2059_v4, 0.0  ;;  %v815_v44 = vadd.f32 %v7958_v15, %v814_v10 }
  0xe8   :  { %v2203_v13 = vmax.f32 %v2179_v9, 0.0  ;;  %1867 = vst.msk [vmem:[#allocation3 + $0x14] sm:$0x1] %vm1385_vm2, %v1843_v8 }
  0xe9   :  { %7094 = vmatmul.msk.bf16.gmra.mxu0 %vm558_vm0, %v7652_v7  ;;  %1987 = vst.msk [vmem:[#allocation3 + $0x15] sm:$0x1] %vm1385_vm2, %v1963_v11 }
  0xea   :  { %2107 = vst.msk [vmem:[#allocation3 + $0x16] sm:$0x1] %vm1385_vm2, %v2083_v12 }
  0xeb   :  { %2227 = vst.msk [vmem:[#allocation3 + $0x17] sm:$0x1] %vm1385_vm2, %v2203_v13 }
  0xec   :  { %v2251_v14 = vld [vmem:[#allocation2 + $0x28] sm:$0x1]  ;;  %v2275_v16 = vld [vmem:[#allocation2 + $0x29] sm:$0x1]  ;;  %v2371_v17 = vld [vmem:[#allocation2 + $0x2a] sm:$0x1] }
  0xed   :  { %v2299_v18 = vmax.f32 %v2251_v14, %v2275_v16  ;;  %v2395_v19 = vld [vmem:[#allocation2 + $0x2b] sm:$0x1]  ;;  %v2491_v20 = vld [vmem:[#allocation2 + $0x2c] sm:$0x1]  ;;  %v2515_v21 = vld [vmem:[#allocation2 + $0x2d] sm:$0x1] }
  0xee   :  { %v2419_v22 = vmax.f32 %v2371_v17, %v2395_v19  ;;  %v2539_v23 = vmax.f32 %v2491_v20, %v2515_v21  ;;  %v2611_v24 = vld [vmem:[#allocation2 + $0x2e] sm:$0x1]  ;;  %v2635_v25 = vld [vmem:[#allocation2 + $0x2f] sm:$0x1]  ;;  %v816_v26 = vpop.f32.mrf.mxu0 }
  0xef   :  { %v2659_v27 = vmax.f32 %v2611_v24, %v2635_v25  ;;  %v2323_v28 = vmax.f32 %v2299_v18, 0.0  ;;  %v817_v49 = vadd.f32 %v7958_v15, %v816_v26  ;;  %v7655_v20 = vld [vmem:[%s10377_s0 + $0x88] sm:$0xff] }
  0xf0   :  { %v2563_v29 = vmax.f32 %v2539_v23, 0.0  ;;  %v2443_v30 = vmax.f32 %v2419_v22, 0.0 }
  0xf1   :  { %v2683_v31 = vmax.f32 %v2659_v27, 0.0  ;;  %2347 = vst.msk [vmem:[#allocation3 + $0x18] sm:$0x1] %vm1385_vm2, %v2323_v28 }
  0xf2   :  { %v2731_v33 = vld [vmem:[#allocation3 + $0x10] sm:$0xff]  ;;  %2587 = vst.msk [vmem:[#allocation3 + $0x1a] sm:$0x1] %vm1385_vm2, %v2563_v29 }
  0xf3   :  { %v2746_v34 = vpack.c.bf16 %v2731_v33, %v2730_v32  ;;  %2707 = vst.msk [vmem:[#allocation3 + $0x1b] sm:$0x1] %vm1385_vm2, %v2683_v31 }
  0xf4   :  { %2467 = vst.msk [vmem:[#allocation3 + $0x19] sm:$0x1] %vm1385_vm2, %v2443_v30 }
  0xf5   :  { %7170 = vmatmul.msk.bf16.vlgmr.msra.gmra.mxu2 %vm1216_vm1, %v2746_v34 }
  0xf6   :  { %v819_v36 = vpop.f32.mrf.mxu0 }
  0xf7   :  { %v820_v4 = vadd.f32 %v7958_v15, %v819_v36 }
  0xf8   :  { %v2757_v38 = vld [vmem:[#allocation3 + $0x11] sm:$0xff] }
  0xf9   :  { %7095 = vmatmul.msk.bf16.gmra.mxu0 %vm558_vm0, %v7653_v35  ;;  %v2772_v39 = vpack.c.bf16 %v2757_v38, %v2756_v37 }
  0xfb   :  { %7158 = vmatmul.msk.bf16.vlgmr.msra.gmra.mxu1 %vm1216_vm1, %v2772_v39  ;;  %v2947_v41 = vld [vmem:[#allocation3 + $0x12] sm:$0xff] }
  0xfc   :  { %v2962_v42 = vpack.c.bf16 %v2947_v41, %v2946_v40 }
  0xfe   :  { %7184 = vmatmul.msk.bf16.vlgmr.msra.gmra.mxu3 %vm1216_vm1, %v2962_v42  ;;  %v821_v43 = vpop.f32.mrf.mxu0 }
  0xff   :  { %v822_v45 = vadd.f32 %v7958_v15, %v821_v43 }
 0x101   :  { %v1150_v46 = vmax.f32 %v815_v44, %v822_v45  ;;  %v7656_v44 = vld [vmem:[%s10377_s0 + $0x90] sm:$0xff] }
 0x103   :  { %1223 = vst.msk [vmem:[#allocation2 + $0x30] sm:$0xff] %vm1216_vm1, %v1150_v46  ;;  %v8083_v46 = vld [vmem:[#allocation3 + $0x13] sm:$0xff] }
 0x106   :  { %v824_v48 = vpop.f32.mrf.mxu0 }
 0x107   :  { %v825_v50 = vadd.f32 %v7958_v15, %v824_v48 }
 0x109   :  { %v1151_v51 = vmax.f32 %v817_v49, %v825_v50  ;;  %7096 = vmatmul.msk.bf16.gmra.mxu0 %vm558_vm0, %v7654_v47 }
 0x10a   :  { %v1291_v52 = vld [vmem:[#allocation2 + $0x30] sm:$0x1]  ;;  %v1315_v53 = vld [vmem:[#allocation2 + $0x31] sm:$0x1]  ;;  %v1412_v54 = vld [vmem:[#allocation2 + $0x32] sm:$0x1] }
 0x10b   :  { %v1339_v55 = vmax.f32 %v1291_v52, %v1315_v53  ;;  %v1436_v56 = vld [vmem:[#allocation2 + $0x33] sm:$0x1]  ;;  %v1532_v57 = vld [vmem:[#allocation2 + $0x34] sm:$0x1]  ;;  %v1556_v58 = vld [vmem:[#allocation2 + $0x35] sm:$0x1] }
 0x10c   :  { %v1460_v59 = vmax.f32 %v1412_v54, %v1436_v56  ;;  %v1580_v60 = vmax.f32 %v1532_v57, %v1556_v58  ;;  %v1652_v61 = vld [vmem:[#allocation2 + $0x36] sm:$0x1]  ;;  %v1676_v62 = vld [vmem:[#allocation2 + $0x37] sm:$0x1]  ;;  %1224 = vst.msk [vmem:[#allocation2 + $0x38] sm:$0xff] %vm1216_vm1, %v1151_v51  ;;  %v7657_v53 = vld [vmem:[%s10377_s0 + $0x98] sm:$0xff] }
 0x10d   :  { %v1700_v63 = vmax.f32 %v1652_v61, %v1676_v62  ;;  %v1363_v0 = vmax.f32 %v1339_v55, 0.0 }
 0x10e   :  { %v826_v1 = vpop.f32.mrf.mxu0  ;;  %v1484_v2 = vmax.f32 %v1460_v59, 0.0  ;;  %v1604_v3 = vmax.f32 %v1580_v60, 0.0 }
 0x10f   :  { %v827_v5 = vadd.f32 %v7958_v15, %v826_v1  ;;  %1388 = vst.msk [vmem:[#allocation3 + $0x20] sm:$0x1] %vm1385_vm2, %v1363_v0  ;;  %v1724_v6 = vmax.f32 %v1700_v63, 0.0 }
 0x110   :  { %1508 = vst.msk [vmem:[#allocation3 + $0x21] sm:$0x1] %vm1385_vm2, %v1484_v2 }
 0x111   :  { %v1152_v7 = vmax.f32 %v820_v4, %v827_v5  ;;  %1628 = vst.msk [vmem:[#allocation3 + $0x22] sm:$0x1] %vm1385_vm2, %v1604_v3 }
 0x112   :  { %1748 = vst.msk [vmem:[#allocation3 + $0x23] sm:$0x1] %vm1385_vm2, %v1724_v6 }
 0x113   :  { %v1772_v8 = vld [vmem:[#allocation2 + $0x38] sm:$0x1]  ;;  %v1796_v9 = vld [vmem:[#allocation2 + $0x39] sm:$0x1]  ;;  %v1892_v10 = vld [vmem:[#allocation2 + $0x3a] sm:$0x1] }
 0x114   :  { %v1820_v11 = vmax.f32 %v1772_v8, %v1796_v9  ;;  %v1916_v12 = vld [vmem:[#allocation2 + $0x3b] sm:$0x1]  ;;  %v2012_v13 = vld [vmem:[#allocation2 + $0x3c] sm:$0x1]  ;;  %v2036_v14 = vld [vmem:[#allocation2 + $0x3d] sm:$0x1] }
 0x115   :  { %v1940_v16 = vmax.f32 %v1892_v10, %v1916_v12  ;;  %v2060_v17 = vmax.f32 %v2012_v13, %v2036_v14  ;;  %v2132_v18 = vld [vmem:[#allocation2 + $0x3e] sm:$0x1]  ;;  %v2156_v19 = vld [vmem:[#allocation2 + $0x3f] sm:$0x1]  ;;  %1225 = vst.msk [vmem:[#allocation2 + $0x40] sm:$0xff] %vm1216_vm1, %v1152_v7 }
 0x116   :  { %v1844_v21 = vmax.f32 %v1820_v11, 0.0  ;;  %v2180_v22 = vmax.f32 %v2132_v18, %v2156_v19  ;;  %v829_v23 = vpop.f32.mrf.mxu0 }
 0x117   :  { %v1964_v24 = vmax.f32 %v1940_v16, 0.0  ;;  %v2084_v25 = vmax.f32 %v2060_v17, 0.0  ;;  %v830_v50 = vadd.f32 %v7958_v15, %v829_v23 }
 0x118   :  { %v2204_v26 = vmax.f32 %v2180_v22, 0.0  ;;  %1868 = vst.msk [vmem:[#allocation3 + $0x24] sm:$0x1] %vm1385_vm2, %v1844_v21 }
 0x119   :  { %1988 = vst.msk [vmem:[#allocation3 + $0x25] sm:$0x1] %vm1385_vm2, %v1964_v24  ;;  %7097 = vmatmul.msk.bf16.gmra.mxu0 %vm558_vm0, %v7655_v20 }
 0x11a   :  { %2108 = vst.msk [vmem:[#allocation3 + $0x26] sm:$0x1] %vm1385_vm2, %v2084_v25 }
 0x11b   :  { %2228 = vst.msk [vmem:[#allocation3 + $0x27] sm:$0x1] %vm1385_vm2, %v2204_v26  ;;  %v7658_v26 = vld [vmem:[%s10377_s0 + $0xa0] sm:$0xff] }
 0x11c   :  { %v2252_v27 = vld [vmem:[#allocation2 + $0x40] sm:$0x1]  ;;  %v2276_v28 = vld [vmem:[#allocation2 + $0x41] sm:$0x1]  ;;  %v2372_v29 = vld [vmem:[#allocation2 + $0x42] sm:$0x1] }
 0x11d   :  { %v2300_v30 = vmax.f32 %v2252_v27, %v2276_v28  ;;  %v2396_v31 = vld [vmem:[#allocation2 + $0x43] sm:$0x1]  ;;  %v2492_v32 = vld [vmem:[#allocation2 + $0x44] sm:$0x1]  ;;  %v2516_v33 = vld [vmem:[#allocation2 + $0x45] sm:$0x1] }
 0x11e   :  { %v2420_v34 = vmax.f32 %v2372_v29, %v2396_v31  ;;  %v2540_v35 = vmax.f32 %v2492_v32, %v2516_v33  ;;  %v2612_v36 = vld [vmem:[#allocation2 + $0x46] sm:$0x1]  ;;  %v2636_v37 = vld [vmem:[#allocation2 + $0x47] sm:$0x1]  ;;  %v831_v38 = vpop.f32.mrf.mxu0 }
 0x11f   :  { %v2660_v39 = vmax.f32 %v2612_v36, %v2636_v37  ;;  %v2324_v40 = vmax.f32 %v2300_v30, 0.0  ;;  %v832_v55 = vadd.f32 %v7958_v15, %v831_v38 }
 0x120   :  { %v2444_v41 = vmax.f32 %v2420_v34, 0.0  ;;  %v2564_v42 = vmax.f32 %v2540_v35, 0.0 }
 0x121   :  { %2348 = vst.msk [vmem:[#allocation3 + $0x28] sm:$0x1] %vm1385_vm2, %v2324_v40  ;;  %v2684_v43 = vmax.f32 %v2660_v39, 0.0 }
 0x122   :  { %2468 = vst.msk [vmem:[#allocation3 + $0x29] sm:$0x1] %vm1385_vm2, %v2444_v41 }
 0x123   :  { %2588 = vst.msk [vmem:[#allocation3 + $0x2a] sm:$0x1] %vm1385_vm2, %v2564_v42 }
 0x124   :  { %2708 = vst.msk [vmem:[#allocation3 + $0x2b] sm:$0x1] %vm1385_vm2, %v2684_v43 }
 0x126   :  { %v834_v45 = vpop.f32.mrf.mxu0 }
 0x127   :  { %v835_v10 = vadd.f32 %v7958_v15, %v834_v45 }
 0x129   :  { %7098 = vmatmul.msk.bf16.gmra.mxu0 %vm558_vm0, %v7656_v44 }
 0x12a   :  { %v8085_v47 = vld [vmem:[#allocation3 + $0x23] sm:$0xff] }
 0x12e   :  { %v836_v49 = vpop.f32.mrf.mxu0 }
 0x12f   :  { %v837_v51 = vadd.f32 %v7958_v15, %v836_v49 }
 0x131   :  { %v1153_v52 = vmax.f32 %v830_v50, %v837_v51 }
 0x133   :  { %1226 = vst.msk [vmem:[#allocation2 + $0x48] sm:$0xff] %vm1216_vm1, %v1153_v52  ;;  %v2732_v52 = vld [vmem:[#allocation3 + $0x20] sm:$0xff] }
 0x136   :  { %v839_v54 = vpop.f32.mrf.mxu0 }
 0x137   :  { %v840_v56 = vadd.f32 %v7958_v15, %v839_v54 }
 0x139   :  { %v1154_v57 = vmax.f32 %v832_v55, %v840_v56  ;;  %7099 = vmatmul.msk.bf16.gmra.mxu0 %vm558_vm0, %v7657_v53  ;;  %v8116_v55 = vld [vmem:[#allocation3 + $0x20] sm:$0xff] }
 0x13a   :  { %v1292_v58 = vld [vmem:[#allocation2 + $0x48] sm:$0x1]  ;;  %v1316_v59 = vld [vmem:[#allocation2 + $0x49] sm:$0x1]  ;;  %v1413_v60 = vld [vmem:[#allocation2 + $0x4a] sm:$0x1] }
 0x13b   :  { %v1340_v61 = vmax.f32 %v1292_v58, %v1316_v59  ;;  %v1437_v62 = vld [vmem:[#allocation2 + $0x4b] sm:$0x1]  ;;  %v1533_v63 = vld [vmem:[#allocation2 + $0x4c] sm:$0x1]  ;;  %v1557_v0 = vld [vmem:[#allocation2 + $0x4d] sm:$0x1] }
 0x13c   :  { %v1461_v1 = vmax.f32 %v1413_v60, %v1437_v62  ;;  %v1581_v2 = vmax.f32 %v1533_v63, %v1557_v0  ;;  %v1653_v3 = vld [vmem:[#allocation2 + $0x4e] sm:$0x1]  ;;  %v1677_v4 = vld [vmem:[#allocation2 + $0x4f] sm:$0x1]  ;;  %1227 = vst.msk [vmem:[#allocation2 + $0x50] sm:$0xff] %vm1216_vm1, %v1154_v57  ;;  %v8128_v63 = vld [vmem:[#allocation3 + $0x21] sm:$0xff] }
 0x13d   :  { %v1701_v5 = vmax.f32 %v1653_v3, %v1677_v4  ;;  %v1364_v6 = vmax.f32 %v1340_v61, 0.0  ;;  %10456 = vst [vmem:[#allocation9_spill] sm:$0xff] %v8116_v55  ;;  %v7659_v59 = vld [vmem:[%s10377_s0 + $0xa8] sm:$0xff] }
 0x13e   :  { %v841_v7 = vpop.f32.mrf.mxu0  ;;  %v1485_v8 = vmax.f32 %v1461_v1, 0.0  ;;  %v1605_v9 = vmax.f32 %v1581_v2, 0.0  ;;  %v2758_v61 = vld [vmem:[#allocation3 + $0x21] sm:$0xff]  ;;  %10458 = vst [vmem:[#allocation11_spill] sm:$0xff] %v8128_v63 }
 0x13f   :  { %v842_v11 = vadd.f32 %v7958_v15, %v841_v7  ;;  %1389 = vst.msk [vmem:[#allocation3 + $0x30] sm:$0x1] %vm1385_vm2, %v1364_v6  ;;  %v1725_v12 = vmax.f32 %v1701_v5, 0.0  ;;  %v2948_v2 = vld [vmem:[#allocation3 + $0x22] sm:$0xff] }
 0x140   :  { %1509 = vst.msk [vmem:[#allocation3 + $0x31] sm:$0x1] %vm1385_vm2, %v1485_v8 }
 0x141   :  { %v1155_v13 = vmax.f32 %v835_v10, %v842_v11  ;;  %1629 = vst.msk [vmem:[#allocation3 + $0x32] sm:$0x1] %vm1385_vm2, %v1605_v9  ;;  %v7660_v10 = vld [vmem:[%s10377_s0 + $0xb0] sm:$0xff] }
 0x142   :  { %1749 = vst.msk [vmem:[#allocation3 + $0x33] sm:$0x1] %vm1385_vm2, %v1725_v12 }
 0x143   :  { %v1773_v14 = vld [vmem:[#allocation2 + $0x50] sm:$0x1]  ;;  %v1797_v16 = vld [vmem:[#allocation2 + $0x51] sm:$0x1]  ;;  %v1893_v17 = vld [vmem:[#allocation2 + $0x52] sm:$0x1] }
 0x144   :  { %v1821_v18 = vmax.f32 %v1773_v14, %v1797_v16  ;;  %v1917_v19 = vld [vmem:[#allocation2 + $0x53] sm:$0x1]  ;;  %v2013_v20 = vld [vmem:[#allocation2 + $0x54] sm:$0x1]  ;;  %v2037_v21 = vld [vmem:[#allocation2 + $0x55] sm:$0x1] }
 0x145   :  { %v1941_v22 = vmax.f32 %v1893_v17, %v1917_v19  ;;  %v2061_v23 = vmax.f32 %v2013_v20, %v2037_v21  ;;  %v2133_v24 = vld [vmem:[#allocation2 + $0x56] sm:$0x1]  ;;  %v2157_v25 = vld [vmem:[#allocation2 + $0x57] sm:$0x1]  ;;  %1228 = vst.msk [vmem:[#allocation2 + $0x58] sm:$0xff] %vm1216_vm1, %v1155_v13 }
 0x146   :  { %v1845_v27 = vmax.f32 %v1821_v18, 0.0  ;;  %v2181_v28 = vmax.f32 %v2133_v24, %v2157_v25  ;;  %v844_v29 = vpop.f32.mrf.mxu0 }
 0x147   :  { %v1965_v30 = vmax.f32 %v1941_v22, 0.0  ;;  %v2085_v31 = vmax.f32 %v2061_v23, 0.0  ;;  %v845_v7 = vadd.f32 %v7958_v15, %v844_v29 }
 0x148   :  { %v2205_v32 = vmax.f32 %v2181_v28, 0.0  ;;  %1869 = vst.msk [vmem:[#allocation3 + $0x34] sm:$0x1] %vm1385_vm2, %v1845_v27 }
 0x149   :  { %1989 = vst.msk [vmem:[#allocation3 + $0x35] sm:$0x1] %vm1385_vm2, %v1965_v30  ;;  %7100 = vmatmul.msk.bf16.gmra.mxu0 %vm558_vm0, %v7658_v26 }
 0x14a   :  { %2109 = vst.msk [vmem:[#allocation3 + $0x36] sm:$0x1] %vm1385_vm2, %v2085_v31 }
 0x14b   :  { %2229 = vst.msk [vmem:[#allocation3 + $0x37] sm:$0x1] %vm1385_vm2, %v2205_v32 }
 0x14c   :  { %v2253_v33 = vld [vmem:[#allocation2 + $0x58] sm:$0x1]  ;;  %v2277_v34 = vld [vmem:[#allocation2 + $0x59] sm:$0x1]  ;;  %v2373_v35 = vld [vmem:[#allocation2 + $0x5a] sm:$0x1] }
 0x14d   :  { %v2301_v36 = vmax.f32 %v2253_v33, %v2277_v34  ;;  %v2397_v37 = vld [vmem:[#allocation2 + $0x5b] sm:$0x1]  ;;  %v2493_v38 = vld [vmem:[#allocation2 + $0x5c] sm:$0x1]  ;;  %v2517_v39 = vld [vmem:[#allocation2 + $0x5d] sm:$0x1] }
 0x14e   :  { %v2421_v40 = vmax.f32 %v2373_v35, %v2397_v37  ;;  %v2541_v41 = vmax.f32 %v2493_v38, %v2517_v39  ;;  %v2613_v42 = vld [vmem:[#allocation2 + $0x5e] sm:$0x1]  ;;  %v2637_v43 = vld [vmem:[#allocation2 + $0x5f] sm:$0x1]  ;;  %v846_v44 = vpop.f32.mrf.mxu0 }
 0x14f   :  { %v2661_v45 = vmax.f32 %v2613_v42, %v2637_v43  ;;  %v2325_v49 = vmax.f32 %v2301_v36, 0.0  ;;  %v847_v12 = vadd.f32 %v7958_v15, %v846_v44 }
 0x150   :  { %v2445_v50 = vmax.f32 %v2421_v40, 0.0  ;;  %v2565_v51 = vmax.f32 %v2541_v41, 0.0 }
 0x151   :  { %2349 = vst.msk [vmem:[#allocation3 + $0x38] sm:$0x1] %vm1385_vm2, %v2325_v49  ;;  %v2685_v53 = vmax.f32 %v2661_v45, 0.0 }
 0x152   :  { %v2733_v54 = vld [vmem:[#allocation3 + $0x30] sm:$0xff]  ;;  %2469 = vst.msk [vmem:[#allocation3 + $0x39] sm:$0x1] %vm1385_vm2, %v2445_v50  ;;  %v7661_v50 = vld [vmem:[%s10377_s0 + $0xb8] sm:$0xff] }
 0x153   :  { %v8118_v56 = vld [vmem:[#allocation3 + $0x30] sm:$0xff]  ;;  %v2747_v57 = vpack.c.bf16 %v2733_v54, %v2732_v52  ;;  %2589 = vst.msk [vmem:[#allocation3 + $0x3a] sm:$0x1] %vm1385_vm2, %v2565_v51 }
 0x154   :  { %10457 = vst [vmem:[#allocation10_spill] sm:$0xff] %v8118_v56 }
 0x155   :  { %2709 = vst.msk [vmem:[#allocation3 + $0x3b] sm:$0x1] %vm1385_vm2, %v2685_v53  ;;  %7171 = vmatmul.msk.bf16.gmra.mxu2 %vm1216_vm1, %v2747_v57 }
 0x156   :  { %v849_v60 = vpop.f32.mrf.mxu0 }
 0x157   :  { %v850_v32 = vadd.f32 %v7958_v15, %v849_v60 }
 0x158   :  { %v2759_v62 = vld [vmem:[#allocation3 + $0x31] sm:$0xff] }
 0x159   :  { %v8130_v0 = vld [vmem:[#allocation3 + $0x31] sm:$0xff]  ;;  %7101 = vmatmul.msk.bf16.gmra.mxu0 %vm558_vm0, %v7659_v59  ;;  %v2773_v1 = vpack.c.bf16 %v2759_v62, %v2758_v61 }
 0x15a   :  { %10459 = vst [vmem:[#allocation12_spill] sm:$0xff] %v8130_v0  ;;  %v2949_v3 = vld [vmem:[#allocation3 + $0x32] sm:$0xff] }
 0x15b   :  { %v2963_v5 = vpack.c.bf16 %v2949_v3, %v2948_v2  ;;  %7159 = vmatmul.msk.bf16.gmra.mxu1 %vm1216_vm1, %v2773_v1 }
 0x15d   :  { %7185 = vmatmul.msk.bf16.gmra.mxu3 %vm1216_vm1, %v2963_v5 }
 0x15e   :  { %v851_v6 = vpop.f32.mrf.mxu0 }
 0x15f   :  { %v852_v8 = vadd.f32 %v7958_v15, %v851_v6 }
 0x161   :  { %v1156_v9 = vmax.f32 %v845_v7, %v852_v8 }
 0x163   :  { %1229 = vst.msk [vmem:[#allocation2 + $0x60] sm:$0xff] %vm1216_vm1, %v1156_v9 }
 0x166   :  { %v854_v11 = vpop.f32.mrf.mxu0 }
 0x167   :  { %v855_v13 = vadd.f32 %v7958_v15, %v854_v11 }
 0x169   :  { %v1157_v14 = vmax.f32 %v847_v12, %v855_v13  ;;  %7102 = vmatmul.msk.bf16.gmra.mxu0 %vm558_vm0, %v7660_v10 }
 0x16a   :  { %v1293_v16 = vld [vmem:[#allocation2 + $0x60] sm:$0x1]  ;;  %v1317_v17 = vld [vmem:[#allocation2 + $0x61] sm:$0x1]  ;;  %v1414_v18 = vld [vmem:[#allocation2 + $0x62] sm:$0x1] }
 0x16b   :  { %v1341_v19 = vmax.f32 %v1293_v16, %v1317_v17  ;;  %v1438_v20 = vld [vmem:[#allocation2 + $0x63] sm:$0x1]  ;;  %v1534_v21 = vld [vmem:[#allocation2 + $0x64] sm:$0x1]  ;;  %v1558_v22 = vld [vmem:[#allocation2 + $0x65] sm:$0x1] }
 0x16c   :  { %v1462_v23 = vmax.f32 %v1414_v18, %v1438_v20  ;;  %v1582_v24 = vmax.f32 %v1534_v21, %v1558_v22  ;;  %v1654_v25 = vld [vmem:[#allocation2 + $0x66] sm:$0x1]  ;;  %v1678_v26 = vld [vmem:[#allocation2 + $0x67] sm:$0x1]  ;;  %1230 = vst.msk [vmem:[#allocation2 + $0x68] sm:$0xff] %vm1216_vm1, %v1157_v14 }
 0x16d   :  { %v1702_v27 = vmax.f32 %v1654_v25, %v1678_v26  ;;  %v1365_v28 = vmax.f32 %v1341_v19, 0.0  ;;  %v7662_v22 = vld [vmem:[%s10377_s0 + $0xc0] sm:$0xff]  ;;  %v8176_v26 = vld [vmem:[#allocation3 + $0x34] sm:$0xff] }
 0x16e   :  { %v856_v29 = vpop.f32.mrf.mxu0  ;;  %v1486_v30 = vmax.f32 %v1462_v23, 0.0  ;;  %v1606_v31 = vmax.f32 %v1582_v24, 0.0  ;;  %v8172_v24 = vld [vmem:[#allocation3 + $0x33] sm:$0xff]  ;;  %10460 = vst [vmem:[#allocation13_spill] sm:$0xff] %v8176_v26 }
 0x16f   :  { %v857_v33 = vadd.f32 %v7958_v15, %v856_v29  ;;  %1390 = vst.msk [vmem:[#allocation3 + $0x40] sm:$0x1] %vm1385_vm2, %v1365_v28  ;;  %v1726_v34 = vmax.f32 %v1702_v27, 0.0 }
 0x170   :  { %1510 = vst.msk [vmem:[#allocation3 + $0x41] sm:$0x1] %vm1385_vm2, %v1486_v30 }
 0x171   :  { %v1158_v35 = vmax.f32 %v850_v32, %v857_v33  ;;  %1630 = vst.msk [vmem:[#allocation3 + $0x42] sm:$0x1] %vm1385_vm2, %v1606_v31 }
 0x172   :  { %1750 = vst.msk [vmem:[#allocation3 + $0x43] sm:$0x1] %vm1385_vm2, %v1726_v34  ;;  %v7663_v34 = vld [vmem:[%s10377_s0 + $0xc8] sm:$0xff] }
 0x173   :  { %v1774_v36 = vld [vmem:[#allocation2 + $0x68] sm:$0x1]  ;;  %v1798_v37 = vld [vmem:[#allocation2 + $0x69] sm:$0x1]  ;;  %v1894_v38 = vld [vmem:[#allocation2 + $0x6a] sm:$0x1] }
 0x174   :  { %v1822_v39 = vmax.f32 %v1774_v36, %v1798_v37  ;;  %v1918_v40 = vld [vmem:[#allocation2 + $0x6b] sm:$0x1]  ;;  %v2014_v41 = vld [vmem:[#allocation2 + $0x6c] sm:$0x1]  ;;  %v2038_v42 = vld [vmem:[#allocation2 + $0x6d] sm:$0x1] }
 0x175   :  { %v1942_v43 = vmax.f32 %v1894_v38, %v1918_v40  ;;  %v2062_v44 = vmax.f32 %v2014_v41, %v2038_v42  ;;  %v2134_v45 = vld [vmem:[#allocation2 + $0x6e] sm:$0x1]  ;;  %v2158_v49 = vld [vmem:[#allocation2 + $0x6f] sm:$0x1]  ;;  %1231 = vst.msk [vmem:[#allocation2 + $0x70] sm:$0xff] %vm1216_vm1, %v1158_v35 }
 0x176   :  { %v1846_v51 = vmax.f32 %v1822_v39, 0.0  ;;  %v2182_v52 = vmax.f32 %v2134_v45, %v2158_v49  ;;  %v859_v53 = vpop.f32.mrf.mxu0 }
 0x177   :  { %v1966_v54 = vmax.f32 %v1942_v43, 0.0  ;;  %v2086_v57 = vmax.f32 %v2062_v44, 0.0  ;;  %v860_v31 = vadd.f32 %v7958_v15, %v859_v53 }
 0x178   :  { %v2206_v59 = vmax.f32 %v2182_v52, 0.0  ;;  %1870 = vst.msk [vmem:[#allocation3 + $0x44] sm:$0x1] %vm1385_vm2, %v1846_v51  ;;  %v2906_v60 = vpop.f32.mrf.mxu2  ;;  %v2825_v61 = vpop.f32.mrf.mxu1 }
 0x179   :  { %1990 = vst.msk [vmem:[#allocation3 + $0x45] sm:$0x1] %vm1385_vm2, %v1966_v54  ;;  %v2907_v62 = vadd.f32 %v2906_v60, %v2825_v61  ;;  %7103 = vmatmul.msk.bf16.gmra.mxu0 %vm558_vm0, %v7661_v50 }
 0x17a   :  { %2110 = vst.msk [vmem:[#allocation3 + $0x46] sm:$0x1] %vm1385_vm2, %v2086_v57 }
 0x17b   :  { %2230 = vst.msk [vmem:[#allocation3 + $0x47] sm:$0x1] %vm1385_vm2, %v2206_v59 }
 0x17c   :  { %v2254_v1 = vld [vmem:[#allocation2 + $0x70] sm:$0x1]  ;;  %v2278_v2 = vld [vmem:[#allocation2 + $0x71] sm:$0x1]  ;;  %v2374_v3 = vld [vmem:[#allocation2 + $0x72] sm:$0x1] }
 0x17d   :  { %v2302_v5 = vmax.f32 %v2254_v1, %v2278_v2  ;;  %v2398_v6 = vld [vmem:[#allocation2 + $0x73] sm:$0x1]  ;;  %v2494_v7 = vld [vmem:[#allocation2 + $0x74] sm:$0x1]  ;;  %v2518_v8 = vld [vmem:[#allocation2 + $0x75] sm:$0x1] }
 0x17e   :  { %v2422_v9 = vmax.f32 %v2374_v3, %v2398_v6  ;;  %v2542_v10 = vmax.f32 %v2494_v7, %v2518_v8  ;;  %v2614_v11 = vld [vmem:[#allocation2 + $0x76] sm:$0x1]  ;;  %v2638_v12 = vld [vmem:[#allocation2 + $0x77] sm:$0x1]  ;;  %v861_v13 = vpop.f32.mrf.mxu0 }
 0x17f   :  { %v2662_v14 = vmax.f32 %v2614_v11, %v2638_v12  ;;  %v2326_v16 = vmax.f32 %v2302_v5, 0.0  ;;  %v862_v36 = vadd.f32 %v7958_v15, %v861_v13 }
 0x180   :  { %v2446_v17 = vmax.f32 %v2422_v9, 0.0  ;;  %v2566_v18 = vmax.f32 %v2542_v10, 0.0 }
 0x181   :  { %v3014_v19 = vpop.f32.mrf.mxu3  ;;  %2350 = vst.msk [vmem:[#allocation3 + $0x48] sm:$0x1] %vm1385_vm2, %v2326_v16  ;;  %v2686_v20 = vmax.f32 %v2662_v14, 0.0  ;;  %v7664_v16 = vld [vmem:[%s10377_s0 + $0xd0] sm:$0xff] }
 0x182   :  { %v8163_v21 = vadd.f32 %v3014_v19, %v2907_v62  ;;  %2470 = vst.msk [vmem:[#allocation3 + $0x49] sm:$0x1] %vm1385_vm2, %v2446_v17  ;;  %v8198_v62 = vld [vmem:[%s10379_s2] ss:$0 sm:$0xff] }
 0x183   :  { %2590 = vst.msk [vmem:[#allocation3 + $0x4a] sm:$0x1] %vm1385_vm2, %v2566_v18 }
 0x184   :  { %2710 = vst.msk [vmem:[#allocation3 + $0x4b] sm:$0x1] %vm1385_vm2, %v2686_v20 }
 0x186   :  { %v864_v23 = vpop.f32.mrf.mxu0 }
 0x187   :  { %v865_v61 = vadd.f32 %v7958_v15, %v864_v23 }
 0x189   :  { %7104 = vmatmul.msk.bf16.gmra.mxu0 %vm558_vm0, %v7662_v22 }
 0x18a   :  { %v8174_v25 = vld [vmem:[#allocation3 + $0x43] sm:$0xff] }
 0x18b   :  { %v8178_v27 = vld [vmem:[#allocation3 + $0x44] sm:$0xff] }
 0x18c   :  { %10461 = vst [vmem:[#allocation14_spill] sm:$0xff] %v8178_v27 }
 0x18e   :  { %v866_v30 = vpop.f32.mrf.mxu0 }
 0x18f   :  { %v867_v32 = vadd.f32 %v7958_v15, %v866_v30 }
 0x191   :  { %v1159_v33 = vmax.f32 %v860_v31, %v867_v32 }
 0x193   :  { %1232 = vst.msk [vmem:[#allocation2 + $0x78] sm:$0xff] %vm1216_vm1, %v1159_v33 }
 0x196   :  { %v869_v35 = vpop.f32.mrf.mxu0 }
 0x197   :  { %v870_v37 = vadd.f32 %v7958_v15, %v869_v35 }
 0x199   :  { %v1160_v38 = vmax.f32 %v862_v36, %v870_v37  ;;  %7105 = vmatmul.msk.bf16.gmra.mxu0 %vm558_vm0, %v7663_v34 }
 0x19a   :  { %v1294_v39 = vld [vmem:[#allocation2 + $0x78] sm:$0x1]  ;;  %v1318_v40 = vld [vmem:[#allocation2 + $0x79] sm:$0x1]  ;;  %v1415_v41 = vld [vmem:[#allocation2 + $0x7a] sm:$0x1] }
 0x19b   :  { %v1342_v42 = vmax.f32 %v1294_v39, %v1318_v40  ;;  %v1439_v43 = vld [vmem:[#allocation2 + $0x7b] sm:$0x1]  ;;  %v1535_v44 = vld [vmem:[#allocation2 + $0x7c] sm:$0x1]  ;;  %v1559_v45 = vld [vmem:[#allocation2 + $0x7d] sm:$0x1] }
 0x19c   :  { %v1463_v49 = vmax.f32 %v1415_v41, %v1439_v43  ;;  %v1583_v50 = vmax.f32 %v1535_v44, %v1559_v45  ;;  %v1655_v51 = vld [vmem:[#allocation2 + $0x7e] sm:$0x1]  ;;  %v1679_v52 = vld [vmem:[#allocation2 + $0x7f] sm:$0x1]  ;;  %1233 = vst.msk [vmem:[#allocation2 + $0x80] sm:$0xff] %vm1216_vm1, %v1160_v38 }
 0x19d   :  { %v1703_v53 = vmax.f32 %v1655_v51, %v1679_v52  ;;  %v1366_v54 = vmax.f32 %v1342_v42, 0.0  ;;  %v8219_v52 = vld [vmem:[#allocation3 + $0x40] sm:$0xff] }
 0x19e   :  { %v871_v57 = vpop.f32.mrf.mxu0  ;;  %v1487_v59 = vmax.f32 %v1463_v49, 0.0  ;;  %v1607_v60 = vmax.f32 %v1583_v50, 0.0  ;;  %v2734_v49 = vld [vmem:[#allocation3 + $0x40] sm:$0xff]  ;;  %10463 = vst [vmem:[#allocation16_spill] sm:$0xff] %v8219_v52 }
 0x19f   :  { %v872_v1 = vadd.f32 %v8198_v62, %v871_v57  ;;  %1391 = vst.msk [vmem:[#allocation3 + $0x50] sm:$0x1] %vm1385_vm2, %v1366_v54  ;;  %v1727_v2 = vmax.f32 %v1703_v53, 0.0  ;;  %v8217_v50 = vld [vmem:[#allocation3 + $0x40] sm:$0xff] }
 0x1a0   :  { %1511 = vst.msk [vmem:[#allocation3 + $0x51] sm:$0x1] %vm1385_vm2, %v1487_v59 }
 0x1a1   :  { %v1161_v3 = vmax.f32 %v865_v61, %v872_v1  ;;  %1631 = vst.msk [vmem:[#allocation3 + $0x52] sm:$0x1] %vm1385_vm2, %v1607_v60  ;;  %v7665_v1 = vld [vmem:[%s10377_s0 + $0xd8] sm:$0xff] }
 0x1a2   :  { %1751 = vst.msk [vmem:[#allocation3 + $0x53] sm:$0x1] %vm1385_vm2, %v1727_v2 }
 0x1a3   :  { %v1775_v5 = vld [vmem:[#allocation2 + $0x80] sm:$0x1]  ;;  %v1799_v6 = vld [vmem:[#allocation2 + $0x81] sm:$0x1]  ;;  %v1895_v15 = vld [vmem:[#allocation2 + $0x82] sm:$0x1] }
 0x1a4   :  { %v1823_v7 = vmax.f32 %v1775_v5, %v1799_v6  ;;  %v1919_v8 = vld [vmem:[#allocation2 + $0x83] sm:$0x1]  ;;  %v2015_v9 = vld [vmem:[#allocation2 + $0x84] sm:$0x1]  ;;  %v2039_v10 = vld [vmem:[#allocation2 + $0x85] sm:$0x1] }
 0x1a5   :  { %v1943_v11 = vmax.f32 %v1895_v15, %v1919_v8  ;;  %v2063_v12 = vmax.f32 %v2015_v9, %v2039_v10  ;;  %v2135_v13 = vld [vmem:[#allocation2 + $0x86] sm:$0x1]  ;;  %v2159_v14 = vld [vmem:[#allocation2 + $0x87] sm:$0x1]  ;;  %1234 = vst.msk [vmem:[#allocation2 + $0x88] sm:$0xff] %vm1216_vm1, %v1161_v3 }
 0x1a6   :  { %v1847_v17 = vmax.f32 %v1823_v7, 0.0  ;;  %v2183_v18 = vmax.f32 %v2135_v13, %v2159_v14  ;;  %v8209_v19 = vpop.f32.mrf.mxu0  ;;  %10462 = vst [vmem:[#allocation15_spill] sm:$0xff] %v8217_v50  ;;  %v2760_v3 = vld [vmem:[#allocation3 + $0x41] sm:$0xff] }
 0x1a7   :  { %v1967_v20 = vmax.f32 %v1943_v11, 0.0  ;;  %v2087_v22 = vmax.f32 %v2063_v12, 0.0  ;;  %v8236_v5 = vld [vmem:[#allocation3 + $0x41] sm:$0xff] }
 0x1a8   :  { %v2207_v23 = vmax.f32 %v2183_v18, 0.0  ;;  %1871 = vst.msk [vmem:[#allocation3 + $0x54] sm:$0x1] %vm1385_vm2, %v1847_v17  ;;  %v8238_v6 = vld [vmem:[#allocation3 + $0x41] sm:$0xff] }
 0x1a9   :  { %1991 = vst.msk [vmem:[#allocation3 + $0x55] sm:$0x1] %vm1385_vm2, %v1967_v20  ;;  %7106 = vmatmul.msk.bf16.gmra.mxu0 %vm558_vm0, %v7664_v16  ;;  %v2950_v10 = vld [vmem:[#allocation3 + $0x42] sm:$0xff] }
 0x1aa   :  { %2111 = vst.msk [vmem:[#allocation3 + $0x56] sm:$0x1] %vm1385_vm2, %v2087_v22  ;;  %v8249_v16 = vld [vmem:[#allocation3 + $0x43] sm:$0xff] }
 0x1ab   :  { %2231 = vst.msk [vmem:[#allocation3 + $0x57] sm:$0x1] %vm1385_vm2, %v2207_v23  ;;  %v8254_v18 = vld [vmem:[#allocation3 + $0x44] sm:$0xff] }
 0x1ac   :  { %v2255_v30 = vld [vmem:[#allocation2 + $0x88] sm:$0x1]  ;;  %v2279_v31 = vld [vmem:[#allocation2 + $0x89] sm:$0x1]  ;;  %v2375_v32 = vld [vmem:[#allocation2 + $0x8a] sm:$0x1] }
 0x1ad   :  { %v2303_v33 = vmax.f32 %v2255_v30, %v2279_v31  ;;  %v2399_v34 = vld [vmem:[#allocation2 + $0x8b] sm:$0x1]  ;;  %v2495_v35 = vld [vmem:[#allocation2 + $0x8c] sm:$0x1]  ;;  %v2519_v36 = vld [vmem:[#allocation2 + $0x8d] sm:$0x1]  ;;  %v875_v31 = vadd.f32 %v8198_v62, %v8209_v19 }
 0x1ae   :  { %v2423_v37 = vmax.f32 %v2375_v32, %v2399_v34  ;;  %v2543_v38 = vmax.f32 %v2495_v35, %v2519_v36  ;;  %v2615_v39 = vld [vmem:[#allocation2 + $0x8e] sm:$0x1]  ;;  %v2639_v40 = vld [vmem:[#allocation2 + $0x8f] sm:$0x1]  ;;  %v876_v41 = vpop.f32.mrf.mxu0  ;;  %10466 = vst [vmem:[#allocation19_spill] sm:$0xff] %v8236_v5  ;;  %v7666_v34 = vld [vmem:[%s10377_s0 + $0xe0] sm:$0xff] }
 0x1af   :  { %v2663_v42 = vmax.f32 %v2615_v39, %v2639_v40  ;;  %v2327_v43 = vmax.f32 %v2303_v33, 0.0  ;;  %10467 = vst [vmem:[#allocation20_spill] sm:$0xff] %v8238_v6  ;;  %v877_v36 = vadd.f32 %v8198_v62, %v876_v41 }
 0x1b0   :  { %v2447_v44 = vmax.f32 %v2423_v37, 0.0  ;;  %v2567_v45 = vmax.f32 %v2543_v38, 0.0  ;;  %10470 = vst [vmem:[#allocation23_spill] sm:$0xff] %v8249_v16 }
 0x1b1   :  { %2351 = vst.msk [vmem:[#allocation3 + $0x58] sm:$0x1] %vm1385_vm2, %v2327_v43  ;;  %v2687_v51 = vmax.f32 %v2663_v42, 0.0 }
 0x1b2   :  { %v2735_v53 = vld [vmem:[#allocation3 + $0x50] sm:$0xff]  ;;  %2471 = vst.msk [vmem:[#allocation3 + $0x59] sm:$0x1] %vm1385_vm2, %v2447_v44 }
 0x1b3   :  { %v8222_v54 = vld [vmem:[#allocation3 + $0x50] sm:$0xff]  ;;  %v2748_v59 = vpack.c.bf16 %v2735_v53, %v2734_v49  ;;  %2591 = vst.msk [vmem:[#allocation3 + $0x5a] sm:$0x1] %vm1385_vm2, %v2567_v45 }
 0x1b4   :  { %10464 = vst [vmem:[#allocation17_spill] sm:$0xff] %v8222_v54  ;;  %v8224_v57 = vld [vmem:[#allocation3 + $0x50] sm:$0xff] }
 0x1b5   :  { %10465 = vst [vmem:[#allocation18_spill] sm:$0xff] %v8224_v57  ;;  %7172 = vmatmul.msk.bf16.gmra.mxu2 %vm1216_vm1, %v2748_v59 }
 0x1b6   :  { %2711 = vst.msk [vmem:[#allocation3 + $0x5b] sm:$0x1] %vm1385_vm2, %v2687_v51  ;;  %v879_v2 = vpop.f32.mrf.mxu0 }
 0x1b7   :  { %10472 = vst [vmem:[#allocation25_spill] sm:$0xff] %v8254_v18 }
 0x1b8   :  { %v2761_v15 = vld [vmem:[#allocation3 + $0x51] sm:$0xff] }
 0x1b9   :  { %v8240_v7 = vld [vmem:[#allocation3 + $0x51] sm:$0xff]  ;;  %7107 = vmatmul.msk.bf16.gmra.mxu0 %vm558_vm0, %v7665_v1  ;;  %v2774_v9 = vpack.c.bf16 %v2761_v15, %v2760_v3 }
 0x1ba   :  { %10468 = vst [vmem:[#allocation21_spill] sm:$0xff] %v8240_v7  ;;  %v8242_v8 = vld [vmem:[#allocation3 + $0x51] sm:$0xff] }
 0x1bb   :  { %10469 = vst [vmem:[#allocation22_spill] sm:$0xff] %v8242_v8  ;;  %v2951_v11 = vld [vmem:[#allocation3 + $0x52] sm:$0xff]  ;;  %7160 = vmatmul.msk.bf16.gmra.mxu1 %vm1216_vm1, %v2774_v9 }
 0x1bc   :  { %v2964_v14 = vpack.c.bf16 %v2951_v11, %v2950_v10  ;;  %v8251_v17 = vld [vmem:[#allocation3 + $0x53] sm:$0xff]  ;;  %v880_v10 = vadd.f32 %v8198_v62, %v879_v2 }
 0x1bd   :  { %10471 = vst [vmem:[#allocation24_spill] sm:$0xff] %v8251_v17  ;;  %v8256_v20 = vld [vmem:[#allocation3 + $0x54] sm:$0xff] }
 0x1be   :  { %10473 = vst [vmem:[#allocation26_spill] sm:$0xff] %v8256_v20  ;;  %7186 = vmatmul.msk.bf16.gmra.mxu3 %vm1216_vm1, %v2964_v14  ;;  %v881_v30 = vpop.f32.mrf.mxu0 }
 0x1bf   :  { %v882_v32 = vadd.f32 %v8198_v62, %v881_v30  ;;  %v8277_v30 = vpop.f32.mrf.mxu2 }
 0x1c1   :  { %v1162_v33 = vmax.f32 %v875_v31, %v882_v32  ;;  %v8279_v31 = vpop.f32.mrf.mxu1 }
 0x1c3   :  { %1235 = vst.msk [vmem:[#allocation2 + $0x90] sm:$0xff] %vm1216_vm1, %v1162_v33 }
 0x1c6   :  { %v884_v35 = vpop.f32.mrf.mxu0 }
 0x1c7   :  { %v885_v37 = vadd.f32 %v8198_v62, %v884_v35 }
 0x1c9   :  { %v1163_v38 = vmax.f32 %v877_v36, %v885_v37  ;;  %7108 = vmatmul.msk.bf16.gmra.mxu0 %vm558_vm0, %v7666_v34 }
 0x1ca   :  { %v1295_v39 = vld [vmem:[#allocation2 + $0x90] sm:$0x1]  ;;  %v1319_v40 = vld [vmem:[#allocation2 + $0x91] sm:$0x1]  ;;  %v1416_v19 = vld [vmem:[#allocation2 + $0x92] sm:$0x1] }
 0x1cb   :  { %v1343_v42 = vmax.f32 %v1295_v39, %v1319_v40  ;;  %v1440_v43 = vld [vmem:[#allocation2 + $0x93] sm:$0x1]  ;;  %v1536_v44 = vld [vmem:[#allocation2 + $0x94] sm:$0x1]  ;;  %v1560_v45 = vld [vmem:[#allocation2 + $0x95] sm:$0x1] }
 0x1cc   :  { %v1464_v49 = vmax.f32 %v1416_v19, %v1440_v43  ;;  %v1584_v51 = vmax.f32 %v1536_v44, %v1560_v45  ;;  %v1656_v53 = vld [vmem:[#allocation2 + $0x96] sm:$0x1]  ;;  %v1680_v59 = vld [vmem:[#allocation2 + $0x97] sm:$0x1]  ;;  %1236 = vst.msk [vmem:[#allocation2 + $0x98] sm:$0xff] %vm1216_vm1, %v1163_v38  ;;  %v7667_v43 = vld [vmem:[%s10377_s0 + $0xe8] sm:$0xff] }
 0x1cd   :  { %v1704_v1 = vmax.f32 %v1656_v53, %v1680_v59  ;;  %v1367_v41 = vmax.f32 %v1343_v42, 0.0 }
 0x1ce   :  { %v886_v3 = vpop.f32.mrf.mxu0  ;;  %v1488_v15 = vmax.f32 %v1464_v49, 0.0  ;;  %v1608_v9 = vmax.f32 %v1584_v51, 0.0  ;;  %v8288_v51 = vpop.f32.mrf.mxu3 }
 0x1cf   :  { %v887_v11 = vadd.f32 %v8198_v62, %v886_v3  ;;  %1392 = vst.msk [vmem:[#allocation3 + $0x60] sm:$0x1] %vm1385_vm2, %v1367_v41  ;;  %v1728_v14 = vmax.f32 %v1704_v1, 0.0 }
 0x1d0   :  { %1512 = vst.msk [vmem:[#allocation3 + $0x61] sm:$0x1] %vm1385_vm2, %v1488_v15 }
 0x1d1   :  { %v1164_v32 = vmax.f32 %v880_v10, %v887_v11  ;;  %1632 = vst.msk [vmem:[#allocation3 + $0x62] sm:$0x1] %vm1385_vm2, %v1608_v9 }
 0x1d2   :  { %1752 = vst.msk [vmem:[#allocation3 + $0x63] sm:$0x1] %vm1385_vm2, %v1728_v14 }
 0x1d3   :  { %v1776_v33 = vld [vmem:[#allocation2 + $0x98] sm:$0x1]  ;;  %v1800_v34 = vld [vmem:[#allocation2 + $0x99] sm:$0x1]  ;;  %v1896_v35 = vld [vmem:[#allocation2 + $0x9a] sm:$0x1] }
 0x1d4   :  { %v1824_v2 = vmax.f32 %v1776_v33, %v1800_v34  ;;  %v1920_v36 = vld [vmem:[#allocation2 + $0x9b] sm:$0x1]  ;;  %v2016_v37 = vld [vmem:[#allocation2 + $0x9c] sm:$0x1]  ;;  %v2040_v38 = vld [vmem:[#allocation2 + $0x9d] sm:$0x1] }
 0x1d5   :  { %v1944_v39 = vmax.f32 %v1896_v35, %v1920_v36  ;;  %v2064_v40 = vmax.f32 %v2016_v37, %v2040_v38  ;;  %v2136_v19 = vld [vmem:[#allocation2 + $0x9e] sm:$0x1]  ;;  %v2160_v42 = vld [vmem:[#allocation2 + $0x9f] sm:$0x1]  ;;  %1237 = vst.msk [vmem:[#allocation2 + $0xa0] sm:$0xff] %vm1216_vm1, %v1164_v32 }
 0x1d6   :  { %v1848_v44 = vmax.f32 %v1824_v2, 0.0  ;;  %v2184_v45 = vmax.f32 %v2136_v19, %v2160_v42  ;;  %v889_v49 = vpop.f32.mrf.mxu0 }
 0x1d7   :  { %v1968_v53 = vmax.f32 %v1944_v39, 0.0  ;;  %v2088_v59 = vmax.f32 %v2064_v40, 0.0 }
 0x1d8   :  { %v2208_v1 = vmax.f32 %v2184_v45, 0.0  ;;  %1872 = vst.msk [vmem:[#allocation3 + $0x64] sm:$0x1] %vm1385_vm2, %v1848_v44  ;;  %v2911_v41 = vpop.f32.mrf.mxu2  ;;  %v2830_v3 = vpop.f32.mrf.mxu1 }
 0x1d9   :  { %1992 = vst.msk [vmem:[#allocation3 + $0x65] sm:$0x1] %vm1385_vm2, %v1968_v53  ;;  %v2912_v15 = vadd.f32 %v2911_v41, %v2830_v3  ;;  %7109 = vmatmul.msk.bf16.gmra.mxu0 %vm558_vm0, %v7667_v43  ;;  %v7668_v53 = vld [vmem:[%s10377_s0 + $0xf0] sm:$0xff] }
 0x1da   :  { %2112 = vst.msk [vmem:[#allocation3 + $0x66] sm:$0x1] %vm1385_vm2, %v2088_v59  ;;  %v8309_v3 = vld [vmem:[#allocation3 + $0x54] sm:$0xff] }
 0x1db   :  { %2232 = vst.msk [vmem:[#allocation3 + $0x67] sm:$0x1] %vm1385_vm2, %v2208_v1  ;;  %v8305_v1 = vld [vmem:[#allocation3 + $0x53] sm:$0xff] }
 0x1dc   :  { %v2256_v9 = vld [vmem:[#allocation2 + $0xa0] sm:$0x1]  ;;  %v2280_v10 = vld [vmem:[#allocation2 + $0xa1] sm:$0x1]  ;;  %v2376_v11 = vld [vmem:[#allocation2 + $0xa2] sm:$0x1] }
 0x1dd   :  { %v2304_v14 = vmax.f32 %v2256_v9, %v2280_v10  ;;  %v2400_v32 = vld [vmem:[#allocation2 + $0xa3] sm:$0x1]  ;;  %v2496_v33 = vld [vmem:[#allocation2 + $0xa4] sm:$0x1]  ;;  %v2520_v34 = vld [vmem:[#allocation2 + $0xa5] sm:$0x1] }
 0x1de   :  { %v2424_v35 = vmax.f32 %v2376_v11, %v2400_v32  ;;  %v2544_v2 = vmax.f32 %v2496_v33, %v2520_v34  ;;  %v2616_v36 = vld [vmem:[#allocation2 + $0xa6] sm:$0x1]  ;;  %v2640_v37 = vld [vmem:[#allocation2 + $0xa7] sm:$0x1]  ;;  %v891_v38 = vpop.f32.mrf.mxu0  ;;  %10474 = vst [vmem:[#allocation27_spill] sm:$0xff] %v8309_v3  ;;  %v7669_v34 = vld [vmem:[%s10377_s0 + $0xf8] sm:$0xff] }
 0x1df   :  { %v2664_v39 = vmax.f32 %v2616_v36, %v2640_v37  ;;  %v2328_v19 = vmax.f32 %v2304_v14, 0.0  ;;  %v890_v14 = vadd.f32 %v8198_v62, %v889_v49 }
 0x1e0   :  { %v3019_v40 = vpop.f32.mrf.mxu3  ;;  %v2448_v43 = vmax.f32 %v2424_v35, 0.0  ;;  %v2568_v44 = vmax.f32 %v2544_v2, 0.0  ;;  %v892_v2 = vadd.f32 %v8198_v62, %v891_v38 }
 0x1e1   :  { %v8295_v42 = vadd.f32 %v3019_v40, %v2912_v15  ;;  %2352 = vst.msk [vmem:[#allocation3 + $0x68] sm:$0x1] %vm1385_vm2, %v2328_v19  ;;  %v2688_v45 = vmax.f32 %v2664_v39, 0.0 }
 0x1e2   :  { %2472 = vst.msk [vmem:[#allocation3 + $0x69] sm:$0x1] %vm1385_vm2, %v2448_v43  ;;  %v8345_v22 = vld [vmem:[#allocation3 + $0x60] sm:$0xff] }
 0x1e3   :  { %2592 = vst.msk [vmem:[#allocation3 + $0x6a] sm:$0x1] %vm1385_vm2, %v2568_v44 }
 0x1e4   :  { %2712 = vst.msk [vmem:[#allocation3 + $0x6b] sm:$0x1] %vm1385_vm2, %v2688_v45 }
 0x1e5   :  { %10477 = vst [vmem:[#allocation30_spill] sm:$0xff] %v8345_v22 }
 0x1e6   :  { %v894_v59 = vpop.f32.mrf.mxu0 }
 0x1e9   :  { %7110 = vmatmul.msk.bf16.gmra.mxu0 %vm558_vm0, %v7668_v53 }
 0x1ea   :  { %v8307_v41 = vld [vmem:[#allocation3 + $0x63] sm:$0xff] }
 0x1eb   :  { %v8311_v15 = vld [vmem:[#allocation3 + $0x64] sm:$0xff] }
 0x1ec   :  { %10475 = vst [vmem:[#allocation28_spill] sm:$0xff] %v8311_v15 }
 0x1ee   :  { %v896_v11 = vpop.f32.mrf.mxu0 }
 0x1ef   :  { %v897_v32 = vadd.f32 %v8198_v62, %v896_v11 }
 0x1f1   :  { %v1165_v33 = vmax.f32 %v890_v14, %v897_v32 }
 0x1f3   :  { %1238 = vst.msk [vmem:[#allocation2 + $0xa8] sm:$0xff] %vm1216_vm1, %v1165_v33 }
 0x1f6   :  { %v899_v35 = vpop.f32.mrf.mxu0 }
 0x1f7   :  { %v900_v36 = vadd.f32 %v8198_v62, %v899_v35 }
 0x1f9   :  { %v1166_v37 = vmax.f32 %v892_v2, %v900_v36  ;;  %7111 = vmatmul.msk.bf16.gmra.mxu0 %vm558_vm0, %v7669_v34  ;;  %v895_v34 = vadd.f32 %v8198_v62, %v894_v59 }
 0x1fa   :  { %v1296_v39 = vld [vmem:[#allocation2 + $0xa8] sm:$0x1]  ;;  %v1320_v40 = vld [vmem:[#allocation2 + $0xa9] sm:$0x1]  ;;  %v1417_v49 = vld [vmem:[#allocation2 + $0xaa] sm:$0x1] }
 0x1fb   :  { %v1344_v19 = vmax.f32 %v1296_v39, %v1320_v40  ;;  %v1441_v43 = vld [vmem:[#allocation2 + $0xab] sm:$0x1]  ;;  %v1537_v44 = vld [vmem:[#allocation2 + $0xac] sm:$0x1]  ;;  %v1561_v45 = vld [vmem:[#allocation2 + $0xad] sm:$0x1] }
 0x1fc   :  { %v1465_v53 = vmax.f32 %v1417_v49, %v1441_v43  ;;  %v1585_v11 = vmax.f32 %v1537_v44, %v1561_v45  ;;  %v1657_v14 = vld [vmem:[#allocation2 + $0xae] sm:$0x1]  ;;  %v1681_v32 = vld [vmem:[#allocation2 + $0xaf] sm:$0x1]  ;;  %1239 = vst.msk [vmem:[#allocation2 + $0xb0] sm:$0xff] %vm1216_vm1, %v1166_v37 }
 0x1fd   :  { %v1705_v33 = vmax.f32 %v1657_v14, %v1681_v32  ;;  %v1368_v38 = vmax.f32 %v1344_v19, 0.0  ;;  %v7670_v32 = vld [vmem:[%s10377_s0 + $0x100] sm:$0xff] }
 0x1fe   :  { %v901_v23 = vpop.f32.mrf.mxu0  ;;  %v1489_v35 = vmax.f32 %v1465_v53, 0.0  ;;  %v1609_v2 = vmax.f32 %v1585_v11, 0.0 }
 0x1ff   :  { %v902_v36 = vadd.f32 %v8198_v62, %v901_v23  ;;  %1393 = vst.msk [vmem:[#allocation3 + $0x70] sm:$0x1] %vm1385_vm2, %v1368_v38  ;;  %v1729_v39 = vmax.f32 %v1705_v33, 0.0 }
 0x200   :  { %1513 = vst.msk [vmem:[#allocation3 + $0x71] sm:$0x1] %vm1385_vm2, %v1489_v35 }
 0x201   :  { %v1167_v40 = vmax.f32 %v895_v34, %v902_v36  ;;  %1633 = vst.msk [vmem:[#allocation3 + $0x72] sm:$0x1] %vm1385_vm2, %v1609_v2 }
 0x202   :  { %1753 = vst.msk [vmem:[#allocation3 + $0x73] sm:$0x1] %vm1385_vm2, %v1729_v39 }
 0x203   :  { %v1777_v37 = vld [vmem:[#allocation2 + $0xb0] sm:$0x1]  ;;  %v1801_v49 = vld [vmem:[#allocation2 + $0xb1] sm:$0x1]  ;;  %v1897_v19 = vld [vmem:[#allocation2 + $0xb2] sm:$0x1] }
 0x204   :  { %v1825_v43 = vmax.f32 %v1777_v37, %v1801_v49  ;;  %v1921_v44 = vld [vmem:[#allocation2 + $0xb3] sm:$0x1]  ;;  %v2017_v45 = vld [vmem:[#allocation2 + $0xb4] sm:$0x1]  ;;  %v2041_v53 = vld [vmem:[#allocation2 + $0xb5] sm:$0x1] }
 0x205   :  { %v1945_v59 = vmax.f32 %v1897_v19, %v1921_v44  ;;  %v2065_v11 = vmax.f32 %v2017_v45, %v2041_v53  ;;  %v2137_v23 = vld [vmem:[#allocation2 + $0xb6] sm:$0x1]  ;;  %v2161_v14 = vld [vmem:[#allocation2 + $0xb7] sm:$0x1]  ;;  %1240 = vst.msk [vmem:[#allocation2 + $0xb8] sm:$0xff] %vm1216_vm1, %v1167_v40 }
 0x206   :  { %v1849_v33 = vmax.f32 %v1825_v43, 0.0  ;;  %v2185_v38 = vmax.f32 %v2137_v23, %v2161_v14  ;;  %v904_v35 = vpop.f32.mrf.mxu0 }
 0x207   :  { %v1969_v2 = vmax.f32 %v1945_v59, 0.0  ;;  %v2089_v34 = vmax.f32 %v2065_v11, 0.0 }
 0x208   :  { %v2209_v36 = vmax.f32 %v2185_v38, 0.0  ;;  %1873 = vst.msk [vmem:[#allocation3 + $0x74] sm:$0x1] %vm1385_vm2, %v1849_v33 }
 0x209   :  { %1993 = vst.msk [vmem:[#allocation3 + $0x75] sm:$0x1] %vm1385_vm2, %v1969_v2  ;;  %7112 = vmatmul.msk.bf16.gmra.mxu0 %vm558_vm0, %v7670_v32  ;;  %v2736_v2 = vld [vmem:[#allocation3 + $0x60] sm:$0xff] }
 0x20a   :  { %2113 = vst.msk [vmem:[#allocation3 + $0x76] sm:$0x1] %vm1385_vm2, %v2089_v34  ;;  %v8343_v34 = vld [vmem:[#allocation3 + $0x60] sm:$0xff] }
 0x20b   :  { %2233 = vst.msk [vmem:[#allocation3 + $0x77] sm:$0x1] %vm1385_vm2, %v2209_v36 }
 0x20c   :  { %v2257_v39 = vld [vmem:[#allocation2 + $0xb8] sm:$0x1]  ;;  %v2281_v40 = vld [vmem:[#allocation2 + $0xb9] sm:$0x1]  ;;  %v2377_v37 = vld [vmem:[#allocation2 + $0xba] sm:$0x1] }
 0x20d   :  { %v2305_v49 = vmax.f32 %v2257_v39, %v2281_v40  ;;  %v2401_v19 = vld [vmem:[#allocation2 + $0xbb] sm:$0x1]  ;;  %v2497_v43 = vld [vmem:[#allocation2 + $0xbc] sm:$0x1]  ;;  %v2521_v44 = vld [vmem:[#allocation2 + $0xbd] sm:$0x1] }
 0x20e   :  { %v2425_v45 = vmax.f32 %v2377_v37, %v2401_v19  ;;  %v2545_v53 = vmax.f32 %v2497_v43, %v2521_v44  ;;  %v2617_v59 = vld [vmem:[#allocation2 + $0xbe] sm:$0x1]  ;;  %v2641_v11 = vld [vmem:[#allocation2 + $0xbf] sm:$0x1]  ;;  %v906_v23 = vpop.f32.mrf.mxu0  ;;  %10476 = vst [vmem:[#allocation29_spill] sm:$0xff] %v8343_v34  ;;  %v7671_v44 = vld [vmem:[%s10377_s0 + $0x108] sm:$0xff] }
 0x20f   :  { %v2665_v14 = vmax.f32 %v2617_v59, %v2641_v11  ;;  %v2329_v33 = vmax.f32 %v2305_v49, 0.0  ;;  %v8362_v59 = vld [vmem:[#allocation3 + $0x61] sm:$0xff] }
 0x210   :  { %v2449_v38 = vmax.f32 %v2425_v45, 0.0  ;;  %v2569_v32 = vmax.f32 %v2545_v53, 0.0  ;;  %v2762_v53 = vld [vmem:[#allocation3 + $0x61] sm:$0xff]  ;;  %10480 = vst [vmem:[#allocation33_spill] sm:$0xff] %v8362_v59 }
 0x211   :  { %2353 = vst.msk [vmem:[#allocation3 + $0x78] sm:$0x1] %vm1385_vm2, %v2329_v33  ;;  %v2689_v36 = vmax.f32 %v2665_v14, 0.0  ;;  %v8364_v11 = vld [vmem:[#allocation3 + $0x61] sm:$0xff] }
 0x212   :  { %v2737_v39 = vld [vmem:[#allocation3 + $0x70] sm:$0xff]  ;;  %2473 = vst.msk [vmem:[#allocation3 + $0x79] sm:$0x1] %vm1385_vm2, %v2449_v38  ;;  %v8375_v43 = vld [vmem:[#allocation3 + $0x63] sm:$0xff] }
 0x213   :  { %v8348_v40 = vld [vmem:[#allocation3 + $0x70] sm:$0xff]  ;;  %v2749_v19 = vpack.c.bf16 %v2737_v39, %v2736_v2  ;;  %2593 = vst.msk [vmem:[#allocation3 + $0x7a] sm:$0x1] %vm1385_vm2, %v2569_v32  ;;  %v2952_v2 = vld [vmem:[#allocation3 + $0x62] sm:$0xff] }
 0x214   :  { %10478 = vst [vmem:[#allocation31_spill] sm:$0xff] %v8348_v40  ;;  %v8350_v37 = vld [vmem:[#allocation3 + $0x70] sm:$0xff] }
 0x215   :  { %10479 = vst [vmem:[#allocation32_spill] sm:$0xff] %v8350_v37  ;;  %7173 = vmatmul.msk.bf16.gmra.mxu2 %vm1216_vm1, %v2749_v19 }
 0x216   :  { %2713 = vst.msk [vmem:[#allocation3 + $0x7b] sm:$0x1] %vm1385_vm2, %v2689_v36  ;;  %v909_v45 = vpop.f32.mrf.mxu0 }
 0x217   :  { %10481 = vst [vmem:[#allocation34_spill] sm:$0xff] %v8364_v11 }
 0x218   :  { %v2763_v14 = vld [vmem:[#allocation3 + $0x71] sm:$0xff]  ;;  %10484 = vst [vmem:[#allocation37_spill] sm:$0xff] %v8375_v43 }
 0x219   :  { %v8366_v33 = vld [vmem:[#allocation3 + $0x71] sm:$0xff]  ;;  %7113 = vmatmul.msk.bf16.gmra.mxu0 %vm558_vm0, %v7671_v44  ;;  %v2775_v32 = vpack.c.bf16 %v2763_v14, %v2762_v53  ;;  %v905_v53 = vadd.f32 %v8198_v62, %v904_v35 }
 0x21a   :  { %10482 = vst [vmem:[#allocation35_spill] sm:$0xff] %v8366_v33  ;;  %v8368_v38 = vld [vmem:[#allocation3 + $0x71] sm:$0xff] }
 0x21b   :  { %10483 = vst [vmem:[#allocation36_spill] sm:$0xff] %v8368_v38  ;;  %v2953_v36 = vld [vmem:[#allocation3 + $0x72] sm:$0xff]  ;;  %7161 = vmatmul.msk.bf16.gmra.mxu1 %vm1216_vm1, %v2775_v32  ;;  %v907_v32 = vadd.f32 %v8198_v62, %v906_v23 }
 0x21c   :  { %v2965_v13 = vpack.c.bf16 %v2953_v36, %v2952_v2  ;;  %v8377_v61 = vld [vmem:[#allocation3 + $0x73] sm:$0xff] }
 0x21d   :  { %10485 = vst [vmem:[#allocation38_spill] sm:$0xff] %v8377_v61  ;;  %v7672_v2 = vld [vmem:[%s10377_s0 + $0x110] sm:$0xff] }
 0x21e   :  { %7187 = vmatmul.msk.bf16.gmra.mxu3 %vm1216_vm1, %v2965_v13  ;;  %v911_v44 = vpop.f32.mrf.mxu0 }
 0x21f   :  { %v912_v14 = vadd.f32 %v8198_v62, %v911_v44 }
 0x221   :  { %v1168_v39 = vmax.f32 %v905_v53, %v912_v14 }
 0x223   :  { %1241 = vst.msk [vmem:[#allocation2 + $0xc0] sm:$0xff] %vm1216_vm1, %v1168_v39 }
 0x226   :  { %v914_v36 = vpop.f32.mrf.mxu0 }
 0x227   :  { %v915_v19 = vadd.f32 %v8198_v62, %v914_v36 }
 0x229   :  { %v1169_v10 = vmax.f32 %v907_v32, %v915_v19  ;;  %7114 = vmatmul.msk.bf16.gmra.mxu0 %vm558_vm0, %v7672_v2  ;;  %v910_v2 = vadd.f32 %v8198_v62, %v909_v45 }
 0x22a   :  { %v1297_v13 = vld [vmem:[#allocation2 + $0xc0] sm:$0x1]  ;;  %v1321_v49 = vld [vmem:[#allocation2 + $0xc1] sm:$0x1]  ;;  %v1418_v35 = vld [vmem:[#allocation2 + $0xc2] sm:$0x1] }
 0x22b   :  { %v1345_v12 = vmax.f32 %v1297_v13, %v1321_v49  ;;  %v1442_v44 = vld [vmem:[#allocation2 + $0xc3] sm:$0x1]  ;;  %v1538_v53 = vld [vmem:[#allocation2 + $0xc4] sm:$0x1]  ;;  %v1562_v14 = vld [vmem:[#allocation2 + $0xc5] sm:$0x1]  ;;  %v8396_v13 = vpop.f32.mrf.mxu2 }
 0x22c   :  { %v1466_v39 = vmax.f32 %v1418_v35, %v1442_v44  ;;  %v1586_v29 = vmax.f32 %v1538_v53, %v1562_v14  ;;  %v1658_v60 = vld [vmem:[#allocation2 + $0xc6] sm:$0x1]  ;;  %v1682_v4 = vld [vmem:[#allocation2 + $0xc7] sm:$0x1]  ;;  %1242 = vst.msk [vmem:[#allocation2 + $0xc8] sm:$0xff] %vm1216_vm1, %v1169_v10  ;;  %v8398_v35 = vpop.f32.mrf.mxu1 }
 0x22d   :  { %v1706_v58 = vmax.f32 %v1658_v60, %v1682_v4  ;;  %v1369_v23 = vmax.f32 %v1345_v12, 0.0 }
 0x22e   :  { %v916_v9 = vpop.f32.mrf.mxu0  ;;  %v1490_v36 = vmax.f32 %v1466_v39, 0.0  ;;  %v1610_v19 = vmax.f32 %v1586_v29, 0.0 }
 0x22f   :  { %v917_v32 = vadd.f32 %v8198_v62, %v916_v9  ;;  %1394 = vst.msk [vmem:[#allocation3 + $0x80] sm:$0x1] %vm1385_vm2, %v1369_v23  ;;  %v1730_v49 = vmax.f32 %v1706_v58, 0.0  ;;  %v7673_v23 = vld [vmem:[%s10377_s0 + $0x118] sm:$0xff] }
 0x230   :  { %1514 = vst.msk [vmem:[#allocation3 + $0x81] sm:$0x1] %vm1385_vm2, %v1490_v36 }
 0x231   :  { %v1170_v44 = vmax.f32 %v910_v2, %v917_v32  ;;  %1634 = vst.msk [vmem:[#allocation3 + $0x82] sm:$0x1] %vm1385_vm2, %v1610_v19  ;;  %v8407_v32 = vpop.f32.mrf.mxu3 }
 0x232   :  { %1754 = vst.msk [vmem:[#allocation3 + $0x83] sm:$0x1] %vm1385_vm2, %v1730_v49 }
 0x233   :  { %v1778_v4 = vld [vmem:[#allocation2 + $0xc8] sm:$0x1]  ;;  %v1802_v29 = vld [vmem:[#allocation2 + $0xc9] sm:$0x1]  ;;  %v1898_v60 = vld [vmem:[#allocation2 + $0xca] sm:$0x1] }
 0x234   :  { %v1826_v12 = vmax.f32 %v1778_v4, %v1802_v29  ;;  %v1922_v10 = vld [vmem:[#allocation2 + $0xcb] sm:$0x1]  ;;  %v2018_v9 = vld [vmem:[#allocation2 + $0xcc] sm:$0x1]  ;;  %v2042_v45 = vld [vmem:[#allocation2 + $0xcd] sm:$0x1] }
 0x235   :  { %v1946_v53 = vmax.f32 %v1898_v60, %v1922_v10  ;;  %v2066_v58 = vmax.f32 %v2018_v9, %v2042_v45  ;;  %v2138_v14 = vld [vmem:[#allocation2 + $0xce] sm:$0x1]  ;;  %v2162_v39 = vld [vmem:[#allocation2 + $0xcf] sm:$0x1]  ;;  %1243 = vst.msk [vmem:[#allocation2 + $0xd0] sm:$0xff] %vm1216_vm1, %v1170_v44 }
 0x236   :  { %v1850_v36 = vmax.f32 %v1826_v12, 0.0  ;;  %v2186_v19 = vmax.f32 %v2138_v14, %v2162_v39  ;;  %v919_v2 = vpop.f32.mrf.mxu0 }
 0x237   :  { %v1970_v49 = vmax.f32 %v1946_v53, 0.0  ;;  %v2090_v4 = vmax.f32 %v2066_v58, 0.0 }
 0x238   :  { %v2210_v29 = vmax.f32 %v2186_v19, 0.0  ;;  %1874 = vst.msk [vmem:[#allocation3 + $0x84] sm:$0x1] %vm1385_vm2, %v1850_v36  ;;  %v2916_v60 = vpop.f32.mrf.mxu2  ;;  %v2835_v10 = vpop.f32.mrf.mxu1 }
 0x239   :  { %1994 = vst.msk [vmem:[#allocation3 + $0x85] sm:$0x1] %vm1385_vm2, %v1970_v49  ;;  %v2917_v9 = vadd.f32 %v2916_v60, %v2835_v10  ;;  %7115 = vmatmul.msk.bf16.gmra.mxu0 %vm558_vm0, %v7673_v23 }
 0x23a   :  { %2114 = vst.msk [vmem:[#allocation3 + $0x86] sm:$0x1] %vm1385_vm2, %v2090_v4 }
 0x23b   :  { %2234 = vst.msk [vmem:[#allocation3 + $0x87] sm:$0x1] %vm1385_vm2, %v2210_v29 }
 0x23c   :  { %v2258_v44 = vld [vmem:[#allocation2 + $0xd0] sm:$0x1]  ;;  %v2282_v12 = vld [vmem:[#allocation2 + $0xd1] sm:$0x1]  ;;  %v2378_v45 = vld [vmem:[#allocation2 + $0xd2] sm:$0x1] }
 0x23d   :  { %v2306_v14 = vmax.f32 %v2258_v44, %v2282_v12  ;;  %v2402_v53 = vld [vmem:[#allocation2 + $0xd3] sm:$0x1]  ;;  %v2498_v58 = vld [vmem:[#allocation2 + $0xd4] sm:$0x1]  ;;  %v2522_v39 = vld [vmem:[#allocation2 + $0xd5] sm:$0x1] }
 0x23e   :  { %v2426_v19 = vmax.f32 %v2378_v45, %v2402_v53  ;;  %v2546_v36 = vmax.f32 %v2498_v58, %v2522_v39  ;;  %v2618_v28 = vld [vmem:[#allocation2 + $0xd6] sm:$0x1]  ;;  %v2642_v48 = vld [vmem:[#allocation2 + $0xd7] sm:$0x1]  ;;  %v921_v18 = vpop.f32.mrf.mxu0  ;;  %v7674_v44 = vld [vmem:[%s10377_s0 + $0x120] sm:$0xff] }
 0x23f   :  { %v2330_v49 = vmax.f32 %v2306_v14, 0.0  ;;  %v2666_v60 = vmax.f32 %v2618_v28, %v2642_v48  ;;  %v920_v28 = vadd.f32 %v8198_v62, %v919_v2  ;;  %v922_v53 = vadd.f32 %v8198_v62, %v921_v18 }
 0x240   :  { %v2450_v23 = vmax.f32 %v2426_v19, 0.0  ;;  %v2570_v20 = vmax.f32 %v2546_v36, 0.0 }
 0x241   :  { %v3024_v10 = vpop.f32.mrf.mxu3  ;;  %v2690_v29 = vmax.f32 %v2666_v60, 0.0  ;;  %2354 = vst.msk [vmem:[#allocation3 + $0x88] sm:$0x1] %vm1385_vm2, %v2330_v49 }
 0x242   :  { %v8414_v4 = vadd.f32 %v3024_v10, %v2917_v9  ;;  %2474 = vst.msk [vmem:[#allocation3 + $0x89] sm:$0x1] %vm1385_vm2, %v2450_v23 }
 0x243   :  { %2594 = vst.msk [vmem:[#allocation3 + $0x8a] sm:$0x1] %vm1385_vm2, %v2570_v20  ;;  %v7675_v20 = vld [vmem:[%s10377_s0 + $0x128] sm:$0xff] }
 0x244   :  { %2714 = vst.msk [vmem:[#allocation3 + $0x8b] sm:$0x1] %vm1385_vm2, %v2690_v29 }
 0x246   :  { %v924_v12 = vpop.f32.mrf.mxu0 }
 0x249   :  { %7116 = vmatmul.msk.bf16.gmra.mxu0 %vm558_vm0, %v7674_v44 }
 0x24e   :  { %v926_v48 = vpop.f32.mrf.mxu0 }
 0x24f   :  { %v927_v9 = vadd.f32 %v8198_v62, %v926_v48 }
 0x251   :  { %v1171_v45 = vmax.f32 %v920_v28, %v927_v9 }
 0x253   :  { %1244 = vst.msk [vmem:[#allocation2 + $0xd8] sm:$0xff] %vm1216_vm1, %v1171_v45 }
 0x256   :  { %v929_v14 = vpop.f32.mrf.mxu0 }
 0x257   :  { %v930_v58 = vadd.f32 %v8198_v62, %v929_v14 }
 0x259   :  { %v1172_v39 = vmax.f32 %v922_v53, %v930_v58  ;;  %7117 = vmatmul.msk.bf16.gmra.mxu0 %vm558_vm0, %v7675_v20  ;;  %v925_v20 = vadd.f32 %v8198_v62, %v924_v12 }
 0x25a   :  { %v1298_v19 = vld [vmem:[#allocation2 + $0xd8] sm:$0x1]  ;;  %v1322_v36 = vld [vmem:[#allocation2 + $0xd9] sm:$0x1]  ;;  %v1419_v2 = vld [vmem:[#allocation2 + $0xda] sm:$0x1] }
 0x25b   :  { %v1346_v49 = vmax.f32 %v1298_v19, %v1322_v36  ;;  %v1443_v60 = vld [vmem:[#allocation2 + $0xdb] sm:$0x1]  ;;  %v1539_v10 = vld [vmem:[#allocation2 + $0xdc] sm:$0x1]  ;;  %v1563_v23 = vld [vmem:[#allocation2 + $0xdd] sm:$0x1] }
 0x25c   :  { %v1467_v29 = vmax.f32 %v1419_v2, %v1443_v60  ;;  %v1587_v44 = vmax.f32 %v1539_v10, %v1563_v23  ;;  %v1659_v48 = vld [vmem:[#allocation2 + $0xde] sm:$0x1]  ;;  %v1683_v28 = vld [vmem:[#allocation2 + $0xdf] sm:$0x1]  ;;  %1245 = vst.msk [vmem:[#allocation2 + $0xe0] sm:$0xff] %vm1216_vm1, %v1172_v39 }
 0x25d   :  { %v1370_v9 = vmax.f32 %v1346_v49, 0.0  ;;  %v1707_v18 = vmax.f32 %v1659_v48, %v1683_v28 }
 0x25e   :  { %v1491_v45 = vmax.f32 %v1467_v29, 0.0  ;;  %v1611_v14 = vmax.f32 %v1587_v44, 0.0  ;;  %v931_v53 = vpop.f32.mrf.mxu0 }
 0x25f   :  { %v1731_v58 = vmax.f32 %v1707_v18, 0.0  ;;  %1395 = vst.msk [vmem:[#allocation3 + $0x90] sm:$0x1] %vm1385_vm2, %v1370_v9  ;;  %v932_v19 = vadd.f32 %v8198_v62, %v931_v53  ;;  %v7676_v9 = vld [vmem:[%s10377_s0 + $0x130] sm:$0xff] }
 0x260   :  { %1515 = vst.msk [vmem:[#allocation3 + $0x91] sm:$0x1] %vm1385_vm2, %v1491_v45 }
 0x261   :  { %1635 = vst.msk [vmem:[#allocation3 + $0x92] sm:$0x1] %vm1385_vm2, %v1611_v14  ;;  %v1173_v36 = vmax.f32 %v925_v20, %v932_v19 }
 0x262   :  { %1755 = vst.msk [vmem:[#allocation3 + $0x93] sm:$0x1] %vm1385_vm2, %v1731_v58 }
 0x263   :  { %v1779_v39 = vld [vmem:[#allocation2 + $0xe0] sm:$0x1]  ;;  %v1803_v2 = vld [vmem:[#allocation2 + $0xe1] sm:$0x1]  ;;  %v1899_v49 = vld [vmem:[#allocation2 + $0xe2] sm:$0x1] }
 0x264   :  { %v1827_v60 = vmax.f32 %v1779_v39, %v1803_v2  ;;  %v1923_v10 = vld [vmem:[#allocation2 + $0xe3] sm:$0x1]  ;;  %v2019_v23 = vld [vmem:[#allocation2 + $0xe4] sm:$0x1]  ;;  %v2043_v29 = vld [vmem:[#allocation2 + $0xe5] sm:$0x1] }
 0x265   :  { %v1947_v12 = vmax.f32 %v1899_v49, %v1923_v10  ;;  %v2067_v44 = vmax.f32 %v2019_v23, %v2043_v29  ;;  %v2139_v48 = vld [vmem:[#allocation2 + $0xe6] sm:$0x1]  ;;  %v2163_v28 = vld [vmem:[#allocation2 + $0xe7] sm:$0x1]  ;;  %1246 = vst.msk [vmem:[#allocation2 + $0xe8] sm:$0xff] %vm1216_vm1, %v1173_v36 }
 0x266   :  { %v1851_v18 = vmax.f32 %v1827_v60, 0.0  ;;  %v2187_v45 = vmax.f32 %v2139_v48, %v2163_v28  ;;  %v934_v14 = vpop.f32.mrf.mxu0 }
 0x267   :  { %v1971_v53 = vmax.f32 %v1947_v12, 0.0  ;;  %v2091_v20 = vmax.f32 %v2067_v44, 0.0 }
 0x268   :  { %1875 = vst.msk [vmem:[#allocation3 + $0x94] sm:$0x1] %vm1385_vm2, %v1851_v18  ;;  %v2211_v58 = vmax.f32 %v2187_v45, 0.0 }
 0x269   :  { %1995 = vst.msk [vmem:[#allocation3 + $0x95] sm:$0x1] %vm1385_vm2, %v1971_v53  ;;  %7118 = vmatmul.msk.bf16.gmra.mxu0 %vm558_vm0, %v7676_v9 }
 0x26a   :  { %2115 = vst.msk [vmem:[#allocation3 + $0x96] sm:$0x1] %vm1385_vm2, %v2091_v20  ;;  %v8451_v20 = vld [vmem:[#allocation3 + $0x80] sm:$0xff] }
 0x26b   :  { %2235 = vst.msk [vmem:[#allocation3 + $0x97] sm:$0x1] %vm1385_vm2, %v2211_v58 }
 0x26c   :  { %v2259_v19 = vld [vmem:[#allocation2 + $0xe8] sm:$0x1]  ;;  %v2283_v36 = vld [vmem:[#allocation2 + $0xe9] sm:$0x1]  ;;  %v2379_v39 = vld [vmem:[#allocation2 + $0xea] sm:$0x1] }
 0x26d   :  { %v2307_v2 = vmax.f32 %v2259_v19, %v2283_v36  ;;  %v2403_v49 = vld [vmem:[#allocation2 + $0xeb] sm:$0x1]  ;;  %v2499_v60 = vld [vmem:[#allocation2 + $0xec] sm:$0x1]  ;;  %v2523_v10 = vld [vmem:[#allocation2 + $0xed] sm:$0x1] }
 0x26e   :  { %v2427_v23 = vmax.f32 %v2379_v39, %v2403_v49  ;;  %v2547_v29 = vmax.f32 %v2499_v60, %v2523_v10  ;;  %v2619_v12 = vld [vmem:[#allocation2 + $0xee] sm:$0x1]  ;;  %v2643_v44 = vld [vmem:[#allocation2 + $0xef] sm:$0x1]  ;;  %v936_v48 = vpop.f32.mrf.mxu0  ;;  %10486 = vst [vmem:[#allocation39_spill] sm:$0xff] %v8451_v20  ;;  %v7677_v36 = vld [vmem:[%s10377_s0 + $0x138] sm:$0xff] }
 0x26f   :  { %v2331_v28 = vmax.f32 %v2307_v2, 0.0  ;;  %v2667_v18 = vmax.f32 %v2619_v12, %v2643_v44  ;;  %v8462_v2 = vld [vmem:[#allocation3 + $0x81] sm:$0xff] }
 0x270   :  { %v2451_v45 = vmax.f32 %v2427_v23, 0.0  ;;  %v2571_v9 = vmax.f32 %v2547_v29, 0.0  ;;  %10488 = vst [vmem:[#allocation41_spill] sm:$0xff] %v8462_v2  ;;  %v935_v23 = vadd.f32 %v8198_v62, %v934_v14  ;;  %v7678_v44 = vld [vmem:[%s10377_s0 + $0x140] sm:$0xff] }
 0x271   :  { %v2691_v53 = vmax.f32 %v2667_v18, 0.0  ;;  %2355 = vst.msk [vmem:[#allocation3 + $0x98] sm:$0x1] %vm1385_vm2, %v2331_v28  ;;  %v937_v18 = vadd.f32 %v8198_v62, %v936_v48 }
 0x272   :  { %2475 = vst.msk [vmem:[#allocation3 + $0x99] sm:$0x1] %vm1385_vm2, %v2451_v45  ;;  %v8453_v58 = vld [vmem:[#allocation3 + $0x90] sm:$0xff] }
 0x273   :  { %10487 = vst [vmem:[#allocation40_spill] sm:$0xff] %v8453_v58 }
 0x274   :  { %2595 = vst.msk [vmem:[#allocation3 + $0x9a] sm:$0x1] %vm1385_vm2, %v2571_v9 }
 0x275   :  { %2715 = vst.msk [vmem:[#allocation3 + $0x9b] sm:$0x1] %vm1385_vm2, %v2691_v53 }
 0x276   :  { %v939_v39 = vpop.f32.mrf.mxu0 }
 0x278   :  { %v8464_v49 = vld [vmem:[#allocation3 + $0x91] sm:$0xff] }
 0x279   :  { %10489 = vst [vmem:[#allocation42_spill] sm:$0xff] %v8464_v49  ;;  %7119 = vmatmul.msk.bf16.gmra.mxu0 %vm558_vm0, %v7677_v36 }
 0x27e   :  { %v941_v10 = vpop.f32.mrf.mxu0 }
 0x27f   :  { %v942_v29 = vadd.f32 %v8198_v62, %v941_v10 }
 0x281   :  { %v1174_v12 = vmax.f32 %v935_v23, %v942_v29 }
 0x283   :  { %1247 = vst.msk [vmem:[#allocation2 + $0xf0] sm:$0xff] %vm1216_vm1, %v1174_v12 }
 0x286   :  { %v944_v28 = vpop.f32.mrf.mxu0 }
 0x287   :  { %v945_v45 = vadd.f32 %v8198_v62, %v944_v28 }
 0x289   :  { %v1175_v9 = vmax.f32 %v937_v18, %v945_v45  ;;  %7120 = vmatmul.msk.bf16.gmra.mxu0 %vm558_vm0, %v7678_v44  ;;  %v940_v44 = vadd.f32 %v8198_v62, %v939_v39 }
 0x28a   :  { %v1299_v53 = vld [vmem:[#allocation2 + $0xf0] sm:$0x1]  ;;  %v1323_v36 = vld [vmem:[#allocation2 + $0xf1] sm:$0x1]  ;;  %v1420_v14 = vld [vmem:[#allocation2 + $0xf2] sm:$0x1] }
 0x28b   :  { %v1347_v60 = vmax.f32 %v1299_v53, %v1323_v36  ;;  %v1444_v10 = vld [vmem:[#allocation2 + $0xf3] sm:$0x1]  ;;  %v1540_v23 = vld [vmem:[#allocation2 + $0xf4] sm:$0x1]  ;;  %v1564_v29 = vld [vmem:[#allocation2 + $0xf5] sm:$0x1]  ;;  %v8482_v36 = vpop.f32.mrf.mxu2 }
 0x28c   :  { %v1468_v12 = vmax.f32 %v1420_v14, %v1444_v10  ;;  %v1588_v19 = vmax.f32 %v1540_v23, %v1564_v29  ;;  %v1660_v2 = vld [vmem:[#allocation2 + $0xf6] sm:$0x1]  ;;  %v1684_v49 = vld [vmem:[#allocation2 + $0xf7] sm:$0x1]  ;;  %1248 = vst.msk [vmem:[#allocation2 + $0xf8] sm:$0xff] %vm1216_vm1, %v1175_v9  ;;  %v8484_v14 = vpop.f32.mrf.mxu1 }
 0x28d   :  { %v1371_v43 = vmax.f32 %v1347_v60, 0.0  ;;  %v1708_v48 = vmax.f32 %v1660_v2, %v1684_v49 }
 0x28e   :  { %v1492_v61 = vmax.f32 %v1468_v12, 0.0  ;;  %v1612_v28 = vmax.f32 %v1588_v19, 0.0  ;;  %v946_v18 = vpop.f32.mrf.mxu0 }
 0x28f   :  { %v1732_v45 = vmax.f32 %v1708_v48, 0.0  ;;  %1396 = vst.msk [vmem:[#allocation3 + $0xa0] sm:$0x1] %vm1385_vm2, %v1371_v43  ;;  %v947_v53 = vadd.f32 %v8198_v62, %v946_v18 }
 0x290   :  { %1516 = vst.msk [vmem:[#allocation3 + $0xa1] sm:$0x1] %vm1385_vm2, %v1492_v61  ;;  %v7679_v61 = vld [vmem:[%s10377_s0 + $0x148] sm:$0xff] }
 0x291   :  { %1636 = vst.msk [vmem:[#allocation3 + $0xa2] sm:$0x1] %vm1385_vm2, %v1612_v28  ;;  %v1176_v60 = vmax.f32 %v940_v44, %v947_v53  ;;  %v8493_v44 = vpop.f32.mrf.mxu3 }
 0x292   :  { %1756 = vst.msk [vmem:[#allocation3 + $0xa3] sm:$0x1] %vm1385_vm2, %v1732_v45 }
 0x293   :  { %v1780_v19 = vld [vmem:[#allocation2 + $0xf8] sm:$0x1]  ;;  %v1804_v2 = vld [vmem:[#allocation2 + $0xf9] sm:$0x1]  ;;  %v1900_v49 = vld [vmem:[#allocation2 + $0xfa] sm:$0x1] }
 0x294   :  { %v1828_v39 = vmax.f32 %v1780_v19, %v1804_v2  ;;  %v1924_v9 = vld [vmem:[#allocation2 + $0xfb] sm:$0x1]  ;;  %v2020_v10 = vld [vmem:[#allocation2 + $0xfc] sm:$0x1]  ;;  %v2044_v43 = vld [vmem:[#allocation2 + $0xfd] sm:$0x1] }
 0x295   :  { %v1948_v23 = vmax.f32 %v1900_v49, %v1924_v9  ;;  %v2068_v62 = vmax.f32 %v2020_v10, %v2044_v43  ;;  %v2140_v29 = vld [vmem:[#allocation2 + $0xfe] sm:$0x1]  ;;  %v2164_v12 = vld [vmem:[#allocation2 + $0xff] sm:$0x1]  ;;  %1249 = vst.msk [vmem:[#allocation2 + $0x100] sm:$0xff] %vm1216_vm1, %v1176_v60 }
 0x296   :  { %v1852_v48 = vmax.f32 %v1828_v39, 0.0  ;;  %v2188_v28 = vmax.f32 %v2140_v29, %v2164_v12  ;;  %v949_v18 = vpop.f32.mrf.mxu0 }
 0x297   :  { %v1972_v45 = vmax.f32 %v1948_v23, 0.0  ;;  %v2092_v53 = vmax.f32 %v2068_v62, 0.0 }
 0x298   :  { %1876 = vst.msk [vmem:[#allocation3 + $0xa4] sm:$0x1] %vm1385_vm2, %v1852_v48  ;;  %v2212_v19 = vmax.f32 %v2188_v28, 0.0  ;;  %v2921_v2 = vpop.f32.mrf.mxu2  ;;  %v2840_v49 = vpop.f32.mrf.mxu1 }
 0x299   :  { %1996 = vst.msk [vmem:[#allocation3 + $0xa5] sm:$0x1] %vm1385_vm2, %v1972_v45  ;;  %v2922_v9 = vadd.f32 %v2921_v2, %v2840_v49  ;;  %7121 = vmatmul.msk.bf16.gmra.mxu0 %vm558_vm0, %v7679_v61 }
 0x29a   :  { %2116 = vst.msk [vmem:[#allocation3 + $0xa6] sm:$0x1] %vm1385_vm2, %v2092_v53 }
 0x29b   :  { %2236 = vst.msk [vmem:[#allocation3 + $0xa7] sm:$0x1] %vm1385_vm2, %v2212_v19 }
 0x29c   :  { %v2260_v60 = vld [vmem:[#allocation2 + $0x100] sm:$0x1]  ;;  %v2284_v39 = vld [vmem:[#allocation2 + $0x101] sm:$0x1]  ;;  %v2380_v10 = vld [vmem:[#allocation2 + $0x102] sm:$0x1] }
 0x29d   :  { %v2308_v43 = vmax.f32 %v2260_v60, %v2284_v39  ;;  %v2404_v23 = vld [vmem:[#allocation2 + $0x103] sm:$0x1]  ;;  %v2500_v62 = vld [vmem:[#allocation2 + $0x104] sm:$0x1]  ;;  %v2524_v29 = vld [vmem:[#allocation2 + $0x105] sm:$0x1] }
 0x29e   :  { %v2428_v12 = vmax.f32 %v2380_v10, %v2404_v23  ;;  %v2548_v48 = vmax.f32 %v2500_v62, %v2524_v29  ;;  %v2620_v28 = vld [vmem:[#allocation2 + $0x106] sm:$0x1]  ;;  %v2644_v11 = vld [vmem:[#allocation2 + $0x107] sm:$0x1]  ;;  %v951_v38 = vpop.f32.mrf.mxu0  ;;  %v7680_v60 = vld [vmem:[%s10377_s0 + $0x150] sm:$0xff] }
 0x29f   :  { %v2332_v45 = vmax.f32 %v2308_v43, 0.0  ;;  %v2668_v2 = vmax.f32 %v2620_v28, %v2644_v11  ;;  %v7681_v23 = vld [vmem:[%s10377_s0 + $0x158] sm:$0xff] }
 0x2a0   :  { %v2452_v61 = vmax.f32 %v2428_v12, 0.0  ;;  %v2572_v16 = vmax.f32 %v2548_v48, 0.0 }
 0x2a1   :  { %v3029_v49 = vpop.f32.mrf.mxu3  ;;  %v2692_v19 = vmax.f32 %v2668_v2, 0.0  ;;  %2356 = vst.msk [vmem:[#allocation3 + $0xa8] sm:$0x1] %vm1385_vm2, %v2332_v45 }
 0x2a2   :  { %v8500_v53 = vadd.f32 %v3029_v49, %v2922_v9  ;;  %2476 = vst.msk [vmem:[#allocation3 + $0xa9] sm:$0x1] %vm1385_vm2, %v2452_v61  ;;  %v8513_v9 = vld [vmem:[%s10379_s2] ss:$0 sm:$0xff] }
 0x2a3   :  { %2596 = vst.msk [vmem:[#allocation3 + $0xaa] sm:$0x1] %vm1385_vm2, %v2572_v16  ;;  %v950_v10 = vadd.f32 %v8513_v9, %v949_v18  ;;  %v952_v29 = vadd.f32 %v8513_v9, %v951_v38 }
 0x2a4   :  { %2716 = vst.msk [vmem:[#allocation3 + $0xab] sm:$0x1] %vm1385_vm2, %v2692_v19 }
 0x2a6   :  { %v954_v39 = vpop.f32.mrf.mxu0 }
 0x2a9   :  { %7122 = vmatmul.msk.bf16.gmra.mxu0 %vm558_vm0, %v7680_v60 }
 0x2ae   :  { %v956_v11 = vpop.f32.mrf.mxu0 }
 0x2af   :  { %v957_v43 = vadd.f32 %v8513_v9, %v956_v11 }
 0x2b1   :  { %v1177_v16 = vmax.f32 %v950_v10, %v957_v43 }
 0x2b3   :  { %1250 = vst.msk [vmem:[#allocation2 + $0x108] sm:$0xff] %vm1216_vm1, %v1177_v16 }
 0x2b6   :  { %v959_v62 = vpop.f32.mrf.mxu0 }
 0x2b7   :  { %v960_v12 = vadd.f32 %v8513_v9, %v959_v62 }
 0x2b9   :  { %v1178_v48 = vmax.f32 %v952_v29, %v960_v12  ;;  %7123 = vmatmul.msk.bf16.gmra.mxu0 %vm558_vm0, %v7681_v23  ;;  %v955_v23 = vadd.f32 %v8513_v9, %v954_v39 }
 0x2ba   :  { %v1300_v28 = vld [vmem:[#allocation2 + $0x108] sm:$0x1]  ;;  %v1324_v45 = vld [vmem:[#allocation2 + $0x109] sm:$0x1]  ;;  %v1421_v18 = vld [vmem:[#allocation2 + $0x10a] sm:$0x1] }
 0x2bb   :  { %v1348_v2 = vmax.f32 %v1300_v28, %v1324_v45  ;;  %v1445_v49 = vld [vmem:[#allocation2 + $0x10b] sm:$0x1]  ;;  %v1541_v61 = vld [vmem:[#allocation2 + $0x10c] sm:$0x1]  ;;  %v1565_v19 = vld [vmem:[#allocation2 + $0x10d] sm:$0x1] }
 0x2bc   :  { %v1469_v60 = vmax.f32 %v1421_v18, %v1445_v49  ;;  %v1589_v11 = vmax.f32 %v1541_v61, %v1565_v19  ;;  %v1661_v10 = vld [vmem:[#allocation2 + $0x10e] sm:$0x1]  ;;  %v1685_v43 = vld [vmem:[#allocation2 + $0x10f] sm:$0x1]  ;;  %1251 = vst.msk [vmem:[#allocation2 + $0x110] sm:$0xff] %vm1216_vm1, %v1178_v48 }
 0x2bd   :  { %v1372_v16 = vmax.f32 %v1348_v2, 0.0  ;;  %v1709_v38 = vmax.f32 %v1661_v10, %v1685_v43 }
 0x2be   :  { %v1493_v17 = vmax.f32 %v1469_v60, 0.0  ;;  %v1613_v62 = vmax.f32 %v1589_v11, 0.0  ;;  %v961_v29 = vpop.f32.mrf.mxu0 }
 0x2bf   :  { %v1733_v12 = vmax.f32 %v1709_v38, 0.0  ;;  %1397 = vst.msk [vmem:[#allocation3 + $0xb0] sm:$0x1] %vm1385_vm2, %v1372_v16  ;;  %v962_v28 = vadd.f32 %v8513_v9, %v961_v29 }
 0x2c0   :  { %1517 = vst.msk [vmem:[#allocation3 + $0xb1] sm:$0x1] %vm1385_vm2, %v1493_v17  ;;  %v7682_v17 = vld [vmem:[%s10377_s0 + $0x160] sm:$0xff] }
 0x2c1   :  { %1637 = vst.msk [vmem:[#allocation3 + $0xb2] sm:$0x1] %vm1385_vm2, %v1613_v62  ;;  %v1179_v45 = vmax.f32 %v955_v23, %v962_v28 }
 0x2c2   :  { %1757 = vst.msk [vmem:[#allocation3 + $0xb3] sm:$0x1] %vm1385_vm2, %v1733_v12 }
 0x2c3   :  { %v1781_v48 = vld [vmem:[#allocation2 + $0x110] sm:$0x1]  ;;  %v1805_v18 = vld [vmem:[#allocation2 + $0x111] sm:$0x1]  ;;  %v1901_v2 = vld [vmem:[#allocation2 + $0x112] sm:$0x1] }
 0x2c4   :  { %v1829_v49 = vmax.f32 %v1781_v48, %v1805_v18  ;;  %v1925_v61 = vld [vmem:[#allocation2 + $0x113] sm:$0x1]  ;;  %v2021_v19 = vld [vmem:[#allocation2 + $0x114] sm:$0x1]  ;;  %v2045_v60 = vld [vmem:[#allocation2 + $0x115] sm:$0x1] }
 0x2c5   :  { %v1949_v39 = vmax.f32 %v1901_v2, %v1925_v61  ;;  %v2069_v11 = vmax.f32 %v2021_v19, %v2045_v60  ;;  %v2141_v10 = vld [vmem:[#allocation2 + $0x116] sm:$0x1]  ;;  %v2165_v43 = vld [vmem:[#allocation2 + $0x117] sm:$0x1]  ;;  %1252 = vst.msk [vmem:[#allocation2 + $0x118] sm:$0xff] %vm1216_vm1, %v1179_v45 }
 0x2c6   :  { %v1853_v16 = vmax.f32 %v1829_v49, 0.0  ;;  %v2189_v38 = vmax.f32 %v2141_v10, %v2165_v43  ;;  %v964_v62 = vpop.f32.mrf.mxu0 }
 0x2c7   :  { %v1973_v29 = vmax.f32 %v1949_v39, 0.0  ;;  %v2093_v23 = vmax.f32 %v2069_v11, 0.0 }
 0x2c8   :  { %1877 = vst.msk [vmem:[#allocation3 + $0xb4] sm:$0x1] %vm1385_vm2, %v1853_v16  ;;  %v2213_v12 = vmax.f32 %v2189_v38, 0.0 }
 0x2c9   :  { %1997 = vst.msk [vmem:[#allocation3 + $0xb5] sm:$0x1] %vm1385_vm2, %v1973_v29  ;;  %7124 = vmatmul.msk.bf16.gmra.mxu0 %vm558_vm0, %v7682_v17 }
 0x2ca   :  { %2117 = vst.msk [vmem:[#allocation3 + $0xb6] sm:$0x1] %vm1385_vm2, %v2093_v23  ;;  %v7683_v23 = vld [vmem:[%s10377_s0 + $0x168] sm:$0xff] }
 0x2cb   :  { %2237 = vst.msk [vmem:[#allocation3 + $0xb7] sm:$0x1] %vm1385_vm2, %v2213_v12 }
 0x2cc   :  { %v2261_v28 = vld [vmem:[#allocation2 + $0x118] sm:$0x1]  ;;  %v2285_v45 = vld [vmem:[#allocation2 + $0x119] sm:$0x1]  ;;  %v2381_v48 = vld [vmem:[#allocation2 + $0x11a] sm:$0x1] }
 0x2cd   :  { %v2309_v18 = vmax.f32 %v2261_v28, %v2285_v45  ;;  %v2405_v2 = vld [vmem:[#allocation2 + $0x11b] sm:$0x1]  ;;  %v2501_v49 = vld [vmem:[#allocation2 + $0x11c] sm:$0x1]  ;;  %v2525_v61 = vld [vmem:[#allocation2 + $0x11d] sm:$0x1]  ;;  %v965_v45 = vadd.f32 %v8513_v9, %v964_v62 }
 0x2ce   :  { %v2429_v19 = vmax.f32 %v2381_v48, %v2405_v2  ;;  %v2549_v60 = vmax.f32 %v2501_v49, %v2525_v61  ;;  %v2621_v39 = vld [vmem:[#allocation2 + $0x11e] sm:$0x1]  ;;  %v2645_v11 = vld [vmem:[#allocation2 + $0x11f] sm:$0x1]  ;;  %v966_v10 = vpop.f32.mrf.mxu0  ;;  %v7684_v2 = vld [vmem:[%s10377_s0 + $0x170] sm:$0xff] }
 0x2cf   :  { %v2333_v43 = vmax.f32 %v2309_v18, 0.0  ;;  %v2669_v16 = vmax.f32 %v2621_v39, %v2645_v11  ;;  %v967_v61 = vadd.f32 %v8513_v9, %v966_v10 }
 0x2d0   :  { %v2453_v38 = vmax.f32 %v2429_v19, 0.0  ;;  %v2573_v17 = vmax.f32 %v2549_v60, 0.0 }
 0x2d1   :  { %v2693_v29 = vmax.f32 %v2669_v16, 0.0  ;;  %2357 = vst.msk [vmem:[#allocation3 + $0xb8] sm:$0x1] %vm1385_vm2, %v2333_v43 }
 0x2d2   :  { %2477 = vst.msk [vmem:[#allocation3 + $0xb9] sm:$0x1] %vm1385_vm2, %v2453_v38 }
 0x2d3   :  { %2597 = vst.msk [vmem:[#allocation3 + $0xba] sm:$0x1] %vm1385_vm2, %v2573_v17 }
 0x2d4   :  { %2717 = vst.msk [vmem:[#allocation3 + $0xbb] sm:$0x1] %vm1385_vm2, %v2693_v29 }
 0x2d6   :  { %v969_v12 = vpop.f32.mrf.mxu0 }
 0x2d9   :  { %7125 = vmatmul.msk.bf16.gmra.mxu0 %vm558_vm0, %v7683_v23 }
 0x2de   :  { %v971_v28 = vpop.f32.mrf.mxu0 }
 0x2df   :  { %v972_v48 = vadd.f32 %v8513_v9, %v971_v28 }
 0x2e1   :  { %v1180_v18 = vmax.f32 %v965_v45, %v972_v48 }
 0x2e3   :  { %1253 = vst.msk [vmem:[#allocation2 + $0x120] sm:$0xff] %vm1216_vm1, %v1180_v18 }
 0x2e6   :  { %v974_v49 = vpop.f32.mrf.mxu0 }
 0x2e7   :  { %v975_v19 = vadd.f32 %v8513_v9, %v974_v49 }
 0x2e9   :  { %v1181_v60 = vmax.f32 %v967_v61, %v975_v19  ;;  %7126 = vmatmul.msk.bf16.gmra.mxu0 %vm558_vm0, %v7684_v2  ;;  %v970_v2 = vadd.f32 %v8513_v9, %v969_v12 }
 0x2ea   :  { %v1301_v39 = vld [vmem:[#allocation2 + $0x120] sm:$0x1]  ;;  %v1325_v11 = vld [vmem:[#allocation2 + $0x121] sm:$0x1]  ;;  %v1422_v62 = vld [vmem:[#allocation2 + $0x122] sm:$0x1] }
 0x2eb   :  { %v1349_v43 = vmax.f32 %v1301_v39, %v1325_v11  ;;  %v1446_v16 = vld [vmem:[#allocation2 + $0x123] sm:$0x1]  ;;  %v1542_v38 = vld [vmem:[#allocation2 + $0x124] sm:$0x1]  ;;  %v1566_v17 = vld [vmem:[#allocation2 + $0x125] sm:$0x1] }
 0x2ec   :  { %v1470_v29 = vmax.f32 %v1422_v62, %v1446_v16  ;;  %v1590_v23 = vmax.f32 %v1542_v38, %v1566_v17  ;;  %v1662_v28 = vld [vmem:[#allocation2 + $0x126] sm:$0x1]  ;;  %v1686_v45 = vld [vmem:[#allocation2 + $0x127] sm:$0x1]  ;;  %1254 = vst.msk [vmem:[#allocation2 + $0x128] sm:$0xff] %vm1216_vm1, %v1181_v60 }
 0x2ed   :  { %v1710_v48 = vmax.f32 %v1662_v28, %v1686_v45  ;;  %v1373_v10 = vmax.f32 %v1349_v43, 0.0 }
 0x2ee   :  { %v976_v18 = vpop.f32.mrf.mxu0  ;;  %v1494_v49 = vmax.f32 %v1470_v29, 0.0  ;;  %v1614_v61 = vmax.f32 %v1590_v23, 0.0 }
 0x2ef   :  { %v977_v19 = vadd.f32 %v8513_v9, %v976_v18  ;;  %1398 = vst.msk [vmem:[#allocation3 + $0xc0] sm:$0x1] %vm1385_vm2, %v1373_v10  ;;  %v1734_v39 = vmax.f32 %v1710_v48, 0.0  ;;  %v7685_v48 = vld [vmem:[%s10377_s0 + $0x178] sm:$0xff] }
 0x2f0   :  { %1518 = vst.msk [vmem:[#allocation3 + $0xc1] sm:$0x1] %vm1385_vm2, %v1494_v49 }
 0x2f1   :  { %v1182_v11 = vmax.f32 %v970_v2, %v977_v19  ;;  %1638 = vst.msk [vmem:[#allocation3 + $0xc2] sm:$0x1] %vm1385_vm2, %v1614_v61 }
 0x2f2   :  { %1758 = vst.msk [vmem:[#allocation3 + $0xc3] sm:$0x1] %vm1385_vm2, %v1734_v39 }
 0x2f3   :  { %v1782_v60 = vld [vmem:[#allocation2 + $0x128] sm:$0x1]  ;;  %v1806_v62 = vld [vmem:[#allocation2 + $0x129] sm:$0x1]  ;;  %v1902_v43 = vld [vmem:[#allocation2 + $0x12a] sm:$0x1] }
 0x2f4   :  { %v1830_v16 = vmax.f32 %v1782_v60, %v1806_v62  ;;  %v1926_v38 = vld [vmem:[#allocation2 + $0x12b] sm:$0x1]  ;;  %v2022_v17 = vld [vmem:[#allocation2 + $0x12c] sm:$0x1]  ;;  %v2046_v29 = vld [vmem:[#allocation2 + $0x12d] sm:$0x1] }
 0x2f5   :  { %v1950_v12 = vmax.f32 %v1902_v43, %v1926_v38  ;;  %v2070_v23 = vmax.f32 %v2022_v17, %v2046_v29  ;;  %v2142_v28 = vld [vmem:[#allocation2 + $0x12e] sm:$0x1]  ;;  %v2166_v45 = vld [vmem:[#allocation2 + $0x12f] sm:$0x1]  ;;  %1255 = vst.msk [vmem:[#allocation2 + $0x130] sm:$0xff] %vm1216_vm1, %v1182_v11 }
 0x2f6   :  { %v1854_v10 = vmax.f32 %v1830_v16, 0.0  ;;  %v2190_v18 = vmax.f32 %v2142_v28, %v2166_v45  ;;  %v979_v49 = vpop.f32.mrf.mxu0 }
 0x2f7   :  { %v1974_v61 = vmax.f32 %v1950_v12, 0.0  ;;  %v2094_v2 = vmax.f32 %v2070_v23, 0.0 }
 0x2f8   :  { %v2214_v19 = vmax.f32 %v2190_v18, 0.0  ;;  %1878 = vst.msk [vmem:[#allocation3 + $0xc4] sm:$0x1] %vm1385_vm2, %v1854_v10 }
 0x2f9   :  { %1998 = vst.msk [vmem:[#allocation3 + $0xc5] sm:$0x1] %vm1385_vm2, %v1974_v61  ;;  %7127 = vmatmul.msk.bf16.gmra.mxu0 %vm558_vm0, %v7685_v48 }
 0x2fa   :  { %2118 = vst.msk [vmem:[#allocation3 + $0xc6] sm:$0x1] %vm1385_vm2, %v2094_v2  ;;  %v7686_v2 = vld [vmem:[%s10377_s0 + $0x180] sm:$0xff] }
 0x2fb   :  { %2238 = vst.msk [vmem:[#allocation3 + $0xc7] sm:$0x1] %vm1385_vm2, %v2214_v19 }
 0x2fc   :  { %v2262_v39 = vld [vmem:[#allocation2 + $0x130] sm:$0x1]  ;;  %v2286_v11 = vld [vmem:[#allocation2 + $0x131] sm:$0x1]  ;;  %v2382_v60 = vld [vmem:[#allocation2 + $0x132] sm:$0x1] }
 0x2fd   :  { %v2310_v62 = vmax.f32 %v2262_v39, %v2286_v11  ;;  %v2406_v43 = vld [vmem:[#allocation2 + $0x133] sm:$0x1]  ;;  %v2502_v16 = vld [vmem:[#allocation2 + $0x134] sm:$0x1]  ;;  %v2526_v38 = vld [vmem:[#allocation2 + $0x135] sm:$0x1]  ;;  %v980_v11 = vadd.f32 %v8513_v9, %v979_v49 }
 0x2fe   :  { %v2430_v17 = vmax.f32 %v2382_v60, %v2406_v43  ;;  %v2550_v29 = vmax.f32 %v2502_v16, %v2526_v38  ;;  %v2622_v12 = vld [vmem:[#allocation2 + $0x136] sm:$0x1]  ;;  %v2646_v23 = vld [vmem:[#allocation2 + $0x137] sm:$0x1]  ;;  %v981_v28 = vpop.f32.mrf.mxu0  ;;  %v7687_v43 = vld [vmem:[%s10377_s0 + $0x188] sm:$0xff] }
 0x2ff   :  { %v2670_v45 = vmax.f32 %v2622_v12, %v2646_v23  ;;  %v2334_v10 = vmax.f32 %v2310_v62, 0.0  ;;  %v982_v38 = vadd.f32 %v8513_v9, %v981_v28 }
 0x300   :  { %v2574_v18 = vmax.f32 %v2550_v29, 0.0  ;;  %v2454_v48 = vmax.f32 %v2430_v17, 0.0 }
 0x301   :  { %v2694_v61 = vmax.f32 %v2670_v45, 0.0  ;;  %2358 = vst.msk [vmem:[#allocation3 + $0xc8] sm:$0x1] %vm1385_vm2, %v2334_v10 }
 0x302   :  { %2598 = vst.msk [vmem:[#allocation3 + $0xca] sm:$0x1] %vm1385_vm2, %v2574_v18 }
 0x303   :  { %2718 = vst.msk [vmem:[#allocation3 + $0xcb] sm:$0x1] %vm1385_vm2, %v2694_v61 }
 0x304   :  { %2478 = vst.msk [vmem:[#allocation3 + $0xc9] sm:$0x1] %vm1385_vm2, %v2454_v48 }
 0x306   :  { %v984_v19 = vpop.f32.mrf.mxu0 }
 0x309   :  { %7128 = vmatmul.msk.bf16.gmra.mxu0 %vm558_vm0, %v7686_v2 }
 0x30e   :  { %v986_v39 = vpop.f32.mrf.mxu0 }
 0x30f   :  { %v987_v60 = vadd.f32 %v8513_v9, %v986_v39 }
 0x311   :  { %v1183_v62 = vmax.f32 %v980_v11, %v987_v60 }
 0x313   :  { %1256 = vst.msk [vmem:[#allocation2 + $0x138] sm:$0xff] %vm1216_vm1, %v1183_v62 }
 0x316   :  { %v989_v16 = vpop.f32.mrf.mxu0 }
 0x317   :  { %v990_v17 = vadd.f32 %v8513_v9, %v989_v16 }
 0x319   :  { %v1184_v29 = vmax.f32 %v982_v38, %v990_v17  ;;  %7129 = vmatmul.msk.bf16.gmra.mxu0 %vm558_vm0, %v7687_v43  ;;  %v985_v43 = vadd.f32 %v8513_v9, %v984_v19 }
 0x31a   :  { %v1302_v12 = vld [vmem:[#allocation2 + $0x138] sm:$0x1]  ;;  %v1326_v23 = vld [vmem:[#allocation2 + $0x139] sm:$0x1]  ;;  %v1423_v49 = vld [vmem:[#allocation2 + $0x13a] sm:$0x1] }
 0x31b   :  { %v1350_v45 = vmax.f32 %v1302_v12, %v1326_v23  ;;  %v1447_v10 = vld [vmem:[#allocation2 + $0x13b] sm:$0x1]  ;;  %v1543_v18 = vld [vmem:[#allocation2 + $0x13c] sm:$0x1]  ;;  %v1567_v48 = vld [vmem:[#allocation2 + $0x13d] sm:$0x1] }
 0x31c   :  { %v1471_v61 = vmax.f32 %v1423_v49, %v1447_v10  ;;  %v1591_v2 = vmax.f32 %v1543_v18, %v1567_v48  ;;  %v1663_v39 = vld [vmem:[#allocation2 + $0x13e] sm:$0x1]  ;;  %v1687_v11 = vld [vmem:[#allocation2 + $0x13f] sm:$0x1]  ;;  %1257 = vst.msk [vmem:[#allocation2 + $0x140] sm:$0xff] %vm1216_vm1, %v1184_v29 }
 0x31d   :  { %v1711_v60 = vmax.f32 %v1663_v39, %v1687_v11  ;;  %v1374_v28 = vmax.f32 %v1350_v45, 0.0 }
 0x31e   :  { %v991_v62 = vpop.f32.mrf.mxu0  ;;  %v1495_v16 = vmax.f32 %v1471_v61, 0.0  ;;  %v1615_v38 = vmax.f32 %v1591_v2, 0.0 }
 0x31f   :  { %v992_v17 = vadd.f32 %v8513_v9, %v991_v62  ;;  %1399 = vst.msk [vmem:[#allocation3 + $0xd0] sm:$0x1] %vm1385_vm2, %v1374_v28  ;;  %v1735_v12 = vmax.f32 %v1711_v60, 0.0  ;;  %v7688_v60 = vld [vmem:[%s10377_s0 + $0x190] sm:$0xff] }
 0x320   :  { %1519 = vst.msk [vmem:[#allocation3 + $0xd1] sm:$0x1] %vm1385_vm2, %v1495_v16 }
 0x321   :  { %v1185_v23 = vmax.f32 %v985_v43, %v992_v17  ;;  %1639 = vst.msk [vmem:[#allocation3 + $0xd2] sm:$0x1] %vm1385_vm2, %v1615_v38 }
 0x322   :  { %1759 = vst.msk [vmem:[#allocation3 + $0xd3] sm:$0x1] %vm1385_vm2, %v1735_v12 }
 0x323   :  { %v1783_v29 = vld [vmem:[#allocation2 + $0x140] sm:$0x1]  ;;  %v1807_v49 = vld [vmem:[#allocation2 + $0x141] sm:$0x1]  ;;  %v1903_v45 = vld [vmem:[#allocation2 + $0x142] sm:$0x1] }
 0x324   :  { %v1831_v10 = vmax.f32 %v1783_v29, %v1807_v49  ;;  %v1927_v18 = vld [vmem:[#allocation2 + $0x143] sm:$0x1]  ;;  %v2023_v48 = vld [vmem:[#allocation2 + $0x144] sm:$0x1]  ;;  %v2047_v61 = vld [vmem:[#allocation2 + $0x145] sm:$0x1] }
 0x325   :  { %v1951_v19 = vmax.f32 %v1903_v45, %v1927_v18  ;;  %v2071_v2 = vmax.f32 %v2023_v48, %v2047_v61  ;;  %v2143_v39 = vld [vmem:[#allocation2 + $0x146] sm:$0x1]  ;;  %v2167_v11 = vld [vmem:[#allocation2 + $0x147] sm:$0x1]  ;;  %1258 = vst.msk [vmem:[#allocation2 + $0x148] sm:$0xff] %vm1216_vm1, %v1185_v23 }
 0x326   :  { %v1855_v28 = vmax.f32 %v1831_v10, 0.0  ;;  %v2191_v62 = vmax.f32 %v2143_v39, %v2167_v11  ;;  %v994_v16 = vpop.f32.mrf.mxu0 }
 0x327   :  { %v1975_v38 = vmax.f32 %v1951_v19, 0.0  ;;  %v2095_v43 = vmax.f32 %v2071_v2, 0.0 }
 0x328   :  { %v2215_v17 = vmax.f32 %v2191_v62, 0.0  ;;  %1879 = vst.msk [vmem:[#allocation3 + $0xd4] sm:$0x1] %vm1385_vm2, %v1855_v28 }
 0x329   :  { %1999 = vst.msk [vmem:[#allocation3 + $0xd5] sm:$0x1] %vm1385_vm2, %v1975_v38  ;;  %7130 = vmatmul.msk.bf16.gmra.mxu0 %vm558_vm0, %v7688_v60 }
 0x32a   :  { %2119 = vst.msk [vmem:[#allocation3 + $0xd6] sm:$0x1] %vm1385_vm2, %v2095_v43  ;;  %v2738_v43 = vld [vmem:[#allocation3 + $0xc0] sm:$0xff] }
 0x32b   :  { %2239 = vst.msk [vmem:[#allocation3 + $0xd7] sm:$0x1] %vm1385_vm2, %v2215_v17 }
 0x32c   :  { %v2263_v12 = vld [vmem:[#allocation2 + $0x148] sm:$0x1]  ;;  %v2287_v23 = vld [vmem:[#allocation2 + $0x149] sm:$0x1]  ;;  %v2383_v29 = vld [vmem:[#allocation2 + $0x14a] sm:$0x1] }
 0x32d   :  { %v2311_v49 = vmax.f32 %v2263_v12, %v2287_v23  ;;  %v2407_v45 = vld [vmem:[#allocation2 + $0x14b] sm:$0x1]  ;;  %v2503_v10 = vld [vmem:[#allocation2 + $0x14c] sm:$0x1]  ;;  %v2527_v18 = vld [vmem:[#allocation2 + $0x14d] sm:$0x1] }
 0x32e   :  { %v2431_v48 = vmax.f32 %v2383_v29, %v2407_v45  ;;  %v2551_v61 = vmax.f32 %v2503_v10, %v2527_v18  ;;  %v2623_v19 = vld [vmem:[#allocation2 + $0x14e] sm:$0x1]  ;;  %v2647_v2 = vld [vmem:[#allocation2 + $0x14f] sm:$0x1]  ;;  %v996_v39 = vpop.f32.mrf.mxu0  ;;  %v7689_v23 = vld [vmem:[%s10377_s0 + $0x198] sm:$0xff] }
 0x32f   :  { %v2671_v11 = vmax.f32 %v2623_v19, %v2647_v2  ;;  %v2335_v28 = vmax.f32 %v2311_v49, 0.0  ;;  %v2764_v49 = vld [vmem:[#allocation3 + $0xc1] sm:$0xff]  ;;  %v995_v2 = vadd.f32 %v8513_v9, %v994_v16 }
 0x330   :  { %v2575_v62 = vmax.f32 %v2551_v61, 0.0  ;;  %v2455_v60 = vmax.f32 %v2431_v48, 0.0  ;;  %v2954_v18 = vld [vmem:[#allocation3 + $0xc2] sm:$0xff] }
 0x331   :  { %v2695_v38 = vmax.f32 %v2671_v11, 0.0  ;;  %2359 = vst.msk [vmem:[#allocation3 + $0xd8] sm:$0x1] %vm1385_vm2, %v2335_v28 }
 0x332   :  { %2599 = vst.msk [vmem:[#allocation3 + $0xda] sm:$0x1] %vm1385_vm2, %v2575_v62  ;;  %v2739_v17 = vld [vmem:[#allocation3 + $0xd0] sm:$0xff]  ;;  %v7690_v62 = vld [vmem:[%s10377_s0 + $0x1a0] sm:$0xff] }
 0x333   :  { %2719 = vst.msk [vmem:[#allocation3 + $0xdb] sm:$0x1] %vm1385_vm2, %v2695_v38  ;;  %v2750_v12 = vpack.c.bf16 %v2739_v17, %v2738_v43  ;;  %v997_v38 = vadd.f32 %v8513_v9, %v996_v39 }
 0x334   :  { %2479 = vst.msk [vmem:[#allocation3 + $0xd9] sm:$0x1] %vm1385_vm2, %v2455_v60 }
 0x335   :  { %7174 = vmatmul.msk.bf16.gmra.mxu2 %vm1216_vm1, %v2750_v12 }
 0x336   :  { %v999_v29 = vpop.f32.mrf.mxu0 }
 0x338   :  { %v2765_v45 = vld [vmem:[#allocation3 + $0xd1] sm:$0xff] }
 0x339   :  { %7131 = vmatmul.msk.bf16.gmra.mxu0 %vm558_vm0, %v7689_v23  ;;  %v2776_v10 = vpack.c.bf16 %v2765_v45, %v2764_v49 }
 0x33b   :  { %7162 = vmatmul.msk.bf16.gmra.mxu1 %vm1216_vm1, %v2776_v10  ;;  %v2955_v48 = vld [vmem:[#allocation3 + $0xd2] sm:$0xff] }
 0x33c   :  { %v2966_v61 = vpack.c.bf16 %v2955_v48, %v2954_v18 }
 0x33e   :  { %7188 = vmatmul.msk.bf16.gmra.mxu3 %vm1216_vm1, %v2966_v61  ;;  %v1001_v19 = vpop.f32.mrf.mxu0 }
 0x33f   :  { %v1002_v11 = vadd.f32 %v8513_v9, %v1001_v19 }
 0x341   :  { %v1186_v28 = vmax.f32 %v995_v2, %v1002_v11 }
 0x343   :  { %1259 = vst.msk [vmem:[#allocation2 + $0x150] sm:$0xff] %vm1216_vm1, %v1186_v28 }
 0x346   :  { %v1004_v60 = vpop.f32.mrf.mxu0 }
 0x347   :  { %v1005_v43 = vadd.f32 %v8513_v9, %v1004_v60 }
 0x349   :  { %v1187_v17 = vmax.f32 %v997_v38, %v1005_v43  ;;  %7132 = vmatmul.msk.bf16.gmra.mxu0 %vm558_vm0, %v7690_v62  ;;  %v1000_v62 = vadd.f32 %v8513_v9, %v999_v29 }
 0x34a   :  { %v1303_v12 = vld [vmem:[#allocation2 + $0x150] sm:$0x1]  ;;  %v1327_v23 = vld [vmem:[#allocation2 + $0x151] sm:$0x1]  ;;  %v1424_v16 = vld [vmem:[#allocation2 + $0x152] sm:$0x1] }
 0x34b   :  { %v1351_v49 = vmax.f32 %v1303_v12, %v1327_v23  ;;  %v1448_v45 = vld [vmem:[#allocation2 + $0x153] sm:$0x1]  ;;  %v1544_v10 = vld [vmem:[#allocation2 + $0x154] sm:$0x1]  ;;  %v1568_v18 = vld [vmem:[#allocation2 + $0x155] sm:$0x1] }
 0x34c   :  { %v1472_v48 = vmax.f32 %v1424_v16, %v1448_v45  ;;  %v1592_v61 = vmax.f32 %v1544_v10, %v1568_v18  ;;  %v1664_v19 = vld [vmem:[#allocation2 + $0x156] sm:$0x1]  ;;  %v1688_v2 = vld [vmem:[#allocation2 + $0x157] sm:$0x1]  ;;  %1260 = vst.msk [vmem:[#allocation2 + $0x158] sm:$0xff] %vm1216_vm1, %v1187_v17 }
 0x34d   :  { %v1712_v11 = vmax.f32 %v1664_v19, %v1688_v2  ;;  %v1375_v39 = vmax.f32 %v1351_v49, 0.0 }
 0x34e   :  { %v1006_v28 = vpop.f32.mrf.mxu0  ;;  %v1496_v60 = vmax.f32 %v1472_v48, 0.0  ;;  %v1616_v38 = vmax.f32 %v1592_v61, 0.0 }
 0x34f   :  { %v1007_v43 = vadd.f32 %v8513_v9, %v1006_v28  ;;  %1400 = vst.msk [vmem:[#allocation3 + $0xe0] sm:$0x1] %vm1385_vm2, %v1375_v39  ;;  %v1736_v12 = vmax.f32 %v1712_v11, 0.0  ;;  %v7691_v11 = vld [vmem:[%s10377_s0 + $0x1a8] sm:$0xff] }
 0x350   :  { %1520 = vst.msk [vmem:[#allocation3 + $0xe1] sm:$0x1] %vm1385_vm2, %v1496_v60 }
 0x351   :  { %v1188_v23 = vmax.f32 %v1000_v62, %v1007_v43  ;;  %1640 = vst.msk [vmem:[#allocation3 + $0xe2] sm:$0x1] %vm1385_vm2, %v1616_v38 }
 0x352   :  { %1760 = vst.msk [vmem:[#allocation3 + $0xe3] sm:$0x1] %vm1385_vm2, %v1736_v12 }
 0x353   :  { %v1784_v17 = vld [vmem:[#allocation2 + $0x158] sm:$0x1]  ;;  %v1808_v16 = vld [vmem:[#allocation2 + $0x159] sm:$0x1]  ;;  %v1904_v49 = vld [vmem:[#allocation2 + $0x15a] sm:$0x1] }
 0x354   :  { %v1832_v45 = vmax.f32 %v1784_v17, %v1808_v16  ;;  %v1928_v10 = vld [vmem:[#allocation2 + $0x15b] sm:$0x1]  ;;  %v2024_v18 = vld [vmem:[#allocation2 + $0x15c] sm:$0x1]  ;;  %v2048_v48 = vld [vmem:[#allocation2 + $0x15d] sm:$0x1] }
 0x355   :  { %v1952_v29 = vmax.f32 %v1904_v49, %v1928_v10  ;;  %v2072_v61 = vmax.f32 %v2024_v18, %v2048_v48  ;;  %v2144_v19 = vld [vmem:[#allocation2 + $0x15e] sm:$0x1]  ;;  %v2168_v2 = vld [vmem:[#allocation2 + $0x15f] sm:$0x1]  ;;  %1261 = vst.msk [vmem:[#allocation2 + $0x160] sm:$0xff] %vm1216_vm1, %v1188_v23 }
 0x356   :  { %v1856_v39 = vmax.f32 %v1832_v45, 0.0  ;;  %v2192_v28 = vmax.f32 %v2144_v19, %v2168_v2  ;;  %v1009_v60 = vpop.f32.mrf.mxu0 }
 0x357   :  { %v1976_v38 = vmax.f32 %v1952_v29, 0.0  ;;  %v2096_v62 = vmax.f32 %v2072_v61, 0.0 }
 0x358   :  { %v2216_v43 = vmax.f32 %v2192_v28, 0.0  ;;  %1880 = vst.msk [vmem:[#allocation3 + $0xe4] sm:$0x1] %vm1385_vm2, %v1856_v39 }
 0x359   :  { %2000 = vst.msk [vmem:[#allocation3 + $0xe5] sm:$0x1] %vm1385_vm2, %v1976_v38  ;;  %7133 = vmatmul.msk.bf16.gmra.mxu0 %vm558_vm0, %v7691_v11 }
 0x35a   :  { %2120 = vst.msk [vmem:[#allocation3 + $0xe6] sm:$0x1] %vm1385_vm2, %v2096_v62  ;;  %v7692_v62 = vld [vmem:[%s10377_s0 + $0x1b0] sm:$0xff] }
 0x35b   :  { %2240 = vst.msk [vmem:[#allocation3 + $0xe7] sm:$0x1] %vm1385_vm2, %v2216_v43 }
 0x35c   :  { %v2264_v12 = vld [vmem:[#allocation2 + $0x160] sm:$0x1]  ;;  %v2288_v23 = vld [vmem:[#allocation2 + $0x161] sm:$0x1]  ;;  %v2384_v17 = vld [vmem:[#allocation2 + $0x162] sm:$0x1] }
 0x35d   :  { %v2312_v16 = vmax.f32 %v2264_v12, %v2288_v23  ;;  %v2408_v49 = vld [vmem:[#allocation2 + $0x163] sm:$0x1]  ;;  %v2504_v45 = vld [vmem:[#allocation2 + $0x164] sm:$0x1]  ;;  %v2528_v10 = vld [vmem:[#allocation2 + $0x165] sm:$0x1] }
 0x35e   :  { %v2432_v18 = vmax.f32 %v2384_v17, %v2408_v49  ;;  %v2552_v48 = vmax.f32 %v2504_v45, %v2528_v10  ;;  %v2624_v29 = vld [vmem:[#allocation2 + $0x166] sm:$0x1]  ;;  %v2648_v61 = vld [vmem:[#allocation2 + $0x167] sm:$0x1]  ;;  %v1011_v19 = vpop.f32.mrf.mxu0  ;;  %v8650_v12 = vld [vmem:[#allocation3 + $0xd4] sm:$0xff] }
 0x35f   :  { %v2672_v2 = vmax.f32 %v2624_v29, %v2648_v61  ;;  %v2336_v39 = vmax.f32 %v2312_v16, 0.0  ;;  %10490 = vst [vmem:[#allocation43_spill] sm:$0xff] %v8650_v12  ;;  %v8652_v23 = vld [vmem:[#allocation3 + $0xd3] sm:$0xff] }
 0x360   :  { %v2576_v28 = vmax.f32 %v2552_v48, 0.0  ;;  %v2456_v11 = vmax.f32 %v2432_v18, 0.0  ;;  %v1010_v18 = vadd.f32 %v8513_v9, %v1009_v60  ;;  %v7693_v61 = vld [vmem:[%s10377_s0 + $0x1b8] sm:$0xff] }
 0x361   :  { %v2696_v38 = vmax.f32 %v2672_v2, 0.0  ;;  %2360 = vst.msk [vmem:[#allocation3 + $0xe8] sm:$0x1] %vm1385_vm2, %v2336_v39  ;;  %v1012_v39 = vadd.f32 %v8513_v9, %v1011_v19 }
 0x362   :  { %2600 = vst.msk [vmem:[#allocation3 + $0xea] sm:$0x1] %vm1385_vm2, %v2576_v28 }
 0x363   :  { %2720 = vst.msk [vmem:[#allocation3 + $0xeb] sm:$0x1] %vm1385_vm2, %v2696_v38 }
 0x364   :  { %2480 = vst.msk [vmem:[#allocation3 + $0xe9] sm:$0x1] %vm1385_vm2, %v2456_v11 }
 0x366   :  { %v1014_v43 = vpop.f32.mrf.mxu0 }
 0x369   :  { %7134 = vmatmul.msk.bf16.gmra.mxu0 %vm558_vm0, %v7692_v62 }
 0x36b   :  { %v8654_v17 = vld [vmem:[#allocation3 + $0xe4] sm:$0xff] }
 0x36c   :  { %10491 = vst [vmem:[#allocation44_spill] sm:$0xff] %v8654_v17  ;;  %v8656_v16 = vld [vmem:[#allocation3 + $0xe3] sm:$0xff] }
 0x36e   :  { %v1016_v10 = vpop.f32.mrf.mxu0 }
 0x36f   :  { %v1017_v48 = vadd.f32 %v8513_v9, %v1016_v10 }
 0x371   :  { %v1189_v29 = vmax.f32 %v1010_v18, %v1017_v48 }
 0x373   :  { %1262 = vst.msk [vmem:[#allocation2 + $0x168] sm:$0xff] %vm1216_vm1, %v1189_v29 }
 0x376   :  { %v1019_v2 = vpop.f32.mrf.mxu0 }
 0x377   :  { %v1020_v28 = vadd.f32 %v8513_v9, %v1019_v2 }
 0x379   :  { %v1190_v11 = vmax.f32 %v1012_v39, %v1020_v28  ;;  %7135 = vmatmul.msk.bf16.gmra.mxu0 %vm558_vm0, %v7693_v61  ;;  %v1015_v61 = vadd.f32 %v8513_v9, %v1014_v43 }
 0x37a   :  { %v1304_v38 = vld [vmem:[#allocation2 + $0x168] sm:$0x1]  ;;  %v1328_v62 = vld [vmem:[#allocation2 + $0x169] sm:$0x1]  ;;  %v1425_v60 = vld [vmem:[#allocation2 + $0x16a] sm:$0x1] }
 0x37b   :  { %v1352_v45 = vmax.f32 %v1304_v38, %v1328_v62  ;;  %v1449_v10 = vld [vmem:[#allocation2 + $0x16b] sm:$0x1]  ;;  %v1545_v18 = vld [vmem:[#allocation2 + $0x16c] sm:$0x1]  ;;  %v1569_v48 = vld [vmem:[#allocation2 + $0x16d] sm:$0x1] }
 0x37c   :  { %v1473_v29 = vmax.f32 %v1425_v60, %v1449_v10  ;;  %v1593_v49 = vmax.f32 %v1545_v18, %v1569_v48  ;;  %v1665_v6 = vld [vmem:[#allocation2 + $0x16e] sm:$0x1]  ;;  %v1689_v8 = vld [vmem:[#allocation2 + $0x16f] sm:$0x1]  ;;  %1263 = vst.msk [vmem:[#allocation2 + $0x170] sm:$0xff] %vm1216_vm1, %v1190_v11 }
 0x37d   :  { %v1713_v20 = vmax.f32 %v1665_v6, %v1689_v8  ;;  %v1376_v19 = vmax.f32 %v1352_v45, 0.0 }
 0x37e   :  { %v1021_v58 = vpop.f32.mrf.mxu0  ;;  %v1497_v2 = vmax.f32 %v1473_v29, 0.0  ;;  %v1617_v39 = vmax.f32 %v1593_v49, 0.0 }
 0x37f   :  { %v1022_v28 = vadd.f32 %v8513_v9, %v1021_v58  ;;  %1401 = vst.msk [vmem:[#allocation3 + $0xf0] sm:$0x1] %vm1385_vm2, %v1376_v19  ;;  %v1737_v38 = vmax.f32 %v1713_v20, 0.0  ;;  %v7694_v20 = vld [vmem:[%s10377_s0 + $0x1c0] sm:$0xff] }
 0x380   :  { %1521 = vst.msk [vmem:[#allocation3 + $0xf1] sm:$0x1] %vm1385_vm2, %v1497_v2 }
 0x381   :  { %v1191_v62 = vmax.f32 %v1015_v61, %v1022_v28  ;;  %1641 = vst.msk [vmem:[#allocation3 + $0xf2] sm:$0x1] %vm1385_vm2, %v1617_v39 }
 0x382   :  { %1761 = vst.msk [vmem:[#allocation3 + $0xf3] sm:$0x1] %vm1385_vm2, %v1737_v38 }
 0x383   :  { %v1785_v11 = vld [vmem:[#allocation2 + $0x170] sm:$0x1]  ;;  %v1809_v6 = vld [vmem:[#allocation2 + $0x171] sm:$0x1]  ;;  %v1905_v8 = vld [vmem:[#allocation2 + $0x172] sm:$0x1] }
 0x384   :  { %v1833_v45 = vmax.f32 %v1785_v11, %v1809_v6  ;;  %v1929_v60 = vld [vmem:[#allocation2 + $0x173] sm:$0x1]  ;;  %v2025_v49 = vld [vmem:[#allocation2 + $0x174] sm:$0x1]  ;;  %v2049_v10 = vld [vmem:[#allocation2 + $0x175] sm:$0x1] }
 0x385   :  { %v1953_v43 = vmax.f32 %v1905_v8, %v1929_v60  ;;  %v2073_v18 = vmax.f32 %v2025_v49, %v2049_v10  ;;  %v2145_v58 = vld [vmem:[#allocation2 + $0x176] sm:$0x1]  ;;  %v2169_v48 = vld [vmem:[#allocation2 + $0x177] sm:$0x1]  ;;  %1264 = vst.msk [vmem:[#allocation2 + $0x178] sm:$0xff] %vm1216_vm1, %v1191_v62 }
 0x386   :  { %v1857_v29 = vmax.f32 %v1833_v45, 0.0  ;;  %v2193_v19 = vmax.f32 %v2145_v58, %v2169_v48  ;;  %v1024_v2 = vpop.f32.mrf.mxu0 }
 0x387   :  { %v1977_v39 = vmax.f32 %v1953_v43, 0.0  ;;  %v2097_v61 = vmax.f32 %v2073_v18, 0.0 }
 0x388   :  { %v2217_v28 = vmax.f32 %v2193_v19, 0.0  ;;  %1881 = vst.msk [vmem:[#allocation3 + $0xf4] sm:$0x1] %vm1385_vm2, %v1857_v29 }
 0x389   :  { %2001 = vst.msk [vmem:[#allocation3 + $0xf5] sm:$0x1] %vm1385_vm2, %v1977_v39  ;;  %7136 = vmatmul.msk.bf16.gmra.mxu0 %vm558_vm0, %v7694_v20 }
 0x38a   :  { %2121 = vst.msk [vmem:[#allocation3 + $0xf6] sm:$0x1] %vm1385_vm2, %v2097_v61  ;;  %v2740_v61 = vld [vmem:[#allocation3 + $0xe0] sm:$0xff] }
 0x38b   :  { %2241 = vst.msk [vmem:[#allocation3 + $0xf7] sm:$0x1] %vm1385_vm2, %v2217_v28 }
 0x38c   :  { %v2265_v38 = vld [vmem:[#allocation2 + $0x178] sm:$0x1]  ;;  %v2289_v62 = vld [vmem:[#allocation2 + $0x179] sm:$0x1]  ;;  %v2385_v11 = vld [vmem:[#allocation2 + $0x17a] sm:$0x1] }
 0x38d   :  { %v2313_v6 = vmax.f32 %v2265_v38, %v2289_v62  ;;  %v2409_v8 = vld [vmem:[#allocation2 + $0x17b] sm:$0x1]  ;;  %v2505_v45 = vld [vmem:[#allocation2 + $0x17c] sm:$0x1]  ;;  %v2529_v60 = vld [vmem:[#allocation2 + $0x17d] sm:$0x1] }
 0x38e   :  { %v2433_v49 = vmax.f32 %v2385_v11, %v2409_v8  ;;  %v2553_v10 = vmax.f32 %v2505_v45, %v2529_v60  ;;  %v2625_v43 = vld [vmem:[#allocation2 + $0x17e] sm:$0x1]  ;;  %v2649_v18 = vld [vmem:[#allocation2 + $0x17f] sm:$0x1]  ;;  %v1026_v58 = vpop.f32.mrf.mxu0  ;;  %v8689_v38 = vld [vmem:[#allocation3 + $0xe0] sm:$0xff] }
 0x38f   :  { %v2673_v48 = vmax.f32 %v2625_v43, %v2649_v18  ;;  %v2337_v29 = vmax.f32 %v2313_v6, 0.0  ;;  %10492 = vst [vmem:[#allocation45_spill] sm:$0xff] %v8689_v38  ;;  %v7695_v6 = vld [vmem:[%s10377_s0 + $0x1c8] sm:$0xff] }
 0x390   :  { %v2577_v19 = vmax.f32 %v2553_v10, 0.0  ;;  %v2457_v20 = vmax.f32 %v2433_v49, 0.0  ;;  %v2766_v60 = vld [vmem:[#allocation3 + $0xe1] sm:$0xff] }
 0x391   :  { %v2697_v39 = vmax.f32 %v2673_v48, 0.0  ;;  %2361 = vst.msk [vmem:[#allocation3 + $0xf8] sm:$0x1] %vm1385_vm2, %v2337_v29  ;;  %v8701_v10 = vld [vmem:[#allocation3 + $0xe1] sm:$0xff] }
 0x392   :  { %2601 = vst.msk [vmem:[#allocation3 + $0xfa] sm:$0x1] %vm1385_vm2, %v2577_v19  ;;  %v2741_v28 = vld [vmem:[#allocation3 + $0xf0] sm:$0xff]  ;;  %v2956_v29 = vld [vmem:[#allocation3 + $0xe2] sm:$0xff] }
 0x393   :  { %v8691_v62 = vld [vmem:[#allocation3 + $0xf0] sm:$0xff]  ;;  %2721 = vst.msk [vmem:[#allocation3 + $0xfb] sm:$0x1] %vm1385_vm2, %v2697_v39  ;;  %v2751_v11 = vpack.c.bf16 %v2741_v28, %v2740_v61  ;;  %v1025_v61 = vadd.f32 %v8513_v9, %v1024_v2 }
 0x394   :  { %10493 = vst [vmem:[#allocation46_spill] sm:$0xff] %v8691_v62 }
 0x395   :  { %2481 = vst.msk [vmem:[#allocation3 + $0xf9] sm:$0x1] %vm1385_vm2, %v2457_v20  ;;  %7175 = vmatmul.msk.bf16.gmra.mxu2 %vm1216_vm1, %v2751_v11 }
 0x396   :  { %v1029_v45 = vpop.f32.mrf.mxu0  ;;  %10494 = vst [vmem:[#allocation47_spill] sm:$0xff] %v8701_v10 }
 0x398   :  { %v2767_v49 = vld [vmem:[#allocation3 + $0xf1] sm:$0xff] }
 0x399   :  { %v8703_v43 = vld [vmem:[#allocation3 + $0xf1] sm:$0xff]  ;;  %7137 = vmatmul.msk.bf16.gmra.mxu0 %vm558_vm0, %v7695_v6  ;;  %v2777_v18 = vpack.c.bf16 %v2767_v49, %v2766_v60  ;;  %v1027_v49 = vadd.f32 %v8513_v9, %v1026_v58 }
 0x39a   :  { %10495 = vst [vmem:[#allocation48_spill] sm:$0xff] %v8703_v43  ;;  %v7696_v6 = vld [vmem:[%s10377_s0 + $0x1d0] sm:$0xff] }
 0x39b   :  { %7163 = vmatmul.msk.bf16.gmra.mxu1 %vm1216_vm1, %v2777_v18 }
 0x39c   :  { %v2957_v19 = vld [vmem:[#allocation3 + $0xf2] sm:$0xff] }
 0x39d   :  { %v2967_v20 = vpack.c.bf16 %v2957_v19, %v2956_v29 }
 0x39e   :  { %v1031_v39 = vpop.f32.mrf.mxu0 }
 0x39f   :  { %7189 = vmatmul.msk.bf16.gmra.mxu3 %vm1216_vm1, %v2967_v20  ;;  %v1032_v28 = vadd.f32 %v8513_v9, %v1031_v39 }
 0x3a1   :  { %v1192_v11 = vmax.f32 %v1025_v61, %v1032_v28 }
 0x3a3   :  { %1265 = vst.msk [vmem:[#allocation2 + $0x180] sm:$0xff] %vm1216_vm1, %v1192_v11 }
 0x3a6   :  { %v1034_v60 = vpop.f32.mrf.mxu0 }
 0x3a7   :  { %v1035_v18 = vadd.f32 %v8513_v9, %v1034_v60 }
 0x3a9   :  { %v1193_v29 = vmax.f32 %v1027_v49, %v1035_v18  ;;  %7138 = vmatmul.msk.bf16.gmra.mxu0 %vm558_vm0, %v7696_v6  ;;  %v1030_v6 = vadd.f32 %v8513_v9, %v1029_v45 }
 0x3aa   :  { %v1305_v19 = vld [vmem:[#allocation2 + $0x180] sm:$0x1]  ;;  %v1329_v20 = vld [vmem:[#allocation2 + $0x181] sm:$0x1]  ;;  %v1426_v2 = vld [vmem:[#allocation2 + $0x182] sm:$0x1] }
 0x3ab   :  { %v1353_v48 = vmax.f32 %v1305_v19, %v1329_v20  ;;  %v1450_v39 = vld [vmem:[#allocation2 + $0x183] sm:$0x1]  ;;  %v1546_v61 = vld [vmem:[#allocation2 + $0x184] sm:$0x1]  ;;  %v1570_v28 = vld [vmem:[#allocation2 + $0x185] sm:$0x1]  ;;  %v8723_v20 = vpop.f32.mrf.mxu2 }
 0x3ac   :  { %v1474_v11 = vmax.f32 %v1426_v2, %v1450_v39  ;;  %v1594_v8 = vmax.f32 %v1546_v61, %v1570_v28  ;;  %v1666_v22 = vld [vmem:[#allocation2 + $0x186] sm:$0x1]  ;;  %v1690_v37 = vld [vmem:[#allocation2 + $0x187] sm:$0x1]  ;;  %1266 = vst.msk [vmem:[#allocation2 + $0x188] sm:$0xff] %vm1216_vm1, %v1193_v29  ;;  %v8725_v2 = vpop.f32.mrf.mxu1 }
 0x3ad   :  { %v1714_v52 = vmax.f32 %v1666_v22, %v1690_v37  ;;  %v1377_v58 = vmax.f32 %v1353_v48, 0.0 }
 0x3ae   :  { %v1036_v57 = vpop.f32.mrf.mxu0  ;;  %v1498_v60 = vmax.f32 %v1474_v11, 0.0  ;;  %v1618_v49 = vmax.f32 %v1594_v8, 0.0  ;;  %v7697_v11 = vld [vmem:[%s10377_s0 + $0x1d8] sm:$0xff] }
 0x3af   :  { %v1037_v18 = vadd.f32 %v8513_v9, %v1036_v57  ;;  %1402 = vst.msk [vmem:[#allocation3 + $0x100] sm:$0x1] %vm1385_vm2, %v1377_v58  ;;  %v1738_v19 = vmax.f32 %v1714_v52, 0.0 }
 0x3b0   :  { %1522 = vst.msk [vmem:[#allocation3 + $0x101] sm:$0x1] %vm1385_vm2, %v1498_v60 }
 0x3b1   :  { %v1194_v39 = vmax.f32 %v1030_v6, %v1037_v18  ;;  %1642 = vst.msk [vmem:[#allocation3 + $0x102] sm:$0x1] %vm1385_vm2, %v1618_v49 }
 0x3b2   :  { %1762 = vst.msk [vmem:[#allocation3 + $0x103] sm:$0x1] %vm1385_vm2, %v1738_v19 }
 0x3b3   :  { %v1786_v22 = vld [vmem:[#allocation2 + $0x188] sm:$0x1]  ;;  %v1810_v37 = vld [vmem:[#allocation2 + $0x189] sm:$0x1]  ;;  %v1906_v8 = vld [vmem:[#allocation2 + $0x18a] sm:$0x1] }
 0x3b4   :  { %v1834_v45 = vmax.f32 %v1786_v22, %v1810_v37  ;;  %v1930_v48 = vld [vmem:[#allocation2 + $0x18b] sm:$0x1]  ;;  %v2026_v57 = vld [vmem:[#allocation2 + $0x18c] sm:$0x1]  ;;  %v2050_v9 = vld [vmem:[#allocation2 + $0x18d] sm:$0x1] }
 0x3b5   :  { %v1954_v29 = vmax.f32 %v1906_v8, %v1930_v48  ;;  %v2074_v52 = vmax.f32 %v2026_v57, %v2050_v9  ;;  %v2146_v61 = vld [vmem:[#allocation2 + $0x18e] sm:$0x1]  ;;  %v2170_v28 = vld [vmem:[#allocation2 + $0x18f] sm:$0x1]  ;;  %1267 = vst.msk [vmem:[#allocation2 + $0x190] sm:$0xff] %vm1216_vm1, %v1194_v39  ;;  %v8735_v8 = vpop.f32.mrf.mxu3 }
 0x3b6   :  { %v1858_v58 = vmax.f32 %v1834_v45, 0.0  ;;  %v2194_v60 = vmax.f32 %v2146_v61, %v2170_v28  ;;  %v1039_v49 = vpop.f32.mrf.mxu0 }
 0x3b7   :  { %v1978_v6 = vmax.f32 %v1954_v29, 0.0  ;;  %v2098_v18 = vmax.f32 %v2074_v52, 0.0 }
 0x3b8   :  { %v2218_v19 = vmax.f32 %v2194_v60, 0.0  ;;  %1882 = vst.msk [vmem:[#allocation3 + $0x104] sm:$0x1] %vm1385_vm2, %v1858_v58  ;;  %v2926_v22 = vpop.f32.mrf.mxu2  ;;  %v2845_v37 = vpop.f32.mrf.mxu1 }
 0x3b9   :  { %2002 = vst.msk [vmem:[#allocation3 + $0x105] sm:$0x1] %vm1385_vm2, %v1978_v6  ;;  %v2927_v48 = vadd.f32 %v2926_v22, %v2845_v37  ;;  %7139 = vmatmul.msk.bf16.gmra.mxu0 %vm558_vm0, %v7697_v11 }
 0x3ba   :  { %2122 = vst.msk [vmem:[#allocation3 + $0x106] sm:$0x1] %vm1385_vm2, %v2098_v18 }
 0x3bb   :  { %2242 = vst.msk [vmem:[#allocation3 + $0x107] sm:$0x1] %vm1385_vm2, %v2218_v19 }
 0x3bc   :  { %v2266_v39 = vld [vmem:[#allocation2 + $0x190] sm:$0x1]  ;;  %v2290_v45 = vld [vmem:[#allocation2 + $0x191] sm:$0x1]  ;;  %v2386_v57 = vld [vmem:[#allocation2 + $0x192] sm:$0x1] }
 0x3bd   :  { %v2314_v9 = vmax.f32 %v2266_v39, %v2290_v45  ;;  %v2410_v29 = vld [vmem:[#allocation2 + $0x193] sm:$0x1]  ;;  %v2506_v52 = vld [vmem:[#allocation2 + $0x194] sm:$0x1]  ;;  %v2530_v61 = vld [vmem:[#allocation2 + $0x195] sm:$0x1] }
 0x3be   :  { %v2434_v28 = vmax.f32 %v2386_v57, %v2410_v29  ;;  %v2554_v58 = vmax.f32 %v2506_v52, %v2530_v61  ;;  %v2626_v60 = vld [vmem:[#allocation2 + $0x196] sm:$0x1]  ;;  %v2650_v10 = vld [vmem:[#allocation2 + $0x197] sm:$0x1]  ;;  %v1041_v43 = vpop.f32.mrf.mxu0  ;;  %v7698_v39 = vld [vmem:[%s10377_s0 + $0x1e0] sm:$0xff] }
 0x3bf   :  { %v2674_v6 = vmax.f32 %v2626_v60, %v2650_v10  ;;  %v2338_v22 = vmax.f32 %v2314_v9, 0.0  ;;  %v8751_v45 = vld [vmem:[#allocation3 + $0xf4] sm:$0xff] }
 0x3c0   :  { %v2578_v37 = vmax.f32 %v2554_v58, 0.0  ;;  %v2458_v11 = vmax.f32 %v2434_v28, 0.0  ;;  %10496 = vst [vmem:[#allocation49_spill] sm:$0xff] %v8751_v45  ;;  %v8753_v57 = vld [vmem:[#allocation3 + $0xf3] sm:$0xff] }
 0x3c1   :  { %v2698_v12 = vmax.f32 %v2674_v6, 0.0  ;;  %v3034_v18 = vpop.f32.mrf.mxu3  ;;  %2362 = vst.msk [vmem:[#allocation3 + $0x108] sm:$0x1] %vm1385_vm2, %v2338_v22  ;;  %v8763_v52 = vld [vmem:[#allocation3 + $0xf3] sm:$0xff]  ;;  %v7715_v22 = vld [vmem:[%s10380_s3 + $0x18] sm:$0x10] }
 0x3c2   :  { %2602 = vst.msk [vmem:[#allocation3 + $0x10a] sm:$0x1] %vm1385_vm2, %v2578_v37  ;;  %v8743_v19 = vadd.f32 %v3034_v18, %v2927_v48  ;;  %v8767_v28 = vld [vmem:[#allocation3 + $0xf4] sm:$0xff]  ;;  %v8778_v37 = vld [vmem:[%s10379_s2] ss:$0 sm:$0xff] }
 0x3c3   :  { %2722 = vst.msk [vmem:[#allocation3 + $0x10b] sm:$0x1] %vm1385_vm2, %v2698_v12  ;;  %v7196_v60 = vld [vmem:[%s10380_s3 + $0x18] sm:$0xf]  ;;  %v7699_v12 = vld [vmem:[%s10377_s0 + $0x1e8] sm:$0xff] }
 0x3c4   :  { %2482 = vst.msk [vmem:[#allocation3 + $0x109] sm:$0x1] %vm1385_vm2, %v2458_v11  ;;  %v1040_v11 = vadd.f32 %v8778_v37, %v1039_v49  ;;  %v7197_v48 = vor.u32 %v7715_v22, %v7196_v60 }
 0x3c5   :  { %10498 = vst [vmem:[#allocation51_spill] sm:$0xff] %v8763_v52 }
 0x3c6   :  { %v1044_v10 = vpop.f32.mrf.mxu0  ;;  %10500 = vst [vmem:[#allocation53_spill] sm:$0xff] %v8767_v28  ;;  %v3127_v49 = vsel %vm2812_vm3, %v7197_v48, 0 }
 0x3c7   :  { %3136 = vmatpush.bf16.msrb.mxu1 %v3127_v49 }
 0x3c9   :  { %7140 = vmatmul.msk.bf16.gmra.mxu0 %vm558_vm0, %v7698_v39 }
 0x3cb   :  { %v8755_v9 = vld [vmem:[#allocation3 + $0x104] sm:$0xff] }
 0x3cc   :  { %10497 = vst [vmem:[#allocation50_spill] sm:$0xff] %v8755_v9  ;;  %v8757_v29 = vld [vmem:[#allocation3 + $0x103] sm:$0xff] }
 0x3cd   :  { %v8765_v61 = vld [vmem:[#allocation3 + $0x103] sm:$0xff] }
 0x3ce   :  { %10499 = vst [vmem:[#allocation52_spill] sm:$0xff] %v8765_v61  ;;  %v8769_v58 = vld [vmem:[#allocation3 + $0x104] sm:$0xff]  ;;  %v1046_v6 = vpop.f32.mrf.mxu0 }
 0x3cf   :  { %10501 = vst [vmem:[#allocation54_spill] sm:$0xff] %v8769_v58  ;;  %v1047_v18 = vadd.f32 %v8778_v37, %v1046_v6  ;;  %v1042_v6 = vadd.f32 %v8778_v37, %v1041_v43 }
 0x3d1   :  { %v1195_v39 = vmax.f32 %v1040_v11, %v1047_v18 }
 0x3d3   :  { %1268 = vst.msk [vmem:[#allocation2 + $0x198] sm:$0xff] %vm1216_vm1, %v1195_v39 }
 0x3d6   :  { %v1049_v52 = vpop.f32.mrf.mxu0 }
 0x3d7   :  { %v1050_v11 = vadd.f32 %v8778_v37, %v1049_v52 }
 0x3d9   :  { %v1196_v18 = vmax.f32 %v1042_v6, %v1050_v11  ;;  %7141 = vmatmul.msk.bf16.gmra.mxu0 %vm558_vm0, %v7699_v12  ;;  %v1045_v12 = vadd.f32 %v8778_v37, %v1044_v10 }
 0x3da   :  { %v1306_v39 = vld [vmem:[#allocation2 + $0x198] sm:$0x1]  ;;  %v1330_v61 = vld [vmem:[#allocation2 + $0x199] sm:$0x1]  ;;  %v1427_v28 = vld [vmem:[#allocation2 + $0x19a] sm:$0x1] }
 0x3db   :  { %v1354_v58 = vmax.f32 %v1306_v39, %v1330_v61  ;;  %v1451_v60 = vld [vmem:[#allocation2 + $0x19b] sm:$0x1]  ;;  %v1547_v22 = vld [vmem:[#allocation2 + $0x19c] sm:$0x1]  ;;  %v1571_v17 = vld [vmem:[#allocation2 + $0x19d] sm:$0x1] }
 0x3dc   :  { %v1475_v38 = vmax.f32 %v1427_v28, %v1451_v60  ;;  %v1595_v62 = vmax.f32 %v1547_v22, %v1571_v17  ;;  %v1667_v59 = vld [vmem:[#allocation2 + $0x19e] sm:$0x1]  ;;  %v1691_v33 = vld [vmem:[#allocation2 + $0x19f] sm:$0x1]  ;;  %1269 = vst.msk [vmem:[#allocation2 + $0x1a0] sm:$0xff] %vm1216_vm1, %v1196_v18 }
 0x3dd   :  { %v1715_v43 = vmax.f32 %v1667_v59, %v1691_v33  ;;  %v1378_v48 = vmax.f32 %v1354_v58, 0.0 }
 0x3de   :  { %v1051_v52 = vpop.f32.mrf.mxu0  ;;  %v1499_v49 = vmax.f32 %v1475_v38, 0.0  ;;  %v1619_v6 = vmax.f32 %v1595_v62, 0.0 }
 0x3df   :  { %v1052_v11 = vadd.f32 %v8778_v37, %v1051_v52  ;;  %1403 = vst.msk [vmem:[#allocation3 + $0x110] sm:$0x1] %vm1385_vm2, %v1378_v48  ;;  %v1739_v61 = vmax.f32 %v1715_v43, 0.0  ;;  %v7700_v43 = vld [vmem:[%s10377_s0 + $0x1f0] sm:$0xff] }
 0x3e0   :  { %1523 = vst.msk [vmem:[#allocation3 + $0x111] sm:$0x1] %vm1385_vm2, %v1499_v49 }
 0x3e1   :  { %v1197_v28 = vmax.f32 %v1045_v12, %v1052_v11  ;;  %1643 = vst.msk [vmem:[#allocation3 + $0x112] sm:$0x1] %vm1385_vm2, %v1619_v6 }
 0x3e2   :  { %1763 = vst.msk [vmem:[#allocation3 + $0x113] sm:$0x1] %vm1385_vm2, %v1739_v61 }
 0x3e3   :  { %v1787_v17 = vld [vmem:[#allocation2 + $0x1a0] sm:$0x1]  ;;  %v1811_v59 = vld [vmem:[#allocation2 + $0x1a1] sm:$0x1]  ;;  %v1907_v33 = vld [vmem:[#allocation2 + $0x1a2] sm:$0x1] }
 0x3e4   :  { %v1835_v58 = vmax.f32 %v1787_v17, %v1811_v59  ;;  %v1931_v38 = vld [vmem:[#allocation2 + $0x1a3] sm:$0x1]  ;;  %v2027_v62 = vld [vmem:[#allocation2 + $0x1a4] sm:$0x1]  ;;  %v2051_v18 = vld [vmem:[#allocation2 + $0x1a5] sm:$0x1] }
 0x3e5   :  { %v1955_v10 = vmax.f32 %v1907_v33, %v1931_v38  ;;  %v2075_v39 = vmax.f32 %v2027_v62, %v2051_v18  ;;  %v2147_v60 = vld [vmem:[#allocation2 + $0x1a6] sm:$0x1]  ;;  %v2171_v22 = vld [vmem:[#allocation2 + $0x1a7] sm:$0x1]  ;;  %1270 = vst.msk [vmem:[#allocation2 + $0x1a8] sm:$0xff] %vm1216_vm1, %v1197_v28 }
 0x3e6   :  { %v1859_v48 = vmax.f32 %v1835_v58, 0.0  ;;  %v2195_v52 = vmax.f32 %v2147_v60, %v2171_v22  ;;  %v1054_v49 = vpop.f32.mrf.mxu0 }
 0x3e7   :  { %v1979_v6 = vmax.f32 %v1955_v10, 0.0  ;;  %v2099_v12 = vmax.f32 %v2075_v39, 0.0 }
 0x3e8   :  { %v2219_v11 = vmax.f32 %v2195_v52, 0.0  ;;  %1883 = vst.msk [vmem:[#allocation3 + $0x114] sm:$0x1] %vm1385_vm2, %v1859_v48 }
 0x3e9   :  { %2003 = vst.msk [vmem:[#allocation3 + $0x115] sm:$0x1] %vm1385_vm2, %v1979_v6  ;;  %7142 = vmatmul.msk.bf16.gmra.mxu0 %vm558_vm0, %v7700_v43 }
 0x3ea   :  { %2123 = vst.msk [vmem:[#allocation3 + $0x116] sm:$0x1] %vm1385_vm2, %v2099_v12  ;;  %v8812_v12 = vld [vmem:[#allocation3 + $0x100] sm:$0xff] }
 0x3eb   :  { %2243 = vst.msk [vmem:[#allocation3 + $0x117] sm:$0x1] %vm1385_vm2, %v2219_v11 }
 0x3ec   :  { %v2267_v61 = vld [vmem:[#allocation2 + $0x1a8] sm:$0x1]  ;;  %v2291_v28 = vld [vmem:[#allocation2 + $0x1a9] sm:$0x1]  ;;  %v2387_v17 = vld [vmem:[#allocation2 + $0x1aa] sm:$0x1] }
 0x3ed   :  { %v2315_v59 = vmax.f32 %v2267_v61, %v2291_v28  ;;  %v2411_v33 = vld [vmem:[#allocation2 + $0x1ab] sm:$0x1]  ;;  %v2507_v58 = vld [vmem:[#allocation2 + $0x1ac] sm:$0x1]  ;;  %v2531_v38 = vld [vmem:[#allocation2 + $0x1ad] sm:$0x1] }
 0x3ee   :  { %v2435_v62 = vmax.f32 %v2387_v17, %v2411_v33  ;;  %v2555_v18 = vmax.f32 %v2507_v58, %v2531_v38  ;;  %v2627_v10 = vld [vmem:[#allocation2 + $0x1ae] sm:$0x1]  ;;  %v2651_v39 = vld [vmem:[#allocation2 + $0x1af] sm:$0x1]  ;;  %v1056_v60 = vpop.f32.mrf.mxu0  ;;  %v8818_v61 = vld [vmem:[#allocation3 + $0x100] sm:$0xff] }
 0x3ef   :  { %v2675_v22 = vmax.f32 %v2627_v10, %v2651_v39  ;;  %v2339_v48 = vmax.f32 %v2315_v59, 0.0  ;;  %10502 = vst [vmem:[#allocation55_spill] sm:$0xff] %v8818_v61  ;;  %v2768_v58 = vld [vmem:[#allocation3 + $0x101] sm:$0xff]  ;;  %v1055_v61 = vadd.f32 %v8778_v37, %v1054_v49 }
 0x3f0   :  { %v2579_v52 = vmax.f32 %v2555_v18, 0.0  ;;  %v2459_v43 = vmax.f32 %v2435_v62, 0.0  ;;  %v8829_v38 = vld [vmem:[#allocation3 + $0x101] sm:$0xff] }
 0x3f1   :  { %v2699_v6 = vmax.f32 %v2675_v22, 0.0  ;;  %2363 = vst.msk [vmem:[#allocation3 + $0x118] sm:$0x1] %vm1385_vm2, %v2339_v48  ;;  %v8831_v62 = vld [vmem:[#allocation3 + $0x101] sm:$0xff] }
 0x3f2   :  { %2603 = vst.msk [vmem:[#allocation3 + $0x11a] sm:$0x1] %vm1385_vm2, %v2579_v52  ;;  %v8816_v11 = vld [vmem:[#allocation3 + $0x110] sm:$0xff] }
 0x3f3   :  { %v8820_v28 = vld [vmem:[#allocation3 + $0x110] sm:$0xff]  ;;  %2723 = vst.msk [vmem:[#allocation3 + $0x11b] sm:$0x1] %vm1385_vm2, %v2699_v6  ;;  %v2752_v17 = vpack.c.bf16 %v8816_v11, %v8812_v12 }
 0x3f4   :  { %10503 = vst [vmem:[#allocation56_spill] sm:$0xff] %v8820_v28 }
 0x3f5   :  { %2483 = vst.msk [vmem:[#allocation3 + $0x119] sm:$0x1] %vm1385_vm2, %v2459_v43  ;;  %7176 = vmatmul.msk.bf16.gmra.mxu2 %vm1216_vm1, %v2752_v17  ;;  %v2958_v43 = vld [vmem:[#allocation3 + $0x102] sm:$0xff] }
 0x3f6   :  { %v1059_v33 = vpop.f32.mrf.mxu0  ;;  %10504 = vst [vmem:[#allocation57_spill] sm:$0xff] %v8829_v38 }
 0x3f7   :  { %10505 = vst [vmem:[#allocation58_spill] sm:$0xff] %v8831_v62 }
 0x3f8   :  { %v2769_v18 = vld [vmem:[#allocation3 + $0x111] sm:$0xff] }
 0x3f9   :  { %v8833_v10 = vld [vmem:[#allocation3 + $0x111] sm:$0xff]  ;;  %v2778_v22 = vpack.c.bf16 %v2769_v18, %v2768_v58  ;;  %v1057_v18 = vadd.f32 %v8778_v37, %v1056_v60 }
 0x3fa   :  { %10506 = vst [vmem:[#allocation59_spill] sm:$0xff] %v8833_v10  ;;  %v8835_v39 = vld [vmem:[#allocation3 + $0x111] sm:$0xff] }
 0x3fb   :  { %10507 = vst [vmem:[#allocation60_spill] sm:$0xff] %v8835_v39  ;;  %7164 = vmatmul.msk.bf16.gmra.mxu1 %vm1216_vm1, %v2778_v22 }
 0x3fc   :  { %v2959_v6 = vld [vmem:[#allocation3 + $0x112] sm:$0xff] }
 0x3fd   :  { %v2968_v17 = vpack.c.bf16 %v2959_v6, %v2958_v43 }
 0x3fe   :  { %v1061_v59 = vpop.f32.mrf.mxu0 }
 0x3ff   :  { %7190 = vmatmul.msk.bf16.gmra.mxu3 %vm1216_vm1, %v2968_v17  ;;  %v1062_v28 = vadd.f32 %v8778_v37, %v1061_v59 }
 0x401   :  { %v1198_v3 = vmax.f32 %v1055_v61, %v1062_v28 }
 0x403   :  { %1271 = vst.msk [vmem:[#allocation2 + $0x1b0] sm:$0xff] %vm1216_vm1, %v1198_v3 }
 0x406   :  { %v1064_v58 = vpop.f32.mrf.mxu0 }
 0x407   :  { %v1065_v52 = vadd.f32 %v8778_v37, %v1064_v58 }
 0x409   :  { %v1199_v48 = vmax.f32 %v1057_v18, %v1065_v52  ;;  %v1060_v52 = vadd.f32 %v8778_v37, %v1059_v33  ;;  %v8852_v18 = vpop.f32.mrf.mxu2 }
 0x40a   :  { %v1307_v22 = vld [vmem:[#allocation2 + $0x1b0] sm:$0x1]  ;;  %v1331_v62 = vld [vmem:[#allocation2 + $0x1b1] sm:$0x1]  ;;  %v1428_v39 = vld [vmem:[#allocation2 + $0x1b2] sm:$0x1] }
 0x40b   :  { %v1355_v43 = vmax.f32 %v1307_v22, %v1331_v62  ;;  %v1452_v6 = vld [vmem:[#allocation2 + $0x1b3] sm:$0x1]  ;;  %v1548_v17 = vld [vmem:[#allocation2 + $0x1b4] sm:$0x1]  ;;  %v1572_v38 = vld [vmem:[#allocation2 + $0x1b5] sm:$0x1] }
 0x40c   :  { %v1476_v10 = vmax.f32 %v1428_v39, %v1452_v6  ;;  %v1596_v49 = vmax.f32 %v1548_v17, %v1572_v38  ;;  %v1668_v15 = vld [vmem:[#allocation2 + $0x1b6] sm:$0x1]  ;;  %v1692_v59 = vld [vmem:[#allocation2 + $0x1b7] sm:$0x1]  ;;  %1272 = vst.msk [vmem:[#allocation2 + $0x1b8] sm:$0xff] %vm1216_vm1, %v1199_v48  ;;  %v8854_v39 = vpop.f32.mrf.mxu1 }
 0x40d   :  { %v1716_v3 = vmax.f32 %v1668_v15, %v1692_v59  ;;  %v1379_v61 = vmax.f32 %v1355_v43, 0.0 }
 0x40e   :  { %v1066_v28 = vpop.f32.mrf.mxu0  ;;  %v1500_v60 = vmax.f32 %v1476_v10, 0.0  ;;  %v1620_v34 = vmax.f32 %v1596_v49, 0.0 }
 0x40f   :  { %v1067_v58 = vadd.f32 %v8778_v37, %v1066_v28  ;;  %1404 = vst.msk [vmem:[#allocation3 + $0x120] sm:$0x1] %vm1385_vm2, %v1379_v61  ;;  %v1740_v62 = vmax.f32 %v1716_v3, 0.0 }
 0x410   :  { %1524 = vst.msk [vmem:[#allocation3 + $0x121] sm:$0x1] %vm1385_vm2, %v1500_v60 }
 0x411   :  { %v1200_v38 = vmax.f32 %v1060_v52, %v1067_v58  ;;  %1644 = vst.msk [vmem:[#allocation3 + $0x122] sm:$0x1] %vm1385_vm2, %v1620_v34 }
 0x412   :  { %1764 = vst.msk [vmem:[#allocation3 + $0x123] sm:$0x1] %vm1385_vm2, %v1740_v62 }
 0x413   :  { %v1788_v15 = vld [vmem:[#allocation2 + $0x1b8] sm:$0x1]  ;;  %v1812_v10 = vld [vmem:[#allocation2 + $0x1b9] sm:$0x1]  ;;  %v1908_v48 = vld [vmem:[#allocation2 + $0x1ba] sm:$0x1] }
 0x414   :  { %v1836_v33 = vmax.f32 %v1788_v15, %v1812_v10  ;;  %v1932_v22 = vld [vmem:[#allocation2 + $0x1bb] sm:$0x1]  ;;  %v2028_v43 = vld [vmem:[#allocation2 + $0x1bc] sm:$0x1]  ;;  %v2052_v6 = vld [vmem:[#allocation2 + $0x1bd] sm:$0x1]  ;;  %v8861_v15 = vpop.f32.mrf.mxu3 }
 0x415   :  { %v1956_v17 = vmax.f32 %v1908_v48, %v1932_v22  ;;  %v2076_v49 = vmax.f32 %v2028_v43, %v2052_v6  ;;  %v2148_v59 = vld [vmem:[#allocation2 + $0x1be] sm:$0x1]  ;;  %v2172_v3 = vld [vmem:[#allocation2 + $0x1bf] sm:$0x1]  ;;  %1273 = vst.msk [vmem:[#allocation2 + $0x1c0] sm:$0xff] %vm1216_vm1, %v1200_v38 }
 0x416   :  { %v1860_v61 = vmax.f32 %v1836_v33, 0.0  ;;  %v2196_v28 = vmax.f32 %v2148_v59, %v2172_v3  ;;  %v1069_v60 = vpop.f32.mrf.mxu0 }
 0x417   :  { %v1980_v52 = vmax.f32 %v1956_v17, 0.0  ;;  %v2100_v34 = vmax.f32 %v2076_v49, 0.0 }
 0x418   :  { %v2220_v58 = vmax.f32 %v2196_v28, 0.0  ;;  %1884 = vst.msk [vmem:[#allocation3 + $0x124] sm:$0x1] %vm1385_vm2, %v1860_v61  ;;  %v2931_v62 = vpop.f32.mrf.mxu2  ;;  %v2850_v40 = vpop.f32.mrf.mxu1 }
 0x419   :  { %2004 = vst.msk [vmem:[#allocation3 + $0x125] sm:$0x1] %vm1385_vm2, %v1980_v52  ;;  %v2932_v10 = vadd.f32 %v2931_v62, %v2850_v40 }
 0x41a   :  { %2124 = vst.msk [vmem:[#allocation3 + $0x126] sm:$0x1] %vm1385_vm2, %v2100_v34 }
 0x41b   :  { %2244 = vst.msk [vmem:[#allocation3 + $0x127] sm:$0x1] %vm1385_vm2, %v2220_v58 }
 0x41c   :  { %v2268_v38 = vld [vmem:[#allocation2 + $0x1c0] sm:$0x1]  ;;  %v2292_v48 = vld [vmem:[#allocation2 + $0x1c1] sm:$0x1]  ;;  %v2388_v33 = vld [vmem:[#allocation2 + $0x1c2] sm:$0x1] }
 0x41d   :  { %v2316_v22 = vmax.f32 %v2268_v38, %v2292_v48  ;;  %v2412_v43 = vld [vmem:[#allocation2 + $0x1c3] sm:$0x1]  ;;  %v2508_v6 = vld [vmem:[#allocation2 + $0x1c4] sm:$0x1]  ;;  %v2532_v17 = vld [vmem:[#allocation2 + $0x1c5] sm:$0x1] }
 0x41e   :  { %v2436_v49 = vmax.f32 %v2388_v33, %v2412_v43  ;;  %v2556_v59 = vmax.f32 %v2508_v6, %v2532_v17  ;;  %v2628_v3 = vld [vmem:[#allocation2 + $0x1c6] sm:$0x1]  ;;  %v2652_v61 = vld [vmem:[#allocation2 + $0x1c7] sm:$0x1]  ;;  %v1071_v28 = vpop.f32.mrf.mxu0 }
 0x41f   :  { %v2676_v5 = vmax.f32 %v2628_v3, %v2652_v61  ;;  %v2340_v7 = vmax.f32 %v2316_v22, 0.0  ;;  %v8876_v22 = vld [vmem:[#allocation3 + $0x114] sm:$0xff]  ;;  %v1072_v48 = vadd.f32 %v8778_v37, %v1071_v28 }
 0x420   :  { %v2580_v52 = vmax.f32 %v2556_v59, 0.0  ;;  %v2460_v40 = vmax.f32 %v2436_v49, 0.0  ;;  %10508 = vst [vmem:[#allocation61_spill] sm:$0xff] %v8876_v22  ;;  %v8890_v49 = vld [vmem:[#allocation3 + $0x114] sm:$0xff] }
 0x421   :  { %v2700_v62 = vmax.f32 %v2676_v5, 0.0  ;;  %2364 = vst.msk [vmem:[#allocation3 + $0x128] sm:$0x1] %vm1385_vm2, %v2340_v7  ;;  %v8878_v5 = vld [vmem:[#allocation3 + $0x113] sm:$0xff] }
 0x422   :  { %v3039_v34 = vpop.f32.mrf.mxu3  ;;  %2604 = vst.msk [vmem:[#allocation3 + $0x12a] sm:$0x1] %vm1385_vm2, %v2580_v52  ;;  %v8870_v38 = vld [vmem:[#allocation3 + $0x120] sm:$0xff] }
 0x423   :  { %v8868_v58 = vadd.f32 %v3039_v34, %v2932_v10  ;;  %2724 = vst.msk [vmem:[#allocation3 + $0x12b] sm:$0x1] %vm1385_vm2, %v2700_v62  ;;  %v8884_v10 = vld [vmem:[#allocation3 + $0x113] sm:$0xff]  ;;  %v1070_v62 = vadd.f32 %v8778_v37, %v1069_v60 }
 0x424   :  { %2484 = vst.msk [vmem:[#allocation3 + $0x129] sm:$0x1] %vm1385_vm2, %v2460_v40 }
 0x425   :  { %10510 = vst [vmem:[#allocation63_spill] sm:$0xff] %v8884_v10 }
 0x426   :  { %v1074_v33 = vpop.f32.mrf.mxu0  ;;  %10511 = vst [vmem:[#allocation64_spill] sm:$0xff] %v8890_v49 }
 0x42b   :  { %v8880_v43 = vld [vmem:[#allocation3 + $0x124] sm:$0xff] }
 0x42c   :  { %10509 = vst [vmem:[#allocation62_spill] sm:$0xff] %v8880_v43  ;;  %v8882_v7 = vld [vmem:[#allocation3 + $0x123] sm:$0xff] }
 0x42d   :  { %v8892_v59 = vld [vmem:[#allocation3 + $0x123] sm:$0xff] }
 0x42e   :  { %10512 = vst [vmem:[#allocation65_spill] sm:$0xff] %v8892_v59  ;;  %v8894_v3 = vld [vmem:[#allocation3 + $0x124] sm:$0xff]  ;;  %v1076_v40 = vpop.f32.mrf.mxu0 }
 0x42f   :  { %10513 = vst [vmem:[#allocation66_spill] sm:$0xff] %v8894_v3  ;;  %v1077_v34 = vadd.f32 %v8778_v37, %v1076_v40 }
 0x431   :  { %v1201_v6 = vmax.f32 %v1070_v62, %v1077_v34 }
 0x433   :  { %1274 = vst.msk [vmem:[#allocation2 + $0x1c8] sm:$0xff] %vm1216_vm1, %v1201_v6 }
 0x436   :  { %v1079_v17 = vpop.f32.mrf.mxu0 }
 0x437   :  { %v1080_v26 = vadd.f32 %v8778_v37, %v1079_v17 }
 0x439   :  { %v1202_v27 = vmax.f32 %v1072_v48, %v1080_v26  ;;  %v1075_v26 = vadd.f32 %v8778_v37, %v1074_v33 }
 0x43a   :  { %v1308_v50 = vld [vmem:[#allocation2 + $0x1c8] sm:$0x1]  ;;  %v1332_v54 = vld [vmem:[#allocation2 + $0x1c9] sm:$0x1]  ;;  %v1429_v61 = vld [vmem:[#allocation2 + $0x1ca] sm:$0x1] }
 0x43b   :  { %v1356_v49 = vmax.f32 %v1308_v50, %v1332_v54  ;;  %v1453_v3 = vld [vmem:[#allocation2 + $0x1cb] sm:$0x1]  ;;  %v1549_v52 = vld [vmem:[#allocation2 + $0x1cc] sm:$0x1]  ;;  %v1573_v10 = vld [vmem:[#allocation2 + $0x1cd] sm:$0x1] }
 0x43c   :  { %v1477_v59 = vmax.f32 %v1429_v61, %v1453_v3  ;;  %v1597_v60 = vmax.f32 %v1549_v52, %v1573_v10  ;;  %v1669_v63 = vld [vmem:[#allocation2 + $0x1ce] sm:$0x1]  ;;  %v1693_v40 = vld [vmem:[#allocation2 + $0x1cf] sm:$0x1]  ;;  %1275 = vst.msk [vmem:[#allocation2 + $0x1d0] sm:$0xff] %vm1216_vm1, %v1202_v27 }
 0x43d   :  { %v1717_v6 = vmax.f32 %v1669_v63, %v1693_v40  ;;  %v1380_v62 = vmax.f32 %v1356_v49, 0.0  ;;  %v7210_v54 = vld [vmem:[%s10380_s3 + $0x20] sm:$0xf]  ;;  %v7716_v63 = vld [vmem:[%s10380_s3 + $0x20] sm:$0x10] }
 0x43e   :  { %v1081_v34 = vpop.f32.mrf.mxu0  ;;  %v1501_v28 = vmax.f32 %v1477_v59, 0.0  ;;  %v1621_v0 = vmax.f32 %v1597_v60, 0.0  ;;  %v7211_v10 = vor.u32 %v7716_v63, %v7210_v54  ;;  %v7224_v54 = vld [vmem:[%s10380_s3 + $0x28] sm:$0xf]  ;;  %v7717_v63 = vld [vmem:[%s10380_s3 + $0x28] sm:$0x10] }
 0x43f   :  { %v1082_v48 = vadd.f32 %v8778_v37, %v1081_v34  ;;  %1405 = vst.msk [vmem:[#allocation3 + $0x130] sm:$0x1] %vm1385_vm2, %v1380_v62  ;;  %v1741_v50 = vmax.f32 %v1717_v6, 0.0 }
 0x440   :  { %1525 = vst.msk [vmem:[#allocation3 + $0x131] sm:$0x1] %vm1385_vm2, %v1501_v28  ;;  %v3251_v34 = vsel %vm2812_vm3, %v7211_v10, 0 }
 0x441   :  { %v1203_v27 = vmax.f32 %v1075_v26, %v1082_v48  ;;  %1645 = vst.msk [vmem:[#allocation3 + $0x132] sm:$0x1] %vm1385_vm2, %v1621_v0  ;;  %3260 = vmatpush.bf16.msrb.mxu2 %v3251_v34 }
 0x442   :  { %1765 = vst.msk [vmem:[#allocation3 + $0x133] sm:$0x1] %vm1385_vm2, %v1741_v50 }
 0x443   :  { %v1789_v33 = vld [vmem:[#allocation2 + $0x1d0] sm:$0x1]  ;;  %v1813_v17 = vld [vmem:[#allocation2 + $0x1d1] sm:$0x1]  ;;  %v1909_v49 = vld [vmem:[#allocation2 + $0x1d2] sm:$0x1] }
 0x444   :  { %v1837_v59 = vmax.f32 %v1789_v33, %v1813_v17  ;;  %v1933_v3 = vld [vmem:[#allocation2 + $0x1d3] sm:$0x1]  ;;  %v2029_v61 = vld [vmem:[#allocation2 + $0x1d4] sm:$0x1]  ;;  %v2053_v52 = vld [vmem:[#allocation2 + $0x1d5] sm:$0x1] }
 0x445   :  { %v1957_v60 = vmax.f32 %v1909_v49, %v1933_v3  ;;  %v2077_v40 = vmax.f32 %v2029_v61, %v2053_v52  ;;  %v2149_v6 = vld [vmem:[#allocation2 + $0x1d6] sm:$0x1]  ;;  %v2173_v62 = vld [vmem:[#allocation2 + $0x1d7] sm:$0x1]  ;;  %1276 = vst.msk [vmem:[#allocation2 + $0x1d8] sm:$0xff] %vm1216_vm1, %v1203_v27  ;;  %v7225_v27 = vor.u32 %v7717_v63, %v7224_v54 }
 0x446   :  { %v1861_v28 = vmax.f32 %v1837_v59, 0.0  ;;  %v2197_v0 = vmax.f32 %v2149_v6, %v2173_v62  ;;  %v1084_v26 = vpop.f32.mrf.mxu0 }
 0x447   :  { %v1981_v48 = vmax.f32 %v1957_v60, 0.0  ;;  %v2101_v50 = vmax.f32 %v2077_v40, 0.0  ;;  %v3376_v10 = vsel %vm2812_vm3, %v7225_v27, 0  ;;  %v8935_v27 = vld [vmem:[#allocation3 + $0x120] sm:$0xff] }
 0x448   :  { %v2221_v33 = vmax.f32 %v2197_v0, 0.0  ;;  %1885 = vst.msk [vmem:[#allocation3 + $0x134] sm:$0x1] %vm1385_vm2, %v1861_v28  ;;  %3385 = vmatpush.bf16.msrb.mxu3 %v3376_v10 }
 0x449   :  { %2005 = vst.msk [vmem:[#allocation3 + $0x135] sm:$0x1] %vm1385_vm2, %v1981_v48 }
 0x44a   :  { %2125 = vst.msk [vmem:[#allocation3 + $0x136] sm:$0x1] %vm1385_vm2, %v2101_v50 }
 0x44b   :  { %2245 = vst.msk [vmem:[#allocation3 + $0x137] sm:$0x1] %vm1385_vm2, %v2221_v33 }
 0x44c   :  { %v2269_v17 = vld [vmem:[#allocation2 + $0x1d8] sm:$0x1]  ;;  %v2293_v49 = vld [vmem:[#allocation2 + $0x1d9] sm:$0x1]  ;;  %v2389_v59 = vld [vmem:[#allocation2 + $0x1da] sm:$0x1] }
 0x44d   :  { %v2317_v3 = vmax.f32 %v2269_v17, %v2293_v49  ;;  %v2413_v61 = vld [vmem:[#allocation2 + $0x1db] sm:$0x1]  ;;  %v2509_v52 = vld [vmem:[#allocation2 + $0x1dc] sm:$0x1]  ;;  %v2533_v60 = vld [vmem:[#allocation2 + $0x1dd] sm:$0x1] }
 0x44e   :  { %v2437_v40 = vmax.f32 %v2389_v59, %v2413_v61  ;;  %v2557_v6 = vmax.f32 %v2509_v52, %v2533_v60  ;;  %v2629_v62 = vld [vmem:[#allocation2 + $0x1de] sm:$0x1]  ;;  %v2653_v34 = vld [vmem:[#allocation2 + $0x1df] sm:$0x1]  ;;  %v1086_v28 = vpop.f32.mrf.mxu0  ;;  %10514 = vst [vmem:[#allocation67_spill] sm:$0xff] %v8935_v27  ;;  %v8949_v61 = vld [vmem:[#allocation3 + $0x121] sm:$0xff] }
 0x44f   :  { %v2677_v0 = vmax.f32 %v2629_v62, %v2653_v34  ;;  %v2341_v48 = vmax.f32 %v2317_v3, 0.0  ;;  %v7701_v59 = vld [vmem:[%s10377_s0 + $0x1f8] sm:$0xff]  ;;  %10516 = vst [vmem:[#allocation69_spill] sm:$0xff] %v8949_v61  ;;  %v8952_v60 = vld [vmem:[#allocation3 + $0x121] sm:$0xff] }
 0x450   :  { %v2581_v50 = vmax.f32 %v2557_v6, 0.0  ;;  %v2461_v54 = vmax.f32 %v2437_v40, 0.0  ;;  %7143 = vmatmul.msk.bf16.gmra.mxu0 %vm558_vm0, %v7701_v59  ;;  %10517 = vst [vmem:[#allocation70_spill] sm:$0xff] %v8952_v60  ;;  %v8959_v34 = vld [vmem:[#allocation3 + $0x122] sm:$0xff]  ;;  %v3195_v62 = vld [vmem:[#allocation3 + $0x14] sm:$0xff] }
 0x451   :  { %v2701_v63 = vmax.f32 %v2677_v0, 0.0  ;;  %2365 = vst.msk [vmem:[#allocation3 + $0x138] sm:$0x1] %vm1385_vm2, %v2341_v48  ;;  %v7238_v48 = vld [vmem:[%s10380_s3 + $0x30] sm:$0xf]  ;;  %v3194_v60 = vld [vmem:[#allocation3 + $0x4] sm:$0xff] }
 0x452   :  { %2605 = vst.msk [vmem:[#allocation3 + $0x13a] sm:$0x1] %vm1385_vm2, %v2581_v50  ;;  %v8933_v33 = vld [vmem:[#allocation3 + $0x130] sm:$0xff] }
 0x453   :  { %v8937_v10 = vld [vmem:[#allocation3 + $0x130] sm:$0xff]  ;;  %2725 = vst.msk [vmem:[#allocation3 + $0x13b] sm:$0x1] %vm1385_vm2, %v2701_v63  ;;  %v2753_v17 = vpack.c.bf16 %v8933_v33, %v8870_v38 }
 0x454   :  { %10515 = vst [vmem:[#allocation68_spill] sm:$0xff] %v8937_v10  ;;  %v7718_v50 = vld [vmem:[%s10380_s3 + $0x30] sm:$0x10] }
 0x455   :  { %2485 = vst.msk [vmem:[#allocation3 + $0x139] sm:$0x1] %vm1385_vm2, %v2461_v54  ;;  %7177 = vmatmul.msk.bf16.gmra.mxu2 %vm1216_vm1, %v2753_v17  ;;  %v7239_v63 = vor.u32 %v7718_v50, %v7238_v48  ;;  %v1085_v17 = vadd.f32 %v8778_v37, %v1084_v26  ;;  %v7702_v48 = vld [vmem:[%s10377_s0 + $0x200] sm:$0xff]  ;;  %v1087_v26 = vadd.f32 %v8778_v37, %v1086_v28 }
 0x456   :  { %v1089_v3 = vpop.f32.mrf.mxu0  ;;  %10519 = vst [vmem:[#allocation72_spill] sm:$0xff] %v8959_v34 }
 0x458   :  { %v2771_v52 = vld [vmem:[#allocation3 + $0x131] sm:$0xff] }
 0x459   :  { %v8954_v40 = vld [vmem:[#allocation3 + $0x131] sm:$0xff]  ;;  %v2779_v6 = vpack.c.bf16 %v2771_v52, %v8949_v61  ;;  %v3500_v52 = vsel %vm2812_vm3, %v7239_v63, 0  ;;  %v3070_v63 = vld [vmem:[#allocation3 + $0x3] sm:$0xff] }
 0x45a   :  { %10518 = vst [vmem:[#allocation71_spill] sm:$0xff] %v8954_v40  ;;  %3509 = vmatpush.bf16.msra.mxu1 %v3500_v52  ;;  %v3210_v40 = vpack.c.bf16 %v3195_v62, %v3194_v60 }
 0x45b   :  { %7165 = vmatmul.msk.bf16.gmra.mxu1 %vm1216_vm1, %v2779_v6 }
 0x45c   :  { %v8962_v0 = vld [vmem:[#allocation3 + $0x132] sm:$0xff] }
 0x45d   :  { %10520 = vst [vmem:[#allocation73_spill] sm:$0xff] %v8962_v0  ;;  %v2969_v54 = vpack.c.bf16 %v8962_v0, %v8959_v34 }
 0x45e   :  { %v1091_v59 = vpop.f32.mrf.mxu0 }
 0x45f   :  { %7191 = vmatmul.msk.bf16.gmra.mxu3 %vm1216_vm1, %v2969_v54  ;;  %v1092_v6 = vadd.f32 %v8778_v37, %v1091_v59 }
 0x460   :  { %7144 = vmatmul.msk.bf16.gmra.mxu0 %vm558_vm0, %v7702_v48  ;;  %v7765_v48 = vld [vmem:[#allocation3 + $0x20] sm:$0xff] }
 0x461   :  { %v1204_v49 = vmax.f32 %v1085_v17, %v1092_v6  ;;  %v7764_v17 = vld [vmem:[#allocation3 + $0x13] sm:$0xff] }
 0x462   :  { %v3086_v52 = vpack.c.bf16 %v7764_v17, %v3070_v63  ;;  %v3319_v6 = vld [vmem:[#allocation3 + $0x10] sm:$0xff] }
 0x463   :  { %1277 = vst.msk [vmem:[#allocation2 + $0x1e0] sm:$0xff] %vm1216_vm1, %v1204_v49 }
 0x465   :  { %7212 = vmatmul.msk.bf16.vlgmr.msrb.gmra.mxu2 %vm1216_vm1, %v3210_v40 }
 0x466   :  { %v1094_v50 = vpop.f32.mrf.mxu0 }
 0x467   :  { %v1095_v54 = vadd.f32 %v8778_v37, %v1094_v50 }
 0x469   :  { %v1205_v59 = vmax.f32 %v1087_v26, %v1095_v54  ;;  %v3335_v26 = vpack.c.bf16 %v7765_v48, %v3319_v6  ;;  %v1090_v54 = vadd.f32 %v8778_v37, %v1089_v3  ;;  %v8997_v3 = vld [vmem:[#allocation3 + $0x24] sm:$0xff] }
 0x46a   :  { %v1309_v49 = vld [vmem:[#allocation2 + $0x1e0] sm:$0x1]  ;;  %v1333_v60 = vld [vmem:[#allocation2 + $0x1e1] sm:$0x1]  ;;  %v1430_v62 = vld [vmem:[#allocation2 + $0x1e2] sm:$0x1] }
 0x46b   :  { %v1357_v27 = vmax.f32 %v1309_v49, %v1333_v60  ;;  %v1454_v10 = vld [vmem:[#allocation2 + $0x1e3] sm:$0x1]  ;;  %v1550_v55 = vld [vmem:[#allocation2 + $0x1e4] sm:$0x1]  ;;  %v1574_v56 = vld [vmem:[#allocation2 + $0x1e5] sm:$0x1]  ;;  %7198 = vmatmul.msk.bf16.vlgmr.msrb.gmra.mxu1 %vm1216_vm1, %v3086_v52 }
 0x46c   :  { %v1478_v28 = vmax.f32 %v1430_v62, %v1454_v10  ;;  %v1598_v40 = vmax.f32 %v1550_v55, %v1574_v56  ;;  %v1670_v0 = vld [vmem:[#allocation2 + $0x1e6] sm:$0x1]  ;;  %v1694_v50 = vld [vmem:[#allocation2 + $0x1e7] sm:$0x1]  ;;  %1278 = vst.msk [vmem:[#allocation2 + $0x1e8] sm:$0xff] %vm1216_vm1, %v1205_v59  ;;  %v8990_v56 = vpop.f32.mrf.mxu2  ;;  %v8992_v10 = vpop.f32.mrf.mxu1  ;;  %v7766_v62 = vld [vmem:[#allocation3 + $0x34] sm:$0xff] }
 0x46d   :  { %v1381_v63 = vmax.f32 %v1357_v27, 0.0  ;;  %v1718_v17 = vmax.f32 %v1670_v0, %v1694_v50  ;;  %10521 = vst [vmem:[#allocation74_spill] sm:$0xff] %v8990_v56  ;;  %v7703_v0 = vld [vmem:[%s10377_s0 + $0x208] sm:$0xff] }
 0x46e   :  { %v1502_v61 = vmax.f32 %v1478_v28, 0.0  ;;  %v1622_v34 = vmax.f32 %v1598_v40, 0.0  ;;  %v1096_v49 = vpop.f32.mrf.mxu0  ;;  %10522 = vst [vmem:[#allocation75_spill] sm:$0xff] %v8997_v3  ;;  %v3211_v28 = vpack.c.bf16 %v7766_v62, %v8997_v3  ;;  %v9007_v3 = vpop.f32.mrf.mxu3 }
 0x46f   :  { %7226 = vmatmul.msk.bf16.vlgmr.msrb.gmra.mxu3 %vm1216_vm1, %v3335_v26  ;;  %1406 = vst.msk [vmem:[#allocation3 + $0x140] sm:$0x1] %vm1385_vm2, %v1381_v63  ;;  %v1742_v52 = vmax.f32 %v1718_v17, 0.0  ;;  %v1097_v55 = vadd.f32 %v8778_v37, %v1096_v49 }
 0x470   :  { %1526 = vst.msk [vmem:[#allocation3 + $0x141] sm:$0x1] %vm1385_vm2, %v1502_v61  ;;  %7145 = vmatmul.msk.bf16.gmra.mxu0 %vm558_vm0, %v7703_v0 }
 0x471   :  { %1646 = vst.msk [vmem:[#allocation3 + $0x142] sm:$0x1] %vm1385_vm2, %v1622_v34  ;;  %v1206_v27 = vmax.f32 %v1090_v54, %v1097_v55 }
 0x472   :  { %1766 = vst.msk [vmem:[#allocation3 + $0x143] sm:$0x1] %vm1385_vm2, %v1742_v52 }
 0x473   :  { %v1790_v59 = vld [vmem:[#allocation2 + $0x1e8] sm:$0x1]  ;;  %v1814_v6 = vld [vmem:[#allocation2 + $0x1e9] sm:$0x1]  ;;  %v1910_v60 = vld [vmem:[#allocation2 + $0x1ea] sm:$0x1] }
 0x474   :  { %v1838_v40 = vmax.f32 %v1790_v59, %v1814_v6  ;;  %v1934_v50 = vld [vmem:[#allocation2 + $0x1eb] sm:$0x1]  ;;  %v2030_v61 = vld [vmem:[#allocation2 + $0x1ec] sm:$0x1]  ;;  %v2054_v48 = vld [vmem:[#allocation2 + $0x1ed] sm:$0x1] }
 0x475   :  { %v1958_v34 = vmax.f32 %v1910_v60, %v1934_v50  ;;  %v2078_v26 = vmax.f32 %v2030_v61, %v2054_v48  ;;  %v2150_v54 = vld [vmem:[#allocation2 + $0x1ee] sm:$0x1]  ;;  %v2174_v63 = vld [vmem:[#allocation2 + $0x1ef] sm:$0x1]  ;;  %1279 = vst.msk [vmem:[#allocation2 + $0x1f0] sm:$0xff] %vm1216_vm1, %v1206_v27  ;;  %7213 = vmatmul.msk.bf16.gmra.mxu2 %vm1216_vm1, %v3211_v28  ;;  %v7767_v50 = vld [vmem:[#allocation3 + $0x23] sm:$0xff] }
 0x476   :  { %v1862_v17 = vmax.f32 %v1838_v40, 0.0  ;;  %v2198_v49 = vmax.f32 %v2150_v54, %v2174_v63  ;;  %10523 = vst [vmem:[#allocation76_spill] sm:$0xff] %v9007_v3  ;;  %v7768_v27 = vld [vmem:[#allocation3 + $0x33] sm:$0xff] }
 0x477   :  { %v1982_v52 = vmax.f32 %v1958_v34, 0.0  ;;  %v2102_v55 = vmax.f32 %v2078_v26, 0.0  ;;  %v3087_v61 = vpack.c.bf16 %v7768_v27, %v7767_v50  ;;  %v7769_v48 = vld [vmem:[#allocation3 + $0x30] sm:$0xff]  ;;  %v7770_v34 = vld [vmem:[#allocation3 + $0x40] sm:$0xff] }
 0x478   :  { %1886 = vst.msk [vmem:[#allocation3 + $0x144] sm:$0x1] %vm1385_vm2, %v1862_v17  ;;  %v2222_v59 = vmax.f32 %v2198_v49, 0.0  ;;  %v2936_v6 = vpop.f32.mrf.mxu2  ;;  %v2855_v62 = vpop.f32.mrf.mxu1  ;;  %v3336_v26 = vpack.c.bf16 %v7770_v34, %v7769_v48  ;;  %v7773_v34 = vld [vmem:[#allocation3 + $0x43] sm:$0xff] }
 0x479   :  { %2006 = vst.msk [vmem:[#allocation3 + $0x145] sm:$0x1] %vm1385_vm2, %v1982_v52  ;;  %v2937_v60 = vadd.f32 %v2936_v6, %v2855_v62 }
 0x47a   :  { %2126 = vst.msk [vmem:[#allocation3 + $0x146] sm:$0x1] %vm1385_vm2, %v2102_v55 }
 0x47b   :  { %2246 = vst.msk [vmem:[#allocation3 + $0x147] sm:$0x1] %vm1385_vm2, %v2222_v59  ;;  %7199 = vmatmul.msk.bf16.gmra.mxu1 %vm1216_vm1, %v3087_v61 }
 0x47c   :  { %v2270_v0 = vld [vmem:[#allocation2 + $0x1f0] sm:$0x1]  ;;  %v2294_v28 = vld [vmem:[#allocation2 + $0x1f1] sm:$0x1]  ;;  %v2390_v40 = vld [vmem:[#allocation2 + $0x1f2] sm:$0x1] }
 0x47d   :  { %v2318_v54 = vmax.f32 %v2270_v0, %v2294_v28  ;;  %v2414_v63 = vld [vmem:[#allocation2 + $0x1f3] sm:$0x1]  ;;  %v2510_v17 = vld [vmem:[#allocation2 + $0x1f4] sm:$0x1]  ;;  %v2534_v49 = vld [vmem:[#allocation2 + $0x1f5] sm:$0x1] }
 0x47e   :  { %v2438_v52 = vmax.f32 %v2390_v40, %v2414_v63  ;;  %v2558_v6 = vmax.f32 %v2510_v17, %v2534_v49  ;;  %v2630_v62 = vld [vmem:[#allocation2 + $0x1f6] sm:$0x1]  ;;  %v2654_v50 = vld [vmem:[#allocation2 + $0x1f7] sm:$0x1]  ;;  %v7771_v28 = vld [vmem:[#allocation3 + $0x44] sm:$0xff] }
 0x47f   :  { %7227 = vmatmul.msk.bf16.gmra.mxu3 %vm1216_vm1, %v3336_v26  ;;  %v2342_v55 = vmax.f32 %v2318_v54, 0.0  ;;  %v2678_v59 = vmax.f32 %v2630_v62, %v2654_v50  ;;  %v7772_v40 = vld [vmem:[#allocation3 + $0x54] sm:$0xff]  ;;  %v7776_v17 = vld [vmem:[#allocation3 + $0x60] sm:$0xff] }
 0x480   :  { %v2462_v27 = vmax.f32 %v2438_v52, 0.0  ;;  %v2582_v61 = vmax.f32 %v2558_v6, 0.0  ;;  %v3212_v48 = vpack.c.bf16 %v7772_v40, %v7771_v28  ;;  %v7774_v26 = vld [vmem:[#allocation3 + $0x53] sm:$0xff]  ;;  %v7778_v6 = vld [vmem:[#allocation3 + $0x63] sm:$0xff] }
 0x481   :  { %2366 = vst.msk [vmem:[#allocation3 + $0x148] sm:$0x1] %vm1385_vm2, %v2342_v55  ;;  %v2702_v3 = vmax.f32 %v2678_v59, 0.0  ;;  %v3088_v54 = vpack.c.bf16 %v7774_v26, %v7773_v34  ;;  %v7775_v63 = vld [vmem:[#allocation3 + $0x50] sm:$0xff]  ;;  %v9030_v50 = vld [vmem:[#allocation3 + $0x80] sm:$0xff] }
 0x482   :  { %v3044_v56 = vpop.f32.mrf.mxu3  ;;  %2486 = vst.msk [vmem:[#allocation3 + $0x149] sm:$0x1] %vm1385_vm2, %v2462_v27  ;;  %v3337_v49 = vpack.c.bf16 %v7776_v17, %v7775_v63  ;;  %v7779_v55 = vld [vmem:[#allocation3 + $0x70] sm:$0xff]  ;;  %v3202_v27 = vld [vmem:[#allocation3 + $0xc4] sm:$0xff] }
 0x483   :  { %v9016_v0 = vadd.f32 %v3044_v56, %v2937_v60  ;;  %2606 = vst.msk [vmem:[#allocation3 + $0x14a] sm:$0x1] %vm1385_vm2, %v2582_v61  ;;  %v9023_v56 = vld [vmem:[#allocation3 + $0x74] sm:$0xff]  ;;  %v7777_v60 = vld [vmem:[#allocation3 + $0x64] sm:$0xff]  ;;  %v3338_v59 = vpack.c.bf16 %v9030_v50, %v7779_v55 }
 0x484   :  { %2726 = vst.msk [vmem:[#allocation3 + $0x14b] sm:$0x1] %vm1385_vm2, %v2702_v3  ;;  %v3213_v52 = vpack.c.bf16 %v9023_v56, %v7777_v60  ;;  %v9027_v3 = vld [vmem:[#allocation3 + $0x73] sm:$0xff]  ;;  %v3078_v40 = vld [vmem:[#allocation3 + $0xc3] sm:$0xff] }
 0x485   :  { %7214 = vmatmul.msk.bf16.gmra.mxu2 %vm1216_vm1, %v3212_v48  ;;  %v3089_v62 = vpack.c.bf16 %v9027_v3, %v7778_v6  ;;  %v7780_v61 = vld [vmem:[#allocation3 + $0xd4] sm:$0xff]  ;;  %v7783_v17 = vld [vmem:[#allocation3 + $0xe4] sm:$0xff] }
 0x486   :  { %v3214_v28 = vpack.c.bf16 %v7780_v61, %v3202_v27  ;;  %v7781_v48 = vld [vmem:[#allocation3 + $0xd3] sm:$0xff]  ;;  %v7784_v60 = vld [vmem:[#allocation3 + $0xe3] sm:$0xff]  ;;  %v3216_v61 = vpack.c.bf16 %v8876_v22, %v8755_v9 }
 0x487   :  { %v3090_v34 = vpack.c.bf16 %v7781_v48, %v3078_v40  ;;  %v3327_v26 = vld [vmem:[#allocation3 + $0xd0] sm:$0xff]  ;;  %v7252_v55 = vld [vmem:[%s10380_s3 + $0x38] sm:$0xf]  ;;  %v7720_v40 = vld [vmem:[%s10380_s3 + $0x40] sm:$0x10] }
 0x488   :  { %v7785_v6 = vld [vmem:[#allocation3 + $0xf0] sm:$0xff] }
 0x489   :  { %v3443_v22 = vld [vmem:[#allocation3 + $0x11] sm:$0xff] }
 0x48b   :  { %7200 = vmatmul.msk.bf16.gmra.mxu1 %vm1216_vm1, %v3088_v54  ;;  %v7782_v54 = vld [vmem:[#allocation3 + $0xe0] sm:$0xff] }
 0x48c   :  { %v3339_v63 = vpack.c.bf16 %v7782_v54, %v3327_v26  ;;  %v3092_v26 = vpack.c.bf16 %v8878_v5, %v8757_v29  ;;  %v10524_v54 = vpack.c.bf16 %v8870_v38, %v8816_v11 }
 0x48f   :  { %7228 = vmatmul.msk.bf16.gmra.mxu3 %vm1216_vm1, %v3337_v49  ;;  %v3215_v49 = vpack.c.bf16 %v8751_v45, %v7783_v17  ;;  %v7721_v17 = vld [vmem:[%s10380_s3 + $0x48] sm:$0x10] }
 0x495   :  { %7215 = vmatmul.msk.bf16.gmra.mxu2 %vm1216_vm1, %v3213_v52  ;;  %v3091_v52 = vpack.c.bf16 %v8753_v57, %v7784_v60  ;;  %v9074_v60 = vpop.f32.mrf.mxu2 }
 0x49b   :  { %7201 = vmatmul.msk.bf16.gmra.mxu1 %vm1216_vm1, %v3089_v62  ;;  %v3340_v62 = vpack.c.bf16 %v8812_v12, %v7785_v6  ;;  %v7266_v12 = vld [vmem:[%s10380_s3 + $0x40] sm:$0xf]  ;;  %v9078_v6 = vld [vmem:[#allocation3 + $0x134] sm:$0xff] }
 0x49c   :  { %v7267_v48 = vor.u32 %v7720_v40, %v7266_v12  ;;  %10525 = vst [vmem:[#allocation77_spill] sm:$0xff] %v9078_v6  ;;  %v3217_v11 = vpack.c.bf16 %v9078_v6, %v8880_v43  ;;  %v9090_v40 = vld [vmem:[#allocation3 + $0x140] sm:$0xff] }
 0x49d   :  { %10526 = vst [vmem:[#allocation78_spill] sm:$0xff] %v9090_v40 }
 0x49f   :  { %7229 = vmatmul.msk.bf16.gmra.mxu3 %vm1216_vm1, %v3338_v59  ;;  %v7719_v59 = vld [vmem:[%s10380_s3 + $0x38] sm:$0x10] }
 0x4a0   :  { %v7253_v27 = vor.u32 %v7719_v59, %v7252_v55  ;;  %v9084_v55 = vld [vmem:[#allocation3 + $0x133] sm:$0xff] }
 0x4a1   :  { %v3093_v12 = vpack.c.bf16 %v9084_v55, %v8882_v7 }
 0x4a5   :  { %7216 = vmatmul.msk.bf16.gmra.mxu2 %vm1216_vm1, %v3214_v28  ;;  %v3624_v28 = vsel %vm2812_vm3, %v7253_v27, 0 }
 0x4a6   :  { %3633 = vmatpush.bf16.msra.mxu2 %v3624_v28 }
 0x4ab   :  { %7202 = vmatmul.msk.bf16.gmra.mxu1 %vm1216_vm1, %v3090_v34  ;;  %v3748_v34 = vsel %vm2812_vm3, %v7267_v48, 0  ;;  %v3342_v48 = vpack.c.bf16 %v9090_v40, %v8933_v33  ;;  %v7786_v40 = vld [vmem:[#allocation3 + $0x21] sm:$0xff] }
 0x4ac   :  { %3757 = vmatpush.bf16.msra.mxu3 %v3748_v34 }
 0x4af   :  { %7230 = vmatmul.msk.bf16.gmra.mxu3 %vm1216_vm1, %v3339_v63  ;;  %v7280_v63 = vld [vmem:[%s10380_s3 + $0x48] sm:$0xf] }
 0x4b5   :  { %7217 = vmatmul.msk.bf16.gmra.mxu2 %vm1216_vm1, %v3215_v49  ;;  %v7281_v49 = vor.u32 %v7721_v17, %v7280_v63  ;;  %v3568_v63 = vld [vmem:[#allocation3 + $0x22] sm:$0xff] }
 0x4bb   :  { %7203 = vmatmul.msk.bf16.gmra.mxu1 %vm1216_vm1, %v3091_v52  ;;  %v9076_v52 = vpop.f32.mrf.mxu1 }
 0x4bf   :  { %7231 = vmatmul.msk.bf16.gmra.mxu3 %vm1216_vm1, %v3340_v62  ;;  %v3872_v62 = vsel %vm2812_vm3, %v7281_v49, 0 }
 0x4c0   :  { %3881 = vmatpush.bf16.msrb.mxu1 %v3872_v62 }
 0x4c5   :  { %7218 = vmatmul.msk.bf16.gmra.mxu2 %vm1216_vm1, %v3216_v61  ;;  %v9086_v61 = vpop.f32.mrf.mxu3 }
 0x4cb   :  { %7204 = vmatmul.msk.bf16.gmra.mxu1 %vm1216_vm1, %v3092_v26 }
 0x4cd   :  { %v1099_v38 = vpop.f32.mrf.mxu0 }
 0x4cf   :  { %7232 = vmatmul.msk.bf16.gmra.mxu3 %vm1216_vm1, %v10524_v54 }
 0x4d5   :  { %7219 = vmatmul.msk.bf16.gmra.mxu2 %vm1216_vm1, %v3217_v11  ;;  %v1101_v34 = vpop.f32.mrf.mxu0  ;;  %v3567_v11 = vld [vmem:[#allocation3 + $0x12] sm:$0xff] }
 0x4d8   :  { %v2941_v59 = vpop.f32.mrf.mxu2  ;;  %v2860_v27 = vpop.f32.mrf.mxu1 }
 0x4d9   :  { %v2942_v28 = vadd.f32 %v2941_v59, %v2860_v27  ;;  %v3583_v59 = vpack.c.bf16 %v3568_v63, %v3567_v11  ;;  %v2909_v63 = vadd.f32 %v8277_v30, %v8279_v31  ;;  %v9120_v11 = vld [vmem:[#allocation3 + $0x32] sm:$0xff] }
 0x4da   :  { %10528 = vst [vmem:[#allocation79_spill] sm:$0xff] %v9120_v11 }
 0x4db   :  { %7205 = vmatmul.msk.bf16.gmra.mxu1 %vm1216_vm1, %v3093_v12 }
 0x4dd   :  { %v1104_v27 = vpop.f32.mrf.mxu0 }
 0x4df   :  { %7233 = vmatmul.msk.bf16.gmra.mxu3 %vm1216_vm1, %v3342_v48  ;;  %v3459_v48 = vpack.c.bf16 %v7786_v40, %v3443_v22  ;;  %v10527_v22 = vpack.c.bf16 %v8085_v47, %v8083_v46  ;;  %v3570_v40 = vld [vmem:[#allocation3 + $0x42] sm:$0xff] }
 0x4e0   :  { %v2943_v26 = vpop.f32.mrf.mxu2  ;;  %v2862_v54 = vpop.f32.mrf.mxu1 }
 0x4e1   :  { %v2944_v49 = vadd.f32 %v2943_v26, %v2862_v54 }
 0x4e2   :  { %v3049_v17 = vpop.f32.mrf.mxu3 }
 0x4e3   :  { %v9096_v62 = vadd.f32 %v3049_v17, %v2942_v28  ;;  %v1100_v28 = vadd.f32 %v8778_v37, %v1099_v38  ;;  %v9109_v17 = vld [vmem:[%s10379_s2] ss:$0 sm:$0xff] }
 0x4e4   :  { %v1102_v46 = vadd.f32 %v9109_v17, %v1101_v34 }
 0x4e5   :  { %7254 = vmatmul.msk.bf16.vlgmr.msra.gmra.mxu2 %vm1216_vm1, %v3583_v59  ;;  %v1106_v54 = vpop.f32.mrf.mxu0  ;;  %v3584_v59 = vpack.c.bf16 %v3570_v40, %v9120_v11 }
 0x4e8   :  { %v3262_v6 = vpop.f32.mrf.mxu2  ;;  %v3138_v12 = vpop.f32.mrf.mxu1 }
 0x4e9   :  { %v3178_v33 = vadd.f32 %v3138_v12, %v8163_v21  ;;  %v1107_v21 = vadd.f32 %v9109_v17, %v1106_v54 }
 0x4ea   :  { %v3051_v43 = vpop.f32.mrf.mxu3 }
 0x4eb   :  { %v9100_v45 = vadd.f32 %v3051_v43, %v2944_v49  ;;  %7240 = vmatmul.msk.bf16.vlgmr.msra.gmra.mxu1 %vm1216_vm1, %v3459_v48  ;;  %v3302_v26 = vadd.f32 %v3262_v6, %v3178_v33  ;;  %v3055_v43 = vadd.f32 %v8288_v51, %v2909_v63  ;;  %v1207_v6 = vmax.f32 %v1100_v28, %v1107_v21 }
 0x4ed   :  { %1280 = vst.msk [vmem:[#allocation2 + $0x1f8] sm:$0xff] %vm1216_vm1, %v1207_v6  ;;  %v1109_v47 = vpop.f32.mrf.mxu0  ;;  %v7789_v6 = vld [vmem:[#allocation3 + $0x41] sm:$0xff] }
 0x4ee   :  { %v1110_v51 = vadd.f32 %v9109_v17, %v1109_v47 }
 0x4ef   :  { %7268 = vmatmul.msk.bf16.vlgmr.msra.gmra.mxu3 %vm1216_vm1, %v10527_v22 }
 0x4f0   :  { %v3264_v37 = vpop.f32.mrf.mxu2  ;;  %v3140_v38 = vpop.f32.mrf.mxu1  ;;  %v1208_v33 = vmax.f32 %v1102_v46, %v1110_v51 }
 0x4f1   :  { %v3179_v30 = vadd.f32 %v3140_v38, %v3055_v43  ;;  %v7788_v43 = vld [vmem:[#allocation3 + $0x31] sm:$0xff] }
 0x4f2   :  { %v3387_v49 = vpop.f32.mrf.mxu3  ;;  %v3460_v38 = vpack.c.bf16 %v7789_v6, %v7788_v43  ;;  %1281 = vst.msk [vmem:[#allocation2 + $0x200] sm:$0xff] %vm1216_vm1, %v1208_v33  ;;  %v10529_v33 = vpack.c.bf16 %v8174_v25, %v8172_v24 }
 0x4f3   :  { %v9118_v31 = vadd.f32 %v3387_v49, %v3302_v26  ;;  %v3303_v12 = vadd.f32 %v3264_v37, %v3179_v30 }
 0x4f4   :  { %v1310_v54 = vld [vmem:[#allocation2 + $0x1f8] sm:$0x1]  ;;  %v1334_v63 = vld [vmem:[#allocation2 + $0x1f9] sm:$0x1]  ;;  %v1431_v21 = vld [vmem:[#allocation2 + $0x1fa] sm:$0x1] }
 0x4f5   :  { %7255 = vmatmul.msk.bf16.gmra.mxu2 %vm1216_vm1, %v3584_v59  ;;  %v1358_v37 = vmax.f32 %v1310_v54, %v1334_v63  ;;  %v1455_v40 = vld [vmem:[#allocation2 + $0x1fb] sm:$0x1]  ;;  %v1551_v34 = vld [vmem:[#allocation2 + $0x1fc] sm:$0x1]  ;;  %v1575_v49 = vld [vmem:[#allocation2 + $0x1fd] sm:$0x1]  ;;  %v1111_v63 = vpop.f32.mrf.mxu0 }
 0x4f6   :  { %v1479_v59 = vmax.f32 %v1431_v21, %v1455_v40  ;;  %v1599_v47 = vmax.f32 %v1551_v34, %v1575_v49  ;;  %v1671_v46 = vld [vmem:[#allocation2 + $0x1fe] sm:$0x1]  ;;  %v1695_v51 = vld [vmem:[#allocation2 + $0x1ff] sm:$0x1] }
 0x4f7   :  { %v1719_v9 = vmax.f32 %v1671_v46, %v1695_v51 }
 0x4f8   :  { %v3267_v48 = vpop.f32.mrf.mxu2  ;;  %v3143_v28 = vpop.f32.mrf.mxu1  ;;  %v1503_v43 = vmax.f32 %v1479_v59, 0.0  ;;  %v1623_v54 = vmax.f32 %v1599_v47, 0.0 }
 0x4f9   :  { %v3180_v22 = vadd.f32 %v3143_v28, %v8295_v42  ;;  %v1105_v42 = vadd.f32 %v9109_v17, %v1104_v27  ;;  %v1382_v28 = vmax.f32 %v1358_v37, 0.0  ;;  %v1743_v21 = vmax.f32 %v1719_v9, 0.0  ;;  %v1791_v37 = vld [vmem:[#allocation2 + $0x200] sm:$0x1]  ;;  %v1815_v24 = vld [vmem:[#allocation2 + $0x201] sm:$0x1] }
 0x4fa   :  { %v3389_v26 = vpop.f32.mrf.mxu3  ;;  %1527 = vst.msk [vmem:[#allocation3 + $0x151] sm:$0x1] %vm1385_vm2, %v1503_v43  ;;  %v1911_v25 = vld [vmem:[#allocation2 + $0x202] sm:$0x1]  ;;  %v1839_v34 = vmax.f32 %v1791_v37, %v1815_v24  ;;  %v1935_v49 = vld [vmem:[#allocation2 + $0x203] sm:$0x1] }
 0x4fb   :  { %v9127_v30 = vadd.f32 %v3389_v26, %v3303_v12  ;;  %7241 = vmatmul.msk.bf16.gmra.mxu1 %vm1216_vm1, %v3460_v38  ;;  %v3304_v11 = vadd.f32 %v3267_v48, %v3180_v22  ;;  %v2914_v12 = vadd.f32 %v8396_v13, %v8398_v35  ;;  %1407 = vst.msk [vmem:[#allocation3 + $0x150] sm:$0x1] %vm1385_vm2, %v1382_v28  ;;  %v9143_v13 = vld [vmem:[#allocation3 + $0x52] sm:$0xff]  ;;  %v3572_v35 = vld [vmem:[#allocation3 + $0x62] sm:$0xff] }
 0x4fc   :  { %v1112_v26 = vadd.f32 %v9109_v17, %v1111_v63  ;;  %1647 = vst.msk [vmem:[#allocation3 + $0x152] sm:$0x1] %vm1385_vm2, %v1623_v54  ;;  %v2055_v59 = vld [vmem:[#allocation2 + $0x205] sm:$0x1]  ;;  %v3585_v47 = vpack.c.bf16 %v3572_v35, %v9143_v13  ;;  %v1959_v51 = vmax.f32 %v1911_v25, %v1935_v49  ;;  %v2151_v28 = vld [vmem:[#allocation2 + $0x206] sm:$0x1] }
 0x4fd   :  { %v3057_v27 = vadd.f32 %v8407_v32, %v2914_v12  ;;  %1767 = vst.msk [vmem:[#allocation3 + $0x153] sm:$0x1] %vm1385_vm2, %v1743_v21  ;;  %v2031_v32 = vld [vmem:[#allocation2 + $0x204] sm:$0x1]  ;;  %v2175_v43 = vld [vmem:[#allocation2 + $0x207] sm:$0x1] }
 0x4fe   :  { %v1209_v48 = vmax.f32 %v1105_v42, %v1112_v26  ;;  %v2079_v42 = vmax.f32 %v2031_v32, %v2055_v59  ;;  %v1863_v54 = vmax.f32 %v1839_v34, 0.0  ;;  %v2199_v63 = vmax.f32 %v2151_v28, %v2175_v43 }
 0x4ff   :  { %7269 = vmatmul.msk.bf16.gmra.mxu3 %vm1216_vm1, %v10529_v33  ;;  %v1983_v12 = vmax.f32 %v1959_v51, 0.0  ;;  %v2919_v28 = vadd.f32 %v8482_v36, %v8484_v14 }
 0x500   :  { %v3269_v22 = vpop.f32.mrf.mxu2  ;;  %v3145_v6 = vpop.f32.mrf.mxu1  ;;  %1282 = vst.msk [vmem:[#allocation2 + $0x208] sm:$0xff] %vm1216_vm1, %v1209_v48  ;;  %v2223_v21 = vmax.f32 %v2199_v63, 0.0  ;;  %v7791_v48 = vld [vmem:[#allocation3 + $0x61] sm:$0xff] }
 0x501   :  { %v3181_v38 = vadd.f32 %v3145_v6, %v3057_v27  ;;  %1887 = vst.msk [vmem:[#allocation3 + $0x154] sm:$0x1] %vm1385_vm2, %v1863_v54  ;;  %v7790_v6 = vld [vmem:[#allocation3 + $0x51] sm:$0xff]  ;;  %v10530_v54 = vpack.c.bf16 %v8307_v41, %v8305_v1 }
 0x502   :  { %v3392_v9 = vpop.f32.mrf.mxu3  ;;  %2007 = vst.msk [vmem:[#allocation3 + $0x155] sm:$0x1] %vm1385_vm2, %v1983_v12  ;;  %v3461_v35 = vpack.c.bf16 %v7791_v48, %v7790_v6  ;;  %v9171_v1 = vld [vmem:[#allocation3 + $0x72] sm:$0xff]  ;;  %v9176_v6 = vld [vmem:[#allocation3 + $0x81] sm:$0xff] }
 0x503   :  { %v9146_v40 = vadd.f32 %v3392_v9, %v3304_v11  ;;  %v3305_v46 = vadd.f32 %v3269_v22, %v3181_v38  ;;  %v2103_v11 = vmax.f32 %v2079_v42, 0.0  ;;  %2247 = vst.msk [vmem:[#allocation3 + $0x157] sm:$0x1] %vm1385_vm2, %v2223_v21 }
 0x505   :  { %7256 = vmatmul.msk.bf16.gmra.mxu2 %vm1216_vm1, %v3585_v47  ;;  %2127 = vst.msk [vmem:[#allocation3 + $0x156] sm:$0x1] %vm1385_vm2, %v2103_v11  ;;  %v3059_v11 = vadd.f32 %v8493_v44, %v2919_v28 }
 0x507   :  { %v2271_v38 = vld [vmem:[#allocation2 + $0x208] sm:$0x1]  ;;  %v2295_v37 = vld [vmem:[#allocation2 + $0x209] sm:$0x1]  ;;  %v2391_v24 = vld [vmem:[#allocation2 + $0x20a] sm:$0x1] }
 0x508   :  { %v3272_v26 = vpop.f32.mrf.mxu2  ;;  %v3148_v33 = vpop.f32.mrf.mxu1  ;;  %v2319_v34 = vmax.f32 %v2271_v38, %v2295_v37  ;;  %v2415_v49 = vld [vmem:[#allocation2 + $0x20b] sm:$0x1]  ;;  %v2511_v32 = vld [vmem:[#allocation2 + $0x20c] sm:$0x1]  ;;  %v2535_v59 = vld [vmem:[#allocation2 + $0x20d] sm:$0x1] }
 0x509   :  { %v3182_v22 = vadd.f32 %v3148_v33, %v8414_v4  ;;  %v2439_v47 = vmax.f32 %v2391_v24, %v2415_v49  ;;  %v2559_v51 = vmax.f32 %v2511_v32, %v2535_v59  ;;  %v2631_v4 = vld [vmem:[#allocation2 + $0x20e] sm:$0x1]  ;;  %v2655_v42 = vld [vmem:[#allocation2 + $0x20f] sm:$0x1]  ;;  %v7792_v24 = vld [vmem:[#allocation3 + $0x71] sm:$0xff] }
 0x50a   :  { %v3394_v27 = vpop.f32.mrf.mxu3  ;;  %v2343_v43 = vmax.f32 %v2319_v34, 0.0  ;;  %v9180_v34 = vld [vmem:[#allocation3 + $0x83] sm:$0xff] }
 0x50b   :  { %v9156_v9 = vadd.f32 %v3394_v27, %v3305_v46  ;;  %7242 = vmatmul.msk.bf16.gmra.mxu1 %vm1216_vm1, %v3461_v35  ;;  %v3306_v25 = vadd.f32 %v3272_v26, %v3182_v22  ;;  %v2679_v46 = vmax.f32 %v2631_v4, %v2655_v42  ;;  %v2463_v63 = vmax.f32 %v2439_v47, 0.0  ;;  %v3574_v27 = vld [vmem:[#allocation3 + $0x82] sm:$0xff] }
 0x50c   :  { %v2583_v12 = vmax.f32 %v2559_v51, 0.0  ;;  %2367 = vst.msk [vmem:[#allocation3 + $0x158] sm:$0x1] %vm1385_vm2, %v2343_v43  ;;  %v3586_v41 = vpack.c.bf16 %v3574_v27, %v9171_v1  ;;  %v3710_v59 = vpack.c.bf16 %v9180_v34, %v9027_v3  ;;  %v2924_v47 = vadd.f32 %v8723_v20, %v8725_v2  ;;  %v3576_v42 = vld [vmem:[#allocation3 + $0xe2] sm:$0xff] }
 0x50d   :  { %v2703_v21 = vmax.f32 %v2679_v46, 0.0  ;;  %2487 = vst.msk [vmem:[#allocation3 + $0x159] sm:$0x1] %vm1385_vm2, %v2463_v63 }
 0x50e   :  { %2607 = vst.msk [vmem:[#allocation3 + $0x15a] sm:$0x1] %vm1385_vm2, %v2583_v12 }
 0x50f   :  { %7270 = vmatmul.msk.bf16.gmra.mxu3 %vm1216_vm1, %v10530_v54  ;;  %2727 = vst.msk [vmem:[#allocation3 + $0x15b] sm:$0x1] %vm1385_vm2, %v2703_v21  ;;  %v3575_v54 = vld [vmem:[#allocation3 + $0xd2] sm:$0xff] }
 0x510   :  { %v3274_v26 = vpop.f32.mrf.mxu2  ;;  %v3150_v33 = vpop.f32.mrf.mxu1  ;;  %v3587_v63 = vpack.c.bf16 %v3576_v42, %v3575_v54  ;;  %v3451_v21 = vld [vmem:[#allocation3 + $0xd1] sm:$0xff] }
 0x511   :  { %v3183_v14 = vadd.f32 %v3150_v33, %v3059_v11 }
 0x512   :  { %v3397_v36 = vpop.f32.mrf.mxu3 }
 0x513   :  { %v9169_v22 = vadd.f32 %v3397_v36, %v3306_v25  ;;  %v3307_v44 = vadd.f32 %v3274_v26, %v3183_v14  ;;  %v3462_v25 = vpack.c.bf16 %v9176_v6, %v7792_v24  ;;  %v7793_v26 = vld [vmem:[#allocation3 + $0xe1] sm:$0xff]  ;;  %v2929_v36 = vadd.f32 %v8852_v18, %v8854_v39  ;;  %v9207_v24 = vld [vmem:[#allocation3 + $0xf2] sm:$0xff] }
 0x514   :  { %v10531_v14 = vpack.c.bf16 %v8656_v16, %v8652_v23 }
 0x515   :  { %7257 = vmatmul.msk.bf16.gmra.mxu2 %vm1216_vm1, %v3586_v41  ;;  %v3063_v41 = vadd.f32 %v8861_v15, %v2929_v36  ;;  %v7794_v15 = vld [vmem:[#allocation3 + $0xf1] sm:$0xff]  ;;  %v7723_v36 = vld [vmem:[%s10380_s3 + $0x58] sm:$0x10] }
 0x518   :  { %v3277_v48 = vpop.f32.mrf.mxu2  ;;  %v3153_v35 = vpop.f32.mrf.mxu1 }
 0x519   :  { %v3184_v37 = vadd.f32 %v3153_v35, %v8500_v53  ;;  %v3061_v53 = vadd.f32 %v8735_v8, %v2924_v47  ;;  %v3463_v8 = vpack.c.bf16 %v7793_v26, %v3451_v21 }
 0x51a   :  { %v3399_v38 = vpop.f32.mrf.mxu3 }
 0x51b   :  { %v9182_v49 = vadd.f32 %v3399_v38, %v3307_v44  ;;  %7243 = vmatmul.msk.bf16.gmra.mxu1 %vm1216_vm1, %v3462_v25  ;;  %v3308_v32 = vadd.f32 %v3277_v48, %v3184_v37 }
 0x51f   :  { %7271 = vmatmul.msk.bf16.gmra.mxu3 %vm1216_vm1, %v3710_v59  ;;  %v7795_v59 = vld [vmem:[#allocation3 + $0x101] sm:$0xff] }
 0x520   :  { %v3279_v51 = vpop.f32.mrf.mxu2  ;;  %v3155_v4 = vpop.f32.mrf.mxu1  ;;  %v3464_v47 = vpack.c.bf16 %v7795_v59, %v7794_v15  ;;  %v7322_v15 = vld [vmem:[%s10380_s3 + $0x60] sm:$0xf]  ;;  %v7724_v59 = vld [vmem:[%s10380_s3 + $0x60] sm:$0x10] }
 0x521   :  { %v3185_v43 = vadd.f32 %v3155_v4, %v3061_v53  ;;  %v10532_v4 = vld [vmem:[#allocation74_spill] sm:$0xff] }
 0x522   :  { %v3402_v28 = vpop.f32.mrf.mxu3  ;;  %v2934_v42 = vadd.f32 %v10532_v4, %v8992_v10 }
 0x523   :  { %v9191_v46 = vadd.f32 %v3402_v28, %v3308_v32  ;;  %v3309_v12 = vadd.f32 %v3279_v51, %v3185_v43  ;;  %v10533_v28 = vpack.c.bf16 %v8757_v29, %v8753_v57  ;;  %v10534_v43 = vld [vmem:[#allocation76_spill] sm:$0xff]  ;;  %v9230_v57 = vld [vmem:[#allocation3 + $0x112] sm:$0xff] }
 0x524   :  { %v3065_v54 = vadd.f32 %v10534_v43, %v2934_v42  ;;  %v10535_v29 = vld [vmem:[#allocation72_spill] sm:$0xff]  ;;  %v10538_v43 = vld [vmem:[#allocation73_spill] sm:$0xff] }
 0x525   :  { %7258 = vmatmul.msk.bf16.gmra.mxu2 %vm1216_vm1, %v3587_v63 }
 0x528   :  { %v3282_v3 = vpop.f32.mrf.mxu2  ;;  %v3158_v11 = vpop.f32.mrf.mxu1 }
 0x529   :  { %v3186_v2 = vadd.f32 %v3158_v11, %v8743_v19  ;;  %v3578_v19 = vld [vmem:[#allocation3 + $0x102] sm:$0xff] }
 0x52a   :  { %v3404_v20 = vpop.f32.mrf.mxu3  ;;  %v3588_v25 = vpack.c.bf16 %v3578_v19, %v9207_v24 }
 0x52b   :  { %v9195_v33 = vadd.f32 %v3404_v20, %v3309_v12  ;;  %7244 = vmatmul.msk.bf16.gmra.mxu1 %vm1216_vm1, %v3463_v8  ;;  %v3310_v27 = vadd.f32 %v3282_v3, %v3186_v2  ;;  %v7294_v12 = vld [vmem:[%s10380_s3 + $0x50] sm:$0xf]  ;;  %v7722_v3 = vld [vmem:[%s10380_s3 + $0x50] sm:$0x10]  ;;  %v3589_v2 = vpack.c.bf16 %v10535_v29, %v9230_v57  ;;  %v9277_v29 = vld [vmem:[#allocation3 + $0x143] sm:$0xff] }
 0x52c   :  { %v7295_v10 = vor.u32 %v7722_v3, %v7294_v12  ;;  %v9272_v3 = vld [vmem:[#allocation3 + $0x131] sm:$0xff] }
 0x52e   :  { %v3997_v8 = vsel %vm2812_vm3, %v7295_v10, 0 }
 0x52f   :  { %7272 = vmatmul.msk.bf16.gmra.mxu3 %vm1216_vm1, %v10531_v14  ;;  %4006 = vmatpush.bf16.msrb.mxu2 %v3997_v8 }
 0x530   :  { %v3284_v44 = vpop.f32.mrf.mxu2  ;;  %v3160_v48 = vpop.f32.mrf.mxu1 }
 0x531   :  { %v3187_v38 = vadd.f32 %v3160_v48, %v3063_v41 }
 0x532   :  { %v3407_v35 = vpop.f32.mrf.mxu3 }
 0x533   :  { %v9205_v37 = vadd.f32 %v3407_v35, %v3310_v27  ;;  %v3311_v32 = vadd.f32 %v3284_v44, %v3187_v38  ;;  %v7308_v27 = vld [vmem:[%s10380_s3 + $0x58] sm:$0xf] }
 0x534   :  { %v7309_v14 = vor.u32 %v7723_v36, %v7308_v27  ;;  %v7796_v38 = vld [vmem:[#allocation3 + $0x111] sm:$0xff]  ;;  %v3714_v27 = vpack.c.bf16 %v9277_v29, %v9084_v55 }
 0x535   :  { %7259 = vmatmul.msk.bf16.gmra.mxu2 %vm1216_vm1, %v3588_v25  ;;  %v10536_v25 = vld [vmem:[#allocation69_spill] sm:$0xff]  ;;  %v3815_v55 = vld [vmem:[#allocation3 + $0x14] sm:$0xff] }
 0x536   :  { %v4121_v48 = vsel %vm2812_vm3, %v7309_v14, 0 }
 0x537   :  { %4130 = vmatpush.bf16.msrb.mxu3 %v4121_v48 }
 0x538   :  { %v3287_v18 = vpop.f32.mrf.mxu2  ;;  %v3163_v23 = vpop.f32.mrf.mxu1 }
 0x539   :  { %v3188_v39 = vadd.f32 %v3163_v23, %v8868_v58  ;;  %v7704_v23 = vld [vmem:[%s10377_s0 + $0x210] sm:$0xff] }
 0x53a   :  { %v3409_v16 = vpop.f32.mrf.mxu3  ;;  %7146 = vmatmul.msk.bf16.gmra.mxu0 %vm558_vm0, %v7704_v23 }
 0x53b   :  { %v9212_v53 = vadd.f32 %v3409_v16, %v3311_v32  ;;  %7245 = vmatmul.msk.bf16.gmra.mxu1 %vm1216_vm1, %v3464_v47  ;;  %v3312_v51 = vadd.f32 %v3287_v18, %v3188_v39  ;;  %v3465_v32 = vpack.c.bf16 %v10536_v25, %v7796_v38  ;;  %v2939_v39 = vadd.f32 %v9074_v60, %v9076_v52 }
 0x53d   :  { %v3067_v47 = vadd.f32 %v9086_v61, %v2939_v39  ;;  %v10542_v39 = vld [vmem:[#allocation75_spill] sm:$0xff] }
 0x53f   :  { %7273 = vmatmul.msk.bf16.gmra.mxu3 %vm1216_vm1, %v10533_v28  ;;  %v3582_v28 = vld [vmem:[#allocation3 + $0x142] sm:$0xff] }
 0x540   :  { %v3289_v63 = vpop.f32.mrf.mxu2  ;;  %v3165_v58 = vpop.f32.mrf.mxu1 }
 0x541   :  { %v3189_v21 = vadd.f32 %v3165_v58, %v3065_v54  ;;  %v3590_v54 = vpack.c.bf16 %v3582_v28, %v10538_v43  ;;  %v9270_v58 = vld [vmem:[#allocation3 + $0x141] sm:$0xff] }
 0x542   :  { %v3412_v11 = vpop.f32.mrf.mxu3  ;;  %v3466_v10 = vpack.c.bf16 %v9270_v58, %v9272_v3  ;;  %v10546_v43 = vld [vmem:[#allocation17_spill] sm:$0xff] }
 0x543   :  { %v9228_v20 = vadd.f32 %v3412_v11, %v3312_v51  ;;  %v3313_v26 = vadd.f32 %v3289_v63, %v3189_v21  ;;  %v7323_v51 = vor.u32 %v7724_v59, %v7322_v15 }
 0x545   :  { %7260 = vmatmul.msk.bf16.gmra.mxu2 %vm1216_vm1, %v3589_v2 }
 0x548   :  { %v3292_v41 = vpop.f32.mrf.mxu2  ;;  %v3168_v44 = vpop.f32.mrf.mxu1 }
 0x549   :  { %v3190_v35 = vadd.f32 %v3168_v44, %v9016_v0  ;;  %v10537_v0 = vpack.c.bf16 %v8882_v7, %v8878_v5  ;;  %v4245_v5 = vsel %vm2812_vm3, %v7323_v51, 0  ;;  %v10544_v51 = vld [vmem:[#allocation11_spill] sm:$0xff] }
 0x54a   :  { %v3414_v19 = vpop.f32.mrf.mxu3  ;;  %4254 = vmatpush.bf16.msra.mxu1 %v4245_v5 }
 0x54b   :  { %v9245_v18 = vadd.f32 %v3414_v19, %v3313_v26  ;;  %7246 = vmatmul.msk.bf16.gmra.mxu1 %vm1216_vm1, %v3465_v32  ;;  %v3314_v16 = vadd.f32 %v3292_v41, %v3190_v35  ;;  %v7705_v26 = vld [vmem:[%s10377_s0 + $0x218] sm:$0xff]  ;;  %v10539_v19 = vld [vmem:[#allocation10_spill] sm:$0xff]  ;;  %v10540_v35 = vld [vmem:[#allocation9_spill] sm:$0xff] }
 0x54c   :  { %7147 = vmatmul.msk.bf16.gmra.mxu0 %vm558_vm0, %v7705_v26  ;;  %v10541_v38 = vpack.c.bf16 %v10539_v19, %v10540_v35  ;;  %v10549_v26 = vld [vmem:[#allocation14_spill] sm:$0xff] }
 0x54f   :  { %7274 = vmatmul.msk.bf16.gmra.mxu3 %vm1216_vm1, %v10537_v0  ;;  %v3831_v0 = vpack.c.bf16 %v10542_v39, %v3815_v55 }
 0x550   :  { %v3294_v4 = vpop.f32.mrf.mxu2  ;;  %v3170_v42 = vpop.f32.mrf.mxu1 }
 0x551   :  { %v3191_v52 = vadd.f32 %v3170_v42, %v3067_v47  ;;  %v10543_v47 = vld [vmem:[#allocation12_spill] sm:$0xff] }
 0x552   :  { %v3417_v60 = vpop.f32.mrf.mxu3 }
 0x553   :  { %v9266_v7 = vadd.f32 %v3417_v60, %v3314_v16  ;;  %v3315_v63 = vadd.f32 %v3294_v4, %v3191_v52  ;;  %v10545_v4 = vpack.c.bf16 %v10543_v47, %v10544_v51  ;;  %v10559_v47 = vld [vmem:[#allocation27_spill] sm:$0xff] }
 0x555   :  { %7261 = vmatmul.msk.bf16.gmra.mxu2 %vm1216_vm1, %v3590_v54  ;;  %v10547_v54 = vld [vmem:[#allocation15_spill] sm:$0xff] }
 0x558   :  { %v3297_v12 = vpop.f32.mrf.mxu2  ;;  %v3173_v61 = vpop.f32.mrf.mxu1 }
 0x559   :  { %v3192_v21 = vadd.f32 %v3173_v61, %v9096_v62 }
 0x55a   :  { %v3419_v11 = vpop.f32.mrf.mxu3 }
 0x55b   :  { %v9279_v2 = vadd.f32 %v3419_v11, %v3315_v63  ;;  %7247 = vmatmul.msk.bf16.gmra.mxu1 %vm1216_vm1, %v3466_v10  ;;  %v3316_v8 = vadd.f32 %v3297_v12, %v3192_v21  ;;  %v10548_v63 = vpack.c.bf16 %v10546_v43, %v10547_v54 }
 0x55f   :  { %7275 = vmatmul.msk.bf16.gmra.mxu3 %vm1216_vm1, %v3714_v27 }
 0x560   :  { %v3299_v62 = vpop.f32.mrf.mxu2  ;;  %v3175_v36 = vpop.f32.mrf.mxu1 }
 0x561   :  { %v3193_v41 = vadd.f32 %v3175_v36, %v9100_v45  ;;  %v7706_v45 = vld [vmem:[%s10377_s0 + $0x220] sm:$0xff]  ;;  %v10553_v36 = vld [vmem:[#allocation19_spill] sm:$0xff] }
 0x562   :  { %v3422_v14 = vpop.f32.mrf.mxu3  ;;  %7148 = vmatmul.msk.bf16.gmra.mxu0 %vm558_vm0, %v7706_v45 }
 0x563   :  { %v9290_v44 = vadd.f32 %v3422_v14, %v3316_v8  ;;  %v3317_v48 = vadd.f32 %v3299_v62, %v3193_v41  ;;  %v10550_v8 = vld [vmem:[#allocation13_spill] sm:$0xff] }
 0x564   :  { %v10551_v27 = vpack.c.bf16 %v10549_v26, %v10550_v8  ;;  %v10552_v62 = vld [vmem:[#allocation21_spill] sm:$0xff] }
 0x565   :  { %7296 = vmatmul.msk.bf16.vlgmr.msrb.gmra.mxu2 %vm1216_vm1, %v10541_v38  ;;  %v10554_v14 = vpack.c.bf16 %v10552_v62, %v10553_v36 }
 0x568   :  { %v3635_v25 = vpop.f32.mrf.mxu2  ;;  %v3511_v32 = vpop.f32.mrf.mxu1 }
 0x569   :  { %v3551_v16 = vadd.f32 %v3511_v32, %v9118_v31  ;;  %v10556_v32 = vld [vmem:[#allocation29_spill] sm:$0xff] }
 0x56a   :  { %v3424_v23 = vpop.f32.mrf.mxu3 }
 0x56b   :  { %v9298_v15 = vadd.f32 %v3424_v23, %v3317_v48  ;;  %7282 = vmatmul.msk.bf16.vlgmr.msrb.gmra.mxu1 %vm1216_vm1, %v3831_v0  ;;  %v3675_v59 = vadd.f32 %v3635_v25, %v3551_v16  ;;  %v10555_v25 = vld [vmem:[#allocation31_spill] sm:$0xff] }
 0x56c   :  { %v10557_v55 = vpack.c.bf16 %v10555_v25, %v10556_v32 }
 0x56f   :  { %7310 = vmatmul.msk.bf16.vlgmr.msrb.gmra.mxu3 %vm1216_vm1, %v10545_v4  ;;  %v10561_v4 = vld [vmem:[#allocation35_spill] sm:$0xff] }
 0x570   :  { %v3637_v42 = vpop.f32.mrf.mxu2  ;;  %v3513_v31 = vpop.f32.mrf.mxu1 }
 0x571   :  { %v3552_v60 = vadd.f32 %v3513_v31, %v9127_v30 }
 0x572   :  { %v3759_v28 = vpop.f32.mrf.mxu3 }
 0x573   :  { %v9310_v52 = vadd.f32 %v3759_v28, %v3675_v59  ;;  %v3676_v5 = vadd.f32 %v3637_v42, %v3552_v60  ;;  %v10558_v59 = vld [vmem:[#allocation28_spill] sm:$0xff]  ;;  %v10562_v42 = vld [vmem:[#allocation33_spill] sm:$0xff] }
 0x574   :  { %v10560_v51 = vpack.c.bf16 %v10558_v59, %v10559_v47  ;;  %v10563_v31 = vpack.c.bf16 %v10561_v4, %v10562_v42  ;;  %v10570_v59 = vld [vmem:[#allocation48_spill] sm:$0xff]  ;;  %v10571_v47 = vld [vmem:[#allocation47_spill] sm:$0xff] }
 0x575   :  { %7297 = vmatmul.msk.bf16.gmra.mxu2 %vm1216_vm1, %v10548_v63  ;;  %v3951_v42 = vld [vmem:[#allocation3 + $0x110] sm:$0xff] }
 0x578   :  { %v3640_v12 = vpop.f32.mrf.mxu2  ;;  %v3516_v61 = vpop.f32.mrf.mxu1 }
 0x579   :  { %v3553_v21 = vadd.f32 %v3516_v61, %v9146_v40  ;;  %v9350_v61 = vld [vmem:[#allocation3 + $0x84] sm:$0xff] }
 0x57a   :  { %v3761_v11 = vpop.f32.mrf.mxu3 }
 0x57b   :  { %v9317_v10 = vadd.f32 %v3761_v11, %v3676_v5  ;;  %7283 = vmatmul.msk.bf16.gmra.mxu1 %vm1216_vm1, %v10551_v27  ;;  %v3677_v30 = vadd.f32 %v3640_v12, %v3553_v21  ;;  %v3947_v5 = vld [vmem:[#allocation3 + $0x90] sm:$0xff]  ;;  %v3834_v27 = vpack.c.bf16 %v9350_v61, %v9023_v56  ;;  %v10565_v56 = vld [vmem:[#allocation45_spill] sm:$0xff] }
 0x57c   :  { %v3959_v63 = vpack.c.bf16 %v3947_v5, %v9030_v50 }
 0x57f   :  { %7311 = vmatmul.msk.bf16.gmra.mxu3 %vm1216_vm1, %v10554_v14 }
 0x580   :  { %v3642_v41 = vpop.f32.mrf.mxu2  ;;  %v3518_v48 = vpop.f32.mrf.mxu1 }
 0x581   :  { %v3554_v35 = vadd.f32 %v3518_v48, %v9156_v9 }
 0x582   :  { %v3764_v19 = vpop.f32.mrf.mxu3 }
 0x583   :  { %v9328_v38 = vadd.f32 %v3764_v19, %v3677_v30  ;;  %v3678_v40 = vadd.f32 %v3642_v41, %v3554_v35  ;;  %v4071_v30 = vld [vmem:[#allocation3 + $0x91] sm:$0xff] }
 0x584   :  { %v4083_v50 = vpack.c.bf16 %v4071_v30, %v9176_v6  ;;  %v10564_v35 = vld [vmem:[#allocation46_spill] sm:$0xff]  ;;  %v10576_v30 = vld [vmem:[#allocation59_spill] sm:$0xff] }
 0x585   :  { %7298 = vmatmul.msk.bf16.gmra.mxu2 %vm1216_vm1, %v10557_v55 }
 0x588   :  { %v3645_v23 = vpop.f32.mrf.mxu2  ;;  %v3521_v16 = vpop.f32.mrf.mxu1 }
 0x589   :  { %v3555_v0 = vadd.f32 %v3521_v16, %v9169_v22  ;;  %v10567_v16 = vld [vmem:[#allocation44_spill] sm:$0xff] }
 0x58a   :  { %v3766_v39 = vpop.f32.mrf.mxu3 }
 0x58b   :  { %v9335_v45 = vadd.f32 %v3766_v39, %v3678_v40  ;;  %7284 = vmatmul.msk.bf16.gmra.mxu1 %vm1216_vm1, %v10560_v51  ;;  %v3679_v9 = vadd.f32 %v3645_v23, %v3555_v0  ;;  %v10566_v40 = vpack.c.bf16 %v10564_v35, %v10565_v56  ;;  %v10568_v39 = vld [vmem:[#allocation43_spill] sm:$0xff]  ;;  %v10572_v51 = vpack.c.bf16 %v10570_v59, %v10571_v47 }
 0x58c   :  { %v10569_v0 = vpack.c.bf16 %v10567_v16, %v10568_v39  ;;  %v7350_v16 = vld [vmem:[%s10380_s3 + $0x70] sm:$0xf]  ;;  %v7726_v39 = vld [vmem:[%s10380_s3 + $0x70] sm:$0x10] }
 0x58f   :  { %7312 = vmatmul.msk.bf16.gmra.mxu3 %vm1216_vm1, %v10563_v31 }
 0x590   :  { %v3647_v28 = vpop.f32.mrf.mxu2  ;;  %v3523_v60 = vpop.f32.mrf.mxu1 }
 0x591   :  { %v3556_v54 = vadd.f32 %v3523_v60, %v9182_v49  ;;  %v3950_v60 = vld [vmem:[#allocation3 + $0x100] sm:$0xff] }
 0x592   :  { %v3769_v43 = vpop.f32.mrf.mxu3  ;;  %v3961_v5 = vpack.c.bf16 %v3951_v42, %v3950_v60  ;;  %v10579_v42 = vld [vmem:[#allocation62_spill] sm:$0xff]  ;;  %v4076_v60 = vld [vmem:[#allocation3 + $0x121] sm:$0xff] }
 0x593   :  { %v9346_v22 = vadd.f32 %v3769_v43, %v3679_v9  ;;  %v3680_v12 = vadd.f32 %v3647_v28, %v3556_v54 }
 0x595   :  { %7299 = vmatmul.msk.bf16.gmra.mxu2 %vm1216_vm1, %v3959_v63 }
 0x598   :  { %v3650_v11 = vpop.f32.mrf.mxu2  ;;  %v3526_v21 = vpop.f32.mrf.mxu1 }
 0x599   :  { %v3557_v8 = vadd.f32 %v3526_v21, %v9191_v46 }
 0x59a   :  { %v3771_v26 = vpop.f32.mrf.mxu3 }
 0x59b   :  { %v9355_v62 = vadd.f32 %v3771_v26, %v3680_v12  ;;  %7285 = vmatmul.msk.bf16.gmra.mxu1 %vm1216_vm1, %v3834_v27  ;;  %v3681_v49 = vadd.f32 %v3650_v11, %v3557_v8  ;;  %v10573_v26 = vld [vmem:[#allocation50_spill] sm:$0xff]  ;;  %v10574_v8 = vld [vmem:[#allocation49_spill] sm:$0xff] }
 0x59c   :  { %v10575_v27 = vpack.c.bf16 %v10573_v26, %v10574_v8  ;;  %v3955_v26 = vld [vmem:[#allocation3 + $0x150] sm:$0xff] }
 0x59f   :  { %7313 = vmatmul.msk.bf16.gmra.mxu3 %vm1216_vm1, %v4083_v50 }
 0x5a0   :  { %v3652_v36 = vpop.f32.mrf.mxu2  ;;  %v3528_v14 = vpop.f32.mrf.mxu1 }
 0x5a1   :  { %v3558_v48 = vadd.f32 %v3528_v14, %v9195_v33 }
 0x5a2   :  { %v3774_v41 = vpop.f32.mrf.mxu3 }
 0x5a3   :  { %v9361_v19 = vadd.f32 %v3774_v41, %v3681_v49  ;;  %v3682_v46 = vadd.f32 %v3652_v36, %v3558_v48  ;;  %v10577_v49 = vld [vmem:[#allocation57_spill] sm:$0xff]  ;;  %v3953_v41 = vld [vmem:[#allocation3 + $0x130] sm:$0xff]  ;;  %v7725_v48 = vld [vmem:[%s10380_s3 + $0x68] sm:$0x10] }
 0x5a4   :  { %v10578_v50 = vpack.c.bf16 %v10576_v30, %v10577_v49  ;;  %v10582_v49 = vld [vmem:[#allocation78_spill] sm:$0xff] }
 0x5a5   :  { %7300 = vmatmul.msk.bf16.gmra.mxu2 %vm1216_vm1, %v10566_v40 }
 0x5a8   :  { %v3655_v25 = vpop.f32.mrf.mxu2  ;;  %v3531_v32 = vpop.f32.mrf.mxu1 }
 0x5a9   :  { %v3559_v6 = vadd.f32 %v3531_v32, %v9205_v37 }
 0x5aa   :  { %v3776_v55 = vpop.f32.mrf.mxu3 }
 0x5ab   :  { %v9368_v23 = vadd.f32 %v3776_v55, %v3682_v46  ;;  %7286 = vmatmul.msk.bf16.gmra.mxu1 %vm1216_vm1, %v10569_v0  ;;  %v3683_v33 = vadd.f32 %v3655_v25, %v3559_v6  ;;  %v3952_v25 = vld [vmem:[#allocation3 + $0x120] sm:$0xff] }
 0x5ac   :  { %v3962_v32 = vpack.c.bf16 %v3953_v41, %v3952_v25 }
 0x5af   :  { %7314 = vmatmul.msk.bf16.gmra.mxu3 %vm1216_vm1, %v10572_v51 }
 0x5b0   :  { %v3657_v9 = vpop.f32.mrf.mxu2  ;;  %v3533_v4 = vpop.f32.mrf.mxu1 }
 0x5b1   :  { %v3560_v28 = vadd.f32 %v3533_v4, %v9212_v53 }
 0x5b2   :  { %v3779_v31 = vpop.f32.mrf.mxu3 }
 0x5b3   :  { %v9379_v37 = vadd.f32 %v3779_v31, %v3683_v33  ;;  %v3684_v43 = vadd.f32 %v3657_v9, %v3560_v28  ;;  %v10580_v31 = vld [vmem:[#allocation61_spill] sm:$0xff] }
 0x5b4   :  { %v10581_v28 = vpack.c.bf16 %v10579_v42, %v10580_v31 }
 0x5b5   :  { %7301 = vmatmul.msk.bf16.gmra.mxu2 %vm1216_vm1, %v3961_v5 }
 0x5b7   :  { %v1114_v4 = vpop.f32.mrf.mxu0 }
 0x5b8   :  { %v3660_v54 = vpop.f32.mrf.mxu2  ;;  %v3536_v63 = vpop.f32.mrf.mxu1 }
 0x5b9   :  { %v3561_v11 = vadd.f32 %v3536_v63, %v9228_v20  ;;  %v7336_v20 = vld [vmem:[%s10380_s3 + $0x68] sm:$0xf] }
 0x5ba   :  { %v3781_v12 = vpop.f32.mrf.mxu3  ;;  %v7337_v56 = vor.u32 %v7725_v48, %v7336_v20 }
 0x5bb   :  { %v9383_v21 = vadd.f32 %v3781_v12, %v3684_v43  ;;  %7287 = vmatmul.msk.bf16.gmra.mxu1 %vm1216_vm1, %v10575_v27  ;;  %v3685_v53 = vadd.f32 %v3660_v54, %v3561_v11  ;;  %v4086_v43 = vpack.c.bf16 %v9272_v3, %v4076_v60  ;;  %v7364_v54 = vld [vmem:[%s10380_s3 + $0x78] sm:$0xf] }
 0x5bc   :  { %v4369_v6 = vsel %vm2812_vm3, %v7337_v56, 0  ;;  %v4079_v56 = vld [vmem:[#allocation3 + $0x151] sm:$0xff] }
 0x5bd   :  { %4378 = vmatpush.bf16.msra.mxu2 %v4369_v6 }
 0x5bf   :  { %7315 = vmatmul.msk.bf16.gmra.mxu3 %vm1216_vm1, %v10578_v50  ;;  %v1116_v30 = vpop.f32.mrf.mxu0  ;;  %v3963_v50 = vpack.c.bf16 %v3955_v26, %v10582_v49 }
 0x5c0   :  { %v3662_v36 = vpop.f32.mrf.mxu2  ;;  %v3538_v14 = vpop.f32.mrf.mxu1 }
 0x5c1   :  { %v3562_v35 = vadd.f32 %v3538_v14, %v9245_v18  ;;  %v7351_v18 = vor.u32 %v7726_v39, %v7350_v16  ;;  %v9432_v14 = vld [vmem:[#allocation3 + $0x144] sm:$0xff]  ;;  %v4087_v16 = vpack.c.bf16 %v4079_v56, %v9270_v58 }
 0x5c2   :  { %v3784_v46 = vpop.f32.mrf.mxu3 }
 0x5c3   :  { %v9400_v40 = vadd.f32 %v3784_v46, %v3685_v53  ;;  %v3686_v55 = vadd.f32 %v3662_v36, %v3562_v35  ;;  %v4493_v59 = vsel %vm2812_vm3, %v7351_v18, 0  ;;  %v10583_v35 = vld [vmem:[#allocation77_spill] sm:$0xff]  ;;  %v4313_v18 = vld [vmem:[#allocation3 + $0x33] sm:$0xff] }
 0x5c4   :  { %4502 = vmatpush.bf16.msra.mxu3 %v4493_v59  ;;  %v1115_v59 = vadd.f32 %v9109_v17, %v1114_v4  ;;  %v10584_v4 = vld [vmem:[#allocation79_spill] sm:$0xff] }
 0x5c5   :  { %7302 = vmatmul.msk.bf16.gmra.mxu2 %vm1216_vm1, %v3962_v32 }
 0x5c8   :  { %v3665_v0 = vpop.f32.mrf.mxu2  ;;  %v3541_v33 = vpop.f32.mrf.mxu1 }
 0x5c9   :  { %v3563_v51 = vadd.f32 %v3541_v33, %v9266_v7  ;;  %v7727_v7 = vld [vmem:[%s10380_s3 + $0x78] sm:$0x10]  ;;  %v1119_v32 = vpop.f32.mrf.mxu0 }
 0x5ca   :  { %v3786_v47 = vpop.f32.mrf.mxu3  ;;  %v7365_v63 = vor.u32 %v7727_v7, %v7364_v54  ;;  %v4188_v54 = vld [vmem:[#allocation3 + $0x22] sm:$0xff] }
 0x5cb   :  { %v9412_v9 = vadd.f32 %v3786_v47, %v3686_v55  ;;  %7288 = vmatmul.msk.bf16.gmra.mxu1 %vm1216_vm1, %v10581_v28  ;;  %v3687_v5 = vadd.f32 %v3665_v0, %v3563_v51  ;;  %v7707_v55 = vld [vmem:[%s10377_s0 + $0x228] sm:$0xff] }
 0x5cc   :  { %v4618_v53 = vsel %vm2812_vm3, %v7365_v63, 0  ;;  %7149 = vmatmul.msk.bf16.gmra.mxu0 %vm558_vm0, %v7707_v55  ;;  %v4312_v51 = vld [vmem:[#allocation3 + $0x23] sm:$0xff]  ;;  %v4204_v63 = vpack.c.bf16 %v10584_v4, %v4188_v54 }
 0x5cd   :  { %4627 = vmatpush.bf16.msrb.mxu1 %v4618_v53  ;;  %v4328_v31 = vpack.c.bf16 %v4313_v18, %v4312_v51  ;;  %v4436_v53 = vld [vmem:[#allocation3 + $0x24] sm:$0xff] }
 0x5cf   :  { %7316 = vmatmul.msk.bf16.gmra.mxu3 %vm1216_vm1, %v4086_v43 }
 0x5d0   :  { %v3667_v12 = vpop.f32.mrf.mxu2  ;;  %v3543_v11 = vpop.f32.mrf.mxu1 }
 0x5d1   :  { %v3564_v27 = vadd.f32 %v3543_v11, %v9279_v2  ;;  %v3838_v2 = vpack.c.bf16 %v9432_v14, %v10583_v35  ;;  %v1121_v42 = vpop.f32.mrf.mxu0  ;;  %v1117_v11 = vadd.f32 %v9109_v17, %v1116_v30 }
 0x5d2   :  { %v3789_v8 = vpop.f32.mrf.mxu3  ;;  %v1122_v58 = vadd.f32 %v9109_v17, %v1121_v42 }
 0x5d3   :  { %v9428_v3 = vadd.f32 %v3789_v8, %v3687_v5  ;;  %v3688_v36 = vadd.f32 %v3667_v12, %v3564_v27  ;;  %v4437_v12 = vld [vmem:[#allocation3 + $0x34] sm:$0xff] }
 0x5d4   :  { %v1210_v60 = vmax.f32 %v1115_v59, %v1122_v58  ;;  %v7708_v27 = vld [vmem:[%s10377_s0 + $0x230] sm:$0xff]  ;;  %v1120_v59 = vadd.f32 %v9109_v17, %v1119_v32  ;;  %v9475_v32 = vld [vmem:[#allocation3 + $0x42] sm:$0xff] }
 0x5d5   :  { %7303 = vmatmul.msk.bf16.gmra.mxu2 %vm1216_vm1, %v3963_v50 }
 0x5d6   :  { %1283 = vst.msk [vmem:[#allocation2 + $0x210] sm:$0xff] %vm1216_vm1, %v1210_v60 }
 0x5d8   :  { %v3670_v41 = vpop.f32.mrf.mxu2  ;;  %v3546_v20 = vpop.f32.mrf.mxu1 }
 0x5d9   :  { %v3565_v46 = vadd.f32 %v3546_v20, %v9290_v44 }
 0x5da   :  { %v3791_v48 = vpop.f32.mrf.mxu3 }
 0x5db   :  { %v9437_v25 = vadd.f32 %v3791_v48, %v3688_v36  ;;  %7289 = vmatmul.msk.bf16.gmra.mxu1 %vm1216_vm1, %v3838_v2  ;;  %v3689_v6 = vadd.f32 %v3670_v41, %v3565_v46  ;;  %v4452_v36 = vpack.c.bf16 %v4437_v12, %v4436_v53 }
 0x5dc   :  { %7150 = vmatmul.msk.bf16.gmra.mxu0 %vm558_vm0, %v7708_v27 }
 0x5dd   :  { %v1311_v30 = vld [vmem:[#allocation2 + $0x210] sm:$0x1]  ;;  %v1335_v41 = vld [vmem:[#allocation2 + $0x211] sm:$0x1]  ;;  %v1432_v20 = vld [vmem:[#allocation2 + $0x212] sm:$0x1] }
 0x5de   :  { %v1359_v48 = vmax.f32 %v1311_v30, %v1335_v41  ;;  %v1456_v46 = vld [vmem:[#allocation2 + $0x213] sm:$0x1]  ;;  %v1552_v35 = vld [vmem:[#allocation2 + $0x214] sm:$0x1]  ;;  %v1576_v2 = vld [vmem:[#allocation2 + $0x215] sm:$0x1] }
 0x5df   :  { %7317 = vmatmul.msk.bf16.gmra.mxu3 %vm1216_vm1, %v4087_v16  ;;  %v1124_v8 = vpop.f32.mrf.mxu0  ;;  %v1480_v16 = vmax.f32 %v1432_v20, %v1456_v46  ;;  %v1696_v18 = vld [vmem:[#allocation2 + $0x217] sm:$0x1] }
 0x5e0   :  { %v3672_v44 = vpop.f32.mrf.mxu2  ;;  %v3548_v39 = vpop.f32.mrf.mxu1  ;;  %v1125_v50 = vadd.f32 %v9109_v17, %v1124_v8  ;;  %v1383_v51 = vmax.f32 %v1359_v48, 0.0  ;;  %v4439_v30 = vld [vmem:[#allocation3 + $0x54] sm:$0xff] }
 0x5e1   :  { %v3566_v33 = vadd.f32 %v3548_v39, %v9298_v15  ;;  %v1672_v39 = vld [vmem:[#allocation2 + $0x216] sm:$0x1]  ;;  %v1504_v58 = vmax.f32 %v1480_v16, 0.0 }
 0x5e2   :  { %v3794_v0 = vpop.f32.mrf.mxu3  ;;  %v1720_v42 = vmax.f32 %v1672_v39, %v1696_v18  ;;  %1408 = vst.msk [vmem:[#allocation3 + $0x160] sm:$0x1] %vm1385_vm2, %v1383_v51  ;;  %v4317_v18 = vld [vmem:[#allocation3 + $0x73] sm:$0xff] }
 0x5e3   :  { %v9448_v47 = vadd.f32 %v3794_v0, %v3689_v6  ;;  %v3690_v28 = vadd.f32 %v3672_v44, %v3566_v33  ;;  %v4315_v6 = vld [vmem:[#allocation3 + $0x53] sm:$0xff]  ;;  %v1600_v44 = vmax.f32 %v1552_v35, %v1576_v2  ;;  %1528 = vst.msk [vmem:[#allocation3 + $0x161] sm:$0x1] %vm1385_vm2, %v1504_v58 }
 0x5e5   :  { %7338 = vmatmul.msk.bf16.vlgmr.msra.gmra.mxu2 %vm1216_vm1, %v4328_v31  ;;  %v1624_v60 = vmax.f32 %v1600_v44, 0.0 }
 0x5e7   :  { %1648 = vst.msk [vmem:[#allocation3 + $0x162] sm:$0x1] %vm1385_vm2, %v1624_v60 }
 0x5e8   :  { %v4008_v5 = vpop.f32.mrf.mxu2  ;;  %v3883_v43 = vpop.f32.mrf.mxu1 }
 0x5e9   :  { %v3923_v15 = vadd.f32 %v3883_v43, %v9310_v52  ;;  %v1211_v52 = vmax.f32 %v1117_v11, %v1125_v50 }
 0x5ea   :  { %v3796_v7 = vpop.f32.mrf.mxu3 }
 0x5eb   :  { %v9456_v26 = vadd.f32 %v3796_v7, %v3690_v28  ;;  %7324 = vmatmul.msk.bf16.vlgmr.msra.gmra.mxu1 %vm1216_vm1, %v4204_v63  ;;  %v4048_v49 = vadd.f32 %v4008_v5, %v3923_v15  ;;  %1284 = vst.msk [vmem:[#allocation2 + $0x218] sm:$0xff] %vm1216_vm1, %v1211_v52  ;;  %v4314_v28 = vld [vmem:[#allocation3 + $0x43] sm:$0xff]  ;;  %v1126_v5 = vpop.f32.mrf.mxu0  ;;  %v1744_v7 = vmax.f32 %v1720_v42, 0.0  ;;  %v4205_v52 = vpack.c.bf16 %v9143_v13, %v9475_v32 }
 0x5ec   :  { %v4329_v43 = vpack.c.bf16 %v4315_v6, %v4314_v28  ;;  %v1127_v15 = vadd.f32 %v9109_v17, %v1126_v5 }
 0x5ed   :  { %1768 = vst.msk [vmem:[#allocation3 + $0x163] sm:$0x1] %vm1385_vm2, %v1744_v7 }
 0x5ef   :  { %7352 = vmatmul.msk.bf16.vlgmr.msra.gmra.mxu3 %vm1216_vm1, %v4452_v36 }
 0x5f0   :  { %v4010_v56 = vpop.f32.mrf.mxu2  ;;  %v3885_v55 = vpop.f32.mrf.mxu1 }
 0x5f1   :  { %v3924_v33 = vadd.f32 %v3885_v55, %v9317_v10  ;;  %v1212_v10 = vmax.f32 %v1120_v59, %v1127_v15  ;;  %v7709_v55 = vld [vmem:[%s10377_s0 + $0x238] sm:$0xff]  ;;  %v4316_v15 = vld [vmem:[#allocation3 + $0x63] sm:$0xff] }
 0x5f2   :  { %v4132_v0 = vpop.f32.mrf.mxu3  ;;  %v1792_v4 = vld [vmem:[#allocation2 + $0x218] sm:$0x1]  ;;  %v1816_v63 = vld [vmem:[#allocation2 + $0x219] sm:$0x1]  ;;  %v1912_v12 = vld [vmem:[#allocation2 + $0x21a] sm:$0x1]  ;;  %7151 = vmatmul.msk.bf16.gmra.mxu0 %vm558_vm0, %v7709_v55 }
 0x5f3   :  { %v9468_v31 = vadd.f32 %v4132_v0, %v4048_v49  ;;  %v4049_v54 = vadd.f32 %v4010_v56, %v3924_v33  ;;  %v1840_v27 = vmax.f32 %v1792_v4, %v1816_v63  ;;  %v1936_v53 = vld [vmem:[#allocation2 + $0x21b] sm:$0x1]  ;;  %v2032_v49 = vld [vmem:[#allocation2 + $0x21c] sm:$0x1]  ;;  %v2056_v17 = vld [vmem:[#allocation2 + $0x21d] sm:$0x1] }
 0x5f4   :  { %v1960_v41 = vmax.f32 %v1912_v12, %v1936_v53  ;;  %v2080_v20 = vmax.f32 %v2032_v49, %v2056_v17  ;;  %v2152_v48 = vld [vmem:[#allocation2 + $0x21e] sm:$0x1]  ;;  %v2176_v46 = vld [vmem:[#allocation2 + $0x21f] sm:$0x1]  ;;  %1285 = vst.msk [vmem:[#allocation2 + $0x220] sm:$0xff] %vm1216_vm1, %v1212_v10 }
 0x5f5   :  { %7339 = vmatmul.msk.bf16.gmra.mxu2 %vm1216_vm1, %v4329_v43  ;;  %v1864_v2 = vmax.f32 %v1840_v27, 0.0  ;;  %v2200_v56 = vmax.f32 %v2152_v48, %v2176_v46  ;;  %v9507_v48 = vld [vmem:[#allocation3 + $0x74] sm:$0xff] }
 0x5f6   :  { %v1984_v13 = vmax.f32 %v1960_v41, 0.0  ;;  %v2104_v16 = vmax.f32 %v2080_v20, 0.0 }
 0x5f7   :  { %1888 = vst.msk [vmem:[#allocation3 + $0x164] sm:$0x1] %vm1385_vm2, %v1864_v2  ;;  %v2224_v39 = vmax.f32 %v2200_v56, 0.0  ;;  %v9512_v2 = vld [vmem:[#allocation3 + $0x64] sm:$0xff] }
 0x5f8   :  { %v4013_v11 = vpop.f32.mrf.mxu2  ;;  %v3888_v8 = vpop.f32.mrf.mxu1  ;;  %2008 = vst.msk [vmem:[#allocation3 + $0x165] sm:$0x1] %vm1385_vm2, %v1984_v13  ;;  %v4454_v55 = vpack.c.bf16 %v9507_v48, %v9512_v2 }
 0x5f9   :  { %v3925_v36 = vadd.f32 %v3888_v8, %v9328_v38  ;;  %v4438_v38 = vld [vmem:[#allocation3 + $0x44] sm:$0xff]  ;;  %2128 = vst.msk [vmem:[#allocation3 + $0x166] sm:$0x1] %vm1385_vm2, %v2104_v16 }
 0x5fa   :  { %v4134_v50 = vpop.f32.mrf.mxu3  ;;  %v4453_v44 = vpack.c.bf16 %v4439_v30, %v4438_v38  ;;  %2248 = vst.msk [vmem:[#allocation3 + $0x167] sm:$0x1] %vm1385_vm2, %v2224_v39 }
 0x5fb   :  { %v9482_v35 = vadd.f32 %v4134_v50, %v4049_v54  ;;  %7325 = vmatmul.msk.bf16.gmra.mxu1 %vm1216_vm1, %v4205_v52  ;;  %v4050_v6 = vadd.f32 %v4013_v11, %v3925_v36  ;;  %v2272_v59 = vld [vmem:[#allocation2 + $0x220] sm:$0x1]  ;;  %v2296_v51 = vld [vmem:[#allocation2 + $0x221] sm:$0x1]  ;;  %v2392_v42 = vld [vmem:[#allocation2 + $0x222] sm:$0x1]  ;;  %v4330_v11 = vpack.c.bf16 %v4317_v18, %v4316_v15 }
 0x5fc   :  { %v2320_v60 = vmax.f32 %v2272_v59, %v2296_v51  ;;  %v2416_v5 = vld [vmem:[#allocation2 + $0x223] sm:$0x1]  ;;  %v2512_v43 = vld [vmem:[#allocation2 + $0x224] sm:$0x1]  ;;  %v2536_v54 = vld [vmem:[#allocation2 + $0x225] sm:$0x1] }
 0x5fd   :  { %v2440_v10 = vmax.f32 %v2392_v42, %v2416_v5  ;;  %v2560_v4 = vmax.f32 %v2512_v43, %v2536_v54  ;;  %v2632_v63 = vld [vmem:[#allocation2 + $0x226] sm:$0x1]  ;;  %v2656_v12 = vld [vmem:[#allocation2 + $0x227] sm:$0x1]  ;;  %v9525_v18 = vld [vmem:[#allocation3 + $0x92] sm:$0xff] }
 0x5fe   :  { %v2344_v27 = vmax.f32 %v2320_v60, 0.0  ;;  %v2680_v53 = vmax.f32 %v2632_v63, %v2656_v12  ;;  %v9501_v52 = vld [vmem:[#allocation3 + $0x62] sm:$0xff] }
 0x5ff   :  { %7353 = vmatmul.msk.bf16.gmra.mxu3 %vm1216_vm1, %v4453_v44  ;;  %v2464_v49 = vmax.f32 %v2440_v10, 0.0  ;;  %v2584_v17 = vmax.f32 %v2560_v4, 0.0  ;;  %v4206_v20 = vpack.c.bf16 %v9171_v1, %v9501_v52  ;;  %v9527_v59 = vld [vmem:[#allocation3 + $0x82] sm:$0xff]  ;;  %v7797_v4 = vld [vmem:[#allocation3 + $0xf3] sm:$0xff] }
 0x600   :  { %v4015_v0 = vpop.f32.mrf.mxu2  ;;  %v3890_v33 = vpop.f32.mrf.mxu1  ;;  %2368 = vst.msk [vmem:[#allocation3 + $0x168] sm:$0x1] %vm1385_vm2, %v2344_v27  ;;  %v4320_v10 = vld [vmem:[#allocation3 + $0xe3] sm:$0xff] }
 0x601   :  { %v3926_v58 = vadd.f32 %v3890_v33, %v9335_v45  ;;  %v2704_v45 = vmax.f32 %v2680_v53, 0.0  ;;  %2488 = vst.msk [vmem:[#allocation3 + $0x169] sm:$0x1] %vm1385_vm2, %v2464_v49  ;;  %v4332_v63 = vpack.c.bf16 %v7797_v4, %v4320_v10  ;;  %v4196_v27 = vld [vmem:[#allocation3 + $0xe2] sm:$0xff] }
 0x602   :  { %v4137_v28 = vpop.f32.mrf.mxu3  ;;  %2608 = vst.msk [vmem:[#allocation3 + $0x16a] sm:$0x1] %vm1385_vm2, %v2584_v17  ;;  %v4208_v49 = vpack.c.bf16 %v9207_v24, %v4196_v27  ;;  %v7729_v27 = vld [vmem:[%s10380_s3 + $0x88] sm:$0x10] }
 0x603   :  { %v9495_v7 = vadd.f32 %v4137_v28, %v4050_v6  ;;  %v4051_v8 = vadd.f32 %v4015_v0, %v3926_v58  ;;  %2728 = vst.msk [vmem:[#allocation3 + $0x16b] sm:$0x1] %vm1385_vm2, %v2704_v45  ;;  %v9532_v28 = vld [vmem:[#allocation3 + $0x94] sm:$0xff] }
 0x604   :  { %v4455_v60 = vpack.c.bf16 %v9532_v28, %v9350_v61 }
 0x605   :  { %7340 = vmatmul.msk.bf16.gmra.mxu2 %vm1216_vm1, %v4330_v11 }
 0x608   :  { %v4018_v50 = vpop.f32.mrf.mxu2  ;;  %v3893_v36 = vpop.f32.mrf.mxu1 }
 0x609   :  { %v3927_v41 = vadd.f32 %v3893_v36, %v9346_v22  ;;  %v9517_v22 = vld [vmem:[#allocation3 + $0x93] sm:$0xff] }
 0x60a   :  { %v4139_v30 = vpop.f32.mrf.mxu3  ;;  %v4331_v44 = vpack.c.bf16 %v9517_v22, %v9180_v34 }
 0x60b   :  { %v9509_v46 = vadd.f32 %v4139_v30, %v4051_v8  ;;  %7326 = vmatmul.msk.bf16.gmra.mxu1 %vm1216_vm1, %v4206_v20  ;;  %v4052_v56 = vadd.f32 %v4018_v50, %v3927_v41  ;;  %v7798_v50 = vld [vmem:[#allocation3 + $0xf4] sm:$0xff] }
 0x60f   :  { %7354 = vmatmul.msk.bf16.gmra.mxu3 %vm1216_vm1, %v4454_v55 }
 0x610   :  { %v4020_v38 = vpop.f32.mrf.mxu2  ;;  %v3895_v6 = vpop.f32.mrf.mxu1 }
 0x611   :  { %v3928_v1 = vadd.f32 %v3895_v6, %v9355_v62  ;;  %v4207_v62 = vpack.c.bf16 %v9525_v18, %v9527_v59 }
 0x612   :  { %v4142_v13 = vpop.f32.mrf.mxu3 }
 0x613   :  { %v9520_v16 = vadd.f32 %v4142_v13, %v4052_v56  ;;  %v4053_v39 = vadd.f32 %v4020_v38, %v3928_v1  ;;  %v7800_v38 = vld [vmem:[#allocation3 + $0x113] sm:$0xff] }
 0x615   :  { %7341 = vmatmul.msk.bf16.gmra.mxu2 %vm1216_vm1, %v4331_v44  ;;  %v9554_v44 = vld [vmem:[#allocation3 + $0x102] sm:$0xff] }
 0x618   :  { %v4023_v0 = vpop.f32.mrf.mxu2  ;;  %v3898_v33 = vpop.f32.mrf.mxu1 }
 0x619   :  { %v3929_v42 = vadd.f32 %v3898_v33, %v9361_v19  ;;  %v4209_v33 = vpack.c.bf16 %v9230_v57, %v9554_v44  ;;  %v7378_v57 = vld [vmem:[%s10380_s3 + $0x80] sm:$0xf] }
 0x61a   :  { %v4144_v51 = vpop.f32.mrf.mxu3 }
 0x61b   :  { %v9534_v58 = vadd.f32 %v4144_v51, %v4053_v39  ;;  %7327 = vmatmul.msk.bf16.gmra.mxu1 %vm1216_vm1, %v4207_v62  ;;  %v4054_v34 = vadd.f32 %v4023_v0, %v3929_v42  ;;  %v7801_v42 = vld [vmem:[#allocation3 + $0x104] sm:$0xff]  ;;  %v7802_v62 = vld [vmem:[#allocation3 + $0x114] sm:$0xff] }
 0x61f   :  { %7355 = vmatmul.msk.bf16.gmra.mxu3 %vm1216_vm1, %v4455_v60 }
 0x620   :  { %v4025_v5 = vpop.f32.mrf.mxu2  ;;  %v3900_v43 = vpop.f32.mrf.mxu1 }
 0x621   :  { %v3930_v19 = vadd.f32 %v3900_v43, %v9368_v23  ;;  %v4444_v23 = vld [vmem:[#allocation3 + $0xe4] sm:$0xff]  ;;  %v9563_v43 = vld [vmem:[#allocation3 + $0x133] sm:$0xff] }
 0x622   :  { %v4147_v54 = vpop.f32.mrf.mxu3  ;;  %v4456_v36 = vpack.c.bf16 %v7798_v50, %v4444_v23 }
 0x623   :  { %v9541_v15 = vadd.f32 %v4147_v54, %v4054_v34  ;;  %v4055_v12 = vadd.f32 %v4025_v5, %v3930_v19  ;;  %v4457_v34 = vpack.c.bf16 %v7802_v62, %v7801_v42  ;;  %v7728_v19 = vld [vmem:[%s10380_s3 + $0x80] sm:$0x10] }
 0x624   :  { %v7379_v4 = vor.u32 %v7728_v19, %v7378_v57  ;;  %v9615_v57 = vld [vmem:[#allocation3 + $0x142] sm:$0xff] }
 0x625   :  { %7342 = vmatmul.msk.bf16.gmra.mxu2 %vm1216_vm1, %v4332_v63  ;;  %v7803_v63 = vld [vmem:[#allocation3 + $0x123] sm:$0xff] }
 0x628   :  { %v4028_v11 = vpop.f32.mrf.mxu2  ;;  %v3903_v8 = vpop.f32.mrf.mxu1 }
 0x629   :  { %v3931_v61 = vadd.f32 %v3903_v8, %v9379_v37  ;;  %v7799_v37 = vld [vmem:[#allocation3 + $0x103] sm:$0xff]  ;;  %v4742_v8 = vsel %vm2812_vm3, %v7379_v4, 0 }
 0x62a   :  { %v4149_v53 = vpop.f32.mrf.mxu3  ;;  %v4333_v24 = vpack.c.bf16 %v7800_v38, %v7799_v37  ;;  %4751 = vmatpush.bf16.msrb.mxu2 %v4742_v8  ;;  %v7804_v38 = vld [vmem:[#allocation3 + $0x124] sm:$0xff] }
 0x62b   :  { %v9546_v17 = vadd.f32 %v4149_v53, %v4055_v12  ;;  %7328 = vmatmul.msk.bf16.gmra.mxu1 %vm1216_vm1, %v4208_v49  ;;  %v4056_v45 = vadd.f32 %v4028_v11, %v3931_v61  ;;  %v4334_v12 = vpack.c.bf16 %v9563_v43, %v7803_v63  ;;  %v9583_v53 = vld [vmem:[#allocation3 + $0x132] sm:$0xff] }
 0x62c   :  { %v9620_v63 = vld [vmem:[#allocation3 + $0x154] sm:$0xff] }
 0x62d   :  { %v4459_v8 = vpack.c.bf16 %v9620_v63, %v9432_v14 }
 0x62f   :  { %7356 = vmatmul.msk.bf16.gmra.mxu3 %vm1216_vm1, %v4456_v36 }
 0x630   :  { %v4030_v30 = vpop.f32.mrf.mxu2  ;;  %v3905_v41 = vpop.f32.mrf.mxu1 }
 0x631   :  { %v3932_v56 = vadd.f32 %v3905_v41, %v9383_v21 }
 0x632   :  { %v4152_v20 = vpop.f32.mrf.mxu3 }
 0x633   :  { %v9551_v55 = vadd.f32 %v4152_v20, %v4056_v45  ;;  %v4057_v6 = vadd.f32 %v4030_v30, %v3932_v56  ;;  %v9585_v45 = vld [vmem:[#allocation3 + $0x122] sm:$0xff]  ;;  %v9591_v20 = vld [vmem:[#allocation3 + $0x134] sm:$0xff] }
 0x634   :  { %v4210_v41 = vpack.c.bf16 %v9583_v53, %v9585_v45 }
 0x635   :  { %7343 = vmatmul.msk.bf16.gmra.mxu2 %vm1216_vm1, %v4333_v24  ;;  %v4458_v24 = vpack.c.bf16 %v9591_v20, %v7804_v38 }
 0x638   :  { %v4033_v13 = vpop.f32.mrf.mxu2  ;;  %v3908_v1 = vpop.f32.mrf.mxu1 }
 0x639   :  { %v3933_v0 = vadd.f32 %v3908_v1, %v9400_v40 }
 0x63a   :  { %v4154_v39 = vpop.f32.mrf.mxu3 }
 0x63b   :  { %v9559_v51 = vadd.f32 %v4154_v39, %v4057_v6  ;;  %7329 = vmatmul.msk.bf16.gmra.mxu1 %vm1216_vm1, %v4209_v33  ;;  %v4058_v21 = vadd.f32 %v4033_v13, %v3933_v0  ;;  %v7730_v6 = vld [vmem:[%s10380_s3 + $0x90] sm:$0x10] }
 0x63c   :  { %v9604_v0 = vld [vmem:[#allocation3 + $0x153] sm:$0xff] }
 0x63f   :  { %7357 = vmatmul.msk.bf16.gmra.mxu3 %vm1216_vm1, %v4457_v34  ;;  %v4335_v34 = vpack.c.bf16 %v9604_v0, %v9277_v29 }
 0x640   :  { %v4035_v60 = vpop.f32.mrf.mxu2  ;;  %v3910_v5 = vpop.f32.mrf.mxu1 }
 0x641   :  { %v3934_v40 = vadd.f32 %v3910_v5, %v9412_v9  ;;  %v7392_v9 = vld [vmem:[%s10380_s3 + $0x88] sm:$0xf]  ;;  %v9613_v5 = vld [vmem:[#allocation3 + $0x152] sm:$0xff] }
 0x642   :  { %v4157_v54 = vpop.f32.mrf.mxu3  ;;  %v7393_v61 = vor.u32 %v7729_v27, %v7392_v9  ;;  %v4211_v4 = vpack.c.bf16 %v9613_v5, %v9615_v57 }
 0x643   :  { %v9572_v10 = vadd.f32 %v4157_v54, %v4058_v21  ;;  %v4059_v11 = vadd.f32 %v4035_v60, %v3934_v40 }
 0x644   :  { %v4866_v50 = vsel %vm2812_vm3, %v7393_v61, 0 }
 0x645   :  { %7344 = vmatmul.msk.bf16.gmra.mxu2 %vm1216_vm1, %v4334_v12  ;;  %4875 = vmatpush.bf16.msrb.mxu3 %v4866_v50 }
 0x648   :  { %v4038_v49 = vpop.f32.mrf.mxu2  ;;  %v3913_v23 = vpop.f32.mrf.mxu1 }
 0x649   :  { %v3935_v30 = vadd.f32 %v3913_v23, %v9428_v3  ;;  %v7406_v3 = vld [vmem:[%s10380_s3 + $0x90] sm:$0xf]  ;;  %v1129_v29 = vpop.f32.mrf.mxu0 }
 0x64a   :  { %v4159_v36 = vpop.f32.mrf.mxu3  ;;  %v7407_v13 = vor.u32 %v7730_v6, %v7406_v3  ;;  %v4685_v23 = vld [vmem:[#allocation3 + $0x31] sm:$0xff]  ;;  %v7806_v6 = vld [vmem:[#allocation3 + $0x40] sm:$0xff] }
 0x64b   :  { %v9593_v56 = vadd.f32 %v4159_v36, %v4059_v11  ;;  %7330 = vmatmul.msk.bf16.gmra.mxu1 %vm1216_vm1, %v4210_v41  ;;  %v4060_v37 = vadd.f32 %v4038_v49, %v3935_v30  ;;  %v7805_v36 = vld [vmem:[#allocation3 + $0x41] sm:$0xff] }
 0x64c   :  { %v4990_v42 = vsel %vm2812_vm3, %v7407_v13, 0  ;;  %v4701_v30 = vpack.c.bf16 %v7805_v36, %v4685_v23  ;;  %v7810_v36 = vld [vmem:[#allocation3 + $0x50] sm:$0xff] }
 0x64d   :  { %4999 = vmatpush.bf16.msra.mxu1 %v4990_v42 }
 0x64f   :  { %7358 = vmatmul.msk.bf16.gmra.mxu3 %vm1216_vm1, %v4458_v24  ;;  %v4561_v24 = vld [vmem:[#allocation3 + $0x30] sm:$0xff] }
 0x650   :  { %v4040_v1 = vpop.f32.mrf.mxu2  ;;  %v3915_v39 = vpop.f32.mrf.mxu1  ;;  %v4577_v13 = vpack.c.bf16 %v7806_v6, %v4561_v24  ;;  %v9650_v24 = vld [vmem:[#allocation3 + $0x52] sm:$0xff] }
 0x651   :  { %v3936_v21 = vadd.f32 %v3915_v39, %v9437_v25  ;;  %v1131_v50 = vpop.f32.mrf.mxu0  ;;  %v4809_v39 = vld [vmem:[#allocation3 + $0x32] sm:$0xff]  ;;  %v4826_v6 = vpack.c.bf16 %v9501_v52, %v9650_v24 }
 0x652   :  { %v4162_v33 = vpop.f32.mrf.mxu3 }
 0x653   :  { %v9608_v62 = vadd.f32 %v4162_v33, %v4060_v37  ;;  %v4061_v60 = vadd.f32 %v4040_v1, %v3936_v21  ;;  %v4825_v21 = vpack.c.bf16 %v9475_v32, %v4809_v39 }
 0x655   :  { %7345 = vmatmul.msk.bf16.gmra.mxu2 %vm1216_vm1, %v4335_v34 }
 0x658   :  { %v4043_v54 = vpop.f32.mrf.mxu2  ;;  %v3918_v40 = vpop.f32.mrf.mxu1 }
 0x659   :  { %v3937_v25 = vadd.f32 %v3918_v40, %v9448_v47 }
 0x65a   :  { %v4164_v19 = vpop.f32.mrf.mxu3 }
 0x65b   :  { %v9622_v12 = vadd.f32 %v4164_v19, %v4061_v60  ;;  %7331 = vmatmul.msk.bf16.gmra.mxu1 %vm1216_vm1, %v4211_v4  ;;  %v4062_v11 = vadd.f32 %v4043_v54, %v3937_v25  ;;  %v7808_v4 = vld [vmem:[#allocation3 + $0x51] sm:$0xff] }
 0x65f   :  { %7359 = vmatmul.msk.bf16.gmra.mxu3 %vm1216_vm1, %v4459_v8 }
 0x660   :  { %v4045_v9 = vpop.f32.mrf.mxu2  ;;  %v3920_v27 = vpop.f32.mrf.mxu1 }
 0x661   :  { %v3938_v47 = vadd.f32 %v3920_v27, %v9456_v26  ;;  %v1134_v26 = vpop.f32.mrf.mxu0 }
 0x662   :  { %v4167_v61 = vpop.f32.mrf.mxu3 }
 0x663   :  { %v9629_v49 = vadd.f32 %v4167_v61, %v4062_v11  ;;  %v4063_v41 = vadd.f32 %v4045_v9, %v3938_v47  ;;  %v7809_v11 = vld [vmem:[#allocation3 + $0x61] sm:$0xff] }
 0x664   :  { %v4702_v8 = vpack.c.bf16 %v7809_v11, %v7808_v4 }
 0x665   :  { %7380 = vmatmul.msk.bf16.vlgmr.msrb.gmra.mxu2 %vm1216_vm1, %v4701_v30 }
 0x668   :  { %v4380_v37 = vpop.f32.mrf.mxu2  ;;  %v4256_v38 = vpop.f32.mrf.mxu1 }
 0x669   :  { %v4296_v3 = vadd.f32 %v4256_v38, %v9468_v31  ;;  %v7807_v31 = vld [vmem:[%s10379_s2] ss:$0 sm:$0xff]  ;;  %v1136_v25 = vpop.f32.mrf.mxu0 }
 0x66a   :  { %v4169_v14 = vpop.f32.mrf.mxu3  ;;  %v1130_v40 = vadd.f32 %v7807_v31, %v1129_v29  ;;  %v1137_v32 = vadd.f32 %v7807_v31, %v1136_v25  ;;  %v7811_v29 = vld [vmem:[#allocation3 + $0x60] sm:$0xff] }
 0x66b   :  { %v9633_v1 = vadd.f32 %v4169_v14, %v4063_v41  ;;  %7366 = vmatmul.msk.bf16.vlgmr.msrb.gmra.mxu1 %vm1216_vm1, %v4577_v13  ;;  %v4420_v33 = vadd.f32 %v4380_v37, %v4296_v3  ;;  %v4578_v30 = vpack.c.bf16 %v7811_v29, %v7810_v36  ;;  %v1132_v41 = vadd.f32 %v7807_v31, %v1131_v50  ;;  %v7812_v36 = vld [vmem:[#allocation3 + $0x71] sm:$0xff]  ;;  %v7813_v29 = vld [vmem:[#allocation3 + $0x81] sm:$0xff] }
 0x66c   :  { %v1213_v27 = vmax.f32 %v1130_v40, %v1137_v32 }
 0x66e   :  { %1286 = vst.msk [vmem:[#allocation2 + $0x228] sm:$0xff] %vm1216_vm1, %v1213_v27 }
 0x66f   :  { %7394 = vmatmul.msk.bf16.vlgmr.msrb.gmra.mxu3 %vm1216_vm1, %v4825_v21 }
 0x670   :  { %v4382_v42 = vpop.f32.mrf.mxu2  ;;  %v4258_v34 = vpop.f32.mrf.mxu1 }
 0x671   :  { %v4297_v54 = vadd.f32 %v4258_v34, %v9482_v35  ;;  %v1139_v38 = vpop.f32.mrf.mxu0 }
 0x672   :  { %v4504_v60 = vpop.f32.mrf.mxu3  ;;  %v1140_v3 = vadd.f32 %v7807_v31, %v1139_v38 }
 0x673   :  { %v9642_v19 = vadd.f32 %v4504_v60, %v4420_v33  ;;  %v4421_v9 = vadd.f32 %v4382_v42, %v4297_v54 }
 0x674   :  { %v1214_v13 = vmax.f32 %v1132_v41, %v1140_v3 }
 0x675   :  { %7381 = vmatmul.msk.bf16.gmra.mxu2 %vm1216_vm1, %v4702_v8  ;;  %v1336_v39 = vld [vmem:[#allocation2 + $0x229] sm:$0x1]  ;;  %v1433_v33 = vld [vmem:[#allocation2 + $0x22a] sm:$0x1]  ;;  %v1457_v50 = vld [vmem:[#allocation2 + $0x22b] sm:$0x1] }
 0x676   :  { %v1553_v42 = vld [vmem:[#allocation2 + $0x22c] sm:$0x1]  ;;  %v1577_v34 = vld [vmem:[#allocation2 + $0x22d] sm:$0x1]  ;;  %v1481_v40 = vmax.f32 %v1433_v33, %v1457_v50  ;;  %v1673_v4 = vld [vmem:[#allocation2 + $0x22e] sm:$0x1] }
 0x677   :  { %v1601_v25 = vmax.f32 %v1553_v42, %v1577_v34  ;;  %v1697_v11 = vld [vmem:[#allocation2 + $0x22f] sm:$0x1]  ;;  %1287 = vst.msk [vmem:[#allocation2 + $0x230] sm:$0xff] %vm1216_vm1, %v1214_v13  ;;  %v7814_v34 = vld [vmem:[#allocation3 + $0x70] sm:$0xff] }
 0x678   :  { %v4385_v61 = vpop.f32.mrf.mxu2  ;;  %v4261_v35 = vpop.f32.mrf.mxu1  ;;  %v1721_v27 = vmax.f32 %v1673_v4, %v1697_v11 }
 0x679   :  { %v4298_v23 = vadd.f32 %v4261_v35, %v9495_v7  ;;  %v1312_v7 = vld [vmem:[#allocation2 + $0x228] sm:$0x1]  ;;  %v1505_v35 = vmax.f32 %v1481_v40, 0.0 }
 0x67a   :  { %v4506_v47 = vpop.f32.mrf.mxu3  ;;  %v1360_v21 = vmax.f32 %v1312_v7, %v1336_v39  ;;  %v1745_v38 = vmax.f32 %v1721_v27, 0.0 }
 0x67b   :  { %v9647_v37 = vadd.f32 %v4506_v47, %v4421_v9  ;;  %7367 = vmatmul.msk.bf16.gmra.mxu1 %vm1216_vm1, %v4578_v30  ;;  %v4422_v14 = vadd.f32 %v4385_v61, %v4298_v23  ;;  %v1135_v9 = vadd.f32 %v7807_v31, %v1134_v26  ;;  %v1625_v47 = vmax.f32 %v1601_v25, 0.0  ;;  %v1141_v23 = vpop.f32.mrf.mxu0  ;;  %1529 = vst.msk [vmem:[#allocation3 + $0x171] sm:$0x1] %vm1385_vm2, %v1505_v35 }
 0x67c   :  { %v1384_v32 = vmax.f32 %v1360_v21, 0.0  ;;  %v4703_v30 = vpack.c.bf16 %v7813_v29, %v7812_v36  ;;  %v1142_v3 = vadd.f32 %v7807_v31, %v1141_v23  ;;  %1769 = vst.msk [vmem:[#allocation3 + $0x173] sm:$0x1] %vm1385_vm2, %v1745_v38  ;;  %v9677_v36 = vld [vmem:[#allocation3 + $0xa1] sm:$0xff] }
 0x67d   :  { %1649 = vst.msk [vmem:[#allocation3 + $0x172] sm:$0x1] %vm1385_vm2, %v1625_v47 }
 0x67e   :  { %1409 = vst.msk [vmem:[#allocation3 + $0x170] sm:$0x1] %vm1385_vm2, %v1384_v32  ;;  %v1793_v26 = vld [vmem:[#allocation2 + $0x230] sm:$0x1]  ;;  %v1937_v33 = vld [vmem:[#allocation2 + $0x233] sm:$0x1] }
 0x67f   :  { %7395 = vmatmul.msk.bf16.gmra.mxu3 %vm1216_vm1, %v4826_v6  ;;  %v1913_v6 = vld [vmem:[#allocation2 + $0x232] sm:$0x1]  ;;  %v2033_v21 = vld [vmem:[#allocation2 + $0x234] sm:$0x1]  ;;  %v2057_v50 = vld [vmem:[#allocation2 + $0x235] sm:$0x1] }
 0x680   :  { %v4387_v60 = vpop.f32.mrf.mxu2  ;;  %v4263_v54 = vpop.f32.mrf.mxu1  ;;  %v1961_v40 = vmax.f32 %v1913_v6, %v1937_v33  ;;  %v2081_v25 = vmax.f32 %v2033_v21, %v2057_v50  ;;  %v2153_v4 = vld [vmem:[#allocation2 + $0x236] sm:$0x1]  ;;  %v2177_v11 = vld [vmem:[#allocation2 + $0x237] sm:$0x1] }
 0x681   :  { %v4299_v52 = vadd.f32 %v4263_v54, %v9509_v46  ;;  %v1215_v46 = vmax.f32 %v1135_v9, %v1142_v3  ;;  %v2201_v9 = vmax.f32 %v2153_v4, %v2177_v11  ;;  %v9669_v32 = vld [vmem:[#allocation3 + $0x72] sm:$0xff]  ;;  %v9686_v4 = vld [vmem:[#allocation3 + $0xa0] sm:$0xff] }
 0x682   :  { %v4509_v8 = vpop.f32.mrf.mxu3  ;;  %v1985_v35 = vmax.f32 %v1961_v40, 0.0  ;;  %v4827_v47 = vpack.c.bf16 %v9527_v59, %v9669_v32 }
 0x683   :  { %v9657_v61 = vadd.f32 %v4509_v8, %v4422_v14  ;;  %v4423_v41 = vadd.f32 %v4387_v60, %v4299_v52  ;;  %v1817_v14 = vld [vmem:[#allocation2 + $0x231] sm:$0x1]  ;;  %v7815_v60 = vld [vmem:[#allocation3 + $0x80] sm:$0xff]  ;;  %1288 = vst.msk [vmem:[#allocation2 + $0x238] sm:$0xff] %vm1216_vm1, %v1215_v46  ;;  %v2225_v23 = vmax.f32 %v2201_v9, 0.0 }
 0x684   :  { %v1841_v39 = vmax.f32 %v1793_v26, %v1817_v14  ;;  %v4579_v54 = vpack.c.bf16 %v7815_v60, %v7814_v34  ;;  %2009 = vst.msk [vmem:[#allocation3 + $0x175] sm:$0x1] %vm1385_vm2, %v1985_v35  ;;  %v7817_v35 = vld [vmem:[#allocation3 + $0x90] sm:$0xff] }
 0x685   :  { %7382 = vmatmul.msk.bf16.gmra.mxu2 %vm1216_vm1, %v4703_v30  ;;  %2249 = vst.msk [vmem:[#allocation3 + $0x177] sm:$0x1] %vm1385_vm2, %v2225_v23 }
 0x686   :  { %v1865_v52 = vmax.f32 %v1841_v39, 0.0 }
 0x688   :  { %v4390_v13 = vpop.f32.mrf.mxu2  ;;  %v4266_v7 = vpop.f32.mrf.mxu1  ;;  %1889 = vst.msk [vmem:[#allocation3 + $0x174] sm:$0x1] %vm1385_vm2, %v1865_v52 }
 0x689   :  { %v4300_v31 = vadd.f32 %v4266_v7, %v9520_v16  ;;  %v2105_v16 = vmax.f32 %v2081_v25, 0.0 }
 0x68a   :  { %v4511_v42 = vpop.f32.mrf.mxu3  ;;  %v2297_v38 = vld [vmem:[#allocation2 + $0x239] sm:$0x1]  ;;  %v2393_v3 = vld [vmem:[#allocation2 + $0x23a] sm:$0x1]  ;;  %v2417_v14 = vld [vmem:[#allocation2 + $0x23b] sm:$0x1] }
 0x68b   :  { %v9666_v8 = vadd.f32 %v4511_v42, %v4423_v41  ;;  %7368 = vmatmul.msk.bf16.gmra.mxu1 %vm1216_vm1, %v4579_v54  ;;  %v4424_v27 = vadd.f32 %v4390_v13, %v4300_v31  ;;  %2129 = vst.msk [vmem:[#allocation3 + $0x176] sm:$0x1] %vm1385_vm2, %v2105_v16  ;;  %v2273_v41 = vld [vmem:[#allocation2 + $0x238] sm:$0x1]  ;;  %v2513_v6 = vld [vmem:[#allocation2 + $0x23c] sm:$0x1]  ;;  %v2441_v39 = vmax.f32 %v2393_v3, %v2417_v14 }
 0x68c   :  { %v2321_v26 = vmax.f32 %v2273_v41, %v2297_v38  ;;  %v2537_v13 = vld [vmem:[#allocation2 + $0x23d] sm:$0x1]  ;;  %v2633_v21 = vld [vmem:[#allocation2 + $0x23e] sm:$0x1]  ;;  %v2657_v50 = vld [vmem:[#allocation2 + $0x23f] sm:$0x1]  ;;  %v4580_v16 = vpack.c.bf16 %v9686_v4, %v7817_v35 }
 0x68d   :  { %v2561_v33 = vmax.f32 %v2513_v6, %v2537_v13  ;;  %v7816_v42 = vld [vmem:[#allocation3 + $0x91] sm:$0xff]  ;;  %v2681_v54 = vmax.f32 %v2633_v21, %v2657_v50  ;;  %v2465_v40 = vmax.f32 %v2441_v39, 0.0  ;;  %v7819_v50 = vld [vmem:[#allocation3 + $0x100] sm:$0xff] }
 0x68e   :  { %v4704_v31 = vpack.c.bf16 %v9677_v36, %v7816_v42  ;;  %v2345_v60 = vmax.f32 %v2321_v26, 0.0  ;;  %v7818_v26 = vld [vmem:[#allocation3 + $0x101] sm:$0xff] }
 0x68f   :  { %7396 = vmatmul.msk.bf16.gmra.mxu3 %vm1216_vm1, %v4827_v47  ;;  %v2585_v25 = vmax.f32 %v2561_v33, 0.0  ;;  %2489 = vst.msk [vmem:[#allocation3 + $0x179] sm:$0x1] %vm1385_vm2, %v2465_v40  ;;  %v9693_v47 = vld [vmem:[#allocation3 + $0xa2] sm:$0xff]  ;;  %v4569_v33 = vld [vmem:[#allocation3 + $0xf0] sm:$0xff] }
 0x690   :  { %v4392_v29 = vpop.f32.mrf.mxu2  ;;  %v4268_v30 = vpop.f32.mrf.mxu1  ;;  %2369 = vst.msk [vmem:[#allocation3 + $0x178] sm:$0x1] %vm1385_vm2, %v2345_v60  ;;  %v4581_v42 = vpack.c.bf16 %v7819_v50, %v4569_v33  ;;  %v7731_v33 = vld [vmem:[%s10380_s3 + $0x98] sm:$0x10] }
 0x691   :  { %v4301_v59 = vadd.f32 %v4268_v30, %v9534_v58  ;;  %v2705_v58 = vmax.f32 %v2681_v54, 0.0  ;;  %2609 = vst.msk [vmem:[#allocation3 + $0x17a] sm:$0x1] %vm1385_vm2, %v2585_v25  ;;  %v4828_v30 = vpack.c.bf16 %v9693_v47, %v9525_v18 }
 0x692   :  { %v4514_v46 = vpop.f32.mrf.mxu3 }
 0x693   :  { %v9681_v7 = vadd.f32 %v4514_v46, %v4424_v27  ;;  %v4425_v34 = vadd.f32 %v4392_v29, %v4301_v59  ;;  %2729 = vst.msk [vmem:[#allocation3 + $0x17b] sm:$0x1] %vm1385_vm2, %v2705_v58  ;;  %v4693_v59 = vld [vmem:[#allocation3 + $0xf1] sm:$0xff] }
 0x694   :  { %v4705_v14 = vpack.c.bf16 %v7818_v26, %v4693_v59 }
 0x695   :  { %7383 = vmatmul.msk.bf16.gmra.mxu2 %vm1216_vm1, %v4704_v31 }
 0x698   :  { %v4395_v11 = vpop.f32.mrf.mxu2  ;;  %v4271_v52 = vpop.f32.mrf.mxu1 }
 0x699   :  { %v4302_v27 = vadd.f32 %v4271_v52, %v9541_v15  ;;  %v7821_v52 = vld [vmem:[#allocation3 + $0x121] sm:$0xff] }
 0x69a   :  { %v4516_v9 = vpop.f32.mrf.mxu3 }
 0x69b   :  { %v9695_v23 = vadd.f32 %v4516_v9, %v4425_v34  ;;  %7369 = vmatmul.msk.bf16.gmra.mxu1 %vm1216_vm1, %v4580_v16  ;;  %v4426_v29 = vadd.f32 %v4395_v11, %v4302_v27 }
 0x69f   :  { %7397 = vmatmul.msk.bf16.gmra.mxu3 %vm1216_vm1, %v4828_v30  ;;  %v7822_v30 = vld [vmem:[#allocation3 + $0x110] sm:$0xff] }
 0x6a0   :  { %v4397_v41 = vpop.f32.mrf.mxu2  ;;  %v4273_v38 = vpop.f32.mrf.mxu1 }
 0x6a1   :  { %v4303_v15 = vadd.f32 %v4273_v38, %v9546_v17  ;;  %v4817_v17 = vld [vmem:[#allocation3 + $0xf2] sm:$0xff] }
 0x6a2   :  { %v4519_v3 = vpop.f32.mrf.mxu3  ;;  %v4829_v60 = vpack.c.bf16 %v9554_v44, %v4817_v17 }
 0x6a3   :  { %v9702_v46 = vadd.f32 %v4519_v3, %v4426_v29  ;;  %v4427_v6 = vadd.f32 %v4397_v41, %v4303_v15  ;;  %v7823_v41 = vld [vmem:[#allocation3 + $0x120] sm:$0xff] }
 0x6a4   :  { %v4582_v38 = vpack.c.bf16 %v7823_v41, %v7822_v30 }
 0x6a5   :  { %7384 = vmatmul.msk.bf16.gmra.mxu2 %vm1216_vm1, %v4705_v14 }
 0x6a8   :  { %v4400_v13 = vpop.f32.mrf.mxu2  ;;  %v4276_v39 = vpop.f32.mrf.mxu1 }
 0x6a9   :  { %v4304_v18 = vadd.f32 %v4276_v39, %v9551_v55  ;;  %v7820_v55 = vld [vmem:[#allocation3 + $0x111] sm:$0xff] }
 0x6aa   :  { %v4521_v21 = vpop.f32.mrf.mxu3  ;;  %v4706_v9 = vpack.c.bf16 %v7821_v52, %v7820_v55  ;;  %v7420_v39 = vld [vmem:[%s10380_s3 + $0x98] sm:$0xf] }
 0x6ab   :  { %v9706_v31 = vadd.f32 %v4521_v21, %v4427_v6  ;;  %7370 = vmatmul.msk.bf16.gmra.mxu1 %vm1216_vm1, %v4581_v42  ;;  %v4428_v34 = vadd.f32 %v4400_v13, %v4304_v18  ;;  %v9724_v6 = vld [vmem:[#allocation3 + $0x141] sm:$0xff]  ;;  %v7824_v18 = vld [vmem:[#allocation3 + $0x131] sm:$0xff] }
 0x6ac   :  { %v4707_v50 = vpack.c.bf16 %v9724_v6, %v7824_v18  ;;  %v9774_v18 = vld [vmem:[#allocation3 + $0x150] sm:$0xff] }
 0x6af   :  { %7398 = vmatmul.msk.bf16.gmra.mxu3 %vm1216_vm1, %v4829_v60  ;;  %v9744_v60 = vld [vmem:[#allocation3 + $0x140] sm:$0xff] }
 0x6b0   :  { %v4402_v54 = vpop.f32.mrf.mxu2  ;;  %v4278_v40 = vpop.f32.mrf.mxu1 }
 0x6b1   :  { %v4305_v58 = vadd.f32 %v4278_v40, %v9559_v51  ;;  %v9719_v51 = vld [vmem:[#allocation3 + $0x112] sm:$0xff] }
 0x6b2   :  { %v4524_v25 = vpop.f32.mrf.mxu3  ;;  %v4830_v59 = vpack.c.bf16 %v9585_v45, %v9719_v51  ;;  %v7421_v45 = vor.u32 %v7731_v33, %v7420_v39  ;;  %v9772_v39 = vld [vmem:[#allocation3 + $0x160] sm:$0xff] }
 0x6b3   :  { %v9712_v11 = vadd.f32 %v4524_v25, %v4428_v34  ;;  %v4429_v27 = vadd.f32 %v4402_v54, %v4305_v58  ;;  %v7732_v34 = vld [vmem:[%s10380_s3 + $0xa0] sm:$0x10] }
 0x6b4   :  { %v5114_v17 = vsel %vm2812_vm3, %v7421_v45, 0 }
 0x6b5   :  { %7385 = vmatmul.msk.bf16.gmra.mxu2 %vm1216_vm1, %v4706_v9  ;;  %v7825_v9 = vld [vmem:[#allocation3 + $0x130] sm:$0xff] }
 0x6b6   :  { %5123 = vmatpush.bf16.msra.mxu2 %v5114_v17  ;;  %v9779_v17 = vld [vmem:[#allocation3 + $0x162] sm:$0xff] }
 0x6b8   :  { %v4405_v35 = vpop.f32.mrf.mxu2  ;;  %v4281_v16 = vpop.f32.mrf.mxu1 }
 0x6b9   :  { %v4306_v44 = vadd.f32 %v4281_v16, %v9572_v10 }
 0x6ba   :  { %v4526_v29 = vpop.f32.mrf.mxu3 }
 0x6bb   :  { %v9716_v3 = vadd.f32 %v4526_v29, %v4429_v27  ;;  %7371 = vmatmul.msk.bf16.gmra.mxu1 %vm1216_vm1, %v4582_v38  ;;  %v4430_v15 = vadd.f32 %v4405_v35, %v4306_v44  ;;  %v4583_v27 = vpack.c.bf16 %v9744_v60, %v7825_v9  ;;  %v4831_v29 = vpack.c.bf16 %v9615_v57, %v9583_v53  ;;  %v7448_v44 = vld [vmem:[%s10380_s3 + $0xa8] sm:$0xf] }
 0x6bc   :  { %v7826_v9 = vld [vmem:[#allocation3 + $0x44] sm:$0xff] }
 0x6bf   :  { %7399 = vmatmul.msk.bf16.gmra.mxu3 %vm1216_vm1, %v4830_v59 }
 0x6c0   :  { %v4407_v26 = vpop.f32.mrf.mxu2  ;;  %v4283_v14 = vpop.f32.mrf.mxu1 }
 0x6c1   :  { %v4307_v13 = vadd.f32 %v4283_v14, %v9593_v56  ;;  %v7434_v56 = vld [vmem:[%s10380_s3 + $0xa0] sm:$0xf]  ;;  %v9767_v14 = vld [vmem:[#allocation3 + $0x151] sm:$0xff] }
 0x6c2   :  { %v4529_v10 = vpop.f32.mrf.mxu3  ;;  %v7435_v54 = vor.u32 %v7732_v34, %v7434_v56 }
 0x6c3   :  { %v9733_v21 = vadd.f32 %v4529_v10, %v4430_v15  ;;  %v4431_v42 = vadd.f32 %v4407_v26, %v4307_v13  ;;  %v9761_v15 = vld [vmem:[#allocation3 + $0x161] sm:$0xff] }
 0x6c4   :  { %v5239_v58 = vsel %vm2812_vm3, %v7435_v54, 0  ;;  %v4708_v10 = vpack.c.bf16 %v9761_v15, %v9767_v14  ;;  %v4832_v54 = vpack.c.bf16 %v9779_v17, %v9613_v5 }
 0x6c5   :  { %7386 = vmatmul.msk.bf16.gmra.mxu2 %vm1216_vm1, %v4707_v50  ;;  %5248 = vmatpush.bf16.msra.mxu3 %v5239_v58 }
 0x6c8   :  { %v4410_v40 = vpop.f32.mrf.mxu2  ;;  %v4286_v25 = vpop.f32.mrf.mxu1 }
 0x6c9   :  { %v4308_v52 = vadd.f32 %v4286_v25, %v9608_v62  ;;  %v7733_v62 = vld [vmem:[%s10380_s3 + $0xa8] sm:$0x10] }
 0x6ca   :  { %v4531_v55 = vpop.f32.mrf.mxu3  ;;  %v7449_v30 = vor.u32 %v7733_v62, %v7448_v44  ;;  %v4933_v62 = vld [vmem:[#allocation3 + $0x33] sm:$0xff] }
 0x6cb   :  { %v9749_v35 = vadd.f32 %v4531_v55, %v4431_v42  ;;  %7372 = vmatmul.msk.bf16.gmra.mxu1 %vm1216_vm1, %v4583_v27  ;;  %v4432_v16 = vadd.f32 %v4410_v40, %v4308_v52  ;;  %v4584_v42 = vpack.c.bf16 %v9772_v39, %v9774_v18  ;;  %v5057_v52 = vld [vmem:[#allocation3 + $0x34] sm:$0xff] }
 0x6cc   :  { %v5363_v53 = vsel %vm2812_vm3, %v7449_v30, 0  ;;  %v5073_v27 = vpack.c.bf16 %v7826_v9, %v5057_v52  ;;  %v7830_v52 = vld [vmem:[#allocation3 + $0x63] sm:$0xff] }
 0x6cd   :  { %5372 = vmatpush.bf16.msrb.mxu1 %v5363_v53  ;;  %v10586_v53 = vld [vmem:[#allocation16_spill] sm:$0xff] }
 0x6cf   :  { %7400 = vmatmul.msk.bf16.gmra.mxu3 %vm1216_vm1, %v4831_v29 }
 0x6d0   :  { %v4412_v41 = vpop.f32.mrf.mxu2  ;;  %v4288_v38 = vpop.f32.mrf.mxu1 }
 0x6d1   :  { %v4309_v26 = vadd.f32 %v4288_v38, %v9622_v12 }
 0x6d2   :  { %v4534_v59 = vpop.f32.mrf.mxu3 }
 0x6d3   :  { %v9765_v57 = vadd.f32 %v4534_v59, %v4432_v16  ;;  %v4433_v13 = vadd.f32 %v4412_v41, %v4309_v26  ;;  %v7827_v41 = vld [vmem:[#allocation3 + $0x43] sm:$0xff] }
 0x6d4   :  { %v4949_v38 = vpack.c.bf16 %v7827_v41, %v4933_v62  ;;  %v10585_v26 = vld [vmem:[#allocation18_spill] sm:$0xff] }
 0x6d5   :  { %7387 = vmatmul.msk.bf16.gmra.mxu2 %vm1216_vm1, %v4708_v10  ;;  %v10587_v10 = vpack.c.bf16 %v10585_v26, %v10586_v53  ;;  %v9820_v26 = vld [vmem:[#allocation3 + $0x83] sm:$0xff] }
 0x6d8   :  { %v4415_v33 = vpop.f32.mrf.mxu2  ;;  %v4291_v45 = vpop.f32.mrf.mxu1 }
 0x6d9   :  { %v4310_v50 = vadd.f32 %v4291_v45, %v9629_v49 }
 0x6da   :  { %v4536_v12 = vpop.f32.mrf.mxu3 }
 0x6db   :  { %v9781_v56 = vadd.f32 %v4536_v12, %v4433_v13  ;;  %7373 = vmatmul.msk.bf16.gmra.mxu1 %vm1216_vm1, %v4584_v42  ;;  %v4434_v34 = vadd.f32 %v4415_v33, %v4310_v50 }
 0x6df   :  { %7401 = vmatmul.msk.bf16.gmra.mxu3 %vm1216_vm1, %v4832_v54 }
 0x6e0   :  { %v4417_v40 = vpop.f32.mrf.mxu2  ;;  %v4293_v25 = vpop.f32.mrf.mxu1 }
 0x6e1   :  { %v4311_v49 = vadd.f32 %v4293_v25, %v9633_v1 }
 0x6e2   :  { %v4539_v58 = vpop.f32.mrf.mxu3 }
 0x6e3   :  { %v9788_v55 = vadd.f32 %v4539_v58, %v4434_v34  ;;  %v4435_v16 = vadd.f32 %v4417_v40, %v4311_v49  ;;  %v7829_v49 = vld [vmem:[#allocation3 + $0x53] sm:$0xff] }
 0x6e4   :  { %v4950_v9 = vpack.c.bf16 %v7830_v52, %v7829_v49 }
 0x6e5   :  { %7422 = vmatmul.msk.bf16.vlgmr.msra.gmra.mxu2 %vm1216_vm1, %v5073_v27 }
 0x6e8   :  { %v4753_v29 = vpop.f32.mrf.mxu2  ;;  %v4629_v44 = vpop.f32.mrf.mxu1 }
 0x6e9   :  { %v4669_v5 = vadd.f32 %v4629_v44, %v9642_v19  ;;  %v7828_v19 = vld [vmem:[#allocation3 + $0x54] sm:$0xff] }
 0x6ea   :  { %v4541_v30 = vpop.f32.mrf.mxu3  ;;  %v5074_v42 = vpack.c.bf16 %v9512_v2, %v7828_v19 }
 0x6eb   :  { %v9792_v59 = vadd.f32 %v4541_v30, %v4435_v16  ;;  %7408 = vmatmul.msk.bf16.vlgmr.msra.gmra.mxu1 %vm1216_vm1, %v4949_v38  ;;  %v4793_v1 = vadd.f32 %v4753_v29, %v4669_v5  ;;  %v10588_v16 = vld [vmem:[#allocation32_spill] sm:$0xff]  ;;  %v10589_v29 = vld [vmem:[#allocation30_spill] sm:$0xff] }
 0x6ec   :  { %v10590_v44 = vpack.c.bf16 %v10588_v16, %v10589_v29  ;;  %v9812_v30 = vld [vmem:[#allocation3 + $0x84] sm:$0xff] }
 0x6ed   :  { %v5075_v38 = vpack.c.bf16 %v9812_v30, %v9507_v48  ;;  %v10592_v48 = vld [vmem:[#allocation39_spill] sm:$0xff] }
 0x6ef   :  { %7436 = vmatmul.msk.bf16.vlgmr.msra.gmra.mxu3 %vm1216_vm1, %v10587_v10 }
 0x6f0   :  { %v4755_v13 = vpop.f32.mrf.mxu2  ;;  %v4631_v33 = vpop.f32.mrf.mxu1 }
 0x6f1   :  { %v4670_v12 = vadd.f32 %v4631_v33, %v9647_v37 }
 0x6f2   :  { %v4877_v45 = vpop.f32.mrf.mxu3 }
 0x6f3   :  { %v9800_v50 = vadd.f32 %v4877_v45, %v4793_v1  ;;  %v4794_v34 = vadd.f32 %v4755_v13, %v4670_v12  ;;  %v7831_v45 = vld [vmem:[#allocation3 + $0x73] sm:$0xff] }
 0x6f4   :  { %v4951_v12 = vpack.c.bf16 %v9820_v26, %v7831_v45 }
 0x6f5   :  { %7423 = vmatmul.msk.bf16.gmra.mxu2 %vm1216_vm1, %v5074_v42  ;;  %v10591_v42 = vld [vmem:[#allocation40_spill] sm:$0xff] }
 0x6f8   :  { %v4758_v54 = vpop.f32.mrf.mxu2  ;;  %v4634_v40 = vpop.f32.mrf.mxu1 }
 0x6f9   :  { %v4671_v58 = vadd.f32 %v4634_v40, %v9657_v61 }
 0x6fa   :  { %v4879_v25 = vpop.f32.mrf.mxu3 }
 0x6fb   :  { %v9805_v27 = vadd.f32 %v4879_v25, %v4794_v34  ;;  %7409 = vmatmul.msk.bf16.gmra.mxu1 %vm1216_vm1, %v4950_v9  ;;  %v4795_v37 = vadd.f32 %v4758_v54, %v4671_v58  ;;  %v10593_v34 = vpack.c.bf16 %v10591_v42, %v10592_v48  ;;  %v9831_v25 = vld [vmem:[#allocation3 + $0xa4] sm:$0xff] }
 0x6fc   :  { %v5076_v52 = vpack.c.bf16 %v9831_v25, %v9532_v28 }
 0x6ff   :  { %7437 = vmatmul.msk.bf16.gmra.mxu3 %vm1216_vm1, %v10590_v44 }
 0x700   :  { %v4760_v2 = vpop.f32.mrf.mxu2  ;;  %v4636_v62 = vpop.f32.mrf.mxu1 }
 0x701   :  { %v4672_v61 = vadd.f32 %v4636_v62, %v9666_v8 }
 0x702   :  { %v4882_v5 = vpop.f32.mrf.mxu3 }
 0x703   :  { %v9815_v41 = vadd.f32 %v4882_v5, %v4795_v37  ;;  %v4796_v1 = vadd.f32 %v4760_v2, %v4672_v61  ;;  %v9839_v37 = vld [vmem:[#allocation3 + $0xa3] sm:$0xff]  ;;  %v5189_v5 = vld [vmem:[#allocation3 + $0xb0] sm:$0xff] }
 0x704   :  { %v4952_v62 = vpack.c.bf16 %v9839_v37, %v9517_v22  ;;  %v5201_v28 = vpack.c.bf16 %v5189_v5, %v9686_v4  ;;  %v10595_v22 = vld [vmem:[#allocation53_spill] sm:$0xff]  ;;  %v10604_v5 = vld [vmem:[#allocation64_spill] sm:$0xff] }
 0x705   :  { %7424 = vmatmul.msk.bf16.gmra.mxu2 %vm1216_vm1, %v5075_v38 }
 0x708   :  { %v4763_v53 = vpop.f32.mrf.mxu2  ;;  %v4639_v10 = vpop.f32.mrf.mxu1 }
 0x709   :  { %v4673_v33 = vadd.f32 %v4639_v10, %v9681_v7 }
 0x70a   :  { %v4884_v13 = vpop.f32.mrf.mxu3 }
 0x70b   :  { %v9824_v19 = vadd.f32 %v4884_v13, %v4796_v1  ;;  %7410 = vmatmul.msk.bf16.gmra.mxu1 %vm1216_vm1, %v4951_v12  ;;  %v4797_v8 = vadd.f32 %v4763_v53, %v4673_v33  ;;  %v10594_v33 = vld [vmem:[#allocation54_spill] sm:$0xff] }
 0x70c   :  { %v10596_v45 = vpack.c.bf16 %v10594_v33, %v10595_v22  ;;  %v10607_v33 = vld [vmem:[#allocation63_spill] sm:$0xff] }
 0x70f   :  { %7438 = vmatmul.msk.bf16.gmra.mxu3 %vm1216_vm1, %v10593_v34  ;;  %v10597_v34 = vld [vmem:[#allocation52_spill] sm:$0xff] }
 0x710   :  { %v4765_v54 = vpop.f32.mrf.mxu2  ;;  %v4641_v40 = vpop.f32.mrf.mxu1 }
 0x711   :  { %v4674_v7 = vadd.f32 %v4641_v40, %v9695_v23 }
 0x712   :  { %v4887_v58 = vpop.f32.mrf.mxu3 }
 0x713   :  { %v9834_v49 = vadd.f32 %v4887_v58, %v4797_v8  ;;  %v4798_v9 = vadd.f32 %v4765_v54, %v4674_v7  ;;  %v10598_v54 = vld [vmem:[#allocation51_spill] sm:$0xff]  ;;  %v10600_v58 = vld [vmem:[#allocation56_spill] sm:$0xff] }
 0x714   :  { %v10599_v40 = vpack.c.bf16 %v10597_v34, %v10598_v54  ;;  %v10601_v7 = vld [vmem:[#allocation55_spill] sm:$0xff]  ;;  %v9885_v34 = vld [vmem:[#allocation3 + $0x144] sm:$0xff] }
 0x715   :  { %7425 = vmatmul.msk.bf16.gmra.mxu2 %vm1216_vm1, %v5076_v52  ;;  %v10602_v52 = vpack.c.bf16 %v10600_v58, %v10601_v7 }
 0x718   :  { %v4768_v16 = vpop.f32.mrf.mxu2  ;;  %v4644_v29 = vpop.f32.mrf.mxu1 }
 0x719   :  { %v4675_v2 = vadd.f32 %v4644_v29, %v9702_v46 }
 0x71a   :  { %v4889_v44 = vpop.f32.mrf.mxu3 }
 0x71b   :  { %v9844_v23 = vadd.f32 %v4889_v44, %v4798_v9  ;;  %7411 = vmatmul.msk.bf16.gmra.mxu1 %vm1216_vm1, %v4952_v62  ;;  %v4799_v61 = vadd.f32 %v4768_v16, %v4675_v2  ;;  %v10603_v62 = vld [vmem:[#allocation66_spill] sm:$0xff] }
 0x71f   :  { %7439 = vmatmul.msk.bf16.gmra.mxu3 %vm1216_vm1, %v5201_v28 }
 0x720   :  { %v4770_v38 = vpop.f32.mrf.mxu2  ;;  %v4646_v1 = vpop.f32.mrf.mxu1 }
 0x721   :  { %v4676_v10 = vadd.f32 %v4646_v1, %v9706_v31 }
 0x722   :  { %v4892_v53 = vpop.f32.mrf.mxu3 }
 0x723   :  { %v9850_v13 = vadd.f32 %v4892_v53, %v4799_v61  ;;  %v4800_v46 = vadd.f32 %v4770_v38, %v4676_v10  ;;  %v10605_v61 = vpack.c.bf16 %v10603_v62, %v10604_v5 }
 0x725   :  { %7426 = vmatmul.msk.bf16.gmra.mxu2 %vm1216_vm1, %v10596_v45  ;;  %v10609_v45 = vld [vmem:[#allocation68_spill] sm:$0xff] }
 0x728   :  { %v4773_v12 = vpop.f32.mrf.mxu2  ;;  %v4649_v8 = vpop.f32.mrf.mxu1 }
 0x729   :  { %v4677_v4 = vadd.f32 %v4649_v8, %v9712_v11 }
 0x72a   :  { %v4894_v42 = vpop.f32.mrf.mxu3 }
 0x72b   :  { %v9857_v48 = vadd.f32 %v4894_v42, %v4800_v46  ;;  %7412 = vmatmul.msk.bf16.gmra.mxu1 %vm1216_vm1, %v10599_v40  ;;  %v4801_v31 = vadd.f32 %v4773_v12, %v4677_v4  ;;  %v10606_v46 = vld [vmem:[#allocation65_spill] sm:$0xff]  ;;  %v10610_v12 = vld [vmem:[#allocation67_spill] sm:$0xff] }
 0x72c   :  { %v10608_v22 = vpack.c.bf16 %v10606_v46, %v10607_v33  ;;  %v10611_v8 = vpack.c.bf16 %v10609_v45, %v10610_v12  ;;  %v7462_v40 = vld [vmem:[%s10380_s3 + $0xb0] sm:$0xf]  ;;  %v5204_v46 = vpack.c.bf16 %v9774_v18, %v9744_v60  ;;  %v7490_v33 = vld [vmem:[%s10380_s3 + $0xc0] sm:$0xf]  ;;  %v9924_v45 = vld [vmem:[#allocation3 + $0x164] sm:$0xff] }
 0x72f   :  { %7440 = vmatmul.msk.bf16.gmra.mxu3 %vm1216_vm1, %v10602_v52  ;;  %v5079_v52 = vpack.c.bf16 %v9885_v34, %v9591_v20 }
 0x730   :  { %v4775_v9 = vpop.f32.mrf.mxu2  ;;  %v4651_v16 = vpop.f32.mrf.mxu1 }
 0x731   :  { %v4678_v44 = vadd.f32 %v4651_v16, %v9716_v3 }
 0x732   :  { %v4897_v29 = vpop.f32.mrf.mxu3 }
 0x733   :  { %v9868_v2 = vadd.f32 %v4897_v29, %v4801_v31  ;;  %v4802_v11 = vadd.f32 %v4775_v9, %v4678_v44  ;;  %v7734_v31 = vld [vmem:[%s10380_s3 + $0xb0] sm:$0x10]  ;;  %v7735_v29 = vld [vmem:[%s10380_s3 + $0xb8] sm:$0x10]  ;;  %v9906_v44 = vld [vmem:[#allocation3 + $0x143] sm:$0xff] }
 0x734   :  { %v7463_v7 = vor.u32 %v7734_v31, %v7462_v40 }
 0x735   :  { %7427 = vmatmul.msk.bf16.gmra.mxu2 %vm1216_vm1, %v10605_v61 }
 0x736   :  { %v5487_v16 = vsel %vm2812_vm3, %v7463_v7, 0 }
 0x737   :  { %5496 = vmatpush.bf16.msrb.mxu2 %v5487_v16 }
 0x738   :  { %v4778_v28 = vpop.f32.mrf.mxu2  ;;  %v4654_v38 = vpop.f32.mrf.mxu1 }
 0x739   :  { %v4679_v53 = vadd.f32 %v4654_v38, %v9733_v21  ;;  %v4955_v38 = vpack.c.bf16 %v9906_v44, %v9563_v43 }
 0x73a   :  { %v4899_v1 = vpop.f32.mrf.mxu3 }
 0x73b   :  { %v9875_v10 = vadd.f32 %v4899_v1, %v4802_v11  ;;  %7413 = vmatmul.msk.bf16.gmra.mxu1 %vm1216_vm1, %v10608_v22  ;;  %v4803_v3 = vadd.f32 %v4778_v28, %v4679_v53 }
 0x73f   :  { %7441 = vmatmul.msk.bf16.gmra.mxu3 %vm1216_vm1, %v10611_v8 }
 0x740   :  { %v4780_v42 = vpop.f32.mrf.mxu2  ;;  %v4656_v4 = vpop.f32.mrf.mxu1 }
 0x741   :  { %v4680_v21 = vadd.f32 %v4656_v4, %v9749_v35  ;;  %v7476_v35 = vld [vmem:[%s10380_s3 + $0xb8] sm:$0xf] }
 0x742   :  { %v4902_v54 = vpop.f32.mrf.mxu3  ;;  %v7477_v11 = vor.u32 %v7735_v29, %v7476_v35 }
 0x743   :  { %v9894_v58 = vadd.f32 %v4902_v54, %v4803_v3  ;;  %v4804_v9 = vadd.f32 %v4780_v42, %v4680_v21  ;;  %v5080_v42 = vpack.c.bf16 %v9924_v45, %v9620_v63  ;;  %v9933_v54 = vld [vmem:[#allocation3 + $0x163] sm:$0xff] }
 0x744   :  { %v5611_v20 = vsel %vm2812_vm3, %v7477_v11, 0 }
 0x745   :  { %7428 = vmatmul.msk.bf16.gmra.mxu2 %vm1216_vm1, %v5079_v52  ;;  %5620 = vmatpush.bf16.msrb.mxu3 %v5611_v20  ;;  %v5197_v52 = vld [vmem:[#allocation3 + $0x170] sm:$0xff] }
 0x746   :  { %v5205_v63 = vpack.c.bf16 %v5197_v52, %v9772_v39 }
 0x748   :  { %v4783_v62 = vpop.f32.mrf.mxu2  ;;  %v4659_v5 = vpop.f32.mrf.mxu1 }
 0x749   :  { %v4681_v28 = vadd.f32 %v4659_v5, %v9765_v57  ;;  %v7736_v57 = vld [vmem:[%s10380_s3 + $0xc0] sm:$0x10] }
 0x74a   :  { %v4904_v61 = vpop.f32.mrf.mxu3  ;;  %v7491_v43 = vor.u32 %v7736_v57, %v7490_v33  ;;  %v10613_v33 = vld [vmem:[#allocation20_spill] sm:$0xff] }
 0x74b   :  { %v9912_v1 = vadd.f32 %v4904_v61, %v4804_v9  ;;  %7414 = vmatmul.msk.bf16.gmra.mxu1 %vm1216_vm1, %v4955_v38  ;;  %v4805_v53 = vadd.f32 %v4783_v62, %v4681_v28 }
 0x74c   :  { %v5735_v60 = vsel %vm2812_vm3, %v7491_v43, 0  ;;  %v10615_v43 = vld [vmem:[#allocation24_spill] sm:$0xff] }
 0x74d   :  { %5744 = vmatpush.bf16.msra.mxu1 %v5735_v60 }
 0x74f   :  { %7442 = vmatmul.msk.bf16.gmra.mxu3 %vm1216_vm1, %v5204_v46  ;;  %v10612_v46 = vld [vmem:[#allocation22_spill] sm:$0xff] }
 0x750   :  { %v4785_v22 = vpop.f32.mrf.mxu2  ;;  %v4661_v3 = vpop.f32.mrf.mxu1  ;;  %v10614_v57 = vpack.c.bf16 %v10612_v46, %v10613_v33 }
 0x751   :  { %v4682_v8 = vadd.f32 %v4661_v3, %v9781_v56  ;;  %v4956_v56 = vpack.c.bf16 %v9933_v54, %v9604_v0 }
 0x752   :  { %v4907_v12 = vpop.f32.mrf.mxu3 }
 0x753   :  { %v9928_v18 = vadd.f32 %v4907_v12, %v4805_v53  ;;  %v4806_v4 = vadd.f32 %v4785_v22, %v4682_v8  ;;  %v10616_v22 = vld [vmem:[#allocation23_spill] sm:$0xff] }
 0x754   :  { %v10617_v3 = vpack.c.bf16 %v10615_v43, %v10616_v22  ;;  %v5559_v43 = vld [vmem:[#allocation3 + $0x93] sm:$0xff] }
 0x755   :  { %7429 = vmatmul.msk.bf16.gmra.mxu2 %vm1216_vm1, %v5080_v42 }
 0x758   :  { %v4788_v21 = vpop.f32.mrf.mxu2  ;;  %v4664_v40 = vpop.f32.mrf.mxu1 }
 0x759   :  { %v4683_v7 = vadd.f32 %v4664_v40, %v9788_v55  ;;  %v5430_v55 = vld [vmem:[#allocation3 + $0x42] sm:$0xff] }
 0x75a   :  { %v4909_v31 = vpop.f32.mrf.mxu3  ;;  %v5446_v0 = vpack.c.bf16 %v9650_v24, %v5430_v55 }
 0x75b   :  { %v9938_v9 = vadd.f32 %v4909_v31, %v4806_v4  ;;  %7415 = vmatmul.msk.bf16.gmra.mxu1 %vm1216_vm1, %v4956_v56  ;;  %v4807_v16 = vadd.f32 %v4788_v21, %v4683_v7 }
 0x75f   :  { %7443 = vmatmul.msk.bf16.gmra.mxu3 %vm1216_vm1, %v5205_v63  ;;  %v10619_v63 = vld [vmem:[#allocation34_spill] sm:$0xff] }
 0x760   :  { %v4790_v35 = vpop.f32.mrf.mxu2  ;;  %v4666_v29 = vpop.f32.mrf.mxu1 }
 0x761   :  { %v4684_v62 = vadd.f32 %v4666_v29, %v9792_v59  ;;  %v10621_v29 = vld [vmem:[#allocation38_spill] sm:$0xff] }
 0x762   :  { %v4912_v11 = vpop.f32.mrf.mxu3 }
 0x763   :  { %v9944_v5 = vadd.f32 %v4912_v11, %v4807_v16  ;;  %v4808_v20 = vadd.f32 %v4790_v35, %v4684_v62  ;;  %v10618_v16 = vld [vmem:[#allocation36_spill] sm:$0xff]  ;;  %v10622_v11 = vld [vmem:[#allocation37_spill] sm:$0xff] }
 0x764   :  { %v10620_v35 = vpack.c.bf16 %v10618_v16, %v10619_v63  ;;  %v10623_v62 = vpack.c.bf16 %v10621_v29, %v10622_v11  ;;  %v5561_v29 = vld [vmem:[#allocation3 + $0xb3] sm:$0xff] }
 0x765   :  { %7464 = vmatmul.msk.bf16.vlgmr.msrb.gmra.mxu2 %vm1216_vm1, %v5446_v0  ;;  %v5435_v0 = vld [vmem:[#allocation3 + $0x92] sm:$0xff] }
 0x768   :  { %v5125_v61 = vpop.f32.mrf.mxu2  ;;  %v5001_v28 = vpop.f32.mrf.mxu1 }
 0x769   :  { %v5041_v39 = vadd.f32 %v5001_v28, %v9800_v50  ;;  %v5432_v50 = vld [vmem:[#allocation3 + $0x62] sm:$0xff] }
 0x76a   :  { %v4914_v38 = vpop.f32.mrf.mxu3  ;;  %v5447_v4 = vpack.c.bf16 %v9669_v32, %v5432_v50  ;;  %v5434_v28 = vld [vmem:[#allocation3 + $0x82] sm:$0xff] }
 0x76b   :  { %v9949_v53 = vadd.f32 %v4914_v38, %v4808_v20  ;;  %7450 = vmatmul.msk.bf16.vlgmr.msrb.gmra.mxu1 %vm1216_vm1, %v10614_v57  ;;  %v5165_v59 = vadd.f32 %v5125_v61, %v5041_v39  ;;  %v5448_v38 = vpack.c.bf16 %v5435_v0, %v5434_v28 }
 0x76f   :  { %7478 = vmatmul.msk.bf16.vlgmr.msrb.gmra.mxu3 %vm1216_vm1, %v10617_v3  ;;  %v10624_v3 = vld [vmem:[#allocation42_spill] sm:$0xff] }
 0x770   :  { %v5127_v24 = vpop.f32.mrf.mxu2  ;;  %v5003_v12 = vpop.f32.mrf.mxu1 }
 0x771   :  { %v5042_v60 = vadd.f32 %v5003_v12, %v9805_v27 }
 0x772   :  { %v5250_v8 = vpop.f32.mrf.mxu3 }
 0x773   :  { %v9960_v42 = vadd.f32 %v5250_v8, %v5165_v59  ;;  %v5166_v21 = vadd.f32 %v5127_v24, %v5042_v60  ;;  %v10625_v24 = vld [vmem:[#allocation41_spill] sm:$0xff]  ;;  %v5572_v8 = vpack.c.bf16 %v5559_v43, %v9820_v26 }
 0x774   :  { %v10626_v12 = vpack.c.bf16 %v10624_v3, %v10625_v24 }
 0x775   :  { %7465 = vmatmul.msk.bf16.gmra.mxu2 %vm1216_vm1, %v5447_v4  ;;  %v5437_v4 = vld [vmem:[#allocation3 + $0xb2] sm:$0xff] }
 0x778   :  { %v5130_v40 = vpop.f32.mrf.mxu2  ;;  %v5006_v31 = vpop.f32.mrf.mxu1 }
 0x779   :  { %v5043_v56 = vadd.f32 %v5006_v31, %v9815_v41  ;;  %v5449_v31 = vpack.c.bf16 %v5437_v4, %v9693_v47 }
 0x77a   :  { %v5252_v7 = vpop.f32.mrf.mxu3 }
 0x77b   :  { %v9965_v52 = vadd.f32 %v5252_v7, %v5166_v21  ;;  %7451 = vmatmul.msk.bf16.gmra.mxu1 %vm1216_vm1, %v10620_v35  ;;  %v5167_v27 = vadd.f32 %v5130_v40, %v5043_v56  ;;  %v5313_v56 = vld [vmem:[#allocation3 + $0xb1] sm:$0xff] }
 0x77f   :  { %7479 = vmatmul.msk.bf16.gmra.mxu3 %vm1216_vm1, %v10623_v62  ;;  %v5573_v62 = vpack.c.bf16 %v5561_v29, %v9839_v37 }
 0x780   :  { %v5132_v32 = vpop.f32.mrf.mxu2  ;;  %v5008_v55 = vpop.f32.mrf.mxu1 }
 0x781   :  { %v5044_v61 = vadd.f32 %v5008_v55, %v9824_v19 }
 0x782   :  { %v5255_v20 = vpop.f32.mrf.mxu3 }
 0x783   :  { %v9976_v41 = vadd.f32 %v5255_v20, %v5167_v27  ;;  %v5168_v39 = vadd.f32 %v5132_v32, %v5044_v61  ;;  %v5325_v27 = vpack.c.bf16 %v5313_v56, %v9677_v36  ;;  %v5565_v56 = vld [vmem:[#allocation3 + $0x133] sm:$0xff] }
 0x785   :  { %7466 = vmatmul.msk.bf16.gmra.mxu2 %vm1216_vm1, %v5448_v38 }
 0x788   :  { %v5135_v46 = vpop.f32.mrf.mxu2  ;;  %v5011_v33 = vpop.f32.mrf.mxu1 }
 0x789   :  { %v5045_v59 = vadd.f32 %v5011_v33, %v9834_v49 }
 0x78a   :  { %v5257_v57 = vpop.f32.mrf.mxu3 }
 0x78b   :  { %v9980_v22 = vadd.f32 %v5257_v57, %v5168_v39  ;;  %7452 = vmatmul.msk.bf16.gmra.mxu1 %vm1216_vm1, %v10626_v12  ;;  %v5169_v19 = vadd.f32 %v5135_v46, %v5045_v59  ;;  %v5563_v46 = vld [vmem:[#allocation3 + $0x113] sm:$0xff]  ;;  %v10628_v59 = vld [vmem:[#allocation58_spill] sm:$0xff] }
 0x78c   :  { %v10627_v57 = vld [vmem:[#allocation60_spill] sm:$0xff] }
 0x78d   :  { %v10629_v43 = vpack.c.bf16 %v10627_v57, %v10628_v59  ;;  %v5445_v59 = vld [vmem:[#allocation3 + $0x172] sm:$0xff] }
 0x78f   :  { %7480 = vmatmul.msk.bf16.gmra.mxu3 %vm1216_vm1, %v5572_v8 }
 0x790   :  { %v5137_v60 = vpop.f32.mrf.mxu2  ;;  %v5013_v50 = vpop.f32.mrf.mxu1 }
 0x791   :  { %v5046_v40 = vadd.f32 %v5013_v50, %v9844_v23  ;;  %v5440_v50 = vld [vmem:[#allocation3 + $0x122] sm:$0xff] }
 0x792   :  { %v5260_v21 = vpop.f32.mrf.mxu3 }
 0x793   :  { %v9989_v49 = vadd.f32 %v5260_v21, %v5169_v19  ;;  %v5170_v7 = vadd.f32 %v5137_v60, %v5046_v40  ;;  %v5441_v19 = vld [vmem:[#allocation3 + $0x132] sm:$0xff] }
 0x794   :  { %v5451_v4 = vpack.c.bf16 %v5441_v19, %v5440_v50  ;;  %v5569_v19 = vld [vmem:[#allocation3 + $0x173] sm:$0xff] }
 0x795   :  { %7467 = vmatmul.msk.bf16.gmra.mxu2 %vm1216_vm1, %v5449_v31  ;;  %v5577_v50 = vpack.c.bf16 %v5569_v19, %v9933_v54 }
 0x798   :  { %v5140_v16 = vpop.f32.mrf.mxu2  ;;  %v5016_v63 = vpop.f32.mrf.mxu1 }
 0x799   :  { %v5047_v26 = vadd.f32 %v5016_v63, %v9850_v13  ;;  %v5438_v13 = vld [vmem:[#allocation3 + $0x102] sm:$0xff]  ;;  %v10631_v63 = vld [vmem:[#allocation70_spill] sm:$0xff] }
 0x79a   :  { %v5262_v35 = vpop.f32.mrf.mxu3  ;;  %v5450_v36 = vpack.c.bf16 %v9719_v51, %v5438_v13 }
 0x79b   :  { %v9995_v11 = vadd.f32 %v5262_v35, %v5170_v7  ;;  %7453 = vmatmul.msk.bf16.gmra.mxu1 %vm1216_vm1, %v5325_v27  ;;  %v5171_v23 = vadd.f32 %v5140_v16, %v5047_v26  ;;  %v10630_v16 = vld [vmem:[#allocation71_spill] sm:$0xff] }
 0x79c   :  { %v10632_v35 = vpack.c.bf16 %v10630_v16, %v10631_v63 }
 0x79f   :  { %7481 = vmatmul.msk.bf16.gmra.mxu3 %vm1216_vm1, %v5573_v62  ;;  %v5442_v62 = vld [vmem:[#allocation3 + $0x142] sm:$0xff] }
 0x7a0   :  { %v5142_v47 = vpop.f32.mrf.mxu2  ;;  %v5018_v32 = vpop.f32.mrf.mxu1 }
 0x7a1   :  { %v5048_v0 = vadd.f32 %v5018_v32, %v9857_v48  ;;  %v5562_v48 = vld [vmem:[#allocation3 + $0x103] sm:$0xff] }
 0x7a2   :  { %v5265_v55 = vpop.f32.mrf.mxu3  ;;  %v5574_v24 = vpack.c.bf16 %v5563_v46, %v5562_v48 }
 0x7a3   :  { %v10001_v20 = vadd.f32 %v5265_v55, %v5171_v23  ;;  %v5172_v61 = vadd.f32 %v5142_v47, %v5048_v0  ;;  %v5443_v47 = vld [vmem:[#allocation3 + $0x152] sm:$0xff] }
 0x7a4   :  { %v5452_v0 = vpack.c.bf16 %v5443_v47, %v5442_v62  ;;  %v5683_v62 = vld [vmem:[#allocation3 + $0x94] sm:$0xff] }
 0x7a5   :  { %7468 = vmatmul.msk.bf16.gmra.mxu2 %vm1216_vm1, %v5450_v36 }
 0x7a8   :  { %v5145_v28 = vpop.f32.mrf.mxu2  ;;  %v5021_v38 = vpop.f32.mrf.mxu1 }
 0x7a9   :  { %v5049_v37 = vadd.f32 %v5021_v38, %v9868_v2  ;;  %v5328_v38 = vpack.c.bf16 %v9767_v14, %v9724_v6  ;;  %v5453_v6 = vpack.c.bf16 %v5445_v59, %v9779_v17  ;;  %v5321_v14 = vld [vmem:[#allocation3 + $0x171] sm:$0xff] }
 0x7aa   :  { %v5267_v39 = vpop.f32.mrf.mxu3 }
 0x7ab   :  { %v10006_v33 = vadd.f32 %v5267_v39, %v5172_v61  ;;  %7454 = vmatmul.msk.bf16.gmra.mxu1 %vm1216_vm1, %v10629_v43  ;;  %v5173_v3 = vadd.f32 %v5145_v28, %v5049_v37  ;;  %v5567_v39 = vld [vmem:[#allocation3 + $0x153] sm:$0xff] }
 0x7af   :  { %7482 = vmatmul.msk.bf16.gmra.mxu3 %vm1216_vm1, %v5574_v24 }
 0x7b0   :  { %v10013_v51 = vpop.f32.mrf.mxu2  ;;  %v5023_v12 = vpop.f32.mrf.mxu1 }
 0x7b1   :  { %v10016_v2 = vadd.f32 %v5023_v12, %v9875_v10  ;;  %v5564_v10 = vld [vmem:[#allocation3 + $0x123] sm:$0xff]  ;;  %v5329_v12 = vpack.c.bf16 %v5321_v14, %v9761_v15 }
 0x7b2   :  { %v5270_v8 = vpop.f32.mrf.mxu3  ;;  %v5575_v27 = vpack.c.bf16 %v5565_v56, %v5564_v10  ;;  %v10633_v15 = vld [vmem:[#allocation26_spill] sm:$0xff]  ;;  %v10634_v56 = vld [vmem:[#allocation25_spill] sm:$0xff] }
 0x7b3   :  { %v10018_v60 = vadd.f32 %v5270_v8, %v5173_v3  ;;  %v10635_v16 = vpack.c.bf16 %v10633_v15, %v10634_v56  ;;  %v5688_v14 = vld [vmem:[#allocation3 + $0x124] sm:$0xff] }
 0x7b5   :  { %7469 = vmatmul.msk.bf16.gmra.mxu2 %vm1216_vm1, %v5451_v4 }
 0x7b8   :  { %v5150_v21 = vpop.f32.mrf.mxu2  ;;  %v5026_v40 = vpop.f32.mrf.mxu1 }
 0x7b9   :  { %v5051_v7 = vadd.f32 %v5026_v40, %v9894_v58 }
 0x7ba   :  { %v10021_v31 = vpop.f32.mrf.mxu3 }
 0x7bb   :  { %7455 = vmatmul.msk.bf16.gmra.mxu1 %vm1216_vm1, %v10632_v35  ;;  %v5175_v26 = vadd.f32 %v5150_v21, %v5051_v7  ;;  %v5681_v35 = vld [vmem:[#allocation3 + $0x74] sm:$0xff] }
 0x7bf   :  { %7483 = vmatmul.msk.bf16.gmra.mxu3 %vm1216_vm1, %v5575_v27 }
 0x7c0   :  { %v10029_v29 = vpop.f32.mrf.mxu2  ;;  %v5028_v23 = vpop.f32.mrf.mxu1 }
 0x7c1   :  { %v10032_v55 = vadd.f32 %v5028_v23, %v9912_v1  ;;  %v5576_v1 = vpack.c.bf16 %v5567_v39, %v9906_v44 }
 0x7c2   :  { %v5275_v32 = vpop.f32.mrf.mxu3 }
 0x7c3   :  { %v10034_v58 = vadd.f32 %v5275_v32, %v5175_v26  ;;  %v5680_v26 = vld [vmem:[#allocation3 + $0x64] sm:$0xff] }
 0x7c4   :  { %v5695_v27 = vpack.c.bf16 %v5681_v35, %v5680_v26 }
 0x7c5   :  { %7470 = vmatmul.msk.bf16.gmra.mxu2 %vm1216_vm1, %v5452_v0 }
 0x7c8   :  { %v5155_v13 = vpop.f32.mrf.mxu2  ;;  %v5031_v36 = vpop.f32.mrf.mxu1 }
 0x7c9   :  { %v5053_v28 = vadd.f32 %v5031_v36, %v9928_v18 }
 0x7ca   :  { %v10037_v61 = vpop.f32.mrf.mxu3 }
 0x7cb   :  { %7456 = vmatmul.msk.bf16.gmra.mxu1 %vm1216_vm1, %v5328_v38  ;;  %v5177_v37 = vadd.f32 %v5155_v13, %v5053_v28  ;;  %v5685_v13 = vld [vmem:[#allocation3 + $0xb4] sm:$0xff] }
 0x7cf   :  { %7484 = vmatmul.msk.bf16.gmra.mxu3 %vm1216_vm1, %v5576_v1 }
 0x7d0   :  { %v10045_v46 = vpop.f32.mrf.mxu2  ;;  %v5033_v57 = vpop.f32.mrf.mxu1 }
 0x7d1   :  { %v10048_v48 = vadd.f32 %v5033_v57, %v9938_v9 }
 0x7d2   :  { %v5280_v43 = vpop.f32.mrf.mxu3 }
 0x7d3   :  { %v10050_v18 = vadd.f32 %v5280_v43, %v5177_v37  ;;  %v5686_v37 = vld [vmem:[#allocation3 + $0x104] sm:$0xff] }
 0x7d5   :  { %7471 = vmatmul.msk.bf16.gmra.mxu2 %vm1216_vm1, %v5453_v6 }
 0x7d8   :  { %v5036_v3 = vpop.f32.mrf.mxu1  ;;  %v5160_v8 = vpop.f32.mrf.mxu2 }
 0x7d9   :  { %v5055_v44 = vadd.f32 %v5036_v3, %v9944_v5 }
 0x7da   :  { %v10054_v24 = vpop.f32.mrf.mxu3 }
 0x7db   :  { %7457 = vmatmul.msk.bf16.gmra.mxu1 %vm1216_vm1, %v5329_v12  ;;  %v5179_v9 = vadd.f32 %v5160_v8, %v5055_v44  ;;  %v6006_v44 = vld [vmem:[%s10382_s5 + $0x8] sm:$0x3] }
 0x7dc   :  { %v6064_v19 = vunpack.c.l.b16 %v6006_v44 }
 0x7df   :  { %7485 = vmatmul.msk.bf16.gmra.mxu3 %vm1216_vm1, %v5577_v50  ;;  %v6066_v50 = vpack.c.b16 %v6064_v19, %v6064_v19 }
 0x7e0   :  { %v5038_v17 = vpop.f32.mrf.mxu1  ;;  %v5162_v12 = vpop.f32.mrf.mxu2 }
 0x7e1   :  { %v10062_v21 = vadd.f32 %v5038_v17, %v9949_v53 }
 0x7e2   :  { %v5285_v4 = vpop.f32.mrf.mxu3 }
 0x7e3   :  { %v10064_v40 = vadd.f32 %v5285_v4, %v5179_v9  ;;  %v5176_v9 = vadd.f32 %v10029_v29, %v10032_v55  ;;  %v6072_v4 = vsel %vm6035_vm4, %v6066_v50, 0  ;;  %v5178_v29 = vadd.f32 %v10045_v46, %v10048_v48 }
 0x7e4   :  { %6080 = vmatpush.bf16.msra.mxu3 %v6072_v4  ;;  %v5180_v46 = vadd.f32 %v5162_v12, %v10062_v21  ;;  %v10145_v21 = vld [vmem:[%s10381_s4] ss:$0 sm:$0xff] }
 0x7e5   :  { %v5301_v17 = vadd.f32 %v10037_v61, %v5176_v9  ;;  %v5303_v55 = vadd.f32 %v10054_v24, %v5178_v29 }
 0x7e8   :  { %v5374_v7 = vpop.f32.mrf.mxu1  ;;  %v5498_v15 = vpop.f32.mrf.mxu2 }
 0x7e9   :  { %v10067_v5 = vadd.f32 %v5374_v7, %v9960_v42 }
 0x7ea   :  { %v5287_v8 = vpop.f32.mrf.mxu3 }
 0x7eb   :  { %7492 = vmatmul.msk.bf16.vlgmr.msra.gmra.mxu1 %vm1216_vm1, %v10635_v16  ;;  %v5691_v16 = vld [vmem:[#allocation3 + $0x154] sm:$0xff]  ;;  %v5305_v48 = vadd.f32 %v5287_v8, %v5180_v46 }
 0x7f0   :  { %v5376_v63 = vpop.f32.mrf.mxu1  ;;  %v5500_v61 = vpop.f32.mrf.mxu2 }
 0x7f1   :  { %v10074_v54 = vadd.f32 %v5376_v63, %v9965_v52  ;;  %v5696_v52 = vpack.c.bf16 %v5683_v62, %v9812_v30  ;;  %v5687_v30 = vld [vmem:[#allocation3 + $0x114] sm:$0xff] }
 0x7f2   :  { %v5622_v56 = vpop.f32.mrf.mxu3  ;;  %v5693_v62 = vld [vmem:[#allocation3 + $0x174] sm:$0xff] }
 0x7f8   :  { %v5379_v10 = vpop.f32.mrf.mxu1 }
 0x7f9   :  { %v10077_v53 = vadd.f32 %v5379_v10, %v9976_v41  ;;  %v5700_v10 = vpack.c.bf16 %v5691_v16, %v9885_v34  ;;  %v5701_v34 = vpack.c.bf16 %v5693_v62, %v9924_v45 }
 0x7fa   :  { %v5624_v26 = vpop.f32.mrf.mxu3 }
 0x7fb   :  { %7493 = vmatmul.msk.bf16.gmra.mxu1 %vm1216_vm1, %v5695_v27 }
 0x800   :  { %v5381_v42 = vpop.f32.mrf.mxu1 }
 0x801   :  { %v10081_v23 = vadd.f32 %v5381_v42, %v9980_v22  ;;  %v5697_v22 = vpack.c.bf16 %v5685_v13, %v9831_v25  ;;  %v7502_v25 = vld [vmem:[%s10382_s5 + $0x14] sm:$0x3] }
 0x808   :  { %v5384_v47 = vpop.f32.mrf.mxu1 }
 0x809   :  { %v10084_v32 = vadd.f32 %v5384_v47, %v9989_v49 }
 0x80b   :  { %7494 = vmatmul.msk.bf16.gmra.mxu1 %vm1216_vm1, %v5696_v52  ;;  %v5503_v52 = vpop.f32.mrf.mxu2 }
 0x810   :  { %v5386_v0 = vpop.f32.mrf.mxu1 }
 0x811   :  { %v10089_v41 = vadd.f32 %v5386_v0, %v9995_v11  ;;  %v5698_v11 = vpack.c.bf16 %v5687_v30, %v5686_v37  ;;  %v5627_v0 = vpop.f32.mrf.mxu3  ;;  %v5538_v30 = vadd.f32 %v5498_v15, %v10067_v5 }
 0x818   :  { %v5389_v36 = vpop.f32.mrf.mxu1 }
 0x819   :  { %v10092_v28 = vadd.f32 %v5389_v36, %v10001_v20  ;;  %v6028_v20 = vunpack.c.l.b16 %v7502_v25  ;;  %v5505_v36 = vpop.f32.mrf.mxu2 }
 0x81a   :  { %v5541_v12 = vadd.f32 %v5505_v36, %v10081_v23 }
 0x81b   :  { %7495 = vmatmul.msk.bf16.gmra.mxu1 %vm1216_vm1, %v5697_v22  ;;  %v6030_v59 = vpack.c.b16 %v6028_v20, %v6028_v20  ;;  %v5629_v22 = vpop.f32.mrf.mxu3 }
 0x81c   :  { %v5665_v50 = vadd.f32 %v5629_v22, %v5541_v12 }
 0x81d   :  { %v6037_v43 = vsel %vm6035_vm4, %v6030_v59, 0 }
 0x81e   :  { %6045 = vmatpush.bf16.msra.mxu2 %v6037_v43 }
 0x820   :  { %v5391_v38 = vpop.f32.mrf.mxu1 }
 0x821   :  { %v10097_v49 = vadd.f32 %v5391_v38, %v10006_v33  ;;  %v5689_v33 = vld [vmem:[#allocation3 + $0x134] sm:$0xff]  ;;  %v5508_v37 = vpop.f32.mrf.mxu2 }
 0x822   :  { %v5699_v3 = vpack.c.bf16 %v5689_v33, %v5688_v14  ;;  %v5542_v22 = vadd.f32 %v5508_v37, %v10084_v32 }
 0x828   :  { %v5394_v39 = vpop.f32.mrf.mxu1 }
 0x829   :  { %v10100_v1 = vadd.f32 %v5394_v39, %v10018_v60  ;;  %v5662_v39 = vadd.f32 %v5622_v56, %v5538_v30 }
 0x82b   :  { %7496 = vmatmul.msk.bf16.gmra.mxu1 %vm1216_vm1, %v5698_v11  ;;  %v5632_v11 = vpop.f32.mrf.mxu3 }
 0x830   :  { %v10103_v57 = vpop.f32.mrf.mxu1 }
 0x838   :  { %v5399_v6 = vpop.f32.mrf.mxu1 }
 0x839   :  { %v10110_v60 = vadd.f32 %v5399_v6, %v10034_v58  ;;  %v5510_v6 = vpop.f32.mrf.mxu2 }
 0x83b   :  { %7497 = vmatmul.msk.bf16.gmra.mxu1 %vm1216_vm1, %v5699_v3  ;;  %v5540_v3 = vadd.f32 %v5503_v52, %v10077_v53 }
 0x83d   :  { %v5664_v44 = vadd.f32 %v5627_v0, %v5540_v3 }
 0x840   :  { %v5401_v58 = vpop.f32.mrf.mxu1 }
 0x841   :  { %v10120_v7 = vadd.f32 %v5401_v58, %v5301_v17 }
 0x848   :  { %v5404_v63 = vpop.f32.mrf.mxu1 }
 0x849   :  { %v10123_v35 = vadd.f32 %v5404_v63, %v10050_v18 }
 0x84b   :  { %7498 = vmatmul.msk.bf16.gmra.mxu1 %vm1216_vm1, %v5700_v10 }
 0x850   :  { %v5406_v27 = vpop.f32.mrf.mxu1 }
 0x851   :  { %v10130_v42 = vadd.f32 %v5406_v27, %v5303_v55 }
 0x858   :  { %v5409_v47 = vpop.f32.mrf.mxu1 }
 0x859   :  { %v10133_v18 = vadd.f32 %v5409_v47, %v10064_v40  ;;  %v5539_v40 = vadd.f32 %v5500_v61, %v10074_v54  ;;  %v5634_v54 = vpop.f32.mrf.mxu3  ;;  %v5513_v61 = vpop.f32.mrf.mxu2 }
 0x85b   :  { %7499 = vmatmul.msk.bf16.gmra.mxu1 %vm1216_vm1, %v5701_v34  ;;  %v5663_v45 = vadd.f32 %v5624_v26, %v5539_v40  ;;  %v5543_v40 = vadd.f32 %v5510_v6, %v10089_v41 }
 0x860   :  { %v5411_v24 = vpop.f32.mrf.mxu1 }
 0x861   :  { %v10138_v13 = vadd.f32 %v5411_v24, %v5305_v48  ;;  %v5637_v23 = vpop.f32.mrf.mxu3  ;;  %v7738_v48 = vld [vmem:[%s10382_s5 + $0xc] sm:$0xff]  ;;  %v7737_v24 = vld [vmem:[%s10382_s5] sm:$0xff] }
 0x862   :  { %6046 = vmatpush.bf16.msra.mxu2 %v7738_v48  ;;  %6081 = vmatpush.bf16.msra.mxu3 %v7737_v24 }
 0x868   :  { %v5746_v38 = vpop.f32.mrf.mxu1 }
 0x869   :  { %v5786_v25 = vadd.f32 %v5746_v38, %v5662_v39  ;;  %v5515_v38 = vpop.f32.mrf.mxu2  ;;  %v5639_v30 = vpop.f32.mrf.mxu3  ;;  %v5666_v39 = vadd.f32 %v5632_v11, %v5542_v22 }
 0x86b   :  { %v5806_v33 = vadd.f32 %v10145_v21, %v5786_v25 }
 0x870   :  { %v5748_v20 = vpop.f32.mrf.mxu1 }
 0x871   :  { %v5787_v59 = vadd.f32 %v5748_v20, %v5663_v45 }
 0x873   :  { %v5807_v43 = vadd.f32 %v10145_v21, %v5787_v59  ;;  %v5667_v59 = vadd.f32 %v5634_v54, %v5543_v40 }
 0x875   :  { %v5822_v5 = vmax.f32 %v5806_v33, %v5807_v43 }
 0x877   :  { %5831 = vst.msk [vmem:[#allocation4] sm:$0xff] %vm5830_vm5, %v5822_v5 }
 0x878   :  { %v5751_v14 = vpop.f32.mrf.mxu1 }
 0x879   :  { %v5788_v56 = vadd.f32 %v5751_v14, %v5664_v44 }
 0x87b   :  { %v5808_v34 = vadd.f32 %v10145_v21, %v5788_v56 }
 0x87e   :  { %v5839_v19 = vld [vmem:[#allocation4] sm:$0x1]  ;;  %v5847_v8 = vld [vmem:[#allocation4 + $0x1] sm:$0x1]  ;;  %v5880_v9 = vld [vmem:[#allocation4 + $0x2] sm:$0x1] }
 0x87f   :  { %v5855_v17 = vmax.f32 %v5839_v19, %v5847_v8  ;;  %v5888_v4 = vld [vmem:[#allocation4 + $0x3] sm:$0x1]  ;;  %v5920_v58 = vld [vmem:[#allocation4 + $0x4] sm:$0x1]  ;;  %v5928_v15 = vld [vmem:[#allocation4 + $0x5] sm:$0x1] }
 0x880   :  { %v5896_v16 = vmax.f32 %v5880_v9, %v5888_v4  ;;  %v5936_v63 = vmax.f32 %v5920_v58, %v5928_v15  ;;  %v5960_v10 = vld [vmem:[#allocation4 + $0x6] sm:$0x1]  ;;  %v5968_v29 = vld [vmem:[#allocation4 + $0x7] sm:$0x1]  ;;  %v5753_v55 = vpop.f32.mrf.mxu1  ;;  %v5518_v4 = vpop.f32.mrf.mxu2 }
 0x881   :  { %v5863_v53 = vmax.f32 %v5855_v17, 0.0  ;;  %v5976_v26 = vmax.f32 %v5960_v10, %v5968_v29  ;;  %v5789_v27 = vadd.f32 %v5753_v55, %v5665_v50  ;;  %v5642_v15 = vpop.f32.mrf.mxu3  ;;  %v5545_v10 = vadd.f32 %v5515_v38, %v10097_v49 }
 0x882   :  { %v5904_v62 = vmax.f32 %v5896_v16, 0.0  ;;  %v5944_v47 = vmax.f32 %v5936_v63, 0.0  ;;  %v5544_v16 = vadd.f32 %v5513_v61, %v10092_v28 }
 0x883   :  { %5872 = vst.msk [vmem:[#allocation5] sm:$0x1] %vm5871_vm6, %v5863_v53  ;;  %v5984_v52 = vmax.f32 %v5976_v26, 0.0  ;;  %v5809_v0 = vadd.f32 %v10145_v21, %v5789_v27  ;;  %v5669_v26 = vadd.f32 %v5639_v30, %v5545_v10 }
 0x884   :  { %5912 = vst.msk [vmem:[#allocation5 + $0x1] sm:$0x1] %vm5871_vm6, %v5904_v62  ;;  %v5668_v63 = vadd.f32 %v5637_v23, %v5544_v16 }
 0x885   :  { %5952 = vst.msk [vmem:[#allocation5 + $0x2] sm:$0x1] %vm5871_vm6, %v5944_v47  ;;  %v5823_v46 = vmax.f32 %v5808_v34, %v5809_v0 }
 0x886   :  { %5992 = vst.msk [vmem:[#allocation5 + $0x3] sm:$0x1] %vm5871_vm6, %v5984_v52 }
 0x887   :  { %5832 = vst.msk [vmem:[#allocation4 + $0x8] sm:$0xff] %vm5830_vm5, %v5823_v46 }
 0x888   :  { %v5756_v36 = vpop.f32.mrf.mxu1  ;;  %v5520_v27 = vpop.f32.mrf.mxu2 }
 0x889   :  { %v5790_v3 = vadd.f32 %v5756_v36, %v5666_v39  ;;  %v5644_v46 = vpop.f32.mrf.mxu3 }
 0x88b   :  { %v5810_v6 = vadd.f32 %v10145_v21, %v5790_v3  ;;  %v5546_v3 = vadd.f32 %v5518_v4, %v10100_v1 }
 0x88e   :  { %v5840_v45 = vld [vmem:[#allocation4 + $0x8] sm:$0x1]  ;;  %v5848_v25 = vld [vmem:[#allocation4 + $0x9] sm:$0x1]  ;;  %v5881_v20 = vld [vmem:[#allocation4 + $0xa] sm:$0x1] }
 0x88f   :  { %v5856_v33 = vmax.f32 %v5840_v45, %v5848_v25  ;;  %v5889_v43 = vld [vmem:[#allocation4 + $0xb] sm:$0x1]  ;;  %v5921_v5 = vld [vmem:[#allocation4 + $0xc] sm:$0x1]  ;;  %v5929_v14 = vld [vmem:[#allocation4 + $0xd] sm:$0x1]  ;;  %v5174_v25 = vadd.f32 %v10013_v51, %v10016_v2 }
 0x890   :  { %v5897_v44 = vmax.f32 %v5881_v20, %v5889_v43  ;;  %v5937_v12 = vmax.f32 %v5921_v5, %v5929_v14  ;;  %v5961_v19 = vld [vmem:[#allocation4 + $0xe] sm:$0x1]  ;;  %v5969_v8 = vld [vmem:[#allocation4 + $0xf] sm:$0x1]  ;;  %v5758_v9 = vpop.f32.mrf.mxu1  ;;  %v5523_v5 = vpop.f32.mrf.mxu2 }
 0x891   :  { %v5864_v32 = vmax.f32 %v5856_v33, 0.0  ;;  %v5977_v37 = vmax.f32 %v5961_v19, %v5969_v8  ;;  %v5791_v50 = vadd.f32 %v5758_v9, %v5667_v59  ;;  %v5299_v59 = vadd.f32 %v10021_v31, %v5174_v25  ;;  %v5647_v14 = vpop.f32.mrf.mxu3 }
 0x892   :  { %v5905_v11 = vmax.f32 %v5897_v44, 0.0  ;;  %v5945_v17 = vmax.f32 %v5937_v12, 0.0  ;;  %v5670_v44 = vadd.f32 %v5642_v15, %v5546_v3 }
 0x893   :  { %5873 = vst.msk [vmem:[#allocation5 + $0x4] sm:$0x1] %vm5871_vm6, %v5864_v32  ;;  %v5985_v41 = vmax.f32 %v5977_v37, 0.0  ;;  %v5811_v54 = vadd.f32 %v10145_v21, %v5791_v50  ;;  %v5423_v43 = vadd.f32 %v10103_v57, %v5299_v59 }
 0x894   :  { %5913 = vst.msk [vmem:[#allocation5 + $0x5] sm:$0x1] %vm5871_vm6, %v5905_v11 }
 0x895   :  { %5953 = vst.msk [vmem:[#allocation5 + $0x6] sm:$0x1] %vm5871_vm6, %v5945_v17  ;;  %v5824_v58 = vmax.f32 %v5810_v6, %v5811_v54  ;;  %v5547_v12 = vadd.f32 %v5520_v27, %v5423_v43 }
 0x896   :  { %5993 = vst.msk [vmem:[#allocation5 + $0x7] sm:$0x1] %vm5871_vm6, %v5985_v41 }
 0x897   :  { %5833 = vst.msk [vmem:[#allocation4 + $0x10] sm:$0xff] %vm5830_vm5, %v5824_v58  ;;  %v5671_v8 = vadd.f32 %v5644_v46, %v5547_v12 }
 0x898   :  { %v5761_v56 = vpop.f32.mrf.mxu1  ;;  %v5525_v15 = vpop.f32.mrf.mxu2 }
 0x899   :  { %v5792_v0 = vadd.f32 %v5761_v56, %v5668_v63 }
 0x89b   :  { %v5812_v40 = vadd.f32 %v10145_v21, %v5792_v0 }
 0x89e   :  { %v5841_v29 = vld [vmem:[#allocation4 + $0x10] sm:$0x1]  ;;  %v5849_v55 = vld [vmem:[#allocation4 + $0x11] sm:$0x1]  ;;  %v5882_v53 = vld [vmem:[#allocation4 + $0x12] sm:$0x1] }
 0x89f   :  { %v5857_v62 = vmax.f32 %v5841_v29, %v5849_v55  ;;  %v5890_v47 = vld [vmem:[#allocation4 + $0x13] sm:$0x1]  ;;  %v5922_v52 = vld [vmem:[#allocation4 + $0x14] sm:$0x1]  ;;  %v5930_v34 = vld [vmem:[#allocation4 + $0x15] sm:$0x1]  ;;  %v5649_v29 = vpop.f32.mrf.mxu3 }
 0x8a0   :  { %v5898_v48 = vmax.f32 %v5882_v53, %v5890_v47  ;;  %v5938_v24 = vmax.f32 %v5922_v52, %v5930_v34  ;;  %v5962_v36 = vld [vmem:[#allocation4 + $0x16] sm:$0x1]  ;;  %v5970_v22 = vld [vmem:[#allocation4 + $0x17] sm:$0x1]  ;;  %v5763_v39 = vpop.f32.mrf.mxu1  ;;  %v5549_v47 = vadd.f32 %v5525_v15, %v10120_v7  ;;  %v7515_v52 = vld [vmem:[%s10382_s5 + $0x20] sm:$0x3] }
 0x8a1   :  { %v5865_v28 = vmax.f32 %v5857_v62, 0.0  ;;  %v5978_v61 = vmax.f32 %v5962_v36, %v5970_v22  ;;  %v5793_v23 = vadd.f32 %v5763_v39, %v5669_v26  ;;  %v5548_v26 = vadd.f32 %v5523_v5, %v10110_v60  ;;  %v5528_v62 = vpop.f32.mrf.mxu2  ;;  %v7523_v34 = vld [vmem:[%s10382_s5 + $0x2c] sm:$0x3] }
 0x8a2   :  { %v5906_v49 = vmax.f32 %v5898_v48, 0.0  ;;  %v5946_v38 = vmax.f32 %v5938_v24, 0.0  ;;  %v6107_v36 = vunpack.c.l.b16 %v7515_v52  ;;  %v6151_v22 = vunpack.c.l.b16 %v7523_v34 }
 0x8a3   :  { %5874 = vst.msk [vmem:[#allocation5 + $0x8] sm:$0x1] %vm5871_vm6, %v5865_v28  ;;  %v5986_v30 = vmax.f32 %v5978_v61, 0.0  ;;  %v5813_v45 = vadd.f32 %v10145_v21, %v5793_v23  ;;  %v5672_v27 = vadd.f32 %v5647_v14, %v5548_v26  ;;  %v5673_v39 = vadd.f32 %v5649_v29, %v5549_v47 }
 0x8a4   :  { %5914 = vst.msk [vmem:[#allocation5 + $0x9] sm:$0x1] %vm5871_vm6, %v5906_v49  ;;  %v6109_v25 = vpack.c.b16 %v6107_v36, %v6107_v36 }
 0x8a5   :  { %5954 = vst.msk [vmem:[#allocation5 + $0xa] sm:$0x1] %vm5871_vm6, %v5946_v38  ;;  %v5825_v20 = vmax.f32 %v5812_v40, %v5813_v45 }
 0x8a6   :  { %5994 = vst.msk [vmem:[#allocation5 + $0xb] sm:$0x1] %vm5871_vm6, %v5986_v30  ;;  %v6115_v3 = vsel %vm6035_vm4, %v6109_v25, 0 }
 0x8a7   :  { %5834 = vst.msk [vmem:[#allocation4 + $0x18] sm:$0xff] %vm5830_vm5, %v5825_v20  ;;  %v5652_v0 = vpop.f32.mrf.mxu3  ;;  %v6153_v20 = vpack.c.b16 %v6151_v22, %v6151_v22  ;;  %6123 = vmatpush.bf16.msrb.mxu2 %v6115_v3 }
 0x8a8   :  { %v5766_v33 = vpop.f32.mrf.mxu1 }
 0x8a9   :  { %v5794_v31 = vadd.f32 %v5766_v33, %v5670_v44  ;;  %v6159_v44 = vsel %vm6035_vm4, %v6153_v20, 0 }
 0x8aa   :  { %6167 = vmatpush.bf16.msrb.mxu3 %v6159_v44  ;;  %v6087_v44 = vld [vmem:[#allocation5 + $0x2] sm:$0x1] }
 0x8ab   :  { %v5814_v63 = vadd.f32 %v10145_v21, %v5794_v31 }
 0x8ae   :  { %v5842_v19 = vld [vmem:[#allocation4 + $0x18] sm:$0x1]  ;;  %v5850_v51 = vld [vmem:[#allocation4 + $0x19] sm:$0x1]  ;;  %v5883_v2 = vld [vmem:[#allocation4 + $0x1a] sm:$0x1] }
 0x8af   :  { %v5858_v9 = vmax.f32 %v5842_v19, %v5850_v51  ;;  %v5891_v32 = vld [vmem:[#allocation4 + $0x1b] sm:$0x1]  ;;  %v5923_v37 = vld [vmem:[#allocation4 + $0x1c] sm:$0x1]  ;;  %v5931_v50 = vld [vmem:[#allocation4 + $0x1d] sm:$0x1]  ;;  %v5654_v31 = vpop.f32.mrf.mxu3 }
 0x8b0   :  { %v5899_v11 = vmax.f32 %v5883_v2, %v5891_v32  ;;  %v5939_v17 = vmax.f32 %v5923_v37, %v5931_v50  ;;  %v5963_v41 = vld [vmem:[#allocation4 + $0x1e] sm:$0x1]  ;;  %v5971_v6 = vld [vmem:[#allocation4 + $0x1f] sm:$0x1]  ;;  %v5768_v57 = vpop.f32.mrf.mxu1  ;;  %v5530_v32 = vpop.f32.mrf.mxu2  ;;  %v5550_v37 = vadd.f32 %v5528_v62, %v10123_v35  ;;  %v6000_v50 = vld [vmem:[#allocation5] sm:$0x1] }
 0x8b1   :  { %v5866_v54 = vmax.f32 %v5858_v9, 0.0  ;;  %v5979_v58 = vmax.f32 %v5963_v41, %v5971_v6  ;;  %v5795_v56 = vadd.f32 %v5768_v57, %v5671_v8  ;;  %v7739_v8 = vld [vmem:[%s10382_s5 + $0x18] sm:$0xff]  ;;  %v7740_v9 = vld [vmem:[%s10382_s5 + $0x24] sm:$0xff]  ;;  %v6002_v57 = vpack.c.bf16 %v6000_v50, %v6000_v50 }
 0x8b2   :  { %v5907_v1 = vmax.f32 %v5899_v11, 0.0  ;;  %v5947_v4 = vmax.f32 %v5939_v17, 0.0  ;;  %6124 = vmatpush.bf16.msrb.mxu2 %v7739_v8  ;;  %6168 = vmatpush.bf16.msrb.mxu3 %v7740_v9  ;;  %v6007_v17 = vld [vmem:[#allocation5 + $0x1] sm:$0x1]  ;;  %v5674_v41 = vadd.f32 %v5652_v0, %v5550_v37  ;;  %v6131_v8 = vld [vmem:[#allocation5 + $0x3] sm:$0x1]  ;;  %v6089_v50 = vpack.c.bf16 %v6087_v44, %v6087_v44 }
 0x8b3   :  { %5875 = vst.msk [vmem:[#allocation5 + $0xc] sm:$0x1] %vm5871_vm6, %v5866_v54  ;;  %v5987_v16 = vmax.f32 %v5979_v58, 0.0  ;;  %v5815_v10 = vadd.f32 %v10145_v21, %v5795_v56  ;;  %v6009_v56 = vpack.c.bf16 %v6007_v17, %v6007_v17 }
 0x8b4   :  { %5915 = vst.msk [vmem:[#allocation5 + $0xd] sm:$0x1] %vm5871_vm6, %v5907_v1 }
 0x8b5   :  { %5955 = vst.msk [vmem:[#allocation5 + $0xe] sm:$0x1] %vm5871_vm6, %v5947_v4  ;;  %v5826_v55 = vmax.f32 %v5814_v63, %v5815_v10  ;;  %v5551_v4 = vadd.f32 %v5530_v32, %v10130_v42 }
 0x8b6   :  { %5995 = vst.msk [vmem:[#allocation5 + $0xf] sm:$0x1] %vm5871_vm6, %v5987_v16 }
 0x8b7   :  { %5835 = vst.msk [vmem:[#allocation4 + $0x20] sm:$0xff] %vm5830_vm5, %v5826_v55  ;;  %v5675_v10 = vadd.f32 %v5654_v31, %v5551_v4 }
 0x8b8   :  { %v5771_v53 = vpop.f32.mrf.mxu1 }
 0x8b9   :  { %v5796_v7 = vadd.f32 %v5771_v53, %v5672_v27  ;;  %v6054_v27 = vunpack.c.l.b16 %v6002_v57  ;;  %v7555_v57 = vld [vmem:[%s10382_s5 + $0x5c] sm:$0x3] }
 0x8bb   :  { %v5816_v19 = vadd.f32 %v10145_v21, %v5796_v7 }
 0x8be   :  { %v5843_v46 = vld [vmem:[#allocation4 + $0x20] sm:$0x1]  ;;  %v5851_v48 = vld [vmem:[#allocation4 + $0x21] sm:$0x1]  ;;  %v5884_v24 = vld [vmem:[#allocation4 + $0x22] sm:$0x1] }
 0x8bf   :  { %v5859_v60 = vmax.f32 %v5843_v46, %v5851_v48  ;;  %v5892_v28 = vld [vmem:[#allocation4 + $0x23] sm:$0x1]  ;;  %v5924_v61 = vld [vmem:[#allocation4 + $0x24] sm:$0x1]  ;;  %v5932_v23 = vld [vmem:[#allocation4 + $0x25] sm:$0x1]  ;;  %v6017_v46 = vunpack.c.l.b16 %v6009_v56 }
 0x8c0   :  { %v5900_v49 = vmax.f32 %v5884_v24, %v5892_v28  ;;  %v5940_v38 = vmax.f32 %v5924_v61, %v5932_v23  ;;  %v5964_v30 = vld [vmem:[#allocation4 + $0x26] sm:$0x1]  ;;  %v5972_v40 = vld [vmem:[#allocation4 + $0x27] sm:$0x1]  ;;  %v5773_v45 = vpop.f32.mrf.mxu1  ;;  %v7742_v56 = vld [vmem:[%s10382_s5 + $0x3c] sm:$0xff] }
 0x8c1   :  { %v5867_v59 = vmax.f32 %v5859_v60, 0.0  ;;  %v5980_v33 = vmax.f32 %v5964_v30, %v5972_v40  ;;  %v5797_v43 = vadd.f32 %v5773_v45, %v5673_v39  ;;  %v7539_v30 = vld [vmem:[%s10382_s5 + $0x44] sm:$0x3]  ;;  %v5533_v40 = vpop.f32.mrf.mxu2  ;;  %v5657_v45 = vpop.f32.mrf.mxu3 }
 0x8c2   :  { %v5908_v5 = vmax.f32 %v5900_v49, 0.0  ;;  %v5948_v14 = vmax.f32 %v5940_v38, 0.0  ;;  %v7531_v38 = vld [vmem:[%s10382_s5 + $0x38] sm:$0x3] }
 0x8c3   :  { %5876 = vst.msk [vmem:[#allocation5 + $0x10] sm:$0x1] %vm5871_vm6, %v5867_v59  ;;  %v5988_v12 = vmax.f32 %v5980_v33, 0.0  ;;  %v5817_v51 = vadd.f32 %v10145_v21, %v5797_v43 }
 0x8c4   :  { %5916 = vst.msk [vmem:[#allocation5 + $0x11] sm:$0x1] %vm5871_vm6, %v5908_v5 }
 0x8c5   :  { %5956 = vst.msk [vmem:[#allocation5 + $0x12] sm:$0x1] %vm5871_vm6, %v5948_v14  ;;  %v5827_v2 = vmax.f32 %v5816_v19, %v5817_v51  ;;  %v6240_v19 = vunpack.c.l.b16 %v7539_v30 }
 0x8c6   :  { %5996 = vst.msk [vmem:[#allocation5 + $0x13] sm:$0x1] %vm5871_vm6, %v5988_v12  ;;  %v6196_v12 = vunpack.c.l.b16 %v7531_v38 }
 0x8c7   :  { %5836 = vst.msk [vmem:[#allocation4 + $0x28] sm:$0xff] %vm5830_vm5, %v5827_v2  ;;  %v6242_v37 = vpack.c.b16 %v6240_v19, %v6240_v19  ;;  %v7744_v19 = vld [vmem:[%s10382_s5 + $0x54] sm:$0xff] }
 0x8c8   :  { %v5776_v11 = vpop.f32.mrf.mxu1  ;;  %v6198_v32 = vpack.c.b16 %v6196_v12, %v6196_v12  ;;  %v6176_v12 = vld [vmem:[#allocation5 + $0x4] sm:$0x1] }
 0x8c9   :  { %v5798_v54 = vadd.f32 %v5776_v11, %v5674_v41  ;;  %v6133_v11 = vpack.c.bf16 %v6131_v8, %v6131_v8  ;;  %v6248_v41 = vsel %vm6035_vm4, %v6242_v37, 0  ;;  %v6178_v37 = vpack.c.bf16 %v6176_v12, %v6176_v12 }
 0x8ca   :  { %v6001_v6 = vld [vmem:[#allocation5 + $0x10] sm:$0x1]  ;;  %v6204_v17 = vsel %vm6035_vm4, %v6198_v32, 0  ;;  %v7571_v32 = vld [vmem:[%s10382_s5 + $0x74] sm:$0x3] }
 0x8cb   :  { %v6008_v58 = vld [vmem:[#allocation5 + $0x11] sm:$0x1]  ;;  %v6003_v1 = vpack.c.bf16 %v6001_v6, %v6001_v6  ;;  %v5818_v0 = vadd.f32 %v10145_v21, %v5798_v54 }
 0x8cc   :  { %v6010_v15 = vpack.c.bf16 %v6008_v58, %v6008_v58  ;;  %v6088_v16 = vld [vmem:[#allocation5 + $0x12] sm:$0x1]  ;;  %v7547_v6 = vld [vmem:[%s10382_s5 + $0x50] sm:$0x3] }
 0x8cd   :  { %v6055_v35 = vunpack.c.l.b16 %v6003_v1  ;;  %v6132_v63 = vld [vmem:[#allocation5 + $0x13] sm:$0x1]  ;;  %v6090_v48 = vpack.c.bf16 %v6088_v16, %v6088_v16  ;;  %v5552_v1 = vadd.f32 %v5533_v40, %v10133_v18  ;;  %v6284_v16 = vunpack.c.l.b16 %v7547_v6 }
 0x8ce   :  { %v5844_v29 = vld [vmem:[#allocation4 + $0x28] sm:$0x1]  ;;  %v5852_v55 = vld [vmem:[#allocation4 + $0x29] sm:$0x1]  ;;  %v5885_v53 = vld [vmem:[#allocation4 + $0x2a] sm:$0x1]  ;;  %v6018_v26 = vunpack.c.l.b16 %v6010_v15  ;;  %v6134_v49 = vpack.c.bf16 %v6132_v63, %v6132_v63  ;;  %v6097_v15 = vunpack.c.l.b16 %v6089_v50  ;;  %v5535_v63 = vpop.f32.mrf.mxu2  ;;  %v6186_v6 = vunpack.c.l.b16 %v6178_v37 }
 0x8cf   :  { %v5860_v62 = vmax.f32 %v5844_v29, %v5852_v55  ;;  %v5893_v47 = vld [vmem:[#allocation4 + $0x2b] sm:$0x1]  ;;  %v5925_v52 = vld [vmem:[#allocation4 + $0x2c] sm:$0x1]  ;;  %v5933_v34 = vld [vmem:[#allocation4 + $0x2d] sm:$0x1]  ;;  %v6098_v2 = vunpack.c.l.b16 %v6090_v48  ;;  %v5659_v29 = vpop.f32.mrf.mxu3  ;;  %v6141_v55 = vunpack.c.l.b16 %v6133_v11 }
 0x8d0   :  { %v5901_v42 = vmax.f32 %v5885_v53, %v5893_v47  ;;  %v5941_v24 = vmax.f32 %v5925_v52, %v5933_v34  ;;  %v5965_v36 = vld [vmem:[#allocation4 + $0x2e] sm:$0x1]  ;;  %v5973_v22 = vld [vmem:[#allocation4 + $0x2f] sm:$0x1]  ;;  %v5778_v39 = vpop.f32.mrf.mxu1  ;;  %v6019_v60 = vrot.slane %v6018_v26, 7  ;;  %v6056_v28 = vrot.slane %v6055_v35, 7 }
 0x8d1   :  { %v5868_v61 = vmax.f32 %v5860_v62, 0.0  ;;  %v5981_v23 = vmax.f32 %v5965_v36, %v5973_v22  ;;  %v5799_v7 = vadd.f32 %v5778_v39, %v5675_v10  ;;  %v6142_v9 = vunpack.c.l.b16 %v6134_v49  ;;  %v7741_v58 = vld [vmem:[%s10382_s5 + $0x30] sm:$0xff]  ;;  %v7747_v37 = vld [vmem:[%s10382_s5 + $0x78] sm:$0xff] }
 0x8d2   :  { %v5909_v25 = vmax.f32 %v5901_v42, 0.0  ;;  %v5949_v20 = vmax.f32 %v5941_v24, 0.0  ;;  %v6021_v59 = vsel %vm6020_vm7, %v6019_v60, %v6017_v46  ;;  %v6057_v33 = vsel %vm6020_vm7, %v6056_v28, %v6054_v27 }
 0x8d3   :  { %5877 = vst.msk [vmem:[#allocation5 + $0x14] sm:$0x1] %vm5871_vm6, %v5868_v61  ;;  %v5989_v43 = vmax.f32 %v5981_v23, 0.0  ;;  %v5819_v5 = vadd.f32 %v10145_v21, %v5799_v7  ;;  %v6022_v14 = vpack.c.b16 %v6021_v59, %v6021_v59  ;;  %v6058_v3 = vpack.c.b16 %v6057_v33, %v6057_v33 }
 0x8d4   :  { %5917 = vst.msk [vmem:[#allocation5 + $0x15] sm:$0x1] %vm5871_vm6, %v5909_v25  ;;  %v6099_v54 = vrot.slane %v6098_v2, 7  ;;  %v6143_v4 = vrot.slane %v6142_v9, 7  ;;  %v6328_v35 = vunpack.c.l.b16 %v7555_v57  ;;  %v5676_v10 = vadd.f32 %v5657_v45, %v5552_v1  ;;  %v6220_v2 = vld [vmem:[#allocation5 + $0x5] sm:$0x1] }
 0x8d5   :  { %5957 = vst.msk [vmem:[#allocation5 + $0x16] sm:$0x1] %vm5871_vm6, %v5949_v20  ;;  %v5828_v51 = vmax.f32 %v5818_v0, %v5819_v5  ;;  %7507 = vmatmul.msk.bf16.vlgmr.msra.gmra.mxu2 %vm5830_vm5, %v6022_v14  ;;  %7512 = vmatmul.msk.bf16.vlgmr.msra.gmra.mxu3 %vm5830_vm5, %v6058_v3  ;;  %v5553_v53 = vadd.f32 %v5535_v63, %v10138_v13  ;;  %v7563_v9 = vld [vmem:[%s10382_s5 + $0x68] sm:$0x3] }
 0x8d6   :  { %5997 = vst.msk [vmem:[#allocation5 + $0x17] sm:$0x1] %vm5871_vm6, %v5989_v43  ;;  %6212 = vmatpush.bf16.msra.mxu2 %v6204_v17  ;;  %6256 = vmatpush.bf16.msra.mxu3 %v6248_v41  ;;  %v6100_v26 = vsel %vm6020_vm7, %v6099_v54, %v6097_v15  ;;  %v6144_v18 = vsel %vm6020_vm7, %v6143_v4, %v6141_v55  ;;  %v6373_v11 = vunpack.c.l.b16 %v7563_v9  ;;  %v6417_v17 = vunpack.c.l.b16 %v7571_v32 }
 0x8d7   :  { %5837 = vst.msk [vmem:[#allocation4 + $0x30] sm:$0xff] %vm5830_vm5, %v5828_v51  ;;  %v5677_v0 = vadd.f32 %v5659_v29, %v5553_v53  ;;  %v6286_v36 = vpack.c.b16 %v6284_v16, %v6284_v16  ;;  %v6330_v22 = vpack.c.b16 %v6328_v35, %v6328_v35  ;;  %v6101_v23 = vpack.c.b16 %v6100_v26, %v6100_v26 }
 0x8d8   :  { %v5781_v31 = vpop.f32.mrf.mxu1  ;;  %v6145_v30 = vpack.c.b16 %v6144_v18, %v6144_v18  ;;  %v6222_v50 = vpack.c.bf16 %v6220_v2, %v6220_v2  ;;  %v6375_v63 = vpack.c.b16 %v6373_v11, %v6373_v11  ;;  %v6397_v11 = vld [vmem:[#allocation5 + $0x9] sm:$0x1] }
 0x8d9   :  { %v5800_v34 = vadd.f32 %v5781_v31, %v5676_v10  ;;  %v6292_v5 = vsel %vm6035_vm4, %v6286_v36, 0  ;;  %v6336_v14 = vsel %vm6035_vm4, %v6330_v22, 0  ;;  %v6419_v10 = vpack.c.b16 %v6417_v17, %v6417_v17 }
 0x8da   :  { %6213 = vmatpush.bf16.msra.mxu2 %v7741_v58  ;;  %6257 = vmatpush.bf16.msra.mxu3 %v7742_v56  ;;  %v6177_v27 = vld [vmem:[#allocation5 + $0x14] sm:$0x1]  ;;  %v6230_v56 = vunpack.c.l.b16 %v6222_v50  ;;  %v7748_v50 = vld [vmem:[%s10382_s5 + $0x84] sm:$0xff] }
 0x8db   :  { %v6221_v40 = vld [vmem:[#allocation5 + $0x15] sm:$0x1]  ;;  %v5820_v20 = vadd.f32 %v10145_v21, %v5800_v34  ;;  %v6179_v59 = vpack.c.bf16 %v6177_v27, %v6177_v27  ;;  %v6425_v36 = vsel %vm6035_vm4, %v6419_v10, 0 }
 0x8dc   :  { %v6223_v3 = vpack.c.bf16 %v6221_v40, %v6221_v40 }
 0x8dd   :  { %v6187_v51 = vunpack.c.l.b16 %v6179_v59  ;;  %v6309_v34 = vld [vmem:[#allocation5 + $0x17] sm:$0x1] }
 0x8de   :  { %v5845_v62 = vld [vmem:[#allocation4 + $0x30] sm:$0x1]  ;;  %v5853_v47 = vld [vmem:[#allocation4 + $0x31] sm:$0x1]  ;;  %v5886_v52 = vld [vmem:[#allocation4 + $0x32] sm:$0x1]  ;;  %v6231_v8 = vunpack.c.l.b16 %v6223_v3 }
 0x8df   :  { %v5861_v46 = vmax.f32 %v5845_v62, %v5853_v47  ;;  %v5894_v48 = vld [vmem:[#allocation4 + $0x33] sm:$0x1]  ;;  %v5926_v42 = vld [vmem:[#allocation4 + $0x34] sm:$0x1]  ;;  %v5934_v24 = vld [vmem:[#allocation4 + $0x35] sm:$0x1] }
 0x8e0   :  { %v5902_v39 = vmax.f32 %v5886_v52, %v5894_v48  ;;  %v5942_v13 = vmax.f32 %v5926_v42, %v5934_v24  ;;  %v5966_v60 = vld [vmem:[#allocation4 + $0x36] sm:$0x1]  ;;  %v5974_v28 = vld [vmem:[#allocation4 + $0x37] sm:$0x1]  ;;  %v5783_v61 = vpop.f32.mrf.mxu1  ;;  %v6188_v31 = vrot.slane %v6187_v51, 7  ;;  %v6232_v41 = vrot.slane %v6231_v8, 7 }
 0x8e1   :  { %v5869_v7 = vmax.f32 %v5861_v46, 0.0  ;;  %v5982_v49 = vmax.f32 %v5966_v60, %v5974_v28  ;;  %v5801_v38 = vadd.f32 %v5783_v61, %v5677_v0  ;;  %v6265_v52 = vld [vmem:[#allocation5 + $0x16] sm:$0x1]  ;;  %v6381_v24 = vsel %vm6035_vm4, %v6375_v63, 0  ;;  %v7746_v60 = vld [vmem:[%s10382_s5 + $0x6c] sm:$0xff] }
 0x8e2   :  { %v5910_v45 = vmax.f32 %v5902_v39, 0.0  ;;  %v5950_v25 = vmax.f32 %v5942_v13, 0.0  ;;  %v6189_v35 = vsel %vm6020_vm7, %v6188_v31, %v6186_v6  ;;  %v6233_v27 = vsel %vm6020_vm7, %v6232_v41, %v6230_v56  ;;  %v7745_v13 = vld [vmem:[%s10382_s5 + $0x60] sm:$0xff]  ;;  %v6353_v31 = vld [vmem:[#allocation5 + $0x8] sm:$0x1] }
 0x8e3   :  { %5878 = vst.msk [vmem:[#allocation5 + $0x18] sm:$0x1] %vm5871_vm6, %v5869_v7  ;;  %v5990_v33 = vmax.f32 %v5982_v49, 0.0  ;;  %v5821_v43 = vadd.f32 %v10145_v21, %v5801_v38  ;;  %v7743_v21 = vld [vmem:[%s10382_s5 + $0x48] sm:$0xff]  ;;  %v6190_v46 = vpack.c.b16 %v6189_v35, %v6189_v35  ;;  %v6234_v42 = vpack.c.b16 %v6233_v27, %v6233_v27  ;;  %v6264_v28 = vld [vmem:[#allocation5 + $0x6] sm:$0x1] }
 0x8e4   :  { %5918 = vst.msk [vmem:[#allocation5 + $0x19] sm:$0x1] %vm5871_vm6, %v5910_v45  ;;  %v6267_v22 = vpack.c.bf16 %v6265_v52, %v6265_v52  ;;  %v6311_v39 = vpack.c.bf16 %v6309_v34, %v6309_v34  ;;  %v6308_v61 = vld [vmem:[#allocation5 + $0x7] sm:$0x1]  ;;  %v7579_v49 = vld [vmem:[%s10382_s5 + $0x80] sm:$0x3] }
 0x8e5   :  { %5958 = vst.msk [vmem:[#allocation5 + $0x1a] sm:$0x1] %vm5871_vm6, %v5950_v25  ;;  %v5829_v44 = vmax.f32 %v5820_v20, %v5821_v43  ;;  %7520 = vmatmul.msk.bf16.vlgmr.msrb.gmra.mxu2 %vm5830_vm5, %v6101_v23  ;;  %7528 = vmatmul.msk.bf16.vlgmr.msrb.gmra.mxu3 %vm5830_vm5, %v6145_v30  ;;  %v7587_v38 = vld [vmem:[%s10382_s5 + $0x8c] sm:$0x3]  ;;  %v6266_v30 = vpack.c.bf16 %v6264_v28, %v6264_v28  ;;  %v6461_v45 = vunpack.c.l.b16 %v7579_v49  ;;  %v7595_v6 = vld [vmem:[%s10382_s5 + $0x98] sm:$0x3] }
 0x8e6   :  { %5998 = vst.msk [vmem:[#allocation5 + $0x1b] sm:$0x1] %vm5871_vm6, %v5990_v33  ;;  %6300 = vmatpush.bf16.msrb.mxu2 %v6292_v5  ;;  %6344 = vmatpush.bf16.msrb.mxu3 %v6336_v14  ;;  %v6275_v23 = vunpack.c.l.b16 %v6267_v22  ;;  %v6319_v7 = vunpack.c.l.b16 %v6311_v39  ;;  %v6310_v40 = vpack.c.bf16 %v6308_v61, %v6308_v61  ;;  %v6505_v25 = vunpack.c.l.b16 %v7587_v38  ;;  %v7611_v22 = vld [vmem:[%s10382_s5 + $0xb0] sm:$0x3]  ;;  %v7619_v39 = vld [vmem:[%s10382_s5 + $0xbc] sm:$0x3] }
 0x8e7   :  { %5838 = vst.msk [vmem:[#allocation4 + $0x38] sm:$0xff] %vm5830_vm5, %v5829_v44  ;;  %v6274_v33 = vunpack.c.l.b16 %v6266_v30  ;;  %v6463_v5 = vpack.c.b16 %v6461_v45, %v6461_v45  ;;  %v6550_v56 = vunpack.c.l.b16 %v7595_v6  ;;  %v6638_v28 = vunpack.c.l.b16 %v7611_v22 }
 0x8e8   :  { %v6276_v20 = vrot.slane %v6275_v23, 7  ;;  %v6320_v59 = vrot.slane %v6319_v7, 7  ;;  %v6318_v43 = vunpack.c.l.b16 %v6310_v40  ;;  %v6507_v14 = vpack.c.b16 %v6505_v25, %v6505_v25 }
 0x8e9   :  { %v6469_v2 = vsel %vm6035_vm4, %v6463_v5, 0  ;;  %v6552_v63 = vpack.c.b16 %v6550_v56, %v6550_v56  ;;  %v6682_v61 = vunpack.c.l.b16 %v7619_v39  ;;  %v6640_v30 = vpack.c.b16 %v6638_v28, %v6638_v28 }
 0x8ea   :  { %6301 = vmatpush.bf16.msrb.mxu2 %v7743_v21  ;;  %6345 = vmatpush.bf16.msrb.mxu3 %v7744_v19  ;;  %v6277_v3 = vsel %vm6020_vm7, %v6276_v20, %v6274_v33  ;;  %v6321_v44 = vsel %vm6020_vm7, %v6320_v59, %v6318_v43  ;;  %v6354_v12 = vld [vmem:[#allocation5 + $0x18] sm:$0x1]  ;;  %v6513_v8 = vsel %vm6035_vm4, %v6507_v14, 0 }
 0x8eb   :  { %v6398_v21 = vld [vmem:[#allocation5 + $0x19] sm:$0x1]  ;;  %v6278_v19 = vpack.c.b16 %v6277_v3, %v6277_v3  ;;  %v6322_v51 = vpack.c.b16 %v6321_v44, %v6321_v44  ;;  %v6356_v9 = vpack.c.bf16 %v6354_v12, %v6354_v12  ;;  %v6684_v40 = vpack.c.b16 %v6682_v61, %v6682_v61  ;;  %v6719_v12 = vld [vmem:[%s10384_s7 + $0x18] sm:$0x1] }
 0x8ec   :  { %v6400_v32 = vpack.c.bf16 %v6398_v21, %v6398_v21  ;;  %v6646_v5 = vsel %vm6035_vm4, %v6640_v30, 0  ;;  %v7751_v21 = vld [vmem:[%s10382_s5 + $0xa8] sm:$0xff] }
 0x8ed   :  { %v6364_v17 = vunpack.c.l.b16 %v6356_v9  ;;  %v6690_v14 = vsel %vm6035_vm4, %v6684_v40, 0 }
 0x8ee   :  { %v5846_v57 = vld [vmem:[#allocation4 + $0x38] sm:$0x1]  ;;  %v5854_v54 = vld [vmem:[#allocation4 + $0x39] sm:$0x1]  ;;  %v5887_v58 = vld [vmem:[#allocation4 + $0x3a] sm:$0x1]  ;;  %v6408_v41 = vunpack.c.l.b16 %v6400_v32 }
 0x8ef   :  { %v5862_v1 = vmax.f32 %v5846_v57, %v5854_v54  ;;  %v5895_v4 = vld [vmem:[#allocation4 + $0x3b] sm:$0x1]  ;;  %v5927_v15 = vld [vmem:[#allocation4 + $0x3c] sm:$0x1]  ;;  %v5935_v16 = vld [vmem:[#allocation4 + $0x3d] sm:$0x1]  ;;  %v6355_v54 = vpack.c.bf16 %v6353_v31, %v6353_v31 }
 0x8f0   :  { %v5903_v29 = vmax.f32 %v5887_v58, %v5895_v4  ;;  %v5943_v55 = vmax.f32 %v5927_v15, %v5935_v16  ;;  %v5967_v53 = vld [vmem:[#allocation4 + $0x3e] sm:$0x1]  ;;  %v5975_v26 = vld [vmem:[#allocation4 + $0x3f] sm:$0x1]  ;;  %v7603_v57 = vld [vmem:[%s10382_s5 + $0xa4] sm:$0x3]  ;;  %v6399_v58 = vpack.c.bf16 %v6397_v11, %v6397_v11 }
 0x8f1   :  { %v5870_v62 = vmax.f32 %v5862_v1, 0.0  ;;  %v5983_v47 = vmax.f32 %v5967_v53, %v5975_v26  ;;  %v6594_v1 = vunpack.c.l.b16 %v7603_v57  ;;  %v6365_v4 = vrot.slane %v6364_v17, 7  ;;  %v6442_v53 = vld [vmem:[#allocation5 + $0x1a] sm:$0x1]  ;;  %v6486_v26 = vld [vmem:[#allocation5 + $0x1b] sm:$0x1] }
 0x8f2   :  { %v5911_v18 = vmax.f32 %v5903_v29, 0.0  ;;  %v5951_v0 = vmax.f32 %v5943_v55, 0.0  ;;  %v6409_v15 = vrot.slane %v6408_v41, 7  ;;  %v6363_v16 = vunpack.c.l.b16 %v6355_v54 }
 0x8f3   :  { %5879 = vst.msk [vmem:[#allocation5 + $0x1c] sm:$0x1] %vm5871_vm6, %v5870_v62  ;;  %v5991_v48 = vmax.f32 %v5983_v47, 0.0  ;;  %v6407_v35 = vunpack.c.l.b16 %v6399_v58  ;;  %v6596_v10 = vpack.c.b16 %v6594_v1, %v6594_v1  ;;  %v6558_v47 = vsel %vm6035_vm4, %v6552_v63, 0  ;;  %v6618_v63 = vld [vmem:[#allocation5 + $0xe] sm:$0x1] }
 0x8f4   :  { %5919 = vst.msk [vmem:[#allocation5 + $0x1d] sm:$0x1] %vm5871_vm6, %v5911_v18  ;;  %v6366_v29 = vsel %vm6020_vm7, %v6365_v4, %v6363_v16  ;;  %v6444_v34 = vpack.c.bf16 %v6442_v53, %v6442_v53  ;;  %v6488_v18 = vpack.c.bf16 %v6486_v26, %v6486_v26  ;;  %v6620_v53 = vpack.c.bf16 %v6618_v63, %v6618_v63 }
 0x8f5   :  { %5959 = vst.msk [vmem:[#allocation5 + $0x1e] sm:$0x1] %vm5871_vm6, %v5951_v0  ;;  %7536 = vmatmul.msk.bf16.vlgmr.msra.gmra.mxu2 %vm5830_vm5, %v6190_v46  ;;  %7544 = vmatmul.msk.bf16.vlgmr.msra.gmra.mxu3 %vm5830_vm5, %v6234_v42  ;;  %v6410_v55 = vsel %vm6020_vm7, %v6409_v15, %v6407_v35  ;;  %v6367_v27 = vpack.c.b16 %v6366_v29, %v6366_v29  ;;  %v6602_v52 = vsel %vm6035_vm4, %v6596_v10, 0  ;;  %v7749_v0 = vld [vmem:[%s10382_s5 + $0x90] sm:$0xff]  ;;  %v7750_v46 = vld [vmem:[%s10382_s5 + $0x9c] sm:$0xff] }
 0x8f6   :  { %5999 = vst.msk [vmem:[#allocation5 + $0x1f] sm:$0x1] %vm5871_vm6, %v5991_v48  ;;  %6389 = vmatpush.bf16.msra.mxu2 %v6381_v24  ;;  %6433 = vmatpush.bf16.msra.mxu3 %v6425_v36  ;;  %v6411_v62 = vpack.c.b16 %v6410_v55, %v6410_v55  ;;  %v6441_v48 = vld [vmem:[#allocation5 + $0xa] sm:$0x1]  ;;  %v6485_v42 = vld [vmem:[#allocation5 + $0xb] sm:$0x1]  ;;  %v6452_v24 = vunpack.c.l.b16 %v6444_v34  ;;  %v6496_v36 = vunpack.c.l.b16 %v6488_v18 }
 0x8f7   :  { %v6662_v10 = vld [vmem:[#allocation5 + $0xf] sm:$0x1] }
 0x8f8   :  { %v6453_v23 = vrot.slane %v6452_v24, 7  ;;  %v6497_v7 = vrot.slane %v6496_v36, 7  ;;  %v6664_v26 = vpack.c.bf16 %v6662_v10, %v6662_v10 }
 0x8fa   :  { %6390 = vmatpush.bf16.msra.mxu2 %v7745_v13  ;;  %6434 = vmatpush.bf16.msra.mxu3 %v7746_v60  ;;  %v6443_v13 = vpack.c.bf16 %v6441_v48, %v6441_v48  ;;  %v6487_v60 = vpack.c.bf16 %v6485_v42, %v6485_v42  ;;  %v6531_v20 = vld [vmem:[#allocation5 + $0x1c] sm:$0x1]  ;;  %v7755_v48 = vld [vmem:[%s10384_s7 + $0x10] sm:$0xff] }
 0x8fb   :  { %v6575_v59 = vld [vmem:[#allocation5 + $0x1d] sm:$0x1]  ;;  %v6533_v3 = vpack.c.bf16 %v6531_v20, %v6531_v20 }
 0x8fc   :  { %v6451_v49 = vunpack.c.l.b16 %v6443_v13  ;;  %v6495_v38 = vunpack.c.l.b16 %v6487_v60  ;;  %v6577_v44 = vpack.c.bf16 %v6575_v59, %v6575_v59  ;;  %v6619_v56 = vld [vmem:[#allocation5 + $0x1e] sm:$0x1] }
 0x8fd   :  { %v6541_v9 = vunpack.c.l.b16 %v6533_v3  ;;  %v6663_v1 = vld [vmem:[#allocation5 + $0x1f] sm:$0x1]  ;;  %v6621_v16 = vpack.c.bf16 %v6619_v56, %v6619_v56 }
 0x8fe   :  { %v6454_v45 = vsel %vm6020_vm7, %v6453_v23, %v6451_v49  ;;  %v6498_v25 = vsel %vm6020_vm7, %v6497_v7, %v6495_v38  ;;  %v6585_v32 = vunpack.c.l.b16 %v6577_v44  ;;  %v6665_v35 = vpack.c.bf16 %v6663_v1, %v6663_v1  ;;  %v7754_v49 = vld [vmem:[%s10384_s7 + $0x8] sm:$0xff] }
 0x8ff   :  { %v6455_v33 = vpack.c.b16 %v6454_v45, %v6454_v45  ;;  %v6499_v43 = vpack.c.b16 %v6498_v25, %v6498_v25  ;;  %v6542_v17 = vrot.slane %v6541_v9, 7  ;;  %v6629_v29 = vunpack.c.l.b16 %v6621_v16 }
 0x900   :  { %v6586_v41 = vrot.slane %v6585_v32, 7  ;;  %v6673_v55 = vunpack.c.l.b16 %v6665_v35 }
 0x905   :  { %7552 = vmatmul.msk.bf16.vlgmr.msrb.gmra.mxu2 %vm5830_vm5, %v6278_v19  ;;  %7560 = vmatmul.msk.bf16.vlgmr.msrb.gmra.mxu3 %vm5830_vm5, %v6322_v51  ;;  %v7752_v19 = vld [vmem:[%s10382_s5 + $0xb4] sm:$0xff]  ;;  %v6737_v51 = vunpack.c.l.b16 %v6719_v12 }
 0x906   :  { %6477 = vmatpush.bf16.msrb.mxu2 %v6469_v2  ;;  %6521 = vmatpush.bf16.msrb.mxu3 %v6513_v8  ;;  %v6530_v2 = vld [vmem:[#allocation5 + $0xc] sm:$0x1]  ;;  %v6574_v8 = vld [vmem:[#allocation5 + $0xd] sm:$0x1] }
 0x907   :  { %v6576_v31 = vpack.c.bf16 %v6574_v8, %v6574_v8 }
 0x909   :  { %v6584_v57 = vunpack.c.l.b16 %v6576_v31 }
 0x90a   :  { %6478 = vmatpush.bf16.msrb.mxu2 %v7747_v37  ;;  %6522 = vmatpush.bf16.msrb.mxu3 %v7748_v50  ;;  %v6741_v37 = vpack.c.b16 %v6737_v51, %v6737_v51  ;;  %v6532_v50 = vpack.c.bf16 %v6530_v2, %v6530_v2 }
 0x90b   :  { %v6587_v58 = vsel %vm6020_vm7, %v6586_v41, %v6584_v57 }
 0x90c   :  { %v6751_v11 = vsel %vm6749_vm8, %v6741_v37, 0  ;;  %v6540_v6 = vunpack.c.l.b16 %v6532_v50  ;;  %v6588_v15 = vpack.c.b16 %v6587_v58, %v6587_v58 }
 0x90d   :  { %6757 = vmatpush.bf16.msrb.mxu1 %v6751_v11 }
 0x90e   :  { %v6543_v54 = vsel %vm6020_vm7, %v6542_v17, %v6540_v6 }
 0x90f   :  { %v6544_v4 = vpack.c.b16 %v6543_v54, %v6543_v54 }
 0x911   :  { %6758 = vmatpush.bf16.msrb.mxu1 %v7755_v48 }
 0x915   :  { %7568 = vmatmul.msk.bf16.vlgmr.msra.gmra.mxu2 %vm5830_vm5, %v6367_v27  ;;  %7576 = vmatmul.msk.bf16.vlgmr.msra.gmra.mxu3 %vm5830_vm5, %v6411_v62  ;;  %v6630_v27 = vrot.slane %v6629_v29, 7  ;;  %v6674_v62 = vrot.slane %v6673_v55, 7 }
 0x916   :  { %6566 = vmatpush.bf16.msra.mxu2 %v6558_v47  ;;  %6610 = vmatpush.bf16.msra.mxu3 %v6602_v52  ;;  %v6628_v47 = vunpack.c.l.b16 %v6620_v53  ;;  %v6672_v52 = vunpack.c.l.b16 %v6664_v26  ;;  %v7760_v53 = vld [vmem:[%s10385_s8] ss:$0 sm:$0xff] }
 0x917   :  { %6759 = vmatpush.bf16.msrb.mxu1 %v7754_v49 }
 0x918   :  { %v6631_v34 = vsel %vm6020_vm7, %v6630_v27, %v6628_v47  ;;  %v6675_v18 = vsel %vm6020_vm7, %v6674_v62, %v6672_v52 }
 0x91a   :  { %6567 = vmatpush.bf16.msra.mxu2 %v7749_v0  ;;  %6611 = vmatpush.bf16.msra.mxu3 %v7750_v46  ;;  %v6632_v0 = vpack.c.b16 %v6631_v34, %v6631_v34  ;;  %v6676_v46 = vpack.c.b16 %v6675_v18, %v6675_v18 }
 0x925   :  { %7584 = vmatmul.msk.bf16.vlgmr.msrb.gmra.mxu2 %vm5830_vm5, %v6455_v33  ;;  %7592 = vmatmul.msk.bf16.vlgmr.msrb.gmra.mxu3 %vm5830_vm5, %v6499_v43  ;;  %v7753_v43 = vld [vmem:[%s10384_s7] sm:$0xff] }
 0x926   :  { %6654 = vmatpush.bf16.msrb.mxu2 %v6646_v5  ;;  %6698 = vmatpush.bf16.msrb.mxu3 %v6690_v14 }
 0x927   :  { %6760 = vmatpush.bf16.msrb.mxu1 %v7753_v43 }
 0x92a   :  { %6655 = vmatpush.bf16.msrb.mxu2 %v7751_v21  ;;  %6699 = vmatpush.bf16.msrb.mxu3 %v7752_v19 }
 0x935   :  { %7600 = vmatmul.msk.bf16.vlgmr.msra.gmra.mxu2 %vm5830_vm5, %v6544_v4  ;;  %7608 = vmatmul.msk.bf16.vlgmr.msra.gmra.mxu3 %vm5830_vm5, %v6588_v15  ;;  %v7759_v15 = vld [vmem:[%s10383_s6] ss:$0 sm:$0xff] }
 0x945   :  { %7616 = vmatmul.msk.bf16.vlgmr.msrb.gmra.mxu2 %vm5830_vm5, %v6632_v0  ;;  %7624 = vmatmul.msk.bf16.vlgmr.msrb.gmra.mxu3 %vm5830_vm5, %v6676_v46 }
 0x958   :  { %v6048_v42 = vpop.f32.mrf.mxu2  ;;  %v6083_v24 = vpop.f32.mrf.mxu3 }
 0x959   :  { %v6084_v36 = vadd.f32 %v6083_v24, %v6048_v42 }
 0x960   :  { %v6050_v22 = vpop.f32.mrf.mxu2  ;;  %v6085_v39 = vpop.f32.mrf.mxu3 }
 0x968   :  { %v6126_v13 = vpop.f32.mrf.mxu2  ;;  %v6170_v60 = vpop.f32.mrf.mxu3 }
 0x969   :  { %v6130_v28 = vadd.f32 %v6126_v13, %v6084_v36 }
 0x96b   :  { %v6174_v61 = vadd.f32 %v6170_v60, %v6130_v28 }
 0x970   :  { %v6128_v23 = vpop.f32.mrf.mxu2  ;;  %v6172_v7 = vpop.f32.mrf.mxu3 }
 0x978   :  { %v6215_v38 = vpop.f32.mrf.mxu2  ;;  %v6259_v30 = vpop.f32.mrf.mxu3 }
 0x979   :  { %v6219_v19 = vadd.f32 %v6215_v38, %v6174_v61 }
 0x97b   :  { %v6263_v51 = vadd.f32 %v6259_v30, %v6219_v19 }
 0x980   :  { %v6217_v40 = vpop.f32.mrf.mxu2  ;;  %v6261_v45 = vpop.f32.mrf.mxu3 }
 0x988   :  { %v6303_v25 = vpop.f32.mrf.mxu2  ;;  %v6347_v20 = vpop.f32.mrf.mxu3 }
 0x989   :  { %v6307_v9 = vadd.f32 %v6303_v25, %v6263_v51 }
 0x98b   :  { %v6351_v32 = vadd.f32 %v6347_v20, %v6307_v9 }
 0x990   :  { %v6305_v59 = vpop.f32.mrf.mxu2  ;;  %v6349_v33 = vpop.f32.mrf.mxu3 }
 0x998   :  { %v6392_v5 = vpop.f32.mrf.mxu2  ;;  %v6436_v14 = vpop.f32.mrf.mxu3 }
 0x999   :  { %v6396_v37 = vadd.f32 %v6392_v5, %v6351_v32 }
 0x99b   :  { %v6440_v11 = vadd.f32 %v6436_v14, %v6396_v37 }
 0x9a0   :  { %v6394_v3 = vpop.f32.mrf.mxu2  ;;  %v6438_v44 = vpop.f32.mrf.mxu3 }
 0x9a8   :  { %v6480_v12 = vpop.f32.mrf.mxu2  ;;  %v6524_v21 = vpop.f32.mrf.mxu3 }
 0x9a9   :  { %v6484_v17 = vadd.f32 %v6480_v12, %v6440_v11 }
 0x9ab   :  { %v6528_v57 = vadd.f32 %v6524_v21, %v6484_v17 }
 0x9b0   :  { %v6482_v2 = vpop.f32.mrf.mxu2  ;;  %v6526_v8 = vpop.f32.mrf.mxu3 }
 0x9b8   :  { %v6569_v50 = vpop.f32.mrf.mxu2  ;;  %v6613_v31 = vpop.f32.mrf.mxu3 }
 0x9b9   :  { %v6573_v54 = vadd.f32 %v6569_v50, %v6528_v57 }
 0x9bb   :  { %v6617_v58 = vadd.f32 %v6613_v31, %v6573_v54 }
 0x9c0   :  { %v6571_v41 = vpop.f32.mrf.mxu2  ;;  %v6615_v6 = vpop.f32.mrf.mxu3 }
 0x9c8   :  { %v6657_v56 = vpop.f32.mrf.mxu2  ;;  %v6701_v1 = vpop.f32.mrf.mxu3 }
 0x9c9   :  { %v6661_v4 = vadd.f32 %v6657_v56, %v6617_v58 }
 0x9cb   :  { %v6705_v16 = vadd.f32 %v6701_v1, %v6661_v4 }
 0x9cd   :  { %v6710_v35 = vadd.f32 %v7759_v15, %v6705_v16 }
 0x9cf   :  { %v6711_v63 = vmax.f32 %v6710_v35, 0.0 }
 0x9d0   :  { %v6659_v10 = vpop.f32.mrf.mxu2  ;;  %v6703_v29 = vpop.f32.mrf.mxu3 }
 0x9d1   :  { %v6712_v55 = vpack.c.bf16 %v6711_v63, %v6711_v63 }
 0x9d3   :  { %7637 = vmatmul.msk.bf16.vlgmr.msrb.gmra.mxu1 %vm6745_vm9, %v6712_v55 }
 0xa50   :  { %v6762_v26 = vpop.f32.mrf.mxu1 }
 0xa51   :  { %v6763_v27 = vadd.f32 %v7760_v53, %v6762_v26 }
 0xa53   :  { %6767 = vst.msk [vmem:[#allocation6] sm:$0x3] %vm6766_vm10, %v6763_v27 }
 0xa54   :  { %6778 = dma.vmem_to_hbm [thread:$0]  %s6774_s22, 32, %s6776_s23, [#allocation7]  }
 0xa58   :  { %v6764_v62 = vpop.f32.mrf.mxu1 }
 0xa59   :  { %7856 = dma.done.wait [#allocation7], 32  }
 0xa5a   :  { %7857 = vsyncadd [#allocation7], 4294967264 }
 0xa5b   :  { %6783 = vsyncpa [#allocation7], 1 }

</bundles_post_ra>
